<compile_context>
chip_gen: v7x
topology: tpu7x:2x2x1
jax: 0.10.0
libtpu: 0.0.40
codegen_flags: <defaults>
</compile_context>

<pallas_src>
import jax
import jax.numpy as jnp
from jax import lax
from jax.experimental import pallas as pl
from jax.experimental.pallas import tpu as pltpu


# Fixed depthwise filters from the PyTorch module.
SOBEL_X = ((1, 0, -1), (2, 0, -2), (1, 0, -1))
SOBEL_Y = ((1, 2, 1), (0, 0, 0), (-1, -2, -1))
LAPLACE = ((0, 1, 0), (1, -4, 1), (0, 1, 0))


# ----------------------------- kernel factory -----------------------------
def _make_kernel(C_in, C_out, H, W):
    HW = H * W

    def make_taps(a, K, row, col):
        """Shifted, zero-padded KxK windows of a lane-dense (C, HW) image.

        Returns K*K arrays of shape (C, HW) in tap-major (di, dj) order, matching
        weights flattened as transpose(O,Kh,Kw,I).reshape(O, K*K*I).
        tap[di,dj][c, i*W + j] == x[c, i+di-p, j+dj-p]  (0 outside the image).
        """
        p = K // 2
        taps = []
        for di in range(K):
            for dj in range(K):
                off = (di - p) * W + (dj - p)
                if off == 0:
                    taps.append(a)           # center tap: no shift, always valid
                    continue
                shifted = pltpu.roll(a, (-off) % HW, axis=1)
                valid = ((row >= p - di) & (row < H + p - di) &
                         (col >= p - dj) & (col < W + p - dj))
                taps.append(jnp.where(valid, shifted, 0.0))
        return taps

    def stencil(taps3, coef):
        # Fixed-coefficient 3x3 depthwise conv as a linear combination of the
        # shared shifted windows (no extra slicing / shifting per stencil).
        acc = None
        for di in range(3):
            for dj in range(3):
                c = coef[di][dj]
                if c == 0:
                    continue
                t = taps3[di * 3 + dj]
                t = t if c == 1 else t * float(c)
                acc = t if acc is None else acc + t
        return acc

    def kernel(gate_ref, x_ref, rc_ref, wm1_ref, wm2_ref, w5_ref, b_ref, o_ref):
        gate = gate_ref[pl.program_id(0)]                   # selected expert
        x = x_ref[0].astype(jnp.float32)                    # (C_in, HW) lane-dense
        row = rc_ref[0:1, :]                                # (1, HW) int32
        col = rc_ref[1:2, :]                                # (1, HW) int32

        relu = lambda a: jnp.maximum(a, 0.0)

        def conv5(a, w, b):
            # Single fused im2col matmul: (C_out, 25*C) @ (25*C, HW).
            patch = jnp.concatenate(make_taps(a, 5, row, col), axis=0)
            return jnp.dot(w, patch, preferred_element_type=jnp.float32) + b

        # 3x3 windows of x, shared by the main 3x3 conv and the fixed stencils.
        taps3 = make_taps(x, 3, row, col)

        @pl.when(gate == 0)
        def _main():
            bm1 = b_ref[0 * C_out:1 * C_out, :]
            bm2 = b_ref[1 * C_out:2 * C_out, :]
            patch3 = jnp.concatenate(taps3, axis=0)          # (9*C_in, HW)
            y = relu(jnp.dot(wm1_ref[...], patch3,
                             preferred_element_type=jnp.float32) + bm1)
            o_ref[0] = relu(conv5(y, wm2_ref[...], bm2)).astype(o_ref.dtype)

        @pl.when(gate == 1)
        def _sobel():
            bsx = b_ref[2 * C_out:3 * C_out, :]
            bsy = b_ref[3 * C_out:4 * C_out, :]
            sx = stencil(taps3, SOBEL_X)
            sy = stencil(taps3, SOBEL_Y)
            ox = relu(conv5(sx, w5_ref[0 * C_out:1 * C_out, :], bsx))
            oy = relu(conv5(sy, w5_ref[1 * C_out:2 * C_out, :], bsy))
            o_ref[0] = ((ox + oy) * 0.5).astype(o_ref.dtype)

        @pl.when(gate == 2)
        def _laplace():
            bl = b_ref[4 * C_out:5 * C_out, :]
            lp = stencil(taps3, LAPLACE)
            o_ref[0] = relu(conv5(lp, w5_ref[2 * C_out:3 * C_out, :],
                                  bl)).astype(o_ref.dtype)

    return kernel


# ----------------------------- wrapper-side glue -----------------------------
def _fold_bn(w, b, stats, eps=1e-5):
    # Fold eval-mode BatchNorm2d into the preceding conv's weight/bias.
    gamma, beta, mean, var = stats
    scale = gamma / jnp.sqrt(var + eps)
    return w * scale[:, None, None, None], (b - mean) * scale + beta


def _flatten_conv_w(w):
    # (O, I, Kh, Kw) -> (O, Kh*Kw*I), tap-major (matches make_taps row order).
    o, i, kh, kw = w.shape
    return jnp.transpose(w, (0, 2, 3, 1)).reshape(o, kh * kw * i)


@jax.jit
def conv_block_lk_sobel_moe(x, p):
    """x: (N, C_in, H, W); p: dict of raw PyTorch-style parameters."""
    N, C_in, H, W = x.shape
    C_out = p["main_w1"].shape[0]
    HW = H * W

    # ---- fold eval-mode BN into the convs (wrapper glue, not kernel work) ----
    wg1, bg1 = _fold_bn(p["gate_w1"], p["gate_b1"], p["gate_bn"])
    wm1, bm1 = _fold_bn(p["main_w1"], p["main_b1"], p["main_bn1"])
    wm2, bm2 = _fold_bn(p["main_w2"], p["main_b2"], p["main_bn2"])
    wsx, bsx = _fold_bn(p["sx_w"], p["sx_b"], p["sx_bn"])
    wsy, bsy = _fold_bn(p["sy_w"], p["sy_b"], p["sy_bn"])
    wl, bl = _fold_bn(p["lap_w"], p["lap_b"], p["lap_bn"])

    # ---- MoE gate in the wrapper: GAP -> 1x1(+BN) -> tanh -> 1x1 -> argmax ----
    # jnp.argmax returns the FIRST maximal index (torch.max tie-breaking).
    gap = jnp.mean(x.astype(jnp.float32), axis=(2, 3))              # (N, C_in)
    h = jnp.tanh(gap @ wg1.reshape(C_in, C_in).T + bg1[None, :])
    logits = h @ p["gate_w2"].reshape(3, C_in).T + p["gate_b2"][None, :]
    gate_idx = jnp.argmax(logits, axis=1).astype(jnp.int32)         # (N,)

    # ---- pack parameters into a few resident slabs ----
    wm1f = _flatten_conv_w(wm1)                                     # (C_out, 9*C_in)
    wm2f = _flatten_conv_w(wm2)                                     # (C_out, 25*C_out)
    w5 = jnp.concatenate([_flatten_conv_w(wsx), _flatten_conv_w(wsy),
                          _flatten_conv_w(wl)], axis=0)             # (3*C_out, 25*C_in)
    bias = jnp.concatenate([bm1, bm2, bsx, bsy, bl]).reshape(5 * C_out, 1)
    # Row / column index table (lets the kernel build border masks without
    # in-kernel iota / integer div-mod).
    rows = jnp.repeat(jnp.arange(H, dtype=jnp.int32), W)            # (HW,)
    cols = jnp.tile(jnp.arange(W, dtype=jnp.int32), H)              # (HW,)
    rc = jnp.stack([rows, cols])                                    # (2, HW)
    consts = [rc, wm1f, wm2f, w5, bias]

    x_flat = x.reshape(N, C_in, HW)                                 # lane-dense

    # ---- cost estimate + explicit VMEM sizing ----
    flops_branch = max(
        2 * HW * (C_out * 9 * C_in + C_out * 25 * C_out),           # main
        2 * HW * (2 * C_out * 25 * C_in + 12 * C_in),               # sobel
        2 * HW * (C_out * 25 * C_in + 5 * C_in))                    # laplacian
    w_bytes = 4 * sum(int(c.size) for c in consts)
    cost = pl.CostEstimate(
        flops=int(N * flops_branch),
        transcendentals=0,
        bytes_accessed=int(4 * (int(x.size) + N * C_out * HW) + w_bytes))

    act = 4 * HW
    per_step = act * (C_in + 9 * C_in + 25 * max(C_in, C_out) + 6 * C_out)
    vmem_limit = int(min(max(4 * per_step + 2 * w_bytes + (2 << 20), 8 << 20),
                         56 << 20))

    kernel = _make_kernel(C_in, C_out, H, W)
    out_flat = pl.pallas_call(
        kernel,
        out_shape=jax.ShapeDtypeStruct((N, C_out, HW), x.dtype),
        grid_spec=pltpu.PrefetchScalarGridSpec(
            num_scalar_prefetch=1,
            grid=(N,),
            in_specs=[pl.BlockSpec((1, C_in, HW), lambda n, g: (n, 0, 0))]
                     + [pl.BlockSpec(c.shape, lambda n, g: (0, 0))
                        for c in consts],
            out_specs=pl.BlockSpec((1, C_out, HW), lambda n, g: (n, 0, 0)),
        ),
        compiler_params=pltpu.CompilerParams(
            dimension_semantics=("parallel",),
            vmem_limit_bytes=vmem_limit),
        cost_estimate=cost,
    )(gate_idx, x_flat, *consts)

    return out_flat.reshape(N, C_out, H, W)


# ----------------------- pure-JAX reference (for checking) -----------------------
@jax.jit
def _ref_forward(x, p, eps=1e-5):
    def conv(a, w, b, pad):
        y = lax.conv_general_dilated(a, w, (1, 1), ((pad, pad), (pad, pad)),
                                     dimension_numbers=("NCHW", "OIHW", "NCHW"))
        return y + b[None, :, None, None]

    def bn(a, stats):
        g, b, m, v = stats
        s = g / jnp.sqrt(v + eps)
        return (a - m[None, :, None, None]) * s[None, :, None, None] \
            + b[None, :, None, None]

    def dwconv(a, k3):
        C = a.shape[1]
        w = jnp.tile(jnp.asarray(k3, jnp.float32)[None, None], (C, 1, 1, 1))
        return lax.conv_general_dilated(a, w, (1, 1), ((1, 1), (1, 1)),
                                        dimension_numbers=("NCHW", "OIHW", "NCHW"),
                                        feature_group_count=C)

    relu = lambda a: jnp.maximum(a, 0.0)

    gap = jnp.mean(x, axis=(2, 3), keepdims=True)
    h = jnp.tanh(bn(conv(gap, p["gate_w1"], p["gate_b1"], 0), p["gate_bn"]))
    k = conv(h, p["gate_w2"], p["gate_b2"], 0)[:, :, 0, 0]          # (N, 3)
    one_hot = jax.nn.one_hot(jnp.argmax(k, axis=1), 3, dtype=x.dtype)

    main = relu(bn(conv(x, p["main_w1"], p["main_b1"], 1), p["main_bn1"]))
    main = relu(bn(conv(main, p["main_w2"], p["main_b2"], 2), p["main_bn2"]))
    sx = relu(bn(conv(dwconv(x, SOBEL_X), p["sx_w"], p["sx_b"], 2), p["sx_bn"]))
    sy = relu(bn(conv(dwconv(x, SOBEL_Y), p["sy_w"], p["sy_b"], 2), p["sy_bn"]))
    sob = (sy + sx) * 0.5
    lap = relu(bn(conv(dwconv(x, LAPLACE), p["lap_w"], p["lap_b"], 2), p["lap_bn"]))

    out = jnp.stack([main, sob, lap], axis=2)                       # (N,C_out,3,H,W)
    return jnp.sum(out * one_hot[:, None, :, None, None], axis=2)


# ---------------------------------- test ----------------------------------
if __name__ == "__main__":
    N, C_in, C_out, H, W = 2, 4, 8, 16, 16

    def conv_params(key, c_out, c_in, k):
        k1, k2 = jax.random.split(key)
        bound = 1.0 / (c_in * k * k) ** 0.5
        w = jax.random.uniform(k1, (c_out, c_in, k, k), jnp.float32, -bound, bound)
        b = jax.random.uniform(k2, (c_out,), jnp.float32, -bound, bound)
        return w, b

    def bn_params(key, c):
        k1, k2, k3, k4 = jax.random.split(key, 4)
        gamma = jax.random.uniform(k1, (c,), jnp.float32, 0.5, 1.5)
        beta = jax.random.uniform(k2, (c,), jnp.float32, -0.2, 0.2)
        mean = jax.random.normal(k3, (c,), jnp.float32) * 0.1
        var = jax.random.uniform(k4, (c,), jnp.float32, 0.5, 1.5)
        return gamma, beta, mean, var

    key = jax.random.PRNGKey(0)
    ks = list(jax.random.split(key, 16))
    x = jax.random.normal(ks[0], (N, C_in, H, W), jnp.float32)

    wg1, bg1 = conv_params(ks[1], C_in, C_in, 1)
    wg2, bg2 = conv_params(ks[3], 3, C_in, 1)
    wm1, bm1 = conv_params(ks[4], C_out, C_in, 3)
    wm2, bm2 = conv_params(ks[6], C_out, C_out, 5)
    wsx, bsx = conv_params(ks[8], C_out, C_in, 5)
    wsy, bsy = conv_params(ks[10], C_out, C_in, 5)
    wl, bl = conv_params(ks[12], C_out, C_in, 5)

    params = {
        "gate_w1": wg1, "gate_b1": bg1, "gate_bn": bn_params(ks[2], C_in),
        "gate_w2": wg2, "gate_b2": bg2,
        "main_w1": wm1, "main_b1": bm1, "main_bn1": bn_params(ks[5], C_out),
        "main_w2": wm2, "main_b2": bm2, "main_bn2": bn_params(ks[7], C_out),
        "sx_w": wsx, "sx_b": bsx, "sx_bn": bn_params(ks[9], C_out),
        "sy_w": wsy, "sy_b": bsy, "sy_bn": bn_params(ks[11], C_out),
        "lap_w": wl, "lap_b": bl, "lap_bn": bn_params(ks[13], C_out),
    }

    def check(prm):
        out = jax.block_until_ready(conv_block_lk_sobel_moe(x, prm))
        ref = jax.block_until_ready(_ref_forward(x, prm))
        assert out.shape == (N, C_out, H, W)
        err = float(jnp.max(jnp.abs(out - ref)))
        assert bool(jnp.allclose(out, ref, atol=1e-3, rtol=1e-3)), err

    # Random gating, plus one forced run per expert so every pl.when branch
    # (main / sobel / laplacian) is exercised and verified.
    check(params)
    for g in range(3):
        forced = dict(params)
        forced["gate_b2"] = params["gate_b2"] + 10.0 * jax.nn.one_hot(
            g, 3, dtype=jnp.float32)
        check(forced)

    print("KERNEL_OK")
</pallas_src>

<mosaic_0001>
module attributes {stable_mosaic.version = 11 : i64} {
  func.func @kernel(%arg0: i32, %arg1: memref<2xi32, #tpu.memory_space<smem>>, %arg2: memref<1x4x256xf32, #tpu.memory_space<vmem>>, %arg3: memref<2x256xi32, #tpu.memory_space<vmem>>, %arg4: memref<8x36xf32, #tpu.memory_space<vmem>>, %arg5: memref<8x200xf32, #tpu.memory_space<vmem>>, %arg6: memref<24x100xf32, #tpu.memory_space<vmem>>, %arg7: memref<40x1xf32, #tpu.memory_space<vmem>>, %arg8: memref<1x8x256xf32, #tpu.memory_space<vmem>>) attributes {dimension_semantics = [#tpu.dimension_semantics<parallel>], iteration_bounds = array<i64: 2>, scalar_prefetch = 1 : i64, scratch_operands = 0 : i64, tpu.core_type = #tpu.core_type<tc>, window_params = [{transform_indices = @transform_0, window_bounds = array<i64: 1, 4, 256>}, {pipeline_mode = #tpu.pipeline_mode<synchronous>, transform_indices = @transform_1, window_bounds = array<i64: 2, 256>}, {pipeline_mode = #tpu.pipeline_mode<synchronous>, transform_indices = @transform_2, window_bounds = array<i64: 8, 36>}, {pipeline_mode = #tpu.pipeline_mode<synchronous>, transform_indices = @transform_3, window_bounds = array<i64: 8, 200>}, {pipeline_mode = #tpu.pipeline_mode<synchronous>, transform_indices = @transform_4, window_bounds = array<i64: 24, 100>}, {pipeline_mode = #tpu.pipeline_mode<synchronous>, transform_indices = @transform_5, window_bounds = array<i64: 40, 1>}, {transform_indices = @transform_6, window_bounds = array<i64: 1, 8, 256>}]} {
    %0 = arith.index_cast %arg0 : i32 to index
    %1 = memref.load %arg1[%0] : memref<2xi32, #tpu.memory_space<smem>>
    %c0 = arith.constant 0 : index
    %c0_0 = arith.constant 0 : index
    %c0_1 = arith.constant 0 : index
    %2 = vector.load %arg2[%c0, %c0_0, %c0_1] : memref<1x4x256xf32, #tpu.memory_space<vmem>>, vector<1x4x256xf32>
    %3 = vector.shape_cast %2 : vector<1x4x256xf32> to vector<4x256xf32>
    %c0_2 = arith.constant 0 : index
    %c0_3 = arith.constant 0 : index
    %4 = vector.load %arg3[%c0_2, %c0_3] : memref<2x256xi32, #tpu.memory_space<vmem>>, vector<1x256xi32>
    %c1 = arith.constant 1 : index
    %c0_4 = arith.constant 0 : index
    %5 = vector.load %arg3[%c1, %c0_4] : memref<2x256xi32, #tpu.memory_space<vmem>>, vector<1x256xi32>
    %c17_i32 = arith.constant 17 : i32
    %6 = tpu.dynamic_rotate %3 by %c17_i32 dim 1 : vector<4x256xf32>, i32 -> vector<4x256xf32>
    %c1_i32 = arith.constant 1 : i32
    %7 = vector.broadcast %c1_i32 : i32 to vector<1x256xi32>
    %8 = arith.cmpi sge, %4, %7 : vector<1x256xi32>
    %c17_i32_5 = arith.constant 17 : i32
    %9 = vector.broadcast %c17_i32_5 : i32 to vector<1x256xi32>
    %10 = arith.cmpi slt, %4, %9 : vector<1x256xi32>
    %11 = arith.andi %8, %10 : vector<1x256xi1>
    %c1_i32_6 = arith.constant 1 : i32
    %12 = vector.broadcast %c1_i32_6 : i32 to vector<1x256xi32>
    %13 = arith.cmpi sge, %5, %12 : vector<1x256xi32>
    %14 = arith.andi %11, %13 : vector<1x256xi1>
    %c17_i32_7 = arith.constant 17 : i32
    %15 = vector.broadcast %c17_i32_7 : i32 to vector<1x256xi32>
    %16 = arith.cmpi slt, %5, %15 : vector<1x256xi32>
    %17 = arith.andi %14, %16 : vector<1x256xi1>
    %cst = arith.constant 0.000000e+00 : f32
    %18 = vector.shape_cast %17 : vector<1x256xi1> to vector<1x256xi1>
    %19 = vector.broadcast %18 : vector<1x256xi1> to vector<4x256xi1>
    %20 = vector.broadcast %cst : f32 to vector<4x256xf32>
    %21 = arith.select %19, %6, %20 : vector<4x256xi1>, vector<4x256xf32>
    %c16_i32 = arith.constant 16 : i32
    %22 = tpu.dynamic_rotate %3 by %c16_i32 dim 1 : vector<4x256xf32>, i32 -> vector<4x256xf32>
    %c1_i32_8 = arith.constant 1 : i32
    %23 = vector.broadcast %c1_i32_8 : i32 to vector<1x256xi32>
    %24 = arith.cmpi sge, %4, %23 : vector<1x256xi32>
    %c17_i32_9 = arith.constant 17 : i32
    %25 = vector.broadcast %c17_i32_9 : i32 to vector<1x256xi32>
    %26 = arith.cmpi slt, %4, %25 : vector<1x256xi32>
    %27 = arith.andi %24, %26 : vector<1x256xi1>
    %c0_i32 = arith.constant 0 : i32
    %28 = vector.broadcast %c0_i32 : i32 to vector<1x256xi32>
    %29 = arith.cmpi sge, %5, %28 : vector<1x256xi32>
    %30 = arith.andi %27, %29 : vector<1x256xi1>
    %c16_i32_10 = arith.constant 16 : i32
    %31 = vector.broadcast %c16_i32_10 : i32 to vector<1x256xi32>
    %32 = arith.cmpi slt, %5, %31 : vector<1x256xi32>
    %33 = arith.andi %30, %32 : vector<1x256xi1>
    %cst_11 = arith.constant 0.000000e+00 : f32
    %34 = vector.shape_cast %33 : vector<1x256xi1> to vector<1x256xi1>
    %35 = vector.broadcast %34 : vector<1x256xi1> to vector<4x256xi1>
    %36 = vector.broadcast %cst_11 : f32 to vector<4x256xf32>
    %37 = arith.select %35, %22, %36 : vector<4x256xi1>, vector<4x256xf32>
    %c15_i32 = arith.constant 15 : i32
    %38 = tpu.dynamic_rotate %3 by %c15_i32 dim 1 : vector<4x256xf32>, i32 -> vector<4x256xf32>
    %c1_i32_12 = arith.constant 1 : i32
    %39 = vector.broadcast %c1_i32_12 : i32 to vector<1x256xi32>
    %40 = arith.cmpi sge, %4, %39 : vector<1x256xi32>
    %c17_i32_13 = arith.constant 17 : i32
    %41 = vector.broadcast %c17_i32_13 : i32 to vector<1x256xi32>
    %42 = arith.cmpi slt, %4, %41 : vector<1x256xi32>
    %43 = arith.andi %40, %42 : vector<1x256xi1>
    %c-1_i32 = arith.constant -1 : i32
    %44 = vector.broadcast %c-1_i32 : i32 to vector<1x256xi32>
    %45 = arith.cmpi sge, %5, %44 : vector<1x256xi32>
    %46 = arith.andi %43, %45 : vector<1x256xi1>
    %c15_i32_14 = arith.constant 15 : i32
    %47 = vector.broadcast %c15_i32_14 : i32 to vector<1x256xi32>
    %48 = arith.cmpi slt, %5, %47 : vector<1x256xi32>
    %49 = arith.andi %46, %48 : vector<1x256xi1>
    %cst_15 = arith.constant 0.000000e+00 : f32
    %50 = vector.shape_cast %49 : vector<1x256xi1> to vector<1x256xi1>
    %51 = vector.broadcast %50 : vector<1x256xi1> to vector<4x256xi1>
    %52 = vector.broadcast %cst_15 : f32 to vector<4x256xf32>
    %53 = arith.select %51, %38, %52 : vector<4x256xi1>, vector<4x256xf32>
    %c1_i32_16 = arith.constant 1 : i32
    %54 = tpu.dynamic_rotate %3 by %c1_i32_16 dim 1 : vector<4x256xf32>, i32 -> vector<4x256xf32>
    %c0_i32_17 = arith.constant 0 : i32
    %55 = vector.broadcast %c0_i32_17 : i32 to vector<1x256xi32>
    %56 = arith.cmpi sge, %4, %55 : vector<1x256xi32>
    %c16_i32_18 = arith.constant 16 : i32
    %57 = vector.broadcast %c16_i32_18 : i32 to vector<1x256xi32>
    %58 = arith.cmpi slt, %4, %57 : vector<1x256xi32>
    %59 = arith.andi %56, %58 : vector<1x256xi1>
    %c1_i32_19 = arith.constant 1 : i32
    %60 = vector.broadcast %c1_i32_19 : i32 to vector<1x256xi32>
    %61 = arith.cmpi sge, %5, %60 : vector<1x256xi32>
    %62 = arith.andi %59, %61 : vector<1x256xi1>
    %c17_i32_20 = arith.constant 17 : i32
    %63 = vector.broadcast %c17_i32_20 : i32 to vector<1x256xi32>
    %64 = arith.cmpi slt, %5, %63 : vector<1x256xi32>
    %65 = arith.andi %62, %64 : vector<1x256xi1>
    %cst_21 = arith.constant 0.000000e+00 : f32
    %66 = vector.shape_cast %65 : vector<1x256xi1> to vector<1x256xi1>
    %67 = vector.broadcast %66 : vector<1x256xi1> to vector<4x256xi1>
    %68 = vector.broadcast %cst_21 : f32 to vector<4x256xf32>
    %69 = arith.select %67, %54, %68 : vector<4x256xi1>, vector<4x256xf32>
    %c255_i32 = arith.constant 255 : i32
    %70 = tpu.dynamic_rotate %3 by %c255_i32 dim 1 : vector<4x256xf32>, i32 -> vector<4x256xf32>
    %c0_i32_22 = arith.constant 0 : i32
    %71 = vector.broadcast %c0_i32_22 : i32 to vector<1x256xi32>
    %72 = arith.cmpi sge, %4, %71 : vector<1x256xi32>
    %c16_i32_23 = arith.constant 16 : i32
    %73 = vector.broadcast %c16_i32_23 : i32 to vector<1x256xi32>
    %74 = arith.cmpi slt, %4, %73 : vector<1x256xi32>
    %75 = arith.andi %72, %74 : vector<1x256xi1>
    %c-1_i32_24 = arith.constant -1 : i32
    %76 = vector.broadcast %c-1_i32_24 : i32 to vector<1x256xi32>
    %77 = arith.cmpi sge, %5, %76 : vector<1x256xi32>
    %78 = arith.andi %75, %77 : vector<1x256xi1>
    %c15_i32_25 = arith.constant 15 : i32
    %79 = vector.broadcast %c15_i32_25 : i32 to vector<1x256xi32>
    %80 = arith.cmpi slt, %5, %79 : vector<1x256xi32>
    %81 = arith.andi %78, %80 : vector<1x256xi1>
    %cst_26 = arith.constant 0.000000e+00 : f32
    %82 = vector.shape_cast %81 : vector<1x256xi1> to vector<1x256xi1>
    %83 = vector.broadcast %82 : vector<1x256xi1> to vector<4x256xi1>
    %84 = vector.broadcast %cst_26 : f32 to vector<4x256xf32>
    %85 = arith.select %83, %70, %84 : vector<4x256xi1>, vector<4x256xf32>
    %c241_i32 = arith.constant 241 : i32
    %86 = tpu.dynamic_rotate %3 by %c241_i32 dim 1 : vector<4x256xf32>, i32 -> vector<4x256xf32>
    %c-1_i32_27 = arith.constant -1 : i32
    %87 = vector.broadcast %c-1_i32_27 : i32 to vector<1x256xi32>
    %88 = arith.cmpi sge, %4, %87 : vector<1x256xi32>
    %c15_i32_28 = arith.constant 15 : i32
    %89 = vector.broadcast %c15_i32_28 : i32 to vector<1x256xi32>
    %90 = arith.cmpi slt, %4, %89 : vector<1x256xi32>
    %91 = arith.andi %88, %90 : vector<1x256xi1>
    %c1_i32_29 = arith.constant 1 : i32
    %92 = vector.broadcast %c1_i32_29 : i32 to vector<1x256xi32>
    %93 = arith.cmpi sge, %5, %92 : vector<1x256xi32>
    %94 = arith.andi %91, %93 : vector<1x256xi1>
    %c17_i32_30 = arith.constant 17 : i32
    %95 = vector.broadcast %c17_i32_30 : i32 to vector<1x256xi32>
    %96 = arith.cmpi slt, %5, %95 : vector<1x256xi32>
    %97 = arith.andi %94, %96 : vector<1x256xi1>
    %cst_31 = arith.constant 0.000000e+00 : f32
    %98 = vector.shape_cast %97 : vector<1x256xi1> to vector<1x256xi1>
    %99 = vector.broadcast %98 : vector<1x256xi1> to vector<4x256xi1>
    %100 = vector.broadcast %cst_31 : f32 to vector<4x256xf32>
    %101 = arith.select %99, %86, %100 : vector<4x256xi1>, vector<4x256xf32>
    %c240_i32 = arith.constant 240 : i32
    %102 = tpu.dynamic_rotate %3 by %c240_i32 dim 1 : vector<4x256xf32>, i32 -> vector<4x256xf32>
    %c-1_i32_32 = arith.constant -1 : i32
    %103 = vector.broadcast %c-1_i32_32 : i32 to vector<1x256xi32>
    %104 = arith.cmpi sge, %4, %103 : vector<1x256xi32>
    %c15_i32_33 = arith.constant 15 : i32
    %105 = vector.broadcast %c15_i32_33 : i32 to vector<1x256xi32>
    %106 = arith.cmpi slt, %4, %105 : vector<1x256xi32>
    %107 = arith.andi %104, %106 : vector<1x256xi1>
    %c0_i32_34 = arith.constant 0 : i32
    %108 = vector.broadcast %c0_i32_34 : i32 to vector<1x256xi32>
    %109 = arith.cmpi sge, %5, %108 : vector<1x256xi32>
    %110 = arith.andi %107, %109 : vector<1x256xi1>
    %c16_i32_35 = arith.constant 16 : i32
    %111 = vector.broadcast %c16_i32_35 : i32 to vector<1x256xi32>
    %112 = arith.cmpi slt, %5, %111 : vector<1x256xi32>
    %113 = arith.andi %110, %112 : vector<1x256xi1>
    %cst_36 = arith.constant 0.000000e+00 : f32
    %114 = vector.shape_cast %113 : vector<1x256xi1> to vector<1x256xi1>
    %115 = vector.broadcast %114 : vector<1x256xi1> to vector<4x256xi1>
    %116 = vector.broadcast %cst_36 : f32 to vector<4x256xf32>
    %117 = arith.select %115, %102, %116 : vector<4x256xi1>, vector<4x256xf32>
    %c239_i32 = arith.constant 239 : i32
    %118 = tpu.dynamic_rotate %3 by %c239_i32 dim 1 : vector<4x256xf32>, i32 -> vector<4x256xf32>
    %c-1_i32_37 = arith.constant -1 : i32
    %119 = vector.broadcast %c-1_i32_37 : i32 to vector<1x256xi32>
    %120 = arith.cmpi sge, %4, %119 : vector<1x256xi32>
    %c15_i32_38 = arith.constant 15 : i32
    %121 = vector.broadcast %c15_i32_38 : i32 to vector<1x256xi32>
    %122 = arith.cmpi slt, %4, %121 : vector<1x256xi32>
    %123 = arith.andi %120, %122 : vector<1x256xi1>
    %c-1_i32_39 = arith.constant -1 : i32
    %124 = vector.broadcast %c-1_i32_39 : i32 to vector<1x256xi32>
    %125 = arith.cmpi sge, %5, %124 : vector<1x256xi32>
    %126 = arith.andi %123, %125 : vector<1x256xi1>
    %c15_i32_40 = arith.constant 15 : i32
    %127 = vector.broadcast %c15_i32_40 : i32 to vector<1x256xi32>
    %128 = arith.cmpi slt, %5, %127 : vector<1x256xi32>
    %129 = arith.andi %126, %128 : vector<1x256xi1>
    %cst_41 = arith.constant 0.000000e+00 : f32
    %130 = vector.shape_cast %129 : vector<1x256xi1> to vector<1x256xi1>
    %131 = vector.broadcast %130 : vector<1x256xi1> to vector<4x256xi1>
    %132 = vector.broadcast %cst_41 : f32 to vector<4x256xf32>
    %133 = arith.select %131, %118, %132 : vector<4x256xi1>, vector<4x256xf32>
    %c0_i32_42 = arith.constant 0 : i32
    %134 = arith.cmpi eq, %1, %c0_i32_42 : i32
    %135 = arith.extui %134 : i1 to i32
    %c0_i32_43 = arith.constant 0 : i32
    %136 = arith.cmpi ne, %135, %c0_i32_43 : i32
    scf.if %136 {
      %c0_47 = arith.constant 0 : index
      %c0_48 = arith.constant 0 : index
      %143 = vector.load %arg7[%c0_47, %c0_48] : memref<40x1xf32, #tpu.memory_space<vmem>>, vector<8x1xf32>
      %c8 = arith.constant 8 : index
      %c0_49 = arith.constant 0 : index
      %144 = vector.load %arg7[%c8, %c0_49] : memref<40x1xf32, #tpu.memory_space<vmem>>, vector<8x1xf32>
      %145 = tpu.concatenate %21, %37, %53, %69, %3, %85, %101, %117, %133 in 0 : vector<4x256xf32>, vector<4x256xf32>, vector<4x256xf32>, vector<4x256xf32>, vector<4x256xf32>, vector<4x256xf32>, vector<4x256xf32>, vector<4x256xf32>, vector<4x256xf32> -> vector<36x256xf32>
      %c0_50 = arith.constant 0 : index
      %c0_51 = arith.constant 0 : index
      %146 = vector.load %arg4[%c0_50, %c0_51] : memref<8x36xf32, #tpu.memory_space<vmem>>, vector<8x36xf32>
      %cst_52 = arith.constant dense<0.000000e+00> : vector<8x256xf32>
      %147 = tpu.matmul %146, %145, %cst_52 {dimension_numbers = #tpu.dot_dimension_numbers<[1], [0], [0], [1], [0, 0, 1, 1], [], []>} : vector<8x36xf32>, vector<36x256xf32>, vector<8x256xf32> -> vector<8x256xf32>
      %148 = vector.broadcast %143 : vector<8x1xf32> to vector<8x256xf32>
      %149 = arith.addf %147, %148 : vector<8x256xf32>
      %cst_53 = arith.constant 0.000000e+00 : f32
      %150 = vector.broadcast %cst_53 : f32 to vector<8x256xf32>
      %151 = arith.maximumf %149, %150 : vector<8x256xf32>
      %c0_54 = arith.constant 0 : index
      %c0_55 = arith.constant 0 : index
      %152 = vector.load %arg5[%c0_54, %c0_55] : memref<8x200xf32, #tpu.memory_space<vmem>>, vector<8x200xf32>
      %c34_i32 = arith.constant 34 : i32
      %153 = tpu.dynamic_rotate %151 by %c34_i32 dim 1 : vector<8x256xf32>, i32 -> vector<8x256xf32>
      %c2_i32_56 = arith.constant 2 : i32
      %154 = vector.broadcast %c2_i32_56 : i32 to vector<1x256xi32>
      %155 = arith.cmpi sge, %4, %154 : vector<1x256xi32>
      %c18_i32 = arith.constant 18 : i32
      %156 = vector.broadcast %c18_i32 : i32 to vector<1x256xi32>
      %157 = arith.cmpi slt, %4, %156 : vector<1x256xi32>
      %158 = arith.andi %155, %157 : vector<1x256xi1>
      %c2_i32_57 = arith.constant 2 : i32
      %159 = vector.broadcast %c2_i32_57 : i32 to vector<1x256xi32>
      %160 = arith.cmpi sge, %5, %159 : vector<1x256xi32>
      %161 = arith.andi %158, %160 : vector<1x256xi1>
      %c18_i32_58 = arith.constant 18 : i32
      %162 = vector.broadcast %c18_i32_58 : i32 to vector<1x256xi32>
      %163 = arith.cmpi slt, %5, %162 : vector<1x256xi32>
      %164 = arith.andi %161, %163 : vector<1x256xi1>
      %cst_59 = arith.constant 0.000000e+00 : f32
      %165 = vector.shape_cast %164 : vector<1x256xi1> to vector<1x256xi1>
      %166 = vector.broadcast %165 : vector<1x256xi1> to vector<8x256xi1>
      %167 = vector.broadcast %cst_59 : f32 to vector<8x256xf32>
      %168 = arith.select %166, %153, %167 : vector<8x256xi1>, vector<8x256xf32>
      %c33_i32 = arith.constant 33 : i32
      %169 = tpu.dynamic_rotate %151 by %c33_i32 dim 1 : vector<8x256xf32>, i32 -> vector<8x256xf32>
      %c2_i32_60 = arith.constant 2 : i32
      %170 = vector.broadcast %c2_i32_60 : i32 to vector<1x256xi32>
      %171 = arith.cmpi sge, %4, %170 : vector<1x256xi32>
      %c18_i32_61 = arith.constant 18 : i32
      %172 = vector.broadcast %c18_i32_61 : i32 to vector<1x256xi32>
      %173 = arith.cmpi slt, %4, %172 : vector<1x256xi32>
      %174 = arith.andi %171, %173 : vector<1x256xi1>
      %c1_i32_62 = arith.constant 1 : i32
      %175 = vector.broadcast %c1_i32_62 : i32 to vector<1x256xi32>
      %176 = arith.cmpi sge, %5, %175 : vector<1x256xi32>
      %177 = arith.andi %174, %176 : vector<1x256xi1>
      %c17_i32_63 = arith.constant 17 : i32
      %178 = vector.broadcast %c17_i32_63 : i32 to vector<1x256xi32>
      %179 = arith.cmpi slt, %5, %178 : vector<1x256xi32>
      %180 = arith.andi %177, %179 : vector<1x256xi1>
      %cst_64 = arith.constant 0.000000e+00 : f32
      %181 = vector.shape_cast %180 : vector<1x256xi1> to vector<1x256xi1>
      %182 = vector.broadcast %181 : vector<1x256xi1> to vector<8x256xi1>
      %183 = vector.broadcast %cst_64 : f32 to vector<8x256xf32>
      %184 = arith.select %182, %169, %183 : vector<8x256xi1>, vector<8x256xf32>
      %c32_i32 = arith.constant 32 : i32
      %185 = tpu.dynamic_rotate %151 by %c32_i32 dim 1 : vector<8x256xf32>, i32 -> vector<8x256xf32>
      %c2_i32_65 = arith.constant 2 : i32
      %186 = vector.broadcast %c2_i32_65 : i32 to vector<1x256xi32>
      %187 = arith.cmpi sge, %4, %186 : vector<1x256xi32>
      %c18_i32_66 = arith.constant 18 : i32
      %188 = vector.broadcast %c18_i32_66 : i32 to vector<1x256xi32>
      %189 = arith.cmpi slt, %4, %188 : vector<1x256xi32>
      %190 = arith.andi %187, %189 : vector<1x256xi1>
      %c0_i32_67 = arith.constant 0 : i32
      %191 = vector.broadcast %c0_i32_67 : i32 to vector<1x256xi32>
      %192 = arith.cmpi sge, %5, %191 : vector<1x256xi32>
      %193 = arith.andi %190, %192 : vector<1x256xi1>
      %c16_i32_68 = arith.constant 16 : i32
      %194 = vector.broadcast %c16_i32_68 : i32 to vector<1x256xi32>
      %195 = arith.cmpi slt, %5, %194 : vector<1x256xi32>
      %196 = arith.andi %193, %195 : vector<1x256xi1>
      %cst_69 = arith.constant 0.000000e+00 : f32
      %197 = vector.shape_cast %196 : vector<1x256xi1> to vector<1x256xi1>
      %198 = vector.broadcast %197 : vector<1x256xi1> to vector<8x256xi1>
      %199 = vector.broadcast %cst_69 : f32 to vector<8x256xf32>
      %200 = arith.select %198, %185, %199 : vector<8x256xi1>, vector<8x256xf32>
      %c31_i32 = arith.constant 31 : i32
      %201 = tpu.dynamic_rotate %151 by %c31_i32 dim 1 : vector<8x256xf32>, i32 -> vector<8x256xf32>
      %c2_i32_70 = arith.constant 2 : i32
      %202 = vector.broadcast %c2_i32_70 : i32 to vector<1x256xi32>
      %203 = arith.cmpi sge, %4, %202 : vector<1x256xi32>
      %c18_i32_71 = arith.constant 18 : i32
      %204 = vector.broadcast %c18_i32_71 : i32 to vector<1x256xi32>
      %205 = arith.cmpi slt, %4, %204 : vector<1x256xi32>
      %206 = arith.andi %203, %205 : vector<1x256xi1>
      %c-1_i32_72 = arith.constant -1 : i32
      %207 = vector.broadcast %c-1_i32_72 : i32 to vector<1x256xi32>
      %208 = arith.cmpi sge, %5, %207 : vector<1x256xi32>
      %209 = arith.andi %206, %208 : vector<1x256xi1>
      %c15_i32_73 = arith.constant 15 : i32
      %210 = vector.broadcast %c15_i32_73 : i32 to vector<1x256xi32>
      %211 = arith.cmpi slt, %5, %210 : vector<1x256xi32>
      %212 = arith.andi %209, %211 : vector<1x256xi1>
      %cst_74 = arith.constant 0.000000e+00 : f32
      %213 = vector.shape_cast %212 : vector<1x256xi1> to vector<1x256xi1>
      %214 = vector.broadcast %213 : vector<1x256xi1> to vector<8x256xi1>
      %215 = vector.broadcast %cst_74 : f32 to vector<8x256xf32>
      %216 = arith.select %214, %201, %215 : vector<8x256xi1>, vector<8x256xf32>
      %c30_i32 = arith.constant 30 : i32
      %217 = tpu.dynamic_rotate %151 by %c30_i32 dim 1 : vector<8x256xf32>, i32 -> vector<8x256xf32>
      %c2_i32_75 = arith.constant 2 : i32
      %218 = vector.broadcast %c2_i32_75 : i32 to vector<1x256xi32>
      %219 = arith.cmpi sge, %4, %218 : vector<1x256xi32>
      %c18_i32_76 = arith.constant 18 : i32
      %220 = vector.broadcast %c18_i32_76 : i32 to vector<1x256xi32>
      %221 = arith.cmpi slt, %4, %220 : vector<1x256xi32>
      %222 = arith.andi %219, %221 : vector<1x256xi1>
      %c-2_i32 = arith.constant -2 : i32
      %223 = vector.broadcast %c-2_i32 : i32 to vector<1x256xi32>
      %224 = arith.cmpi sge, %5, %223 : vector<1x256xi32>
      %225 = arith.andi %222, %224 : vector<1x256xi1>
      %c14_i32 = arith.constant 14 : i32
      %226 = vector.broadcast %c14_i32 : i32 to vector<1x256xi32>
      %227 = arith.cmpi slt, %5, %226 : vector<1x256xi32>
      %228 = arith.andi %225, %227 : vector<1x256xi1>
      %cst_77 = arith.constant 0.000000e+00 : f32
      %229 = vector.shape_cast %228 : vector<1x256xi1> to vector<1x256xi1>
      %230 = vector.broadcast %229 : vector<1x256xi1> to vector<8x256xi1>
      %231 = vector.broadcast %cst_77 : f32 to vector<8x256xf32>
      %232 = arith.select %230, %217, %231 : vector<8x256xi1>, vector<8x256xf32>
      %c18_i32_78 = arith.constant 18 : i32
      %233 = tpu.dynamic_rotate %151 by %c18_i32_78 dim 1 : vector<8x256xf32>, i32 -> vector<8x256xf32>
      %c1_i32_79 = arith.constant 1 : i32
      %234 = vector.broadcast %c1_i32_79 : i32 to vector<1x256xi32>
      %235 = arith.cmpi sge, %4, %234 : vector<1x256xi32>
      %c17_i32_80 = arith.constant 17 : i32
      %236 = vector.broadcast %c17_i32_80 : i32 to vector<1x256xi32>
      %237 = arith.cmpi slt, %4, %236 : vector<1x256xi32>
      %238 = arith.andi %235, %237 : vector<1x256xi1>
      %c2_i32_81 = arith.constant 2 : i32
      %239 = vector.broadcast %c2_i32_81 : i32 to vector<1x256xi32>
      %240 = arith.cmpi sge, %5, %239 : vector<1x256xi32>
      %241 = arith.andi %238, %240 : vector<1x256xi1>
      %c18_i32_82 = arith.constant 18 : i32
      %242 = vector.broadcast %c18_i32_82 : i32 to vector<1x256xi32>
      %243 = arith.cmpi slt, %5, %242 : vector<1x256xi32>
      %244 = arith.andi %241, %243 : vector<1x256xi1>
      %cst_83 = arith.constant 0.000000e+00 : f32
      %245 = vector.shape_cast %244 : vector<1x256xi1> to vector<1x256xi1>
      %246 = vector.broadcast %245 : vector<1x256xi1> to vector<8x256xi1>
      %247 = vector.broadcast %cst_83 : f32 to vector<8x256xf32>
      %248 = arith.select %246, %233, %247 : vector<8x256xi1>, vector<8x256xf32>
      %c17_i32_84 = arith.constant 17 : i32
      %249 = tpu.dynamic_rotate %151 by %c17_i32_84 dim 1 : vector<8x256xf32>, i32 -> vector<8x256xf32>
      %c1_i32_85 = arith.constant 1 : i32
      %250 = vector.broadcast %c1_i32_85 : i32 to vector<1x256xi32>
      %251 = arith.cmpi sge, %4, %250 : vector<1x256xi32>
      %c17_i32_86 = arith.constant 17 : i32
      %252 = vector.broadcast %c17_i32_86 : i32 to vector<1x256xi32>
      %253 = arith.cmpi slt, %4, %252 : vector<1x256xi32>
      %254 = arith.andi %251, %253 : vector<1x256xi1>
      %c1_i32_87 = arith.constant 1 : i32
      %255 = vector.broadcast %c1_i32_87 : i32 to vector<1x256xi32>
      %256 = arith.cmpi sge, %5, %255 : vector<1x256xi32>
      %257 = arith.andi %254, %256 : vector<1x256xi1>
      %c17_i32_88 = arith.constant 17 : i32
      %258 = vector.broadcast %c17_i32_88 : i32 to vector<1x256xi32>
      %259 = arith.cmpi slt, %5, %258 : vector<1x256xi32>
      %260 = arith.andi %257, %259 : vector<1x256xi1>
      %cst_89 = arith.constant 0.000000e+00 : f32
      %261 = vector.shape_cast %260 : vector<1x256xi1> to vector<1x256xi1>
      %262 = vector.broadcast %261 : vector<1x256xi1> to vector<8x256xi1>
      %263 = vector.broadcast %cst_89 : f32 to vector<8x256xf32>
      %264 = arith.select %262, %249, %263 : vector<8x256xi1>, vector<8x256xf32>
      %c16_i32_90 = arith.constant 16 : i32
      %265 = tpu.dynamic_rotate %151 by %c16_i32_90 dim 1 : vector<8x256xf32>, i32 -> vector<8x256xf32>
      %c1_i32_91 = arith.constant 1 : i32
      %266 = vector.broadcast %c1_i32_91 : i32 to vector<1x256xi32>
      %267 = arith.cmpi sge, %4, %266 : vector<1x256xi32>
      %c17_i32_92 = arith.constant 17 : i32
      %268 = vector.broadcast %c17_i32_92 : i32 to vector<1x256xi32>
      %269 = arith.cmpi slt, %4, %268 : vector<1x256xi32>
      %270 = arith.andi %267, %269 : vector<1x256xi1>
      %c0_i32_93 = arith.constant 0 : i32
      %271 = vector.broadcast %c0_i32_93 : i32 to vector<1x256xi32>
      %272 = arith.cmpi sge, %5, %271 : vector<1x256xi32>
      %273 = arith.andi %270, %272 : vector<1x256xi1>
      %c16_i32_94 = arith.constant 16 : i32
      %274 = vector.broadcast %c16_i32_94 : i32 to vector<1x256xi32>
      %275 = arith.cmpi slt, %5, %274 : vector<1x256xi32>
      %276 = arith.andi %273, %275 : vector<1x256xi1>
      %cst_95 = arith.constant 0.000000e+00 : f32
      %277 = vector.shape_cast %276 : vector<1x256xi1> to vector<1x256xi1>
      %278 = vector.broadcast %277 : vector<1x256xi1> to vector<8x256xi1>
      %279 = vector.broadcast %cst_95 : f32 to vector<8x256xf32>
      %280 = arith.select %278, %265, %279 : vector<8x256xi1>, vector<8x256xf32>
      %c15_i32_96 = arith.constant 15 : i32
      %281 = tpu.dynamic_rotate %151 by %c15_i32_96 dim 1 : vector<8x256xf32>, i32 -> vector<8x256xf32>
      %c1_i32_97 = arith.constant 1 : i32
      %282 = vector.broadcast %c1_i32_97 : i32 to vector<1x256xi32>
      %283 = arith.cmpi sge, %4, %282 : vector<1x256xi32>
      %c17_i32_98 = arith.constant 17 : i32
      %284 = vector.broadcast %c17_i32_98 : i32 to vector<1x256xi32>
      %285 = arith.cmpi slt, %4, %284 : vector<1x256xi32>
      %286 = arith.andi %283, %285 : vector<1x256xi1>
      %c-1_i32_99 = arith.constant -1 : i32
      %287 = vector.broadcast %c-1_i32_99 : i32 to vector<1x256xi32>
      %288 = arith.cmpi sge, %5, %287 : vector<1x256xi32>
      %289 = arith.andi %286, %288 : vector<1x256xi1>
      %c15_i32_100 = arith.constant 15 : i32
      %290 = vector.broadcast %c15_i32_100 : i32 to vector<1x256xi32>
      %291 = arith.cmpi slt, %5, %290 : vector<1x256xi32>
      %292 = arith.andi %289, %291 : vector<1x256xi1>
      %cst_101 = arith.constant 0.000000e+00 : f32
      %293 = vector.shape_cast %292 : vector<1x256xi1> to vector<1x256xi1>
      %294 = vector.broadcast %293 : vector<1x256xi1> to vector<8x256xi1>
      %295 = vector.broadcast %cst_101 : f32 to vector<8x256xf32>
      %296 = arith.select %294, %281, %295 : vector<8x256xi1>, vector<8x256xf32>
      %c14_i32_102 = arith.constant 14 : i32
      %297 = tpu.dynamic_rotate %151 by %c14_i32_102 dim 1 : vector<8x256xf32>, i32 -> vector<8x256xf32>
      %c1_i32_103 = arith.constant 1 : i32
      %298 = vector.broadcast %c1_i32_103 : i32 to vector<1x256xi32>
      %299 = arith.cmpi sge, %4, %298 : vector<1x256xi32>
      %c17_i32_104 = arith.constant 17 : i32
      %300 = vector.broadcast %c17_i32_104 : i32 to vector<1x256xi32>
      %301 = arith.cmpi slt, %4, %300 : vector<1x256xi32>
      %302 = arith.andi %299, %301 : vector<1x256xi1>
      %c-2_i32_105 = arith.constant -2 : i32
      %303 = vector.broadcast %c-2_i32_105 : i32 to vector<1x256xi32>
      %304 = arith.cmpi sge, %5, %303 : vector<1x256xi32>
      %305 = arith.andi %302, %304 : vector<1x256xi1>
      %c14_i32_106 = arith.constant 14 : i32
      %306 = vector.broadcast %c14_i32_106 : i32 to vector<1x256xi32>
      %307 = arith.cmpi slt, %5, %306 : vector<1x256xi32>
      %308 = arith.andi %305, %307 : vector<1x256xi1>
      %cst_107 = arith.constant 0.000000e+00 : f32
      %309 = vector.shape_cast %308 : vector<1x256xi1> to vector<1x256xi1>
      %310 = vector.broadcast %309 : vector<1x256xi1> to vector<8x256xi1>
      %311 = vector.broadcast %cst_107 : f32 to vector<8x256xf32>
      %312 = arith.select %310, %297, %311 : vector<8x256xi1>, vector<8x256xf32>
      %c2_i32_108 = arith.constant 2 : i32
      %313 = tpu.dynamic_rotate %151 by %c2_i32_108 dim 1 : vector<8x256xf32>, i32 -> vector<8x256xf32>
      %c0_i32_109 = arith.constant 0 : i32
      %314 = vector.broadcast %c0_i32_109 : i32 to vector<1x256xi32>
      %315 = arith.cmpi sge, %4, %314 : vector<1x256xi32>
      %c16_i32_110 = arith.constant 16 : i32
      %316 = vector.broadcast %c16_i32_110 : i32 to vector<1x256xi32>
      %317 = arith.cmpi slt, %4, %316 : vector<1x256xi32>
      %318 = arith.andi %315, %317 : vector<1x256xi1>
      %c2_i32_111 = arith.constant 2 : i32
      %319 = vector.broadcast %c2_i32_111 : i32 to vector<1x256xi32>
      %320 = arith.cmpi sge, %5, %319 : vector<1x256xi32>
      %321 = arith.andi %318, %320 : vector<1x256xi1>
      %c18_i32_112 = arith.constant 18 : i32
      %322 = vector.broadcast %c18_i32_112 : i32 to vector<1x256xi32>
      %323 = arith.cmpi slt, %5, %322 : vector<1x256xi32>
      %324 = arith.andi %321, %323 : vector<1x256xi1>
      %cst_113 = arith.constant 0.000000e+00 : f32
      %325 = vector.shape_cast %324 : vector<1x256xi1> to vector<1x256xi1>
      %326 = vector.broadcast %325 : vector<1x256xi1> to vector<8x256xi1>
      %327 = vector.broadcast %cst_113 : f32 to vector<8x256xf32>
      %328 = arith.select %326, %313, %327 : vector<8x256xi1>, vector<8x256xf32>
      %c1_i32_114 = arith.constant 1 : i32
      %329 = tpu.dynamic_rotate %151 by %c1_i32_114 dim 1 : vector<8x256xf32>, i32 -> vector<8x256xf32>
      %c0_i32_115 = arith.constant 0 : i32
      %330 = vector.broadcast %c0_i32_115 : i32 to vector<1x256xi32>
      %331 = arith.cmpi sge, %4, %330 : vector<1x256xi32>
      %c16_i32_116 = arith.constant 16 : i32
      %332 = vector.broadcast %c16_i32_116 : i32 to vector<1x256xi32>
      %333 = arith.cmpi slt, %4, %332 : vector<1x256xi32>
      %334 = arith.andi %331, %333 : vector<1x256xi1>
      %c1_i32_117 = arith.constant 1 : i32
      %335 = vector.broadcast %c1_i32_117 : i32 to vector<1x256xi32>
      %336 = arith.cmpi sge, %5, %335 : vector<1x256xi32>
      %337 = arith.andi %334, %336 : vector<1x256xi1>
      %c17_i32_118 = arith.constant 17 : i32
      %338 = vector.broadcast %c17_i32_118 : i32 to vector<1x256xi32>
      %339 = arith.cmpi slt, %5, %338 : vector<1x256xi32>
      %340 = arith.andi %337, %339 : vector<1x256xi1>
      %cst_119 = arith.constant 0.000000e+00 : f32
      %341 = vector.shape_cast %340 : vector<1x256xi1> to vector<1x256xi1>
      %342 = vector.broadcast %341 : vector<1x256xi1> to vector<8x256xi1>
      %343 = vector.broadcast %cst_119 : f32 to vector<8x256xf32>
      %344 = arith.select %342, %329, %343 : vector<8x256xi1>, vector<8x256xf32>
      %c255_i32_120 = arith.constant 255 : i32
      %345 = tpu.dynamic_rotate %151 by %c255_i32_120 dim 1 : vector<8x256xf32>, i32 -> vector<8x256xf32>
      %c0_i32_121 = arith.constant 0 : i32
      %346 = vector.broadcast %c0_i32_121 : i32 to vector<1x256xi32>
      %347 = arith.cmpi sge, %4, %346 : vector<1x256xi32>
      %c16_i32_122 = arith.constant 16 : i32
      %348 = vector.broadcast %c16_i32_122 : i32 to vector<1x256xi32>
      %349 = arith.cmpi slt, %4, %348 : vector<1x256xi32>
      %350 = arith.andi %347, %349 : vector<1x256xi1>
      %c-1_i32_123 = arith.constant -1 : i32
      %351 = vector.broadcast %c-1_i32_123 : i32 to vector<1x256xi32>
      %352 = arith.cmpi sge, %5, %351 : vector<1x256xi32>
      %353 = arith.andi %350, %352 : vector<1x256xi1>
      %c15_i32_124 = arith.constant 15 : i32
      %354 = vector.broadcast %c15_i32_124 : i32 to vector<1x256xi32>
      %355 = arith.cmpi slt, %5, %354 : vector<1x256xi32>
      %356 = arith.andi %353, %355 : vector<1x256xi1>
      %cst_125 = arith.constant 0.000000e+00 : f32
      %357 = vector.shape_cast %356 : vector<1x256xi1> to vector<1x256xi1>
      %358 = vector.broadcast %357 : vector<1x256xi1> to vector<8x256xi1>
      %359 = vector.broadcast %cst_125 : f32 to vector<8x256xf32>
      %360 = arith.select %358, %345, %359 : vector<8x256xi1>, vector<8x256xf32>
      %c254_i32 = arith.constant 254 : i32
      %361 = tpu.dynamic_rotate %151 by %c254_i32 dim 1 : vector<8x256xf32>, i32 -> vector<8x256xf32>
      %c0_i32_126 = arith.constant 0 : i32
      %362 = vector.broadcast %c0_i32_126 : i32 to vector<1x256xi32>
      %363 = arith.cmpi sge, %4, %362 : vector<1x256xi32>
      %c16_i32_127 = arith.constant 16 : i32
      %364 = vector.broadcast %c16_i32_127 : i32 to vector<1x256xi32>
      %365 = arith.cmpi slt, %4, %364 : vector<1x256xi32>
      %366 = arith.andi %363, %365 : vector<1x256xi1>
      %c-2_i32_128 = arith.constant -2 : i32
      %367 = vector.broadcast %c-2_i32_128 : i32 to vector<1x256xi32>
      %368 = arith.cmpi sge, %5, %367 : vector<1x256xi32>
      %369 = arith.andi %366, %368 : vector<1x256xi1>
      %c14_i32_129 = arith.constant 14 : i32
      %370 = vector.broadcast %c14_i32_129 : i32 to vector<1x256xi32>
      %371 = arith.cmpi slt, %5, %370 : vector<1x256xi32>
      %372 = arith.andi %369, %371 : vector<1x256xi1>
      %cst_130 = arith.constant 0.000000e+00 : f32
      %373 = vector.shape_cast %372 : vector<1x256xi1> to vector<1x256xi1>
      %374 = vector.broadcast %373 : vector<1x256xi1> to vector<8x256xi1>
      %375 = vector.broadcast %cst_130 : f32 to vector<8x256xf32>
      %376 = arith.select %374, %361, %375 : vector<8x256xi1>, vector<8x256xf32>
      %c242_i32 = arith.constant 242 : i32
      %377 = tpu.dynamic_rotate %151 by %c242_i32 dim 1 : vector<8x256xf32>, i32 -> vector<8x256xf32>
      %c-1_i32_131 = arith.constant -1 : i32
      %378 = vector.broadcast %c-1_i32_131 : i32 to vector<1x256xi32>
      %379 = arith.cmpi sge, %4, %378 : vector<1x256xi32>
      %c15_i32_132 = arith.constant 15 : i32
      %380 = vector.broadcast %c15_i32_132 : i32 to vector<1x256xi32>
      %381 = arith.cmpi slt, %4, %380 : vector<1x256xi32>
      %382 = arith.andi %379, %381 : vector<1x256xi1>
      %c2_i32_133 = arith.constant 2 : i32
      %383 = vector.broadcast %c2_i32_133 : i32 to vector<1x256xi32>
      %384 = arith.cmpi sge, %5, %383 : vector<1x256xi32>
      %385 = arith.andi %382, %384 : vector<1x256xi1>
      %c18_i32_134 = arith.constant 18 : i32
      %386 = vector.broadcast %c18_i32_134 : i32 to vector<1x256xi32>
      %387 = arith.cmpi slt, %5, %386 : vector<1x256xi32>
      %388 = arith.andi %385, %387 : vector<1x256xi1>
      %cst_135 = arith.constant 0.000000e+00 : f32
      %389 = vector.shape_cast %388 : vector<1x256xi1> to vector<1x256xi1>
      %390 = vector.broadcast %389 : vector<1x256xi1> to vector<8x256xi1>
      %391 = vector.broadcast %cst_135 : f32 to vector<8x256xf32>
      %392 = arith.select %390, %377, %391 : vector<8x256xi1>, vector<8x256xf32>
      %c241_i32_136 = arith.constant 241 : i32
      %393 = tpu.dynamic_rotate %151 by %c241_i32_136 dim 1 : vector<8x256xf32>, i32 -> vector<8x256xf32>
      %c-1_i32_137 = arith.constant -1 : i32
      %394 = vector.broadcast %c-1_i32_137 : i32 to vector<1x256xi32>
      %395 = arith.cmpi sge, %4, %394 : vector<1x256xi32>
      %c15_i32_138 = arith.constant 15 : i32
      %396 = vector.broadcast %c15_i32_138 : i32 to vector<1x256xi32>
      %397 = arith.cmpi slt, %4, %396 : vector<1x256xi32>
      %398 = arith.andi %395, %397 : vector<1x256xi1>
      %c1_i32_139 = arith.constant 1 : i32
      %399 = vector.broadcast %c1_i32_139 : i32 to vector<1x256xi32>
      %400 = arith.cmpi sge, %5, %399 : vector<1x256xi32>
      %401 = arith.andi %398, %400 : vector<1x256xi1>
      %c17_i32_140 = arith.constant 17 : i32
      %402 = vector.broadcast %c17_i32_140 : i32 to vector<1x256xi32>
      %403 = arith.cmpi slt, %5, %402 : vector<1x256xi32>
      %404 = arith.andi %401, %403 : vector<1x256xi1>
      %cst_141 = arith.constant 0.000000e+00 : f32
      %405 = vector.shape_cast %404 : vector<1x256xi1> to vector<1x256xi1>
      %406 = vector.broadcast %405 : vector<1x256xi1> to vector<8x256xi1>
      %407 = vector.broadcast %cst_141 : f32 to vector<8x256xf32>
      %408 = arith.select %406, %393, %407 : vector<8x256xi1>, vector<8x256xf32>
      %c240_i32_142 = arith.constant 240 : i32
      %409 = tpu.dynamic_rotate %151 by %c240_i32_142 dim 1 : vector<8x256xf32>, i32 -> vector<8x256xf32>
      %c-1_i32_143 = arith.constant -1 : i32
      %410 = vector.broadcast %c-1_i32_143 : i32 to vector<1x256xi32>
      %411 = arith.cmpi sge, %4, %410 : vector<1x256xi32>
      %c15_i32_144 = arith.constant 15 : i32
      %412 = vector.broadcast %c15_i32_144 : i32 to vector<1x256xi32>
      %413 = arith.cmpi slt, %4, %412 : vector<1x256xi32>
      %414 = arith.andi %411, %413 : vector<1x256xi1>
      %c0_i32_145 = arith.constant 0 : i32
      %415 = vector.broadcast %c0_i32_145 : i32 to vector<1x256xi32>
      %416 = arith.cmpi sge, %5, %415 : vector<1x256xi32>
      %417 = arith.andi %414, %416 : vector<1x256xi1>
      %c16_i32_146 = arith.constant 16 : i32
      %418 = vector.broadcast %c16_i32_146 : i32 to vector<1x256xi32>
      %419 = arith.cmpi slt, %5, %418 : vector<1x256xi32>
      %420 = arith.andi %417, %419 : vector<1x256xi1>
      %cst_147 = arith.constant 0.000000e+00 : f32
      %421 = vector.shape_cast %420 : vector<1x256xi1> to vector<1x256xi1>
      %422 = vector.broadcast %421 : vector<1x256xi1> to vector<8x256xi1>
      %423 = vector.broadcast %cst_147 : f32 to vector<8x256xf32>
      %424 = arith.select %422, %409, %423 : vector<8x256xi1>, vector<8x256xf32>
      %c239_i32_148 = arith.constant 239 : i32
      %425 = tpu.dynamic_rotate %151 by %c239_i32_148 dim 1 : vector<8x256xf32>, i32 -> vector<8x256xf32>
      %c-1_i32_149 = arith.constant -1 : i32
      %426 = vector.broadcast %c-1_i32_149 : i32 to vector<1x256xi32>
      %427 = arith.cmpi sge, %4, %426 : vector<1x256xi32>
      %c15_i32_150 = arith.constant 15 : i32
      %428 = vector.broadcast %c15_i32_150 : i32 to vector<1x256xi32>
      %429 = arith.cmpi slt, %4, %428 : vector<1x256xi32>
      %430 = arith.andi %427, %429 : vector<1x256xi1>
      %c-1_i32_151 = arith.constant -1 : i32
      %431 = vector.broadcast %c-1_i32_151 : i32 to vector<1x256xi32>
      %432 = arith.cmpi sge, %5, %431 : vector<1x256xi32>
      %433 = arith.andi %430, %432 : vector<1x256xi1>
      %c15_i32_152 = arith.constant 15 : i32
      %434 = vector.broadcast %c15_i32_152 : i32 to vector<1x256xi32>
      %435 = arith.cmpi slt, %5, %434 : vector<1x256xi32>
      %436 = arith.andi %433, %435 : vector<1x256xi1>
      %cst_153 = arith.constant 0.000000e+00 : f32
      %437 = vector.shape_cast %436 : vector<1x256xi1> to vector<1x256xi1>
      %438 = vector.broadcast %437 : vector<1x256xi1> to vector<8x256xi1>
      %439 = vector.broadcast %cst_153 : f32 to vector<8x256xf32>
      %440 = arith.select %438, %425, %439 : vector<8x256xi1>, vector<8x256xf32>
      %c238_i32 = arith.constant 238 : i32
      %441 = tpu.dynamic_rotate %151 by %c238_i32 dim 1 : vector<8x256xf32>, i32 -> vector<8x256xf32>
      %c-1_i32_154 = arith.constant -1 : i32
      %442 = vector.broadcast %c-1_i32_154 : i32 to vector<1x256xi32>
      %443 = arith.cmpi sge, %4, %442 : vector<1x256xi32>
      %c15_i32_155 = arith.constant 15 : i32
      %444 = vector.broadcast %c15_i32_155 : i32 to vector<1x256xi32>
      %445 = arith.cmpi slt, %4, %444 : vector<1x256xi32>
      %446 = arith.andi %443, %445 : vector<1x256xi1>
      %c-2_i32_156 = arith.constant -2 : i32
      %447 = vector.broadcast %c-2_i32_156 : i32 to vector<1x256xi32>
      %448 = arith.cmpi sge, %5, %447 : vector<1x256xi32>
      %449 = arith.andi %446, %448 : vector<1x256xi1>
      %c14_i32_157 = arith.constant 14 : i32
      %450 = vector.broadcast %c14_i32_157 : i32 to vector<1x256xi32>
      %451 = arith.cmpi slt, %5, %450 : vector<1x256xi32>
      %452 = arith.andi %449, %451 : vector<1x256xi1>
      %cst_158 = arith.constant 0.000000e+00 : f32
      %453 = vector.shape_cast %452 : vector<1x256xi1> to vector<1x256xi1>
      %454 = vector.broadcast %453 : vector<1x256xi1> to vector<8x256xi1>
      %455 = vector.broadcast %cst_158 : f32 to vector<8x256xf32>
      %456 = arith.select %454, %441, %455 : vector<8x256xi1>, vector<8x256xf32>
      %c226_i32 = arith.constant 226 : i32
      %457 = tpu.dynamic_rotate %151 by %c226_i32 dim 1 : vector<8x256xf32>, i32 -> vector<8x256xf32>
      %c-2_i32_159 = arith.constant -2 : i32
      %458 = vector.broadcast %c-2_i32_159 : i32 to vector<1x256xi32>
      %459 = arith.cmpi sge, %4, %458 : vector<1x256xi32>
      %c14_i32_160 = arith.constant 14 : i32
      %460 = vector.broadcast %c14_i32_160 : i32 to vector<1x256xi32>
      %461 = arith.cmpi slt, %4, %460 : vector<1x256xi32>
      %462 = arith.andi %459, %461 : vector<1x256xi1>
      %c2_i32_161 = arith.constant 2 : i32
      %463 = vector.broadcast %c2_i32_161 : i32 to vector<1x256xi32>
      %464 = arith.cmpi sge, %5, %463 : vector<1x256xi32>
      %465 = arith.andi %462, %464 : vector<1x256xi1>
      %c18_i32_162 = arith.constant 18 : i32
      %466 = vector.broadcast %c18_i32_162 : i32 to vector<1x256xi32>
      %467 = arith.cmpi slt, %5, %466 : vector<1x256xi32>
      %468 = arith.andi %465, %467 : vector<1x256xi1>
      %cst_163 = arith.constant 0.000000e+00 : f32
      %469 = vector.shape_cast %468 : vector<1x256xi1> to vector<1x256xi1>
      %470 = vector.broadcast %469 : vector<1x256xi1> to vector<8x256xi1>
      %471 = vector.broadcast %cst_163 : f32 to vector<8x256xf32>
      %472 = arith.select %470, %457, %471 : vector<8x256xi1>, vector<8x256xf32>
      %c225_i32 = arith.constant 225 : i32
      %473 = tpu.dynamic_rotate %151 by %c225_i32 dim 1 : vector<8x256xf32>, i32 -> vector<8x256xf32>
      %c-2_i32_164 = arith.constant -2 : i32
      %474 = vector.broadcast %c-2_i32_164 : i32 to vector<1x256xi32>
      %475 = arith.cmpi sge, %4, %474 : vector<1x256xi32>
      %c14_i32_165 = arith.constant 14 : i32
      %476 = vector.broadcast %c14_i32_165 : i32 to vector<1x256xi32>
      %477 = arith.cmpi slt, %4, %476 : vector<1x256xi32>
      %478 = arith.andi %475, %477 : vector<1x256xi1>
      %c1_i32_166 = arith.constant 1 : i32
      %479 = vector.broadcast %c1_i32_166 : i32 to vector<1x256xi32>
      %480 = arith.cmpi sge, %5, %479 : vector<1x256xi32>
      %481 = arith.andi %478, %480 : vector<1x256xi1>
      %c17_i32_167 = arith.constant 17 : i32
      %482 = vector.broadcast %c17_i32_167 : i32 to vector<1x256xi32>
      %483 = arith.cmpi slt, %5, %482 : vector<1x256xi32>
      %484 = arith.andi %481, %483 : vector<1x256xi1>
      %cst_168 = arith.constant 0.000000e+00 : f32
      %485 = vector.shape_cast %484 : vector<1x256xi1> to vector<1x256xi1>
      %486 = vector.broadcast %485 : vector<1x256xi1> to vector<8x256xi1>
      %487 = vector.broadcast %cst_168 : f32 to vector<8x256xf32>
      %488 = arith.select %486, %473, %487 : vector<8x256xi1>, vector<8x256xf32>
      %c224_i32 = arith.constant 224 : i32
      %489 = tpu.dynamic_rotate %151 by %c224_i32 dim 1 : vector<8x256xf32>, i32 -> vector<8x256xf32>
      %c-2_i32_169 = arith.constant -2 : i32
      %490 = vector.broadcast %c-2_i32_169 : i32 to vector<1x256xi32>
      %491 = arith.cmpi sge, %4, %490 : vector<1x256xi32>
      %c14_i32_170 = arith.constant 14 : i32
      %492 = vector.broadcast %c14_i32_170 : i32 to vector<1x256xi32>
      %493 = arith.cmpi slt, %4, %492 : vector<1x256xi32>
      %494 = arith.andi %491, %493 : vector<1x256xi1>
      %c0_i32_171 = arith.constant 0 : i32
      %495 = vector.broadcast %c0_i32_171 : i32 to vector<1x256xi32>
      %496 = arith.cmpi sge, %5, %495 : vector<1x256xi32>
      %497 = arith.andi %494, %496 : vector<1x256xi1>
      %c16_i32_172 = arith.constant 16 : i32
      %498 = vector.broadcast %c16_i32_172 : i32 to vector<1x256xi32>
      %499 = arith.cmpi slt, %5, %498 : vector<1x256xi32>
      %500 = arith.andi %497, %499 : vector<1x256xi1>
      %cst_173 = arith.constant 0.000000e+00 : f32
      %501 = vector.shape_cast %500 : vector<1x256xi1> to vector<1x256xi1>
      %502 = vector.broadcast %501 : vector<1x256xi1> to vector<8x256xi1>
      %503 = vector.broadcast %cst_173 : f32 to vector<8x256xf32>
      %504 = arith.select %502, %489, %503 : vector<8x256xi1>, vector<8x256xf32>
      %c223_i32 = arith.constant 223 : i32
      %505 = tpu.dynamic_rotate %151 by %c223_i32 dim 1 : vector<8x256xf32>, i32 -> vector<8x256xf32>
      %c-2_i32_174 = arith.constant -2 : i32
      %506 = vector.broadcast %c-2_i32_174 : i32 to vector<1x256xi32>
      %507 = arith.cmpi sge, %4, %506 : vector<1x256xi32>
      %c14_i32_175 = arith.constant 14 : i32
      %508 = vector.broadcast %c14_i32_175 : i32 to vector<1x256xi32>
      %509 = arith.cmpi slt, %4, %508 : vector<1x256xi32>
      %510 = arith.andi %507, %509 : vector<1x256xi1>
      %c-1_i32_176 = arith.constant -1 : i32
      %511 = vector.broadcast %c-1_i32_176 : i32 to vector<1x256xi32>
      %512 = arith.cmpi sge, %5, %511 : vector<1x256xi32>
      %513 = arith.andi %510, %512 : vector<1x256xi1>
      %c15_i32_177 = arith.constant 15 : i32
      %514 = vector.broadcast %c15_i32_177 : i32 to vector<1x256xi32>
      %515 = arith.cmpi slt, %5, %514 : vector<1x256xi32>
      %516 = arith.andi %513, %515 : vector<1x256xi1>
      %cst_178 = arith.constant 0.000000e+00 : f32
      %517 = vector.shape_cast %516 : vector<1x256xi1> to vector<1x256xi1>
      %518 = vector.broadcast %517 : vector<1x256xi1> to vector<8x256xi1>
      %519 = vector.broadcast %cst_178 : f32 to vector<8x256xf32>
      %520 = arith.select %518, %505, %519 : vector<8x256xi1>, vector<8x256xf32>
      %c222_i32 = arith.constant 222 : i32
      %521 = tpu.dynamic_rotate %151 by %c222_i32 dim 1 : vector<8x256xf32>, i32 -> vector<8x256xf32>
      %c-2_i32_179 = arith.constant -2 : i32
      %522 = vector.broadcast %c-2_i32_179 : i32 to vector<1x256xi32>
      %523 = arith.cmpi sge, %4, %522 : vector<1x256xi32>
      %c14_i32_180 = arith.constant 14 : i32
      %524 = vector.broadcast %c14_i32_180 : i32 to vector<1x256xi32>
      %525 = arith.cmpi slt, %4, %524 : vector<1x256xi32>
      %526 = arith.andi %523, %525 : vector<1x256xi1>
      %c-2_i32_181 = arith.constant -2 : i32
      %527 = vector.broadcast %c-2_i32_181 : i32 to vector<1x256xi32>
      %528 = arith.cmpi sge, %5, %527 : vector<1x256xi32>
      %529 = arith.andi %526, %528 : vector<1x256xi1>
      %c14_i32_182 = arith.constant 14 : i32
      %530 = vector.broadcast %c14_i32_182 : i32 to vector<1x256xi32>
      %531 = arith.cmpi slt, %5, %530 : vector<1x256xi32>
      %532 = arith.andi %529, %531 : vector<1x256xi1>
      %cst_183 = arith.constant 0.000000e+00 : f32
      %533 = vector.shape_cast %532 : vector<1x256xi1> to vector<1x256xi1>
      %534 = vector.broadcast %533 : vector<1x256xi1> to vector<8x256xi1>
      %535 = vector.broadcast %cst_183 : f32 to vector<8x256xf32>
      %536 = arith.select %534, %521, %535 : vector<8x256xi1>, vector<8x256xf32>
      %537 = tpu.concatenate %168, %184, %200, %216, %232, %248, %264, %280, %296, %312, %328, %344, %151, %360, %376, %392 in 0 : vector<8x256xf32>, vector<8x256xf32>, vector<8x256xf32>, vector<8x256xf32>, vector<8x256xf32>, vector<8x256xf32>, vector<8x256xf32>, vector<8x256xf32>, vector<8x256xf32>, vector<8x256xf32>, vector<8x256xf32>, vector<8x256xf32>, vector<8x256xf32>, vector<8x256xf32>, vector<8x256xf32>, vector<8x256xf32> -> vector<128x256xf32>
      %538 = tpu.concatenate %408, %424, %440, %456, %472, %488, %504, %520, %536 in 0 : vector<8x256xf32>, vector<8x256xf32>, vector<8x256xf32>, vector<8x256xf32>, vector<8x256xf32>, vector<8x256xf32>, vector<8x256xf32>, vector<8x256xf32>, vector<8x256xf32> -> vector<72x256xf32>
      %539 = tpu.concatenate %537, %538 in 0 : vector<128x256xf32>, vector<72x256xf32> -> vector<200x256xf32>
      %cst_184 = arith.constant dense<0.000000e+00> : vector<8x256xf32>
      %540 = tpu.matmul %152, %539, %cst_184 {dimension_numbers = #tpu.dot_dimension_numbers<[1], [0], [0], [1], [0, 0, 1, 1], [], []>} : vector<8x200xf32>, vector<200x256xf32>, vector<8x256xf32> -> vector<8x256xf32>
      %541 = vector.broadcast %144 : vector<8x1xf32> to vector<8x256xf32>
      %542 = arith.addf %540, %541 : vector<8x256xf32>
      %cst_185 = arith.constant 0.000000e+00 : f32
      %543 = vector.broadcast %cst_185 : f32 to vector<8x256xf32>
      %544 = arith.maximumf %542, %543 : vector<8x256xf32>
      %c0_186 = arith.constant 0 : index
      %c0_187 = arith.constant 0 : index
      %c0_188 = arith.constant 0 : index
      %545 = vector.load %arg8[%c0_186, %c0_187, %c0_188] : memref<1x8x256xf32, #tpu.memory_space<vmem>>, vector<1x8x256xf32>
      %546 = vector.shape_cast %545 : vector<1x8x256xf32> to vector<8x256xf32>
      %547 = vector.shape_cast %544 : vector<8x256xf32> to vector<1x8x256xf32>
      tpu.vector_store %arg8[%c0_186, %c0_187, %c0_188], %547 {strides = array<i32>} : memref<1x8x256xf32, #tpu.memory_space<vmem>>, vector<1x8x256xf32>,
    } else {
    }
    %c1_i32_44 = arith.constant 1 : i32
    %137 = arith.cmpi eq, %1, %c1_i32_44 : i32
    %138 = arith.extui %137 : i1 to i32
    %c0_i32_45 = arith.constant 0 : i32
    %139 = arith.cmpi ne, %138, %c0_i32_45 : i32
    scf.if %139 {
      %c16 = arith.constant 16 : index
      %c0_47 = arith.constant 0 : index
      %143 = vector.load %arg7[%c16, %c0_47] : memref<40x1xf32, #tpu.memory_space<vmem>>, vector<8x1xf32>
      %c24 = arith.constant 24 : index
      %c0_48 = arith.constant 0 : index
      %144 = vector.load %arg7[%c24, %c0_48] : memref<40x1xf32, #tpu.memory_space<vmem>>, vector<8x1xf32>
      %cst_49 = arith.constant -1.000000e+00 : f32
      %145 = vector.broadcast %cst_49 : f32 to vector<4x256xf32>
      %146 = arith.mulf %53, %145 : vector<4x256xf32>
      %147 = arith.addf %21, %146 : vector<4x256xf32>
      %cst_50 = arith.constant 2.000000e+00 : f32
      %148 = vector.broadcast %cst_50 : f32 to vector<4x256xf32>
      %149 = arith.mulf %69, %148 : vector<4x256xf32>
      %150 = arith.addf %147, %149 : vector<4x256xf32>
      %cst_51 = arith.constant -2.000000e+00 : f32
      %151 = vector.broadcast %cst_51 : f32 to vector<4x256xf32>
      %152 = arith.mulf %85, %151 : vector<4x256xf32>
      %153 = arith.addf %150, %152 : vector<4x256xf32>
      %154 = arith.addf %153, %101 : vector<4x256xf32>
      %cst_52 = arith.constant -1.000000e+00 : f32
      %155 = vector.broadcast %cst_52 : f32 to vector<4x256xf32>
      %156 = arith.mulf %133, %155 : vector<4x256xf32>
      %157 = arith.addf %154, %156 : vector<4x256xf32>
      %cst_53 = arith.constant 2.000000e+00 : f32
      %158 = vector.broadcast %cst_53 : f32 to vector<4x256xf32>
      %159 = arith.mulf %37, %158 : vector<4x256xf32>
      %160 = arith.addf %21, %159 : vector<4x256xf32>
      %161 = arith.addf %160, %53 : vector<4x256xf32>
      %cst_54 = arith.constant -1.000000e+00 : f32
      %162 = vector.broadcast %cst_54 : f32 to vector<4x256xf32>
      %163 = arith.mulf %101, %162 : vector<4x256xf32>
      %164 = arith.addf %161, %163 : vector<4x256xf32>
      %cst_55 = arith.constant -2.000000e+00 : f32
      %165 = vector.broadcast %cst_55 : f32 to vector<4x256xf32>
      %166 = arith.mulf %117, %165 : vector<4x256xf32>
      %167 = arith.addf %164, %166 : vector<4x256xf32>
      %cst_56 = arith.constant -1.000000e+00 : f32
      %168 = vector.broadcast %cst_56 : f32 to vector<4x256xf32>
      %169 = arith.mulf %133, %168 : vector<4x256xf32>
      %170 = arith.addf %167, %169 : vector<4x256xf32>
      %c0_57 = arith.constant 0 : index
      %c0_58 = arith.constant 0 : index
      %171 = vector.load %arg6[%c0_57, %c0_58] : memref<24x100xf32, #tpu.memory_space<vmem>>, vector<8x100xf32>
      %c34_i32 = arith.constant 34 : i32
      %172 = tpu.dynamic_rotate %157 by %c34_i32 dim 1 : vector<4x256xf32>, i32 -> vector<4x256xf32>
      %c2_i32_59 = arith.constant 2 : i32
      %173 = vector.broadcast %c2_i32_59 : i32 to vector<1x256xi32>
      %174 = arith.cmpi sge, %4, %173 : vector<1x256xi32>
      %c18_i32 = arith.constant 18 : i32
      %175 = vector.broadcast %c18_i32 : i32 to vector<1x256xi32>
      %176 = arith.cmpi slt, %4, %175 : vector<1x256xi32>
      %177 = arith.andi %174, %176 : vector<1x256xi1>
      %c2_i32_60 = arith.constant 2 : i32
      %178 = vector.broadcast %c2_i32_60 : i32 to vector<1x256xi32>
      %179 = arith.cmpi sge, %5, %178 : vector<1x256xi32>
      %180 = arith.andi %177, %179 : vector<1x256xi1>
      %c18_i32_61 = arith.constant 18 : i32
      %181 = vector.broadcast %c18_i32_61 : i32 to vector<1x256xi32>
      %182 = arith.cmpi slt, %5, %181 : vector<1x256xi32>
      %183 = arith.andi %180, %182 : vector<1x256xi1>
      %cst_62 = arith.constant 0.000000e+00 : f32
      %184 = vector.shape_cast %183 : vector<1x256xi1> to vector<1x256xi1>
      %185 = vector.broadcast %184 : vector<1x256xi1> to vector<4x256xi1>
      %186 = vector.broadcast %cst_62 : f32 to vector<4x256xf32>
      %187 = arith.select %185, %172, %186 : vector<4x256xi1>, vector<4x256xf32>
      %c33_i32 = arith.constant 33 : i32
      %188 = tpu.dynamic_rotate %157 by %c33_i32 dim 1 : vector<4x256xf32>, i32 -> vector<4x256xf32>
      %c2_i32_63 = arith.constant 2 : i32
      %189 = vector.broadcast %c2_i32_63 : i32 to vector<1x256xi32>
      %190 = arith.cmpi sge, %4, %189 : vector<1x256xi32>
      %c18_i32_64 = arith.constant 18 : i32
      %191 = vector.broadcast %c18_i32_64 : i32 to vector<1x256xi32>
      %192 = arith.cmpi slt, %4, %191 : vector<1x256xi32>
      %193 = arith.andi %190, %192 : vector<1x256xi1>
      %c1_i32_65 = arith.constant 1 : i32
      %194 = vector.broadcast %c1_i32_65 : i32 to vector<1x256xi32>
      %195 = arith.cmpi sge, %5, %194 : vector<1x256xi32>
      %196 = arith.andi %193, %195 : vector<1x256xi1>
      %c17_i32_66 = arith.constant 17 : i32
      %197 = vector.broadcast %c17_i32_66 : i32 to vector<1x256xi32>
      %198 = arith.cmpi slt, %5, %197 : vector<1x256xi32>
      %199 = arith.andi %196, %198 : vector<1x256xi1>
      %cst_67 = arith.constant 0.000000e+00 : f32
      %200 = vector.shape_cast %199 : vector<1x256xi1> to vector<1x256xi1>
      %201 = vector.broadcast %200 : vector<1x256xi1> to vector<4x256xi1>
      %202 = vector.broadcast %cst_67 : f32 to vector<4x256xf32>
      %203 = arith.select %201, %188, %202 : vector<4x256xi1>, vector<4x256xf32>
      %c32_i32 = arith.constant 32 : i32
      %204 = tpu.dynamic_rotate %157 by %c32_i32 dim 1 : vector<4x256xf32>, i32 -> vector<4x256xf32>
      %c2_i32_68 = arith.constant 2 : i32
      %205 = vector.broadcast %c2_i32_68 : i32 to vector<1x256xi32>
      %206 = arith.cmpi sge, %4, %205 : vector<1x256xi32>
      %c18_i32_69 = arith.constant 18 : i32
      %207 = vector.broadcast %c18_i32_69 : i32 to vector<1x256xi32>
      %208 = arith.cmpi slt, %4, %207 : vector<1x256xi32>
      %209 = arith.andi %206, %208 : vector<1x256xi1>
      %c0_i32_70 = arith.constant 0 : i32
      %210 = vector.broadcast %c0_i32_70 : i32 to vector<1x256xi32>
      %211 = arith.cmpi sge, %5, %210 : vector<1x256xi32>
      %212 = arith.andi %209, %211 : vector<1x256xi1>
      %c16_i32_71 = arith.constant 16 : i32
      %213 = vector.broadcast %c16_i32_71 : i32 to vector<1x256xi32>
      %214 = arith.cmpi slt, %5, %213 : vector<1x256xi32>
      %215 = arith.andi %212, %214 : vector<1x256xi1>
      %cst_72 = arith.constant 0.000000e+00 : f32
      %216 = vector.shape_cast %215 : vector<1x256xi1> to vector<1x256xi1>
      %217 = vector.broadcast %216 : vector<1x256xi1> to vector<4x256xi1>
      %218 = vector.broadcast %cst_72 : f32 to vector<4x256xf32>
      %219 = arith.select %217, %204, %218 : vector<4x256xi1>, vector<4x256xf32>
      %c31_i32 = arith.constant 31 : i32
      %220 = tpu.dynamic_rotate %157 by %c31_i32 dim 1 : vector<4x256xf32>, i32 -> vector<4x256xf32>
      %c2_i32_73 = arith.constant 2 : i32
      %221 = vector.broadcast %c2_i32_73 : i32 to vector<1x256xi32>
      %222 = arith.cmpi sge, %4, %221 : vector<1x256xi32>
      %c18_i32_74 = arith.constant 18 : i32
      %223 = vector.broadcast %c18_i32_74 : i32 to vector<1x256xi32>
      %224 = arith.cmpi slt, %4, %223 : vector<1x256xi32>
      %225 = arith.andi %222, %224 : vector<1x256xi1>
      %c-1_i32_75 = arith.constant -1 : i32
      %226 = vector.broadcast %c-1_i32_75 : i32 to vector<1x256xi32>
      %227 = arith.cmpi sge, %5, %226 : vector<1x256xi32>
      %228 = arith.andi %225, %227 : vector<1x256xi1>
      %c15_i32_76 = arith.constant 15 : i32
      %229 = vector.broadcast %c15_i32_76 : i32 to vector<1x256xi32>
      %230 = arith.cmpi slt, %5, %229 : vector<1x256xi32>
      %231 = arith.andi %228, %230 : vector<1x256xi1>
      %cst_77 = arith.constant 0.000000e+00 : f32
      %232 = vector.shape_cast %231 : vector<1x256xi1> to vector<1x256xi1>
      %233 = vector.broadcast %232 : vector<1x256xi1> to vector<4x256xi1>
      %234 = vector.broadcast %cst_77 : f32 to vector<4x256xf32>
      %235 = arith.select %233, %220, %234 : vector<4x256xi1>, vector<4x256xf32>
      %c30_i32 = arith.constant 30 : i32
      %236 = tpu.dynamic_rotate %157 by %c30_i32 dim 1 : vector<4x256xf32>, i32 -> vector<4x256xf32>
      %c2_i32_78 = arith.constant 2 : i32
      %237 = vector.broadcast %c2_i32_78 : i32 to vector<1x256xi32>
      %238 = arith.cmpi sge, %4, %237 : vector<1x256xi32>
      %c18_i32_79 = arith.constant 18 : i32
      %239 = vector.broadcast %c18_i32_79 : i32 to vector<1x256xi32>
      %240 = arith.cmpi slt, %4, %239 : vector<1x256xi32>
      %241 = arith.andi %238, %240 : vector<1x256xi1>
      %c-2_i32 = arith.constant -2 : i32
      %242 = vector.broadcast %c-2_i32 : i32 to vector<1x256xi32>
      %243 = arith.cmpi sge, %5, %242 : vector<1x256xi32>
      %244 = arith.andi %241, %243 : vector<1x256xi1>
      %c14_i32 = arith.constant 14 : i32
      %245 = vector.broadcast %c14_i32 : i32 to vector<1x256xi32>
      %246 = arith.cmpi slt, %5, %245 : vector<1x256xi32>
      %247 = arith.andi %244, %246 : vector<1x256xi1>
      %cst_80 = arith.constant 0.000000e+00 : f32
      %248 = vector.shape_cast %247 : vector<1x256xi1> to vector<1x256xi1>
      %249 = vector.broadcast %248 : vector<1x256xi1> to vector<4x256xi1>
      %250 = vector.broadcast %cst_80 : f32 to vector<4x256xf32>
      %251 = arith.select %249, %236, %250 : vector<4x256xi1>, vector<4x256xf32>
      %c18_i32_81 = arith.constant 18 : i32
      %252 = tpu.dynamic_rotate %157 by %c18_i32_81 dim 1 : vector<4x256xf32>, i32 -> vector<4x256xf32>
      %c1_i32_82 = arith.constant 1 : i32
      %253 = vector.broadcast %c1_i32_82 : i32 to vector<1x256xi32>
      %254 = arith.cmpi sge, %4, %253 : vector<1x256xi32>
      %c17_i32_83 = arith.constant 17 : i32
      %255 = vector.broadcast %c17_i32_83 : i32 to vector<1x256xi32>
      %256 = arith.cmpi slt, %4, %255 : vector<1x256xi32>
      %257 = arith.andi %254, %256 : vector<1x256xi1>
      %c2_i32_84 = arith.constant 2 : i32
      %258 = vector.broadcast %c2_i32_84 : i32 to vector<1x256xi32>
      %259 = arith.cmpi sge, %5, %258 : vector<1x256xi32>
      %260 = arith.andi %257, %259 : vector<1x256xi1>
      %c18_i32_85 = arith.constant 18 : i32
      %261 = vector.broadcast %c18_i32_85 : i32 to vector<1x256xi32>
      %262 = arith.cmpi slt, %5, %261 : vector<1x256xi32>
      %263 = arith.andi %260, %262 : vector<1x256xi1>
      %cst_86 = arith.constant 0.000000e+00 : f32
      %264 = vector.shape_cast %263 : vector<1x256xi1> to vector<1x256xi1>
      %265 = vector.broadcast %264 : vector<1x256xi1> to vector<4x256xi1>
      %266 = vector.broadcast %cst_86 : f32 to vector<4x256xf32>
      %267 = arith.select %265, %252, %266 : vector<4x256xi1>, vector<4x256xf32>
      %c17_i32_87 = arith.constant 17 : i32
      %268 = tpu.dynamic_rotate %157 by %c17_i32_87 dim 1 : vector<4x256xf32>, i32 -> vector<4x256xf32>
      %c1_i32_88 = arith.constant 1 : i32
      %269 = vector.broadcast %c1_i32_88 : i32 to vector<1x256xi32>
      %270 = arith.cmpi sge, %4, %269 : vector<1x256xi32>
      %c17_i32_89 = arith.constant 17 : i32
      %271 = vector.broadcast %c17_i32_89 : i32 to vector<1x256xi32>
      %272 = arith.cmpi slt, %4, %271 : vector<1x256xi32>
      %273 = arith.andi %270, %272 : vector<1x256xi1>
      %c1_i32_90 = arith.constant 1 : i32
      %274 = vector.broadcast %c1_i32_90 : i32 to vector<1x256xi32>
      %275 = arith.cmpi sge, %5, %274 : vector<1x256xi32>
      %276 = arith.andi %273, %275 : vector<1x256xi1>
      %c17_i32_91 = arith.constant 17 : i32
      %277 = vector.broadcast %c17_i32_91 : i32 to vector<1x256xi32>
      %278 = arith.cmpi slt, %5, %277 : vector<1x256xi32>
      %279 = arith.andi %276, %278 : vector<1x256xi1>
      %cst_92 = arith.constant 0.000000e+00 : f32
      %280 = vector.shape_cast %279 : vector<1x256xi1> to vector<1x256xi1>
      %281 = vector.broadcast %280 : vector<1x256xi1> to vector<4x256xi1>
      %282 = vector.broadcast %cst_92 : f32 to vector<4x256xf32>
      %283 = arith.select %281, %268, %282 : vector<4x256xi1>, vector<4x256xf32>
      %c16_i32_93 = arith.constant 16 : i32
      %284 = tpu.dynamic_rotate %157 by %c16_i32_93 dim 1 : vector<4x256xf32>, i32 -> vector<4x256xf32>
      %c1_i32_94 = arith.constant 1 : i32
      %285 = vector.broadcast %c1_i32_94 : i32 to vector<1x256xi32>
      %286 = arith.cmpi sge, %4, %285 : vector<1x256xi32>
      %c17_i32_95 = arith.constant 17 : i32
      %287 = vector.broadcast %c17_i32_95 : i32 to vector<1x256xi32>
      %288 = arith.cmpi slt, %4, %287 : vector<1x256xi32>
      %289 = arith.andi %286, %288 : vector<1x256xi1>
      %c0_i32_96 = arith.constant 0 : i32
      %290 = vector.broadcast %c0_i32_96 : i32 to vector<1x256xi32>
      %291 = arith.cmpi sge, %5, %290 : vector<1x256xi32>
      %292 = arith.andi %289, %291 : vector<1x256xi1>
      %c16_i32_97 = arith.constant 16 : i32
      %293 = vector.broadcast %c16_i32_97 : i32 to vector<1x256xi32>
      %294 = arith.cmpi slt, %5, %293 : vector<1x256xi32>
      %295 = arith.andi %292, %294 : vector<1x256xi1>
      %cst_98 = arith.constant 0.000000e+00 : f32
      %296 = vector.shape_cast %295 : vector<1x256xi1> to vector<1x256xi1>
      %297 = vector.broadcast %296 : vector<1x256xi1> to vector<4x256xi1>
      %298 = vector.broadcast %cst_98 : f32 to vector<4x256xf32>
      %299 = arith.select %297, %284, %298 : vector<4x256xi1>, vector<4x256xf32>
      %c15_i32_99 = arith.constant 15 : i32
      %300 = tpu.dynamic_rotate %157 by %c15_i32_99 dim 1 : vector<4x256xf32>, i32 -> vector<4x256xf32>
      %c1_i32_100 = arith.constant 1 : i32
      %301 = vector.broadcast %c1_i32_100 : i32 to vector<1x256xi32>
      %302 = arith.cmpi sge, %4, %301 : vector<1x256xi32>
      %c17_i32_101 = arith.constant 17 : i32
      %303 = vector.broadcast %c17_i32_101 : i32 to vector<1x256xi32>
      %304 = arith.cmpi slt, %4, %303 : vector<1x256xi32>
      %305 = arith.andi %302, %304 : vector<1x256xi1>
      %c-1_i32_102 = arith.constant -1 : i32
      %306 = vector.broadcast %c-1_i32_102 : i32 to vector<1x256xi32>
      %307 = arith.cmpi sge, %5, %306 : vector<1x256xi32>
      %308 = arith.andi %305, %307 : vector<1x256xi1>
      %c15_i32_103 = arith.constant 15 : i32
      %309 = vector.broadcast %c15_i32_103 : i32 to vector<1x256xi32>
      %310 = arith.cmpi slt, %5, %309 : vector<1x256xi32>
      %311 = arith.andi %308, %310 : vector<1x256xi1>
      %cst_104 = arith.constant 0.000000e+00 : f32
      %312 = vector.shape_cast %311 : vector<1x256xi1> to vector<1x256xi1>
      %313 = vector.broadcast %312 : vector<1x256xi1> to vector<4x256xi1>
      %314 = vector.broadcast %cst_104 : f32 to vector<4x256xf32>
      %315 = arith.select %313, %300, %314 : vector<4x256xi1>, vector<4x256xf32>
      %c14_i32_105 = arith.constant 14 : i32
      %316 = tpu.dynamic_rotate %157 by %c14_i32_105 dim 1 : vector<4x256xf32>, i32 -> vector<4x256xf32>
      %c1_i32_106 = arith.constant 1 : i32
      %317 = vector.broadcast %c1_i32_106 : i32 to vector<1x256xi32>
      %318 = arith.cmpi sge, %4, %317 : vector<1x256xi32>
      %c17_i32_107 = arith.constant 17 : i32
      %319 = vector.broadcast %c17_i32_107 : i32 to vector<1x256xi32>
      %320 = arith.cmpi slt, %4, %319 : vector<1x256xi32>
      %321 = arith.andi %318, %320 : vector<1x256xi1>
      %c-2_i32_108 = arith.constant -2 : i32
      %322 = vector.broadcast %c-2_i32_108 : i32 to vector<1x256xi32>
      %323 = arith.cmpi sge, %5, %322 : vector<1x256xi32>
      %324 = arith.andi %321, %323 : vector<1x256xi1>
      %c14_i32_109 = arith.constant 14 : i32
      %325 = vector.broadcast %c14_i32_109 : i32 to vector<1x256xi32>
      %326 = arith.cmpi slt, %5, %325 : vector<1x256xi32>
      %327 = arith.andi %324, %326 : vector<1x256xi1>
      %cst_110 = arith.constant 0.000000e+00 : f32
      %328 = vector.shape_cast %327 : vector<1x256xi1> to vector<1x256xi1>
      %329 = vector.broadcast %328 : vector<1x256xi1> to vector<4x256xi1>
      %330 = vector.broadcast %cst_110 : f32 to vector<4x256xf32>
      %331 = arith.select %329, %316, %330 : vector<4x256xi1>, vector<4x256xf32>
      %c2_i32_111 = arith.constant 2 : i32
      %332 = tpu.dynamic_rotate %157 by %c2_i32_111 dim 1 : vector<4x256xf32>, i32 -> vector<4x256xf32>
      %c0_i32_112 = arith.constant 0 : i32
      %333 = vector.broadcast %c0_i32_112 : i32 to vector<1x256xi32>
      %334 = arith.cmpi sge, %4, %333 : vector<1x256xi32>
      %c16_i32_113 = arith.constant 16 : i32
      %335 = vector.broadcast %c16_i32_113 : i32 to vector<1x256xi32>
      %336 = arith.cmpi slt, %4, %335 : vector<1x256xi32>
      %337 = arith.andi %334, %336 : vector<1x256xi1>
      %c2_i32_114 = arith.constant 2 : i32
      %338 = vector.broadcast %c2_i32_114 : i32 to vector<1x256xi32>
      %339 = arith.cmpi sge, %5, %338 : vector<1x256xi32>
      %340 = arith.andi %337, %339 : vector<1x256xi1>
      %c18_i32_115 = arith.constant 18 : i32
      %341 = vector.broadcast %c18_i32_115 : i32 to vector<1x256xi32>
      %342 = arith.cmpi slt, %5, %341 : vector<1x256xi32>
      %343 = arith.andi %340, %342 : vector<1x256xi1>
      %cst_116 = arith.constant 0.000000e+00 : f32
      %344 = vector.shape_cast %343 : vector<1x256xi1> to vector<1x256xi1>
      %345 = vector.broadcast %344 : vector<1x256xi1> to vector<4x256xi1>
      %346 = vector.broadcast %cst_116 : f32 to vector<4x256xf32>
      %347 = arith.select %345, %332, %346 : vector<4x256xi1>, vector<4x256xf32>
      %c1_i32_117 = arith.constant 1 : i32
      %348 = tpu.dynamic_rotate %157 by %c1_i32_117 dim 1 : vector<4x256xf32>, i32 -> vector<4x256xf32>
      %c0_i32_118 = arith.constant 0 : i32
      %349 = vector.broadcast %c0_i32_118 : i32 to vector<1x256xi32>
      %350 = arith.cmpi sge, %4, %349 : vector<1x256xi32>
      %c16_i32_119 = arith.constant 16 : i32
      %351 = vector.broadcast %c16_i32_119 : i32 to vector<1x256xi32>
      %352 = arith.cmpi slt, %4, %351 : vector<1x256xi32>
      %353 = arith.andi %350, %352 : vector<1x256xi1>
      %c1_i32_120 = arith.constant 1 : i32
      %354 = vector.broadcast %c1_i32_120 : i32 to vector<1x256xi32>
      %355 = arith.cmpi sge, %5, %354 : vector<1x256xi32>
      %356 = arith.andi %353, %355 : vector<1x256xi1>
      %c17_i32_121 = arith.constant 17 : i32
      %357 = vector.broadcast %c17_i32_121 : i32 to vector<1x256xi32>
      %358 = arith.cmpi slt, %5, %357 : vector<1x256xi32>
      %359 = arith.andi %356, %358 : vector<1x256xi1>
      %cst_122 = arith.constant 0.000000e+00 : f32
      %360 = vector.shape_cast %359 : vector<1x256xi1> to vector<1x256xi1>
      %361 = vector.broadcast %360 : vector<1x256xi1> to vector<4x256xi1>
      %362 = vector.broadcast %cst_122 : f32 to vector<4x256xf32>
      %363 = arith.select %361, %348, %362 : vector<4x256xi1>, vector<4x256xf32>
      %c255_i32_123 = arith.constant 255 : i32
      %364 = tpu.dynamic_rotate %157 by %c255_i32_123 dim 1 : vector<4x256xf32>, i32 -> vector<4x256xf32>
      %c0_i32_124 = arith.constant 0 : i32
      %365 = vector.broadcast %c0_i32_124 : i32 to vector<1x256xi32>
      %366 = arith.cmpi sge, %4, %365 : vector<1x256xi32>
      %c16_i32_125 = arith.constant 16 : i32
      %367 = vector.broadcast %c16_i32_125 : i32 to vector<1x256xi32>
      %368 = arith.cmpi slt, %4, %367 : vector<1x256xi32>
      %369 = arith.andi %366, %368 : vector<1x256xi1>
      %c-1_i32_126 = arith.constant -1 : i32
      %370 = vector.broadcast %c-1_i32_126 : i32 to vector<1x256xi32>
      %371 = arith.cmpi sge, %5, %370 : vector<1x256xi32>
      %372 = arith.andi %369, %371 : vector<1x256xi1>
      %c15_i32_127 = arith.constant 15 : i32
      %373 = vector.broadcast %c15_i32_127 : i32 to vector<1x256xi32>
      %374 = arith.cmpi slt, %5, %373 : vector<1x256xi32>
      %375 = arith.andi %372, %374 : vector<1x256xi1>
      %cst_128 = arith.constant 0.000000e+00 : f32
      %376 = vector.shape_cast %375 : vector<1x256xi1> to vector<1x256xi1>
      %377 = vector.broadcast %376 : vector<1x256xi1> to vector<4x256xi1>
      %378 = vector.broadcast %cst_128 : f32 to vector<4x256xf32>
      %379 = arith.select %377, %364, %378 : vector<4x256xi1>, vector<4x256xf32>
      %c254_i32 = arith.constant 254 : i32
      %380 = tpu.dynamic_rotate %157 by %c254_i32 dim 1 : vector<4x256xf32>, i32 -> vector<4x256xf32>
      %c0_i32_129 = arith.constant 0 : i32
      %381 = vector.broadcast %c0_i32_129 : i32 to vector<1x256xi32>
      %382 = arith.cmpi sge, %4, %381 : vector<1x256xi32>
      %c16_i32_130 = arith.constant 16 : i32
      %383 = vector.broadcast %c16_i32_130 : i32 to vector<1x256xi32>
      %384 = arith.cmpi slt, %4, %383 : vector<1x256xi32>
      %385 = arith.andi %382, %384 : vector<1x256xi1>
      %c-2_i32_131 = arith.constant -2 : i32
      %386 = vector.broadcast %c-2_i32_131 : i32 to vector<1x256xi32>
      %387 = arith.cmpi sge, %5, %386 : vector<1x256xi32>
      %388 = arith.andi %385, %387 : vector<1x256xi1>
      %c14_i32_132 = arith.constant 14 : i32
      %389 = vector.broadcast %c14_i32_132 : i32 to vector<1x256xi32>
      %390 = arith.cmpi slt, %5, %389 : vector<1x256xi32>
      %391 = arith.andi %388, %390 : vector<1x256xi1>
      %cst_133 = arith.constant 0.000000e+00 : f32
      %392 = vector.shape_cast %391 : vector<1x256xi1> to vector<1x256xi1>
      %393 = vector.broadcast %392 : vector<1x256xi1> to vector<4x256xi1>
      %394 = vector.broadcast %cst_133 : f32 to vector<4x256xf32>
      %395 = arith.select %393, %380, %394 : vector<4x256xi1>, vector<4x256xf32>
      %c242_i32 = arith.constant 242 : i32
      %396 = tpu.dynamic_rotate %157 by %c242_i32 dim 1 : vector<4x256xf32>, i32 -> vector<4x256xf32>
      %c-1_i32_134 = arith.constant -1 : i32
      %397 = vector.broadcast %c-1_i32_134 : i32 to vector<1x256xi32>
      %398 = arith.cmpi sge, %4, %397 : vector<1x256xi32>
      %c15_i32_135 = arith.constant 15 : i32
      %399 = vector.broadcast %c15_i32_135 : i32 to vector<1x256xi32>
      %400 = arith.cmpi slt, %4, %399 : vector<1x256xi32>
      %401 = arith.andi %398, %400 : vector<1x256xi1>
      %c2_i32_136 = arith.constant 2 : i32
      %402 = vector.broadcast %c2_i32_136 : i32 to vector<1x256xi32>
      %403 = arith.cmpi sge, %5, %402 : vector<1x256xi32>
      %404 = arith.andi %401, %403 : vector<1x256xi1>
      %c18_i32_137 = arith.constant 18 : i32
      %405 = vector.broadcast %c18_i32_137 : i32 to vector<1x256xi32>
      %406 = arith.cmpi slt, %5, %405 : vector<1x256xi32>
      %407 = arith.andi %404, %406 : vector<1x256xi1>
      %cst_138 = arith.constant 0.000000e+00 : f32
      %408 = vector.shape_cast %407 : vector<1x256xi1> to vector<1x256xi1>
      %409 = vector.broadcast %408 : vector<1x256xi1> to vector<4x256xi1>
      %410 = vector.broadcast %cst_138 : f32 to vector<4x256xf32>
      %411 = arith.select %409, %396, %410 : vector<4x256xi1>, vector<4x256xf32>
      %c241_i32_139 = arith.constant 241 : i32
      %412 = tpu.dynamic_rotate %157 by %c241_i32_139 dim 1 : vector<4x256xf32>, i32 -> vector<4x256xf32>
      %c-1_i32_140 = arith.constant -1 : i32
      %413 = vector.broadcast %c-1_i32_140 : i32 to vector<1x256xi32>
      %414 = arith.cmpi sge, %4, %413 : vector<1x256xi32>
      %c15_i32_141 = arith.constant 15 : i32
      %415 = vector.broadcast %c15_i32_141 : i32 to vector<1x256xi32>
      %416 = arith.cmpi slt, %4, %415 : vector<1x256xi32>
      %417 = arith.andi %414, %416 : vector<1x256xi1>
      %c1_i32_142 = arith.constant 1 : i32
      %418 = vector.broadcast %c1_i32_142 : i32 to vector<1x256xi32>
      %419 = arith.cmpi sge, %5, %418 : vector<1x256xi32>
      %420 = arith.andi %417, %419 : vector<1x256xi1>
      %c17_i32_143 = arith.constant 17 : i32
      %421 = vector.broadcast %c17_i32_143 : i32 to vector<1x256xi32>
      %422 = arith.cmpi slt, %5, %421 : vector<1x256xi32>
      %423 = arith.andi %420, %422 : vector<1x256xi1>
      %cst_144 = arith.constant 0.000000e+00 : f32
      %424 = vector.shape_cast %423 : vector<1x256xi1> to vector<1x256xi1>
      %425 = vector.broadcast %424 : vector<1x256xi1> to vector<4x256xi1>
      %426 = vector.broadcast %cst_144 : f32 to vector<4x256xf32>
      %427 = arith.select %425, %412, %426 : vector<4x256xi1>, vector<4x256xf32>
      %c240_i32_145 = arith.constant 240 : i32
      %428 = tpu.dynamic_rotate %157 by %c240_i32_145 dim 1 : vector<4x256xf32>, i32 -> vector<4x256xf32>
      %c-1_i32_146 = arith.constant -1 : i32
      %429 = vector.broadcast %c-1_i32_146 : i32 to vector<1x256xi32>
      %430 = arith.cmpi sge, %4, %429 : vector<1x256xi32>
      %c15_i32_147 = arith.constant 15 : i32
      %431 = vector.broadcast %c15_i32_147 : i32 to vector<1x256xi32>
      %432 = arith.cmpi slt, %4, %431 : vector<1x256xi32>
      %433 = arith.andi %430, %432 : vector<1x256xi1>
      %c0_i32_148 = arith.constant 0 : i32
      %434 = vector.broadcast %c0_i32_148 : i32 to vector<1x256xi32>
      %435 = arith.cmpi sge, %5, %434 : vector<1x256xi32>
      %436 = arith.andi %433, %435 : vector<1x256xi1>
      %c16_i32_149 = arith.constant 16 : i32
      %437 = vector.broadcast %c16_i32_149 : i32 to vector<1x256xi32>
      %438 = arith.cmpi slt, %5, %437 : vector<1x256xi32>
      %439 = arith.andi %436, %438 : vector<1x256xi1>
      %cst_150 = arith.constant 0.000000e+00 : f32
      %440 = vector.shape_cast %439 : vector<1x256xi1> to vector<1x256xi1>
      %441 = vector.broadcast %440 : vector<1x256xi1> to vector<4x256xi1>
      %442 = vector.broadcast %cst_150 : f32 to vector<4x256xf32>
      %443 = arith.select %441, %428, %442 : vector<4x256xi1>, vector<4x256xf32>
      %c239_i32_151 = arith.constant 239 : i32
      %444 = tpu.dynamic_rotate %157 by %c239_i32_151 dim 1 : vector<4x256xf32>, i32 -> vector<4x256xf32>
      %c-1_i32_152 = arith.constant -1 : i32
      %445 = vector.broadcast %c-1_i32_152 : i32 to vector<1x256xi32>
      %446 = arith.cmpi sge, %4, %445 : vector<1x256xi32>
      %c15_i32_153 = arith.constant 15 : i32
      %447 = vector.broadcast %c15_i32_153 : i32 to vector<1x256xi32>
      %448 = arith.cmpi slt, %4, %447 : vector<1x256xi32>
      %449 = arith.andi %446, %448 : vector<1x256xi1>
      %c-1_i32_154 = arith.constant -1 : i32
      %450 = vector.broadcast %c-1_i32_154 : i32 to vector<1x256xi32>
      %451 = arith.cmpi sge, %5, %450 : vector<1x256xi32>
      %452 = arith.andi %449, %451 : vector<1x256xi1>
      %c15_i32_155 = arith.constant 15 : i32
      %453 = vector.broadcast %c15_i32_155 : i32 to vector<1x256xi32>
      %454 = arith.cmpi slt, %5, %453 : vector<1x256xi32>
      %455 = arith.andi %452, %454 : vector<1x256xi1>
      %cst_156 = arith.constant 0.000000e+00 : f32
      %456 = vector.shape_cast %455 : vector<1x256xi1> to vector<1x256xi1>
      %457 = vector.broadcast %456 : vector<1x256xi1> to vector<4x256xi1>
      %458 = vector.broadcast %cst_156 : f32 to vector<4x256xf32>
      %459 = arith.select %457, %444, %458 : vector<4x256xi1>, vector<4x256xf32>
      %c238_i32 = arith.constant 238 : i32
      %460 = tpu.dynamic_rotate %157 by %c238_i32 dim 1 : vector<4x256xf32>, i32 -> vector<4x256xf32>
      %c-1_i32_157 = arith.constant -1 : i32
      %461 = vector.broadcast %c-1_i32_157 : i32 to vector<1x256xi32>
      %462 = arith.cmpi sge, %4, %461 : vector<1x256xi32>
      %c15_i32_158 = arith.constant 15 : i32
      %463 = vector.broadcast %c15_i32_158 : i32 to vector<1x256xi32>
      %464 = arith.cmpi slt, %4, %463 : vector<1x256xi32>
      %465 = arith.andi %462, %464 : vector<1x256xi1>
      %c-2_i32_159 = arith.constant -2 : i32
      %466 = vector.broadcast %c-2_i32_159 : i32 to vector<1x256xi32>
      %467 = arith.cmpi sge, %5, %466 : vector<1x256xi32>
      %468 = arith.andi %465, %467 : vector<1x256xi1>
      %c14_i32_160 = arith.constant 14 : i32
      %469 = vector.broadcast %c14_i32_160 : i32 to vector<1x256xi32>
      %470 = arith.cmpi slt, %5, %469 : vector<1x256xi32>
      %471 = arith.andi %468, %470 : vector<1x256xi1>
      %cst_161 = arith.constant 0.000000e+00 : f32
      %472 = vector.shape_cast %471 : vector<1x256xi1> to vector<1x256xi1>
      %473 = vector.broadcast %472 : vector<1x256xi1> to vector<4x256xi1>
      %474 = vector.broadcast %cst_161 : f32 to vector<4x256xf32>
      %475 = arith.select %473, %460, %474 : vector<4x256xi1>, vector<4x256xf32>
      %c226_i32 = arith.constant 226 : i32
      %476 = tpu.dynamic_rotate %157 by %c226_i32 dim 1 : vector<4x256xf32>, i32 -> vector<4x256xf32>
      %c-2_i32_162 = arith.constant -2 : i32
      %477 = vector.broadcast %c-2_i32_162 : i32 to vector<1x256xi32>
      %478 = arith.cmpi sge, %4, %477 : vector<1x256xi32>
      %c14_i32_163 = arith.constant 14 : i32
      %479 = vector.broadcast %c14_i32_163 : i32 to vector<1x256xi32>
      %480 = arith.cmpi slt, %4, %479 : vector<1x256xi32>
      %481 = arith.andi %478, %480 : vector<1x256xi1>
      %c2_i32_164 = arith.constant 2 : i32
      %482 = vector.broadcast %c2_i32_164 : i32 to vector<1x256xi32>
      %483 = arith.cmpi sge, %5, %482 : vector<1x256xi32>
      %484 = arith.andi %481, %483 : vector<1x256xi1>
      %c18_i32_165 = arith.constant 18 : i32
      %485 = vector.broadcast %c18_i32_165 : i32 to vector<1x256xi32>
      %486 = arith.cmpi slt, %5, %485 : vector<1x256xi32>
      %487 = arith.andi %484, %486 : vector<1x256xi1>
      %cst_166 = arith.constant 0.000000e+00 : f32
      %488 = vector.shape_cast %487 : vector<1x256xi1> to vector<1x256xi1>
      %489 = vector.broadcast %488 : vector<1x256xi1> to vector<4x256xi1>
      %490 = vector.broadcast %cst_166 : f32 to vector<4x256xf32>
      %491 = arith.select %489, %476, %490 : vector<4x256xi1>, vector<4x256xf32>
      %c225_i32 = arith.constant 225 : i32
      %492 = tpu.dynamic_rotate %157 by %c225_i32 dim 1 : vector<4x256xf32>, i32 -> vector<4x256xf32>
      %c-2_i32_167 = arith.constant -2 : i32
      %493 = vector.broadcast %c-2_i32_167 : i32 to vector<1x256xi32>
      %494 = arith.cmpi sge, %4, %493 : vector<1x256xi32>
      %c14_i32_168 = arith.constant 14 : i32
      %495 = vector.broadcast %c14_i32_168 : i32 to vector<1x256xi32>
      %496 = arith.cmpi slt, %4, %495 : vector<1x256xi32>
      %497 = arith.andi %494, %496 : vector<1x256xi1>
      %c1_i32_169 = arith.constant 1 : i32
      %498 = vector.broadcast %c1_i32_169 : i32 to vector<1x256xi32>
      %499 = arith.cmpi sge, %5, %498 : vector<1x256xi32>
      %500 = arith.andi %497, %499 : vector<1x256xi1>
      %c17_i32_170 = arith.constant 17 : i32
      %501 = vector.broadcast %c17_i32_170 : i32 to vector<1x256xi32>
      %502 = arith.cmpi slt, %5, %501 : vector<1x256xi32>
      %503 = arith.andi %500, %502 : vector<1x256xi1>
      %cst_171 = arith.constant 0.000000e+00 : f32
      %504 = vector.shape_cast %503 : vector<1x256xi1> to vector<1x256xi1>
      %505 = vector.broadcast %504 : vector<1x256xi1> to vector<4x256xi1>
      %506 = vector.broadcast %cst_171 : f32 to vector<4x256xf32>
      %507 = arith.select %505, %492, %506 : vector<4x256xi1>, vector<4x256xf32>
      %c224_i32 = arith.constant 224 : i32
      %508 = tpu.dynamic_rotate %157 by %c224_i32 dim 1 : vector<4x256xf32>, i32 -> vector<4x256xf32>
      %c-2_i32_172 = arith.constant -2 : i32
      %509 = vector.broadcast %c-2_i32_172 : i32 to vector<1x256xi32>
      %510 = arith.cmpi sge, %4, %509 : vector<1x256xi32>
      %c14_i32_173 = arith.constant 14 : i32
      %511 = vector.broadcast %c14_i32_173 : i32 to vector<1x256xi32>
      %512 = arith.cmpi slt, %4, %511 : vector<1x256xi32>
      %513 = arith.andi %510, %512 : vector<1x256xi1>
      %c0_i32_174 = arith.constant 0 : i32
      %514 = vector.broadcast %c0_i32_174 : i32 to vector<1x256xi32>
      %515 = arith.cmpi sge, %5, %514 : vector<1x256xi32>
      %516 = arith.andi %513, %515 : vector<1x256xi1>
      %c16_i32_175 = arith.constant 16 : i32
      %517 = vector.broadcast %c16_i32_175 : i32 to vector<1x256xi32>
      %518 = arith.cmpi slt, %5, %517 : vector<1x256xi32>
      %519 = arith.andi %516, %518 : vector<1x256xi1>
      %cst_176 = arith.constant 0.000000e+00 : f32
      %520 = vector.shape_cast %519 : vector<1x256xi1> to vector<1x256xi1>
      %521 = vector.broadcast %520 : vector<1x256xi1> to vector<4x256xi1>
      %522 = vector.broadcast %cst_176 : f32 to vector<4x256xf32>
      %523 = arith.select %521, %508, %522 : vector<4x256xi1>, vector<4x256xf32>
      %c223_i32 = arith.constant 223 : i32
      %524 = tpu.dynamic_rotate %157 by %c223_i32 dim 1 : vector<4x256xf32>, i32 -> vector<4x256xf32>
      %c-2_i32_177 = arith.constant -2 : i32
      %525 = vector.broadcast %c-2_i32_177 : i32 to vector<1x256xi32>
      %526 = arith.cmpi sge, %4, %525 : vector<1x256xi32>
      %c14_i32_178 = arith.constant 14 : i32
      %527 = vector.broadcast %c14_i32_178 : i32 to vector<1x256xi32>
      %528 = arith.cmpi slt, %4, %527 : vector<1x256xi32>
      %529 = arith.andi %526, %528 : vector<1x256xi1>
      %c-1_i32_179 = arith.constant -1 : i32
      %530 = vector.broadcast %c-1_i32_179 : i32 to vector<1x256xi32>
      %531 = arith.cmpi sge, %5, %530 : vector<1x256xi32>
      %532 = arith.andi %529, %531 : vector<1x256xi1>
      %c15_i32_180 = arith.constant 15 : i32
      %533 = vector.broadcast %c15_i32_180 : i32 to vector<1x256xi32>
      %534 = arith.cmpi slt, %5, %533 : vector<1x256xi32>
      %535 = arith.andi %532, %534 : vector<1x256xi1>
      %cst_181 = arith.constant 0.000000e+00 : f32
      %536 = vector.shape_cast %535 : vector<1x256xi1> to vector<1x256xi1>
      %537 = vector.broadcast %536 : vector<1x256xi1> to vector<4x256xi1>
      %538 = vector.broadcast %cst_181 : f32 to vector<4x256xf32>
      %539 = arith.select %537, %524, %538 : vector<4x256xi1>, vector<4x256xf32>
      %c222_i32 = arith.constant 222 : i32
      %540 = tpu.dynamic_rotate %157 by %c222_i32 dim 1 : vector<4x256xf32>, i32 -> vector<4x256xf32>
      %c-2_i32_182 = arith.constant -2 : i32
      %541 = vector.broadcast %c-2_i32_182 : i32 to vector<1x256xi32>
      %542 = arith.cmpi sge, %4, %541 : vector<1x256xi32>
      %c14_i32_183 = arith.constant 14 : i32
      %543 = vector.broadcast %c14_i32_183 : i32 to vector<1x256xi32>
      %544 = arith.cmpi slt, %4, %543 : vector<1x256xi32>
      %545 = arith.andi %542, %544 : vector<1x256xi1>
      %c-2_i32_184 = arith.constant -2 : i32
      %546 = vector.broadcast %c-2_i32_184 : i32 to vector<1x256xi32>
      %547 = arith.cmpi sge, %5, %546 : vector<1x256xi32>
      %548 = arith.andi %545, %547 : vector<1x256xi1>
      %c14_i32_185 = arith.constant 14 : i32
      %549 = vector.broadcast %c14_i32_185 : i32 to vector<1x256xi32>
      %550 = arith.cmpi slt, %5, %549 : vector<1x256xi32>
      %551 = arith.andi %548, %550 : vector<1x256xi1>
      %cst_186 = arith.constant 0.000000e+00 : f32
      %552 = vector.shape_cast %551 : vector<1x256xi1> to vector<1x256xi1>
      %553 = vector.broadcast %552 : vector<1x256xi1> to vector<4x256xi1>
      %554 = vector.broadcast %cst_186 : f32 to vector<4x256xf32>
      %555 = arith.select %553, %540, %554 : vector<4x256xi1>, vector<4x256xf32>
      %556 = tpu.concatenate %187, %203, %219, %235, %251, %267, %283, %299, %315, %331, %347, %363, %157, %379, %395, %411 in 0 : vector<4x256xf32>, vector<4x256xf32>, vector<4x256xf32>, vector<4x256xf32>, vector<4x256xf32>, vector<4x256xf32>, vector<4x256xf32>, vector<4x256xf32>, vector<4x256xf32>, vector<4x256xf32>, vector<4x256xf32>, vector<4x256xf32>, vector<4x256xf32>, vector<4x256xf32>, vector<4x256xf32>, vector<4x256xf32> -> vector<64x256xf32>
      %557 = tpu.concatenate %427, %443, %459, %475, %491, %507, %523, %539, %555 in 0 : vector<4x256xf32>, vector<4x256xf32>, vector<4x256xf32>, vector<4x256xf32>, vector<4x256xf32>, vector<4x256xf32>, vector<4x256xf32>, vector<4x256xf32>, vector<4x256xf32> -> vector<36x256xf32>
      %558 = tpu.concatenate %556, %557 in 0 : vector<64x256xf32>, vector<36x256xf32> -> vector<100x256xf32>
      %cst_187 = arith.constant dense<0.000000e+00> : vector<8x256xf32>
      %559 = tpu.matmul %171, %558, %cst_187 {dimension_numbers = #tpu.dot_dimension_numbers<[1], [0], [0], [1], [0, 0, 1, 1], [], []>} : vector<8x100xf32>, vector<100x256xf32>, vector<8x256xf32> -> vector<8x256xf32>
      %560 = vector.broadcast %143 : vector<8x1xf32> to vector<8x256xf32>
      %561 = arith.addf %559, %560 : vector<8x256xf32>
      %cst_188 = arith.constant 0.000000e+00 : f32
      %562 = vector.broadcast %cst_188 : f32 to vector<8x256xf32>
      %563 = arith.maximumf %561, %562 : vector<8x256xf32>
      %c8 = arith.constant 8 : index
      %c0_189 = arith.constant 0 : index
      %564 = vector.load %arg6[%c8, %c0_189] : memref<24x100xf32, #tpu.memory_space<vmem>>, vector<8x100xf32>
      %c34_i32_190 = arith.constant 34 : i32
      %565 = tpu.dynamic_rotate %170 by %c34_i32_190 dim 1 : vector<4x256xf32>, i32 -> vector<4x256xf32>
      %c2_i32_191 = arith.constant 2 : i32
      %566 = vector.broadcast %c2_i32_191 : i32 to vector<1x256xi32>
      %567 = arith.cmpi sge, %4, %566 : vector<1x256xi32>
      %c18_i32_192 = arith.constant 18 : i32
      %568 = vector.broadcast %c18_i32_192 : i32 to vector<1x256xi32>
      %569 = arith.cmpi slt, %4, %568 : vector<1x256xi32>
      %570 = arith.andi %567, %569 : vector<1x256xi1>
      %c2_i32_193 = arith.constant 2 : i32
      %571 = vector.broadcast %c2_i32_193 : i32 to vector<1x256xi32>
      %572 = arith.cmpi sge, %5, %571 : vector<1x256xi32>
      %573 = arith.andi %570, %572 : vector<1x256xi1>
      %c18_i32_194 = arith.constant 18 : i32
      %574 = vector.broadcast %c18_i32_194 : i32 to vector<1x256xi32>
      %575 = arith.cmpi slt, %5, %574 : vector<1x256xi32>
      %576 = arith.andi %573, %575 : vector<1x256xi1>
      %cst_195 = arith.constant 0.000000e+00 : f32
      %577 = vector.shape_cast %576 : vector<1x256xi1> to vector<1x256xi1>
      %578 = vector.broadcast %577 : vector<1x256xi1> to vector<4x256xi1>
      %579 = vector.broadcast %cst_195 : f32 to vector<4x256xf32>
      %580 = arith.select %578, %565, %579 : vector<4x256xi1>, vector<4x256xf32>
      %c33_i32_196 = arith.constant 33 : i32
      %581 = tpu.dynamic_rotate %170 by %c33_i32_196 dim 1 : vector<4x256xf32>, i32 -> vector<4x256xf32>
      %c2_i32_197 = arith.constant 2 : i32
      %582 = vector.broadcast %c2_i32_197 : i32 to vector<1x256xi32>
      %583 = arith.cmpi sge, %4, %582 : vector<1x256xi32>
      %c18_i32_198 = arith.constant 18 : i32
      %584 = vector.broadcast %c18_i32_198 : i32 to vector<1x256xi32>
      %585 = arith.cmpi slt, %4, %584 : vector<1x256xi32>
      %586 = arith.andi %583, %585 : vector<1x256xi1>
      %c1_i32_199 = arith.constant 1 : i32
      %587 = vector.broadcast %c1_i32_199 : i32 to vector<1x256xi32>
      %588 = arith.cmpi sge, %5, %587 : vector<1x256xi32>
      %589 = arith.andi %586, %588 : vector<1x256xi1>
      %c17_i32_200 = arith.constant 17 : i32
      %590 = vector.broadcast %c17_i32_200 : i32 to vector<1x256xi32>
      %591 = arith.cmpi slt, %5, %590 : vector<1x256xi32>
      %592 = arith.andi %589, %591 : vector<1x256xi1>
      %cst_201 = arith.constant 0.000000e+00 : f32
      %593 = vector.shape_cast %592 : vector<1x256xi1> to vector<1x256xi1>
      %594 = vector.broadcast %593 : vector<1x256xi1> to vector<4x256xi1>
      %595 = vector.broadcast %cst_201 : f32 to vector<4x256xf32>
      %596 = arith.select %594, %581, %595 : vector<4x256xi1>, vector<4x256xf32>
      %c32_i32_202 = arith.constant 32 : i32
      %597 = tpu.dynamic_rotate %170 by %c32_i32_202 dim 1 : vector<4x256xf32>, i32 -> vector<4x256xf32>
      %c2_i32_203 = arith.constant 2 : i32
      %598 = vector.broadcast %c2_i32_203 : i32 to vector<1x256xi32>
      %599 = arith.cmpi sge, %4, %598 : vector<1x256xi32>
      %c18_i32_204 = arith.constant 18 : i32
      %600 = vector.broadcast %c18_i32_204 : i32 to vector<1x256xi32>
      %601 = arith.cmpi slt, %4, %600 : vector<1x256xi32>
      %602 = arith.andi %599, %601 : vector<1x256xi1>
      %c0_i32_205 = arith.constant 0 : i32
      %603 = vector.broadcast %c0_i32_205 : i32 to vector<1x256xi32>
      %604 = arith.cmpi sge, %5, %603 : vector<1x256xi32>
      %605 = arith.andi %602, %604 : vector<1x256xi1>
      %c16_i32_206 = arith.constant 16 : i32
      %606 = vector.broadcast %c16_i32_206 : i32 to vector<1x256xi32>
      %607 = arith.cmpi slt, %5, %606 : vector<1x256xi32>
      %608 = arith.andi %605, %607 : vector<1x256xi1>
      %cst_207 = arith.constant 0.000000e+00 : f32
      %609 = vector.shape_cast %608 : vector<1x256xi1> to vector<1x256xi1>
      %610 = vector.broadcast %609 : vector<1x256xi1> to vector<4x256xi1>
      %611 = vector.broadcast %cst_207 : f32 to vector<4x256xf32>
      %612 = arith.select %610, %597, %611 : vector<4x256xi1>, vector<4x256xf32>
      %c31_i32_208 = arith.constant 31 : i32
      %613 = tpu.dynamic_rotate %170 by %c31_i32_208 dim 1 : vector<4x256xf32>, i32 -> vector<4x256xf32>
      %c2_i32_209 = arith.constant 2 : i32
      %614 = vector.broadcast %c2_i32_209 : i32 to vector<1x256xi32>
      %615 = arith.cmpi sge, %4, %614 : vector<1x256xi32>
      %c18_i32_210 = arith.constant 18 : i32
      %616 = vector.broadcast %c18_i32_210 : i32 to vector<1x256xi32>
      %617 = arith.cmpi slt, %4, %616 : vector<1x256xi32>
      %618 = arith.andi %615, %617 : vector<1x256xi1>
      %c-1_i32_211 = arith.constant -1 : i32
      %619 = vector.broadcast %c-1_i32_211 : i32 to vector<1x256xi32>
      %620 = arith.cmpi sge, %5, %619 : vector<1x256xi32>
      %621 = arith.andi %618, %620 : vector<1x256xi1>
      %c15_i32_212 = arith.constant 15 : i32
      %622 = vector.broadcast %c15_i32_212 : i32 to vector<1x256xi32>
      %623 = arith.cmpi slt, %5, %622 : vector<1x256xi32>
      %624 = arith.andi %621, %623 : vector<1x256xi1>
      %cst_213 = arith.constant 0.000000e+00 : f32
      %625 = vector.shape_cast %624 : vector<1x256xi1> to vector<1x256xi1>
      %626 = vector.broadcast %625 : vector<1x256xi1> to vector<4x256xi1>
      %627 = vector.broadcast %cst_213 : f32 to vector<4x256xf32>
      %628 = arith.select %626, %613, %627 : vector<4x256xi1>, vector<4x256xf32>
      %c30_i32_214 = arith.constant 30 : i32
      %629 = tpu.dynamic_rotate %170 by %c30_i32_214 dim 1 : vector<4x256xf32>, i32 -> vector<4x256xf32>
      %c2_i32_215 = arith.constant 2 : i32
      %630 = vector.broadcast %c2_i32_215 : i32 to vector<1x256xi32>
      %631 = arith.cmpi sge, %4, %630 : vector<1x256xi32>
      %c18_i32_216 = arith.constant 18 : i32
      %632 = vector.broadcast %c18_i32_216 : i32 to vector<1x256xi32>
      %633 = arith.cmpi slt, %4, %632 : vector<1x256xi32>
      %634 = arith.andi %631, %633 : vector<1x256xi1>
      %c-2_i32_217 = arith.constant -2 : i32
      %635 = vector.broadcast %c-2_i32_217 : i32 to vector<1x256xi32>
      %636 = arith.cmpi sge, %5, %635 : vector<1x256xi32>
      %637 = arith.andi %634, %636 : vector<1x256xi1>
      %c14_i32_218 = arith.constant 14 : i32
      %638 = vector.broadcast %c14_i32_218 : i32 to vector<1x256xi32>
      %639 = arith.cmpi slt, %5, %638 : vector<1x256xi32>
      %640 = arith.andi %637, %639 : vector<1x256xi1>
      %cst_219 = arith.constant 0.000000e+00 : f32
      %641 = vector.shape_cast %640 : vector<1x256xi1> to vector<1x256xi1>
      %642 = vector.broadcast %641 : vector<1x256xi1> to vector<4x256xi1>
      %643 = vector.broadcast %cst_219 : f32 to vector<4x256xf32>
      %644 = arith.select %642, %629, %643 : vector<4x256xi1>, vector<4x256xf32>
      %c18_i32_220 = arith.constant 18 : i32
      %645 = tpu.dynamic_rotate %170 by %c18_i32_220 dim 1 : vector<4x256xf32>, i32 -> vector<4x256xf32>
      %c1_i32_221 = arith.constant 1 : i32
      %646 = vector.broadcast %c1_i32_221 : i32 to vector<1x256xi32>
      %647 = arith.cmpi sge, %4, %646 : vector<1x256xi32>
      %c17_i32_222 = arith.constant 17 : i32
      %648 = vector.broadcast %c17_i32_222 : i32 to vector<1x256xi32>
      %649 = arith.cmpi slt, %4, %648 : vector<1x256xi32>
      %650 = arith.andi %647, %649 : vector<1x256xi1>
      %c2_i32_223 = arith.constant 2 : i32
      %651 = vector.broadcast %c2_i32_223 : i32 to vector<1x256xi32>
      %652 = arith.cmpi sge, %5, %651 : vector<1x256xi32>
      %653 = arith.andi %650, %652 : vector<1x256xi1>
      %c18_i32_224 = arith.constant 18 : i32
      %654 = vector.broadcast %c18_i32_224 : i32 to vector<1x256xi32>
      %655 = arith.cmpi slt, %5, %654 : vector<1x256xi32>
      %656 = arith.andi %653, %655 : vector<1x256xi1>
      %cst_225 = arith.constant 0.000000e+00 : f32
      %657 = vector.shape_cast %656 : vector<1x256xi1> to vector<1x256xi1>
      %658 = vector.broadcast %657 : vector<1x256xi1> to vector<4x256xi1>
      %659 = vector.broadcast %cst_225 : f32 to vector<4x256xf32>
      %660 = arith.select %658, %645, %659 : vector<4x256xi1>, vector<4x256xf32>
      %c17_i32_226 = arith.constant 17 : i32
      %661 = tpu.dynamic_rotate %170 by %c17_i32_226 dim 1 : vector<4x256xf32>, i32 -> vector<4x256xf32>
      %c1_i32_227 = arith.constant 1 : i32
      %662 = vector.broadcast %c1_i32_227 : i32 to vector<1x256xi32>
      %663 = arith.cmpi sge, %4, %662 : vector<1x256xi32>
      %c17_i32_228 = arith.constant 17 : i32
      %664 = vector.broadcast %c17_i32_228 : i32 to vector<1x256xi32>
      %665 = arith.cmpi slt, %4, %664 : vector<1x256xi32>
      %666 = arith.andi %663, %665 : vector<1x256xi1>
      %c1_i32_229 = arith.constant 1 : i32
      %667 = vector.broadcast %c1_i32_229 : i32 to vector<1x256xi32>
      %668 = arith.cmpi sge, %5, %667 : vector<1x256xi32>
      %669 = arith.andi %666, %668 : vector<1x256xi1>
      %c17_i32_230 = arith.constant 17 : i32
      %670 = vector.broadcast %c17_i32_230 : i32 to vector<1x256xi32>
      %671 = arith.cmpi slt, %5, %670 : vector<1x256xi32>
      %672 = arith.andi %669, %671 : vector<1x256xi1>
      %cst_231 = arith.constant 0.000000e+00 : f32
      %673 = vector.shape_cast %672 : vector<1x256xi1> to vector<1x256xi1>
      %674 = vector.broadcast %673 : vector<1x256xi1> to vector<4x256xi1>
      %675 = vector.broadcast %cst_231 : f32 to vector<4x256xf32>
      %676 = arith.select %674, %661, %675 : vector<4x256xi1>, vector<4x256xf32>
      %c16_i32_232 = arith.constant 16 : i32
      %677 = tpu.dynamic_rotate %170 by %c16_i32_232 dim 1 : vector<4x256xf32>, i32 -> vector<4x256xf32>
      %c1_i32_233 = arith.constant 1 : i32
      %678 = vector.broadcast %c1_i32_233 : i32 to vector<1x256xi32>
      %679 = arith.cmpi sge, %4, %678 : vector<1x256xi32>
      %c17_i32_234 = arith.constant 17 : i32
      %680 = vector.broadcast %c17_i32_234 : i32 to vector<1x256xi32>
      %681 = arith.cmpi slt, %4, %680 : vector<1x256xi32>
      %682 = arith.andi %679, %681 : vector<1x256xi1>
      %c0_i32_235 = arith.constant 0 : i32
      %683 = vector.broadcast %c0_i32_235 : i32 to vector<1x256xi32>
      %684 = arith.cmpi sge, %5, %683 : vector<1x256xi32>
      %685 = arith.andi %682, %684 : vector<1x256xi1>
      %c16_i32_236 = arith.constant 16 : i32
      %686 = vector.broadcast %c16_i32_236 : i32 to vector<1x256xi32>
      %687 = arith.cmpi slt, %5, %686 : vector<1x256xi32>
      %688 = arith.andi %685, %687 : vector<1x256xi1>
      %cst_237 = arith.constant 0.000000e+00 : f32
      %689 = vector.shape_cast %688 : vector<1x256xi1> to vector<1x256xi1>
      %690 = vector.broadcast %689 : vector<1x256xi1> to vector<4x256xi1>
      %691 = vector.broadcast %cst_237 : f32 to vector<4x256xf32>
      %692 = arith.select %690, %677, %691 : vector<4x256xi1>, vector<4x256xf32>
      %c15_i32_238 = arith.constant 15 : i32
      %693 = tpu.dynamic_rotate %170 by %c15_i32_238 dim 1 : vector<4x256xf32>, i32 -> vector<4x256xf32>
      %c1_i32_239 = arith.constant 1 : i32
      %694 = vector.broadcast %c1_i32_239 : i32 to vector<1x256xi32>
      %695 = arith.cmpi sge, %4, %694 : vector<1x256xi32>
      %c17_i32_240 = arith.constant 17 : i32
      %696 = vector.broadcast %c17_i32_240 : i32 to vector<1x256xi32>
      %697 = arith.cmpi slt, %4, %696 : vector<1x256xi32>
      %698 = arith.andi %695, %697 : vector<1x256xi1>
      %c-1_i32_241 = arith.constant -1 : i32
      %699 = vector.broadcast %c-1_i32_241 : i32 to vector<1x256xi32>
      %700 = arith.cmpi sge, %5, %699 : vector<1x256xi32>
      %701 = arith.andi %698, %700 : vector<1x256xi1>
      %c15_i32_242 = arith.constant 15 : i32
      %702 = vector.broadcast %c15_i32_242 : i32 to vector<1x256xi32>
      %703 = arith.cmpi slt, %5, %702 : vector<1x256xi32>
      %704 = arith.andi %701, %703 : vector<1x256xi1>
      %cst_243 = arith.constant 0.000000e+00 : f32
      %705 = vector.shape_cast %704 : vector<1x256xi1> to vector<1x256xi1>
      %706 = vector.broadcast %705 : vector<1x256xi1> to vector<4x256xi1>
      %707 = vector.broadcast %cst_243 : f32 to vector<4x256xf32>
      %708 = arith.select %706, %693, %707 : vector<4x256xi1>, vector<4x256xf32>
      %c14_i32_244 = arith.constant 14 : i32
      %709 = tpu.dynamic_rotate %170 by %c14_i32_244 dim 1 : vector<4x256xf32>, i32 -> vector<4x256xf32>
      %c1_i32_245 = arith.constant 1 : i32
      %710 = vector.broadcast %c1_i32_245 : i32 to vector<1x256xi32>
      %711 = arith.cmpi sge, %4, %710 : vector<1x256xi32>
      %c17_i32_246 = arith.constant 17 : i32
      %712 = vector.broadcast %c17_i32_246 : i32 to vector<1x256xi32>
      %713 = arith.cmpi slt, %4, %712 : vector<1x256xi32>
      %714 = arith.andi %711, %713 : vector<1x256xi1>
      %c-2_i32_247 = arith.constant -2 : i32
      %715 = vector.broadcast %c-2_i32_247 : i32 to vector<1x256xi32>
      %716 = arith.cmpi sge, %5, %715 : vector<1x256xi32>
      %717 = arith.andi %714, %716 : vector<1x256xi1>
      %c14_i32_248 = arith.constant 14 : i32
      %718 = vector.broadcast %c14_i32_248 : i32 to vector<1x256xi32>
      %719 = arith.cmpi slt, %5, %718 : vector<1x256xi32>
      %720 = arith.andi %717, %719 : vector<1x256xi1>
      %cst_249 = arith.constant 0.000000e+00 : f32
      %721 = vector.shape_cast %720 : vector<1x256xi1> to vector<1x256xi1>
      %722 = vector.broadcast %721 : vector<1x256xi1> to vector<4x256xi1>
      %723 = vector.broadcast %cst_249 : f32 to vector<4x256xf32>
      %724 = arith.select %722, %709, %723 : vector<4x256xi1>, vector<4x256xf32>
      %c2_i32_250 = arith.constant 2 : i32
      %725 = tpu.dynamic_rotate %170 by %c2_i32_250 dim 1 : vector<4x256xf32>, i32 -> vector<4x256xf32>
      %c0_i32_251 = arith.constant 0 : i32
      %726 = vector.broadcast %c0_i32_251 : i32 to vector<1x256xi32>
      %727 = arith.cmpi sge, %4, %726 : vector<1x256xi32>
      %c16_i32_252 = arith.constant 16 : i32
      %728 = vector.broadcast %c16_i32_252 : i32 to vector<1x256xi32>
      %729 = arith.cmpi slt, %4, %728 : vector<1x256xi32>
      %730 = arith.andi %727, %729 : vector<1x256xi1>
      %c2_i32_253 = arith.constant 2 : i32
      %731 = vector.broadcast %c2_i32_253 : i32 to vector<1x256xi32>
      %732 = arith.cmpi sge, %5, %731 : vector<1x256xi32>
      %733 = arith.andi %730, %732 : vector<1x256xi1>
      %c18_i32_254 = arith.constant 18 : i32
      %734 = vector.broadcast %c18_i32_254 : i32 to vector<1x256xi32>
      %735 = arith.cmpi slt, %5, %734 : vector<1x256xi32>
      %736 = arith.andi %733, %735 : vector<1x256xi1>
      %cst_255 = arith.constant 0.000000e+00 : f32
      %737 = vector.shape_cast %736 : vector<1x256xi1> to vector<1x256xi1>
      %738 = vector.broadcast %737 : vector<1x256xi1> to vector<4x256xi1>
      %739 = vector.broadcast %cst_255 : f32 to vector<4x256xf32>
      %740 = arith.select %738, %725, %739 : vector<4x256xi1>, vector<4x256xf32>
      %c1_i32_256 = arith.constant 1 : i32
      %741 = tpu.dynamic_rotate %170 by %c1_i32_256 dim 1 : vector<4x256xf32>, i32 -> vector<4x256xf32>
      %c0_i32_257 = arith.constant 0 : i32
      %742 = vector.broadcast %c0_i32_257 : i32 to vector<1x256xi32>
      %743 = arith.cmpi sge, %4, %742 : vector<1x256xi32>
      %c16_i32_258 = arith.constant 16 : i32
      %744 = vector.broadcast %c16_i32_258 : i32 to vector<1x256xi32>
      %745 = arith.cmpi slt, %4, %744 : vector<1x256xi32>
      %746 = arith.andi %743, %745 : vector<1x256xi1>
      %c1_i32_259 = arith.constant 1 : i32
      %747 = vector.broadcast %c1_i32_259 : i32 to vector<1x256xi32>
      %748 = arith.cmpi sge, %5, %747 : vector<1x256xi32>
      %749 = arith.andi %746, %748 : vector<1x256xi1>
      %c17_i32_260 = arith.constant 17 : i32
      %750 = vector.broadcast %c17_i32_260 : i32 to vector<1x256xi32>
      %751 = arith.cmpi slt, %5, %750 : vector<1x256xi32>
      %752 = arith.andi %749, %751 : vector<1x256xi1>
      %cst_261 = arith.constant 0.000000e+00 : f32
      %753 = vector.shape_cast %752 : vector<1x256xi1> to vector<1x256xi1>
      %754 = vector.broadcast %753 : vector<1x256xi1> to vector<4x256xi1>
      %755 = vector.broadcast %cst_261 : f32 to vector<4x256xf32>
      %756 = arith.select %754, %741, %755 : vector<4x256xi1>, vector<4x256xf32>
      %c255_i32_262 = arith.constant 255 : i32
      %757 = tpu.dynamic_rotate %170 by %c255_i32_262 dim 1 : vector<4x256xf32>, i32 -> vector<4x256xf32>
      %c0_i32_263 = arith.constant 0 : i32
      %758 = vector.broadcast %c0_i32_263 : i32 to vector<1x256xi32>
      %759 = arith.cmpi sge, %4, %758 : vector<1x256xi32>
      %c16_i32_264 = arith.constant 16 : i32
      %760 = vector.broadcast %c16_i32_264 : i32 to vector<1x256xi32>
      %761 = arith.cmpi slt, %4, %760 : vector<1x256xi32>
      %762 = arith.andi %759, %761 : vector<1x256xi1>
      %c-1_i32_265 = arith.constant -1 : i32
      %763 = vector.broadcast %c-1_i32_265 : i32 to vector<1x256xi32>
      %764 = arith.cmpi sge, %5, %763 : vector<1x256xi32>
      %765 = arith.andi %762, %764 : vector<1x256xi1>
      %c15_i32_266 = arith.constant 15 : i32
      %766 = vector.broadcast %c15_i32_266 : i32 to vector<1x256xi32>
      %767 = arith.cmpi slt, %5, %766 : vector<1x256xi32>
      %768 = arith.andi %765, %767 : vector<1x256xi1>
      %cst_267 = arith.constant 0.000000e+00 : f32
      %769 = vector.shape_cast %768 : vector<1x256xi1> to vector<1x256xi1>
      %770 = vector.broadcast %769 : vector<1x256xi1> to vector<4x256xi1>
      %771 = vector.broadcast %cst_267 : f32 to vector<4x256xf32>
      %772 = arith.select %770, %757, %771 : vector<4x256xi1>, vector<4x256xf32>
      %c254_i32_268 = arith.constant 254 : i32
      %773 = tpu.dynamic_rotate %170 by %c254_i32_268 dim 1 : vector<4x256xf32>, i32 -> vector<4x256xf32>
      %c0_i32_269 = arith.constant 0 : i32
      %774 = vector.broadcast %c0_i32_269 : i32 to vector<1x256xi32>
      %775 = arith.cmpi sge, %4, %774 : vector<1x256xi32>
      %c16_i32_270 = arith.constant 16 : i32
      %776 = vector.broadcast %c16_i32_270 : i32 to vector<1x256xi32>
      %777 = arith.cmpi slt, %4, %776 : vector<1x256xi32>
      %778 = arith.andi %775, %777 : vector<1x256xi1>
      %c-2_i32_271 = arith.constant -2 : i32
      %779 = vector.broadcast %c-2_i32_271 : i32 to vector<1x256xi32>
      %780 = arith.cmpi sge, %5, %779 : vector<1x256xi32>
      %781 = arith.andi %778, %780 : vector<1x256xi1>
      %c14_i32_272 = arith.constant 14 : i32
      %782 = vector.broadcast %c14_i32_272 : i32 to vector<1x256xi32>
      %783 = arith.cmpi slt, %5, %782 : vector<1x256xi32>
      %784 = arith.andi %781, %783 : vector<1x256xi1>
      %cst_273 = arith.constant 0.000000e+00 : f32
      %785 = vector.shape_cast %784 : vector<1x256xi1> to vector<1x256xi1>
      %786 = vector.broadcast %785 : vector<1x256xi1> to vector<4x256xi1>
      %787 = vector.broadcast %cst_273 : f32 to vector<4x256xf32>
      %788 = arith.select %786, %773, %787 : vector<4x256xi1>, vector<4x256xf32>
      %c242_i32_274 = arith.constant 242 : i32
      %789 = tpu.dynamic_rotate %170 by %c242_i32_274 dim 1 : vector<4x256xf32>, i32 -> vector<4x256xf32>
      %c-1_i32_275 = arith.constant -1 : i32
      %790 = vector.broadcast %c-1_i32_275 : i32 to vector<1x256xi32>
      %791 = arith.cmpi sge, %4, %790 : vector<1x256xi32>
      %c15_i32_276 = arith.constant 15 : i32
      %792 = vector.broadcast %c15_i32_276 : i32 to vector<1x256xi32>
      %793 = arith.cmpi slt, %4, %792 : vector<1x256xi32>
      %794 = arith.andi %791, %793 : vector<1x256xi1>
      %c2_i32_277 = arith.constant 2 : i32
      %795 = vector.broadcast %c2_i32_277 : i32 to vector<1x256xi32>
      %796 = arith.cmpi sge, %5, %795 : vector<1x256xi32>
      %797 = arith.andi %794, %796 : vector<1x256xi1>
      %c18_i32_278 = arith.constant 18 : i32
      %798 = vector.broadcast %c18_i32_278 : i32 to vector<1x256xi32>
      %799 = arith.cmpi slt, %5, %798 : vector<1x256xi32>
      %800 = arith.andi %797, %799 : vector<1x256xi1>
      %cst_279 = arith.constant 0.000000e+00 : f32
      %801 = vector.shape_cast %800 : vector<1x256xi1> to vector<1x256xi1>
      %802 = vector.broadcast %801 : vector<1x256xi1> to vector<4x256xi1>
      %803 = vector.broadcast %cst_279 : f32 to vector<4x256xf32>
      %804 = arith.select %802, %789, %803 : vector<4x256xi1>, vector<4x256xf32>
      %c241_i32_280 = arith.constant 241 : i32
      %805 = tpu.dynamic_rotate %170 by %c241_i32_280 dim 1 : vector<4x256xf32>, i32 -> vector<4x256xf32>
      %c-1_i32_281 = arith.constant -1 : i32
      %806 = vector.broadcast %c-1_i32_281 : i32 to vector<1x256xi32>
      %807 = arith.cmpi sge, %4, %806 : vector<1x256xi32>
      %c15_i32_282 = arith.constant 15 : i32
      %808 = vector.broadcast %c15_i32_282 : i32 to vector<1x256xi32>
      %809 = arith.cmpi slt, %4, %808 : vector<1x256xi32>
      %810 = arith.andi %807, %809 : vector<1x256xi1>
      %c1_i32_283 = arith.constant 1 : i32
      %811 = vector.broadcast %c1_i32_283 : i32 to vector<1x256xi32>
      %812 = arith.cmpi sge, %5, %811 : vector<1x256xi32>
      %813 = arith.andi %810, %812 : vector<1x256xi1>
      %c17_i32_284 = arith.constant 17 : i32
      %814 = vector.broadcast %c17_i32_284 : i32 to vector<1x256xi32>
      %815 = arith.cmpi slt, %5, %814 : vector<1x256xi32>
      %816 = arith.andi %813, %815 : vector<1x256xi1>
      %cst_285 = arith.constant 0.000000e+00 : f32
      %817 = vector.shape_cast %816 : vector<1x256xi1> to vector<1x256xi1>
      %818 = vector.broadcast %817 : vector<1x256xi1> to vector<4x256xi1>
      %819 = vector.broadcast %cst_285 : f32 to vector<4x256xf32>
      %820 = arith.select %818, %805, %819 : vector<4x256xi1>, vector<4x256xf32>
      %c240_i32_286 = arith.constant 240 : i32
      %821 = tpu.dynamic_rotate %170 by %c240_i32_286 dim 1 : vector<4x256xf32>, i32 -> vector<4x256xf32>
      %c-1_i32_287 = arith.constant -1 : i32
      %822 = vector.broadcast %c-1_i32_287 : i32 to vector<1x256xi32>
      %823 = arith.cmpi sge, %4, %822 : vector<1x256xi32>
      %c15_i32_288 = arith.constant 15 : i32
      %824 = vector.broadcast %c15_i32_288 : i32 to vector<1x256xi32>
      %825 = arith.cmpi slt, %4, %824 : vector<1x256xi32>
      %826 = arith.andi %823, %825 : vector<1x256xi1>
      %c0_i32_289 = arith.constant 0 : i32
      %827 = vector.broadcast %c0_i32_289 : i32 to vector<1x256xi32>
      %828 = arith.cmpi sge, %5, %827 : vector<1x256xi32>
      %829 = arith.andi %826, %828 : vector<1x256xi1>
      %c16_i32_290 = arith.constant 16 : i32
      %830 = vector.broadcast %c16_i32_290 : i32 to vector<1x256xi32>
      %831 = arith.cmpi slt, %5, %830 : vector<1x256xi32>
      %832 = arith.andi %829, %831 : vector<1x256xi1>
      %cst_291 = arith.constant 0.000000e+00 : f32
      %833 = vector.shape_cast %832 : vector<1x256xi1> to vector<1x256xi1>
      %834 = vector.broadcast %833 : vector<1x256xi1> to vector<4x256xi1>
      %835 = vector.broadcast %cst_291 : f32 to vector<4x256xf32>
      %836 = arith.select %834, %821, %835 : vector<4x256xi1>, vector<4x256xf32>
      %c239_i32_292 = arith.constant 239 : i32
      %837 = tpu.dynamic_rotate %170 by %c239_i32_292 dim 1 : vector<4x256xf32>, i32 -> vector<4x256xf32>
      %c-1_i32_293 = arith.constant -1 : i32
      %838 = vector.broadcast %c-1_i32_293 : i32 to vector<1x256xi32>
      %839 = arith.cmpi sge, %4, %838 : vector<1x256xi32>
      %c15_i32_294 = arith.constant 15 : i32
      %840 = vector.broadcast %c15_i32_294 : i32 to vector<1x256xi32>
      %841 = arith.cmpi slt, %4, %840 : vector<1x256xi32>
      %842 = arith.andi %839, %841 : vector<1x256xi1>
      %c-1_i32_295 = arith.constant -1 : i32
      %843 = vector.broadcast %c-1_i32_295 : i32 to vector<1x256xi32>
      %844 = arith.cmpi sge, %5, %843 : vector<1x256xi32>
      %845 = arith.andi %842, %844 : vector<1x256xi1>
      %c15_i32_296 = arith.constant 15 : i32
      %846 = vector.broadcast %c15_i32_296 : i32 to vector<1x256xi32>
      %847 = arith.cmpi slt, %5, %846 : vector<1x256xi32>
      %848 = arith.andi %845, %847 : vector<1x256xi1>
      %cst_297 = arith.constant 0.000000e+00 : f32
      %849 = vector.shape_cast %848 : vector<1x256xi1> to vector<1x256xi1>
      %850 = vector.broadcast %849 : vector<1x256xi1> to vector<4x256xi1>
      %851 = vector.broadcast %cst_297 : f32 to vector<4x256xf32>
      %852 = arith.select %850, %837, %851 : vector<4x256xi1>, vector<4x256xf32>
      %c238_i32_298 = arith.constant 238 : i32
      %853 = tpu.dynamic_rotate %170 by %c238_i32_298 dim 1 : vector<4x256xf32>, i32 -> vector<4x256xf32>
      %c-1_i32_299 = arith.constant -1 : i32
      %854 = vector.broadcast %c-1_i32_299 : i32 to vector<1x256xi32>
      %855 = arith.cmpi sge, %4, %854 : vector<1x256xi32>
      %c15_i32_300 = arith.constant 15 : i32
      %856 = vector.broadcast %c15_i32_300 : i32 to vector<1x256xi32>
      %857 = arith.cmpi slt, %4, %856 : vector<1x256xi32>
      %858 = arith.andi %855, %857 : vector<1x256xi1>
      %c-2_i32_301 = arith.constant -2 : i32
      %859 = vector.broadcast %c-2_i32_301 : i32 to vector<1x256xi32>
      %860 = arith.cmpi sge, %5, %859 : vector<1x256xi32>
      %861 = arith.andi %858, %860 : vector<1x256xi1>
      %c14_i32_302 = arith.constant 14 : i32
      %862 = vector.broadcast %c14_i32_302 : i32 to vector<1x256xi32>
      %863 = arith.cmpi slt, %5, %862 : vector<1x256xi32>
      %864 = arith.andi %861, %863 : vector<1x256xi1>
      %cst_303 = arith.constant 0.000000e+00 : f32
      %865 = vector.shape_cast %864 : vector<1x256xi1> to vector<1x256xi1>
      %866 = vector.broadcast %865 : vector<1x256xi1> to vector<4x256xi1>
      %867 = vector.broadcast %cst_303 : f32 to vector<4x256xf32>
      %868 = arith.select %866, %853, %867 : vector<4x256xi1>, vector<4x256xf32>
      %c226_i32_304 = arith.constant 226 : i32
      %869 = tpu.dynamic_rotate %170 by %c226_i32_304 dim 1 : vector<4x256xf32>, i32 -> vector<4x256xf32>
      %c-2_i32_305 = arith.constant -2 : i32
      %870 = vector.broadcast %c-2_i32_305 : i32 to vector<1x256xi32>
      %871 = arith.cmpi sge, %4, %870 : vector<1x256xi32>
      %c14_i32_306 = arith.constant 14 : i32
      %872 = vector.broadcast %c14_i32_306 : i32 to vector<1x256xi32>
      %873 = arith.cmpi slt, %4, %872 : vector<1x256xi32>
      %874 = arith.andi %871, %873 : vector<1x256xi1>
      %c2_i32_307 = arith.constant 2 : i32
      %875 = vector.broadcast %c2_i32_307 : i32 to vector<1x256xi32>
      %876 = arith.cmpi sge, %5, %875 : vector<1x256xi32>
      %877 = arith.andi %874, %876 : vector<1x256xi1>
      %c18_i32_308 = arith.constant 18 : i32
      %878 = vector.broadcast %c18_i32_308 : i32 to vector<1x256xi32>
      %879 = arith.cmpi slt, %5, %878 : vector<1x256xi32>
      %880 = arith.andi %877, %879 : vector<1x256xi1>
      %cst_309 = arith.constant 0.000000e+00 : f32
      %881 = vector.shape_cast %880 : vector<1x256xi1> to vector<1x256xi1>
      %882 = vector.broadcast %881 : vector<1x256xi1> to vector<4x256xi1>
      %883 = vector.broadcast %cst_309 : f32 to vector<4x256xf32>
      %884 = arith.select %882, %869, %883 : vector<4x256xi1>, vector<4x256xf32>
      %c225_i32_310 = arith.constant 225 : i32
      %885 = tpu.dynamic_rotate %170 by %c225_i32_310 dim 1 : vector<4x256xf32>, i32 -> vector<4x256xf32>
      %c-2_i32_311 = arith.constant -2 : i32
      %886 = vector.broadcast %c-2_i32_311 : i32 to vector<1x256xi32>
      %887 = arith.cmpi sge, %4, %886 : vector<1x256xi32>
      %c14_i32_312 = arith.constant 14 : i32
      %888 = vector.broadcast %c14_i32_312 : i32 to vector<1x256xi32>
      %889 = arith.cmpi slt, %4, %888 : vector<1x256xi32>
      %890 = arith.andi %887, %889 : vector<1x256xi1>
      %c1_i32_313 = arith.constant 1 : i32
      %891 = vector.broadcast %c1_i32_313 : i32 to vector<1x256xi32>
      %892 = arith.cmpi sge, %5, %891 : vector<1x256xi32>
      %893 = arith.andi %890, %892 : vector<1x256xi1>
      %c17_i32_314 = arith.constant 17 : i32
      %894 = vector.broadcast %c17_i32_314 : i32 to vector<1x256xi32>
      %895 = arith.cmpi slt, %5, %894 : vector<1x256xi32>
      %896 = arith.andi %893, %895 : vector<1x256xi1>
      %cst_315 = arith.constant 0.000000e+00 : f32
      %897 = vector.shape_cast %896 : vector<1x256xi1> to vector<1x256xi1>
      %898 = vector.broadcast %897 : vector<1x256xi1> to vector<4x256xi1>
      %899 = vector.broadcast %cst_315 : f32 to vector<4x256xf32>
      %900 = arith.select %898, %885, %899 : vector<4x256xi1>, vector<4x256xf32>
      %c224_i32_316 = arith.constant 224 : i32
      %901 = tpu.dynamic_rotate %170 by %c224_i32_316 dim 1 : vector<4x256xf32>, i32 -> vector<4x256xf32>
      %c-2_i32_317 = arith.constant -2 : i32
      %902 = vector.broadcast %c-2_i32_317 : i32 to vector<1x256xi32>
      %903 = arith.cmpi sge, %4, %902 : vector<1x256xi32>
      %c14_i32_318 = arith.constant 14 : i32
      %904 = vector.broadcast %c14_i32_318 : i32 to vector<1x256xi32>
      %905 = arith.cmpi slt, %4, %904 : vector<1x256xi32>
      %906 = arith.andi %903, %905 : vector<1x256xi1>
      %c0_i32_319 = arith.constant 0 : i32
      %907 = vector.broadcast %c0_i32_319 : i32 to vector<1x256xi32>
      %908 = arith.cmpi sge, %5, %907 : vector<1x256xi32>
      %909 = arith.andi %906, %908 : vector<1x256xi1>
      %c16_i32_320 = arith.constant 16 : i32
      %910 = vector.broadcast %c16_i32_320 : i32 to vector<1x256xi32>
      %911 = arith.cmpi slt, %5, %910 : vector<1x256xi32>
      %912 = arith.andi %909, %911 : vector<1x256xi1>
      %cst_321 = arith.constant 0.000000e+00 : f32
      %913 = vector.shape_cast %912 : vector<1x256xi1> to vector<1x256xi1>
      %914 = vector.broadcast %913 : vector<1x256xi1> to vector<4x256xi1>
      %915 = vector.broadcast %cst_321 : f32 to vector<4x256xf32>
      %916 = arith.select %914, %901, %915 : vector<4x256xi1>, vector<4x256xf32>
      %c223_i32_322 = arith.constant 223 : i32
      %917 = tpu.dynamic_rotate %170 by %c223_i32_322 dim 1 : vector<4x256xf32>, i32 -> vector<4x256xf32>
      %c-2_i32_323 = arith.constant -2 : i32
      %918 = vector.broadcast %c-2_i32_323 : i32 to vector<1x256xi32>
      %919 = arith.cmpi sge, %4, %918 : vector<1x256xi32>
      %c14_i32_324 = arith.constant 14 : i32
      %920 = vector.broadcast %c14_i32_324 : i32 to vector<1x256xi32>
      %921 = arith.cmpi slt, %4, %920 : vector<1x256xi32>
      %922 = arith.andi %919, %921 : vector<1x256xi1>
      %c-1_i32_325 = arith.constant -1 : i32
      %923 = vector.broadcast %c-1_i32_325 : i32 to vector<1x256xi32>
      %924 = arith.cmpi sge, %5, %923 : vector<1x256xi32>
      %925 = arith.andi %922, %924 : vector<1x256xi1>
      %c15_i32_326 = arith.constant 15 : i32
      %926 = vector.broadcast %c15_i32_326 : i32 to vector<1x256xi32>
      %927 = arith.cmpi slt, %5, %926 : vector<1x256xi32>
      %928 = arith.andi %925, %927 : vector<1x256xi1>
      %cst_327 = arith.constant 0.000000e+00 : f32
      %929 = vector.shape_cast %928 : vector<1x256xi1> to vector<1x256xi1>
      %930 = vector.broadcast %929 : vector<1x256xi1> to vector<4x256xi1>
      %931 = vector.broadcast %cst_327 : f32 to vector<4x256xf32>
      %932 = arith.select %930, %917, %931 : vector<4x256xi1>, vector<4x256xf32>
      %c222_i32_328 = arith.constant 222 : i32
      %933 = tpu.dynamic_rotate %170 by %c222_i32_328 dim 1 : vector<4x256xf32>, i32 -> vector<4x256xf32>
      %c-2_i32_329 = arith.constant -2 : i32
      %934 = vector.broadcast %c-2_i32_329 : i32 to vector<1x256xi32>
      %935 = arith.cmpi sge, %4, %934 : vector<1x256xi32>
      %c14_i32_330 = arith.constant 14 : i32
      %936 = vector.broadcast %c14_i32_330 : i32 to vector<1x256xi32>
      %937 = arith.cmpi slt, %4, %936 : vector<1x256xi32>
      %938 = arith.andi %935, %937 : vector<1x256xi1>
      %c-2_i32_331 = arith.constant -2 : i32
      %939 = vector.broadcast %c-2_i32_331 : i32 to vector<1x256xi32>
      %940 = arith.cmpi sge, %5, %939 : vector<1x256xi32>
      %941 = arith.andi %938, %940 : vector<1x256xi1>
      %c14_i32_332 = arith.constant 14 : i32
      %942 = vector.broadcast %c14_i32_332 : i32 to vector<1x256xi32>
      %943 = arith.cmpi slt, %5, %942 : vector<1x256xi32>
      %944 = arith.andi %941, %943 : vector<1x256xi1>
      %cst_333 = arith.constant 0.000000e+00 : f32
      %945 = vector.shape_cast %944 : vector<1x256xi1> to vector<1x256xi1>
      %946 = vector.broadcast %945 : vector<1x256xi1> to vector<4x256xi1>
      %947 = vector.broadcast %cst_333 : f32 to vector<4x256xf32>
      %948 = arith.select %946, %933, %947 : vector<4x256xi1>, vector<4x256xf32>
      %949 = tpu.concatenate %580, %596, %612, %628, %644, %660, %676, %692, %708, %724, %740, %756, %170, %772, %788, %804 in 0 : vector<4x256xf32>, vector<4x256xf32>, vector<4x256xf32>, vector<4x256xf32>, vector<4x256xf32>, vector<4x256xf32>, vector<4x256xf32>, vector<4x256xf32>, vector<4x256xf32>, vector<4x256xf32>, vector<4x256xf32>, vector<4x256xf32>, vector<4x256xf32>, vector<4x256xf32>, vector<4x256xf32>, vector<4x256xf32> -> vector<64x256xf32>
      %950 = tpu.concatenate %820, %836, %852, %868, %884, %900, %916, %932, %948 in 0 : vector<4x256xf32>, vector<4x256xf32>, vector<4x256xf32>, vector<4x256xf32>, vector<4x256xf32>, vector<4x256xf32>, vector<4x256xf32>, vector<4x256xf32>, vector<4x256xf32> -> vector<36x256xf32>
      %951 = tpu.concatenate %949, %950 in 0 : vector<64x256xf32>, vector<36x256xf32> -> vector<100x256xf32>
      %cst_334 = arith.constant dense<0.000000e+00> : vector<8x256xf32>
      %952 = tpu.matmul %564, %951, %cst_334 {dimension_numbers = #tpu.dot_dimension_numbers<[1], [0], [0], [1], [0, 0, 1, 1], [], []>} : vector<8x100xf32>, vector<100x256xf32>, vector<8x256xf32> -> vector<8x256xf32>
      %953 = vector.broadcast %144 : vector<8x1xf32> to vector<8x256xf32>
      %954 = arith.addf %952, %953 : vector<8x256xf32>
      %cst_335 = arith.constant 0.000000e+00 : f32
      %955 = vector.broadcast %cst_335 : f32 to vector<8x256xf32>
      %956 = arith.maximumf %954, %955 : vector<8x256xf32>
      %957 = arith.addf %563, %956 : vector<8x256xf32>
      %cst_336 = arith.constant 5.000000e-01 : f32
      %958 = vector.broadcast %cst_336 : f32 to vector<8x256xf32>
      %959 = arith.mulf %957, %958 : vector<8x256xf32>
      %c0_337 = arith.constant 0 : index
      %c0_338 = arith.constant 0 : index
      %c0_339 = arith.constant 0 : index
      %960 = vector.load %arg8[%c0_337, %c0_338, %c0_339] : memref<1x8x256xf32, #tpu.memory_space<vmem>>, vector<1x8x256xf32>
      %961 = vector.shape_cast %960 : vector<1x8x256xf32> to vector<8x256xf32>
      %962 = vector.shape_cast %959 : vector<8x256xf32> to vector<1x8x256xf32>
      tpu.vector_store %arg8[%c0_337, %c0_338, %c0_339], %962 {strides = array<i32>} : memref<1x8x256xf32, #tpu.memory_space<vmem>>, vector<1x8x256xf32>,
    } else {
    }
    %c2_i32 = arith.constant 2 : i32
    %140 = arith.cmpi eq, %1, %c2_i32 : i32
    %141 = arith.extui %140 : i1 to i32
    %c0_i32_46 = arith.constant 0 : i32
    %142 = arith.cmpi ne, %141, %c0_i32_46 : i32
    scf.if %142 {
      %c32 = arith.constant 32 : index
      %c0_47 = arith.constant 0 : index
      %143 = vector.load %arg7[%c32, %c0_47] : memref<40x1xf32, #tpu.memory_space<vmem>>, vector<8x1xf32>
      %144 = arith.addf %37, %69 : vector<4x256xf32>
      %cst_48 = arith.constant -4.000000e+00 : f32
      %145 = vector.broadcast %cst_48 : f32 to vector<4x256xf32>
      %146 = arith.mulf %3, %145 : vector<4x256xf32>
      %147 = arith.addf %144, %146 : vector<4x256xf32>
      %148 = arith.addf %147, %85 : vector<4x256xf32>
      %149 = arith.addf %148, %117 : vector<4x256xf32>
      %c16 = arith.constant 16 : index
      %c0_49 = arith.constant 0 : index
      %150 = vector.load %arg6[%c16, %c0_49] : memref<24x100xf32, #tpu.memory_space<vmem>>, vector<8x100xf32>
      %c34_i32 = arith.constant 34 : i32
      %151 = tpu.dynamic_rotate %149 by %c34_i32 dim 1 : vector<4x256xf32>, i32 -> vector<4x256xf32>
      %c2_i32_50 = arith.constant 2 : i32
      %152 = vector.broadcast %c2_i32_50 : i32 to vector<1x256xi32>
      %153 = arith.cmpi sge, %4, %152 : vector<1x256xi32>
      %c18_i32 = arith.constant 18 : i32
      %154 = vector.broadcast %c18_i32 : i32 to vector<1x256xi32>
      %155 = arith.cmpi slt, %4, %154 : vector<1x256xi32>
      %156 = arith.andi %153, %155 : vector<1x256xi1>
      %c2_i32_51 = arith.constant 2 : i32
      %157 = vector.broadcast %c2_i32_51 : i32 to vector<1x256xi32>
      %158 = arith.cmpi sge, %5, %157 : vector<1x256xi32>
      %159 = arith.andi %156, %158 : vector<1x256xi1>
      %c18_i32_52 = arith.constant 18 : i32
      %160 = vector.broadcast %c18_i32_52 : i32 to vector<1x256xi32>
      %161 = arith.cmpi slt, %5, %160 : vector<1x256xi32>
      %162 = arith.andi %159, %161 : vector<1x256xi1>
      %cst_53 = arith.constant 0.000000e+00 : f32
      %163 = vector.shape_cast %162 : vector<1x256xi1> to vector<1x256xi1>
      %164 = vector.broadcast %163 : vector<1x256xi1> to vector<4x256xi1>
      %165 = vector.broadcast %cst_53 : f32 to vector<4x256xf32>
      %166 = arith.select %164, %151, %165 : vector<4x256xi1>, vector<4x256xf32>
      %c33_i32 = arith.constant 33 : i32
      %167 = tpu.dynamic_rotate %149 by %c33_i32 dim 1 : vector<4x256xf32>, i32 -> vector<4x256xf32>
      %c2_i32_54 = arith.constant 2 : i32
      %168 = vector.broadcast %c2_i32_54 : i32 to vector<1x256xi32>
      %169 = arith.cmpi sge, %4, %168 : vector<1x256xi32>
      %c18_i32_55 = arith.constant 18 : i32
      %170 = vector.broadcast %c18_i32_55 : i32 to vector<1x256xi32>
      %171 = arith.cmpi slt, %4, %170 : vector<1x256xi32>
      %172 = arith.andi %169, %171 : vector<1x256xi1>
      %c1_i32_56 = arith.constant 1 : i32
      %173 = vector.broadcast %c1_i32_56 : i32 to vector<1x256xi32>
      %174 = arith.cmpi sge, %5, %173 : vector<1x256xi32>
      %175 = arith.andi %172, %174 : vector<1x256xi1>
      %c17_i32_57 = arith.constant 17 : i32
      %176 = vector.broadcast %c17_i32_57 : i32 to vector<1x256xi32>
      %177 = arith.cmpi slt, %5, %176 : vector<1x256xi32>
      %178 = arith.andi %175, %177 : vector<1x256xi1>
      %cst_58 = arith.constant 0.000000e+00 : f32
      %179 = vector.shape_cast %178 : vector<1x256xi1> to vector<1x256xi1>
      %180 = vector.broadcast %179 : vector<1x256xi1> to vector<4x256xi1>
      %181 = vector.broadcast %cst_58 : f32 to vector<4x256xf32>
      %182 = arith.select %180, %167, %181 : vector<4x256xi1>, vector<4x256xf32>
      %c32_i32 = arith.constant 32 : i32
      %183 = tpu.dynamic_rotate %149 by %c32_i32 dim 1 : vector<4x256xf32>, i32 -> vector<4x256xf32>
      %c2_i32_59 = arith.constant 2 : i32
      %184 = vector.broadcast %c2_i32_59 : i32 to vector<1x256xi32>
      %185 = arith.cmpi sge, %4, %184 : vector<1x256xi32>
      %c18_i32_60 = arith.constant 18 : i32
      %186 = vector.broadcast %c18_i32_60 : i32 to vector<1x256xi32>
      %187 = arith.cmpi slt, %4, %186 : vector<1x256xi32>
      %188 = arith.andi %185, %187 : vector<1x256xi1>
      %c0_i32_61 = arith.constant 0 : i32
      %189 = vector.broadcast %c0_i32_61 : i32 to vector<1x256xi32>
      %190 = arith.cmpi sge, %5, %189 : vector<1x256xi32>
      %191 = arith.andi %188, %190 : vector<1x256xi1>
      %c16_i32_62 = arith.constant 16 : i32
      %192 = vector.broadcast %c16_i32_62 : i32 to vector<1x256xi32>
      %193 = arith.cmpi slt, %5, %192 : vector<1x256xi32>
      %194 = arith.andi %191, %193 : vector<1x256xi1>
      %cst_63 = arith.constant 0.000000e+00 : f32
      %195 = vector.shape_cast %194 : vector<1x256xi1> to vector<1x256xi1>
      %196 = vector.broadcast %195 : vector<1x256xi1> to vector<4x256xi1>
      %197 = vector.broadcast %cst_63 : f32 to vector<4x256xf32>
      %198 = arith.select %196, %183, %197 : vector<4x256xi1>, vector<4x256xf32>
      %c31_i32 = arith.constant 31 : i32
      %199 = tpu.dynamic_rotate %149 by %c31_i32 dim 1 : vector<4x256xf32>, i32 -> vector<4x256xf32>
      %c2_i32_64 = arith.constant 2 : i32
      %200 = vector.broadcast %c2_i32_64 : i32 to vector<1x256xi32>
      %201 = arith.cmpi sge, %4, %200 : vector<1x256xi32>
      %c18_i32_65 = arith.constant 18 : i32
      %202 = vector.broadcast %c18_i32_65 : i32 to vector<1x256xi32>
      %203 = arith.cmpi slt, %4, %202 : vector<1x256xi32>
      %204 = arith.andi %201, %203 : vector<1x256xi1>
      %c-1_i32_66 = arith.constant -1 : i32
      %205 = vector.broadcast %c-1_i32_66 : i32 to vector<1x256xi32>
      %206 = arith.cmpi sge, %5, %205 : vector<1x256xi32>
      %207 = arith.andi %204, %206 : vector<1x256xi1>
      %c15_i32_67 = arith.constant 15 : i32
      %208 = vector.broadcast %c15_i32_67 : i32 to vector<1x256xi32>
      %209 = arith.cmpi slt, %5, %208 : vector<1x256xi32>
      %210 = arith.andi %207, %209 : vector<1x256xi1>
      %cst_68 = arith.constant 0.000000e+00 : f32
      %211 = vector.shape_cast %210 : vector<1x256xi1> to vector<1x256xi1>
      %212 = vector.broadcast %211 : vector<1x256xi1> to vector<4x256xi1>
      %213 = vector.broadcast %cst_68 : f32 to vector<4x256xf32>
      %214 = arith.select %212, %199, %213 : vector<4x256xi1>, vector<4x256xf32>
      %c30_i32 = arith.constant 30 : i32
      %215 = tpu.dynamic_rotate %149 by %c30_i32 dim 1 : vector<4x256xf32>, i32 -> vector<4x256xf32>
      %c2_i32_69 = arith.constant 2 : i32
      %216 = vector.broadcast %c2_i32_69 : i32 to vector<1x256xi32>
      %217 = arith.cmpi sge, %4, %216 : vector<1x256xi32>
      %c18_i32_70 = arith.constant 18 : i32
      %218 = vector.broadcast %c18_i32_70 : i32 to vector<1x256xi32>
      %219 = arith.cmpi slt, %4, %218 : vector<1x256xi32>
      %220 = arith.andi %217, %219 : vector<1x256xi1>
      %c-2_i32 = arith.constant -2 : i32
      %221 = vector.broadcast %c-2_i32 : i32 to vector<1x256xi32>
      %222 = arith.cmpi sge, %5, %221 : vector<1x256xi32>
      %223 = arith.andi %220, %222 : vector<1x256xi1>
      %c14_i32 = arith.constant 14 : i32
      %224 = vector.broadcast %c14_i32 : i32 to vector<1x256xi32>
      %225 = arith.cmpi slt, %5, %224 : vector<1x256xi32>
      %226 = arith.andi %223, %225 : vector<1x256xi1>
      %cst_71 = arith.constant 0.000000e+00 : f32
      %227 = vector.shape_cast %226 : vector<1x256xi1> to vector<1x256xi1>
      %228 = vector.broadcast %227 : vector<1x256xi1> to vector<4x256xi1>
      %229 = vector.broadcast %cst_71 : f32 to vector<4x256xf32>
      %230 = arith.select %228, %215, %229 : vector<4x256xi1>, vector<4x256xf32>
      %c18_i32_72 = arith.constant 18 : i32
      %231 = tpu.dynamic_rotate %149 by %c18_i32_72 dim 1 : vector<4x256xf32>, i32 -> vector<4x256xf32>
      %c1_i32_73 = arith.constant 1 : i32
      %232 = vector.broadcast %c1_i32_73 : i32 to vector<1x256xi32>
      %233 = arith.cmpi sge, %4, %232 : vector<1x256xi32>
      %c17_i32_74 = arith.constant 17 : i32
      %234 = vector.broadcast %c17_i32_74 : i32 to vector<1x256xi32>
      %235 = arith.cmpi slt, %4, %234 : vector<1x256xi32>
      %236 = arith.andi %233, %235 : vector<1x256xi1>
      %c2_i32_75 = arith.constant 2 : i32
      %237 = vector.broadcast %c2_i32_75 : i32 to vector<1x256xi32>
      %238 = arith.cmpi sge, %5, %237 : vector<1x256xi32>
      %239 = arith.andi %236, %238 : vector<1x256xi1>
      %c18_i32_76 = arith.constant 18 : i32
      %240 = vector.broadcast %c18_i32_76 : i32 to vector<1x256xi32>
      %241 = arith.cmpi slt, %5, %240 : vector<1x256xi32>
      %242 = arith.andi %239, %241 : vector<1x256xi1>
      %cst_77 = arith.constant 0.000000e+00 : f32
      %243 = vector.shape_cast %242 : vector<1x256xi1> to vector<1x256xi1>
      %244 = vector.broadcast %243 : vector<1x256xi1> to vector<4x256xi1>
      %245 = vector.broadcast %cst_77 : f32 to vector<4x256xf32>
      %246 = arith.select %244, %231, %245 : vector<4x256xi1>, vector<4x256xf32>
      %c17_i32_78 = arith.constant 17 : i32
      %247 = tpu.dynamic_rotate %149 by %c17_i32_78 dim 1 : vector<4x256xf32>, i32 -> vector<4x256xf32>
      %c1_i32_79 = arith.constant 1 : i32
      %248 = vector.broadcast %c1_i32_79 : i32 to vector<1x256xi32>
      %249 = arith.cmpi sge, %4, %248 : vector<1x256xi32>
      %c17_i32_80 = arith.constant 17 : i32
      %250 = vector.broadcast %c17_i32_80 : i32 to vector<1x256xi32>
      %251 = arith.cmpi slt, %4, %250 : vector<1x256xi32>
      %252 = arith.andi %249, %251 : vector<1x256xi1>
      %c1_i32_81 = arith.constant 1 : i32
      %253 = vector.broadcast %c1_i32_81 : i32 to vector<1x256xi32>
      %254 = arith.cmpi sge, %5, %253 : vector<1x256xi32>
      %255 = arith.andi %252, %254 : vector<1x256xi1>
      %c17_i32_82 = arith.constant 17 : i32
      %256 = vector.broadcast %c17_i32_82 : i32 to vector<1x256xi32>
      %257 = arith.cmpi slt, %5, %256 : vector<1x256xi32>
      %258 = arith.andi %255, %257 : vector<1x256xi1>
      %cst_83 = arith.constant 0.000000e+00 : f32
      %259 = vector.shape_cast %258 : vector<1x256xi1> to vector<1x256xi1>
      %260 = vector.broadcast %259 : vector<1x256xi1> to vector<4x256xi1>
      %261 = vector.broadcast %cst_83 : f32 to vector<4x256xf32>
      %262 = arith.select %260, %247, %261 : vector<4x256xi1>, vector<4x256xf32>
      %c16_i32_84 = arith.constant 16 : i32
      %263 = tpu.dynamic_rotate %149 by %c16_i32_84 dim 1 : vector<4x256xf32>, i32 -> vector<4x256xf32>
      %c1_i32_85 = arith.constant 1 : i32
      %264 = vector.broadcast %c1_i32_85 : i32 to vector<1x256xi32>
      %265 = arith.cmpi sge, %4, %264 : vector<1x256xi32>
      %c17_i32_86 = arith.constant 17 : i32
      %266 = vector.broadcast %c17_i32_86 : i32 to vector<1x256xi32>
      %267 = arith.cmpi slt, %4, %266 : vector<1x256xi32>
      %268 = arith.andi %265, %267 : vector<1x256xi1>
      %c0_i32_87 = arith.constant 0 : i32
      %269 = vector.broadcast %c0_i32_87 : i32 to vector<1x256xi32>
      %270 = arith.cmpi sge, %5, %269 : vector<1x256xi32>
      %271 = arith.andi %268, %270 : vector<1x256xi1>
      %c16_i32_88 = arith.constant 16 : i32
      %272 = vector.broadcast %c16_i32_88 : i32 to vector<1x256xi32>
      %273 = arith.cmpi slt, %5, %272 : vector<1x256xi32>
      %274 = arith.andi %271, %273 : vector<1x256xi1>
      %cst_89 = arith.constant 0.000000e+00 : f32
      %275 = vector.shape_cast %274 : vector<1x256xi1> to vector<1x256xi1>
      %276 = vector.broadcast %275 : vector<1x256xi1> to vector<4x256xi1>
      %277 = vector.broadcast %cst_89 : f32 to vector<4x256xf32>
      %278 = arith.select %276, %263, %277 : vector<4x256xi1>, vector<4x256xf32>
      %c15_i32_90 = arith.constant 15 : i32
      %279 = tpu.dynamic_rotate %149 by %c15_i32_90 dim 1 : vector<4x256xf32>, i32 -> vector<4x256xf32>
      %c1_i32_91 = arith.constant 1 : i32
      %280 = vector.broadcast %c1_i32_91 : i32 to vector<1x256xi32>
      %281 = arith.cmpi sge, %4, %280 : vector<1x256xi32>
      %c17_i32_92 = arith.constant 17 : i32
      %282 = vector.broadcast %c17_i32_92 : i32 to vector<1x256xi32>
      %283 = arith.cmpi slt, %4, %282 : vector<1x256xi32>
      %284 = arith.andi %281, %283 : vector<1x256xi1>
      %c-1_i32_93 = arith.constant -1 : i32
      %285 = vector.broadcast %c-1_i32_93 : i32 to vector<1x256xi32>
      %286 = arith.cmpi sge, %5, %285 : vector<1x256xi32>
      %287 = arith.andi %284, %286 : vector<1x256xi1>
      %c15_i32_94 = arith.constant 15 : i32
      %288 = vector.broadcast %c15_i32_94 : i32 to vector<1x256xi32>
      %289 = arith.cmpi slt, %5, %288 : vector<1x256xi32>
      %290 = arith.andi %287, %289 : vector<1x256xi1>
      %cst_95 = arith.constant 0.000000e+00 : f32
      %291 = vector.shape_cast %290 : vector<1x256xi1> to vector<1x256xi1>
      %292 = vector.broadcast %291 : vector<1x256xi1> to vector<4x256xi1>
      %293 = vector.broadcast %cst_95 : f32 to vector<4x256xf32>
      %294 = arith.select %292, %279, %293 : vector<4x256xi1>, vector<4x256xf32>
      %c14_i32_96 = arith.constant 14 : i32
      %295 = tpu.dynamic_rotate %149 by %c14_i32_96 dim 1 : vector<4x256xf32>, i32 -> vector<4x256xf32>
      %c1_i32_97 = arith.constant 1 : i32
      %296 = vector.broadcast %c1_i32_97 : i32 to vector<1x256xi32>
      %297 = arith.cmpi sge, %4, %296 : vector<1x256xi32>
      %c17_i32_98 = arith.constant 17 : i32
      %298 = vector.broadcast %c17_i32_98 : i32 to vector<1x256xi32>
      %299 = arith.cmpi slt, %4, %298 : vector<1x256xi32>
      %300 = arith.andi %297, %299 : vector<1x256xi1>
      %c-2_i32_99 = arith.constant -2 : i32
      %301 = vector.broadcast %c-2_i32_99 : i32 to vector<1x256xi32>
      %302 = arith.cmpi sge, %5, %301 : vector<1x256xi32>
      %303 = arith.andi %300, %302 : vector<1x256xi1>
      %c14_i32_100 = arith.constant 14 : i32
      %304 = vector.broadcast %c14_i32_100 : i32 to vector<1x256xi32>
      %305 = arith.cmpi slt, %5, %304 : vector<1x256xi32>
      %306 = arith.andi %303, %305 : vector<1x256xi1>
      %cst_101 = arith.constant 0.000000e+00 : f32
      %307 = vector.shape_cast %306 : vector<1x256xi1> to vector<1x256xi1>
      %308 = vector.broadcast %307 : vector<1x256xi1> to vector<4x256xi1>
      %309 = vector.broadcast %cst_101 : f32 to vector<4x256xf32>
      %310 = arith.select %308, %295, %309 : vector<4x256xi1>, vector<4x256xf32>
      %c2_i32_102 = arith.constant 2 : i32
      %311 = tpu.dynamic_rotate %149 by %c2_i32_102 dim 1 : vector<4x256xf32>, i32 -> vector<4x256xf32>
      %c0_i32_103 = arith.constant 0 : i32
      %312 = vector.broadcast %c0_i32_103 : i32 to vector<1x256xi32>
      %313 = arith.cmpi sge, %4, %312 : vector<1x256xi32>
      %c16_i32_104 = arith.constant 16 : i32
      %314 = vector.broadcast %c16_i32_104 : i32 to vector<1x256xi32>
      %315 = arith.cmpi slt, %4, %314 : vector<1x256xi32>
      %316 = arith.andi %313, %315 : vector<1x256xi1>
      %c2_i32_105 = arith.constant 2 : i32
      %317 = vector.broadcast %c2_i32_105 : i32 to vector<1x256xi32>
      %318 = arith.cmpi sge, %5, %317 : vector<1x256xi32>
      %319 = arith.andi %316, %318 : vector<1x256xi1>
      %c18_i32_106 = arith.constant 18 : i32
      %320 = vector.broadcast %c18_i32_106 : i32 to vector<1x256xi32>
      %321 = arith.cmpi slt, %5, %320 : vector<1x256xi32>
      %322 = arith.andi %319, %321 : vector<1x256xi1>
      %cst_107 = arith.constant 0.000000e+00 : f32
      %323 = vector.shape_cast %322 : vector<1x256xi1> to vector<1x256xi1>
      %324 = vector.broadcast %323 : vector<1x256xi1> to vector<4x256xi1>
      %325 = vector.broadcast %cst_107 : f32 to vector<4x256xf32>
      %326 = arith.select %324, %311, %325 : vector<4x256xi1>, vector<4x256xf32>
      %c1_i32_108 = arith.constant 1 : i32
      %327 = tpu.dynamic_rotate %149 by %c1_i32_108 dim 1 : vector<4x256xf32>, i32 -> vector<4x256xf32>
      %c0_i32_109 = arith.constant 0 : i32
      %328 = vector.broadcast %c0_i32_109 : i32 to vector<1x256xi32>
      %329 = arith.cmpi sge, %4, %328 : vector<1x256xi32>
      %c16_i32_110 = arith.constant 16 : i32
      %330 = vector.broadcast %c16_i32_110 : i32 to vector<1x256xi32>
      %331 = arith.cmpi slt, %4, %330 : vector<1x256xi32>
      %332 = arith.andi %329, %331 : vector<1x256xi1>
      %c1_i32_111 = arith.constant 1 : i32
      %333 = vector.broadcast %c1_i32_111 : i32 to vector<1x256xi32>
      %334 = arith.cmpi sge, %5, %333 : vector<1x256xi32>
      %335 = arith.andi %332, %334 : vector<1x256xi1>
      %c17_i32_112 = arith.constant 17 : i32
      %336 = vector.broadcast %c17_i32_112 : i32 to vector<1x256xi32>
      %337 = arith.cmpi slt, %5, %336 : vector<1x256xi32>
      %338 = arith.andi %335, %337 : vector<1x256xi1>
      %cst_113 = arith.constant 0.000000e+00 : f32
      %339 = vector.shape_cast %338 : vector<1x256xi1> to vector<1x256xi1>
      %340 = vector.broadcast %339 : vector<1x256xi1> to vector<4x256xi1>
      %341 = vector.broadcast %cst_113 : f32 to vector<4x256xf32>
      %342 = arith.select %340, %327, %341 : vector<4x256xi1>, vector<4x256xf32>
      %c255_i32_114 = arith.constant 255 : i32
      %343 = tpu.dynamic_rotate %149 by %c255_i32_114 dim 1 : vector<4x256xf32>, i32 -> vector<4x256xf32>
      %c0_i32_115 = arith.constant 0 : i32
      %344 = vector.broadcast %c0_i32_115 : i32 to vector<1x256xi32>
      %345 = arith.cmpi sge, %4, %344 : vector<1x256xi32>
      %c16_i32_116 = arith.constant 16 : i32
      %346 = vector.broadcast %c16_i32_116 : i32 to vector<1x256xi32>
      %347 = arith.cmpi slt, %4, %346 : vector<1x256xi32>
      %348 = arith.andi %345, %347 : vector<1x256xi1>
      %c-1_i32_117 = arith.constant -1 : i32
      %349 = vector.broadcast %c-1_i32_117 : i32 to vector<1x256xi32>
      %350 = arith.cmpi sge, %5, %349 : vector<1x256xi32>
      %351 = arith.andi %348, %350 : vector<1x256xi1>
      %c15_i32_118 = arith.constant 15 : i32
      %352 = vector.broadcast %c15_i32_118 : i32 to vector<1x256xi32>
      %353 = arith.cmpi slt, %5, %352 : vector<1x256xi32>
      %354 = arith.andi %351, %353 : vector<1x256xi1>
      %cst_119 = arith.constant 0.000000e+00 : f32
      %355 = vector.shape_cast %354 : vector<1x256xi1> to vector<1x256xi1>
      %356 = vector.broadcast %355 : vector<1x256xi1> to vector<4x256xi1>
      %357 = vector.broadcast %cst_119 : f32 to vector<4x256xf32>
      %358 = arith.select %356, %343, %357 : vector<4x256xi1>, vector<4x256xf32>
      %c254_i32 = arith.constant 254 : i32
      %359 = tpu.dynamic_rotate %149 by %c254_i32 dim 1 : vector<4x256xf32>, i32 -> vector<4x256xf32>
      %c0_i32_120 = arith.constant 0 : i32
      %360 = vector.broadcast %c0_i32_120 : i32 to vector<1x256xi32>
      %361 = arith.cmpi sge, %4, %360 : vector<1x256xi32>
      %c16_i32_121 = arith.constant 16 : i32
      %362 = vector.broadcast %c16_i32_121 : i32 to vector<1x256xi32>
      %363 = arith.cmpi slt, %4, %362 : vector<1x256xi32>
      %364 = arith.andi %361, %363 : vector<1x256xi1>
      %c-2_i32_122 = arith.constant -2 : i32
      %365 = vector.broadcast %c-2_i32_122 : i32 to vector<1x256xi32>
      %366 = arith.cmpi sge, %5, %365 : vector<1x256xi32>
      %367 = arith.andi %364, %366 : vector<1x256xi1>
      %c14_i32_123 = arith.constant 14 : i32
      %368 = vector.broadcast %c14_i32_123 : i32 to vector<1x256xi32>
      %369 = arith.cmpi slt, %5, %368 : vector<1x256xi32>
      %370 = arith.andi %367, %369 : vector<1x256xi1>
      %cst_124 = arith.constant 0.000000e+00 : f32
      %371 = vector.shape_cast %370 : vector<1x256xi1> to vector<1x256xi1>
      %372 = vector.broadcast %371 : vector<1x256xi1> to vector<4x256xi1>
      %373 = vector.broadcast %cst_124 : f32 to vector<4x256xf32>
      %374 = arith.select %372, %359, %373 : vector<4x256xi1>, vector<4x256xf32>
      %c242_i32 = arith.constant 242 : i32
      %375 = tpu.dynamic_rotate %149 by %c242_i32 dim 1 : vector<4x256xf32>, i32 -> vector<4x256xf32>
      %c-1_i32_125 = arith.constant -1 : i32
      %376 = vector.broadcast %c-1_i32_125 : i32 to vector<1x256xi32>
      %377 = arith.cmpi sge, %4, %376 : vector<1x256xi32>
      %c15_i32_126 = arith.constant 15 : i32
      %378 = vector.broadcast %c15_i32_126 : i32 to vector<1x256xi32>
      %379 = arith.cmpi slt, %4, %378 : vector<1x256xi32>
      %380 = arith.andi %377, %379 : vector<1x256xi1>
      %c2_i32_127 = arith.constant 2 : i32
      %381 = vector.broadcast %c2_i32_127 : i32 to vector<1x256xi32>
      %382 = arith.cmpi sge, %5, %381 : vector<1x256xi32>
      %383 = arith.andi %380, %382 : vector<1x256xi1>
      %c18_i32_128 = arith.constant 18 : i32
      %384 = vector.broadcast %c18_i32_128 : i32 to vector<1x256xi32>
      %385 = arith.cmpi slt, %5, %384 : vector<1x256xi32>
      %386 = arith.andi %383, %385 : vector<1x256xi1>
      %cst_129 = arith.constant 0.000000e+00 : f32
      %387 = vector.shape_cast %386 : vector<1x256xi1> to vector<1x256xi1>
      %388 = vector.broadcast %387 : vector<1x256xi1> to vector<4x256xi1>
      %389 = vector.broadcast %cst_129 : f32 to vector<4x256xf32>
      %390 = arith.select %388, %375, %389 : vector<4x256xi1>, vector<4x256xf32>
      %c241_i32_130 = arith.constant 241 : i32
      %391 = tpu.dynamic_rotate %149 by %c241_i32_130 dim 1 : vector<4x256xf32>, i32 -> vector<4x256xf32>
      %c-1_i32_131 = arith.constant -1 : i32
      %392 = vector.broadcast %c-1_i32_131 : i32 to vector<1x256xi32>
      %393 = arith.cmpi sge, %4, %392 : vector<1x256xi32>
      %c15_i32_132 = arith.constant 15 : i32
      %394 = vector.broadcast %c15_i32_132 : i32 to vector<1x256xi32>
      %395 = arith.cmpi slt, %4, %394 : vector<1x256xi32>
      %396 = arith.andi %393, %395 : vector<1x256xi1>
      %c1_i32_133 = arith.constant 1 : i32
      %397 = vector.broadcast %c1_i32_133 : i32 to vector<1x256xi32>
      %398 = arith.cmpi sge, %5, %397 : vector<1x256xi32>
      %399 = arith.andi %396, %398 : vector<1x256xi1>
      %c17_i32_134 = arith.constant 17 : i32
      %400 = vector.broadcast %c17_i32_134 : i32 to vector<1x256xi32>
      %401 = arith.cmpi slt, %5, %400 : vector<1x256xi32>
      %402 = arith.andi %399, %401 : vector<1x256xi1>
      %cst_135 = arith.constant 0.000000e+00 : f32
      %403 = vector.shape_cast %402 : vector<1x256xi1> to vector<1x256xi1>
      %404 = vector.broadcast %403 : vector<1x256xi1> to vector<4x256xi1>
      %405 = vector.broadcast %cst_135 : f32 to vector<4x256xf32>
      %406 = arith.select %404, %391, %405 : vector<4x256xi1>, vector<4x256xf32>
      %c240_i32_136 = arith.constant 240 : i32
      %407 = tpu.dynamic_rotate %149 by %c240_i32_136 dim 1 : vector<4x256xf32>, i32 -> vector<4x256xf32>
      %c-1_i32_137 = arith.constant -1 : i32
      %408 = vector.broadcast %c-1_i32_137 : i32 to vector<1x256xi32>
      %409 = arith.cmpi sge, %4, %408 : vector<1x256xi32>
      %c15_i32_138 = arith.constant 15 : i32
      %410 = vector.broadcast %c15_i32_138 : i32 to vector<1x256xi32>
      %411 = arith.cmpi slt, %4, %410 : vector<1x256xi32>
      %412 = arith.andi %409, %411 : vector<1x256xi1>
      %c0_i32_139 = arith.constant 0 : i32
      %413 = vector.broadcast %c0_i32_139 : i32 to vector<1x256xi32>
      %414 = arith.cmpi sge, %5, %413 : vector<1x256xi32>
      %415 = arith.andi %412, %414 : vector<1x256xi1>
      %c16_i32_140 = arith.constant 16 : i32
      %416 = vector.broadcast %c16_i32_140 : i32 to vector<1x256xi32>
      %417 = arith.cmpi slt, %5, %416 : vector<1x256xi32>
      %418 = arith.andi %415, %417 : vector<1x256xi1>
      %cst_141 = arith.constant 0.000000e+00 : f32
      %419 = vector.shape_cast %418 : vector<1x256xi1> to vector<1x256xi1>
      %420 = vector.broadcast %419 : vector<1x256xi1> to vector<4x256xi1>
      %421 = vector.broadcast %cst_141 : f32 to vector<4x256xf32>
      %422 = arith.select %420, %407, %421 : vector<4x256xi1>, vector<4x256xf32>
      %c239_i32_142 = arith.constant 239 : i32
      %423 = tpu.dynamic_rotate %149 by %c239_i32_142 dim 1 : vector<4x256xf32>, i32 -> vector<4x256xf32>
      %c-1_i32_143 = arith.constant -1 : i32
      %424 = vector.broadcast %c-1_i32_143 : i32 to vector<1x256xi32>
      %425 = arith.cmpi sge, %4, %424 : vector<1x256xi32>
      %c15_i32_144 = arith.constant 15 : i32
      %426 = vector.broadcast %c15_i32_144 : i32 to vector<1x256xi32>
      %427 = arith.cmpi slt, %4, %426 : vector<1x256xi32>
      %428 = arith.andi %425, %427 : vector<1x256xi1>
      %c-1_i32_145 = arith.constant -1 : i32
      %429 = vector.broadcast %c-1_i32_145 : i32 to vector<1x256xi32>
      %430 = arith.cmpi sge, %5, %429 : vector<1x256xi32>
      %431 = arith.andi %428, %430 : vector<1x256xi1>
      %c15_i32_146 = arith.constant 15 : i32
      %432 = vector.broadcast %c15_i32_146 : i32 to vector<1x256xi32>
      %433 = arith.cmpi slt, %5, %432 : vector<1x256xi32>
      %434 = arith.andi %431, %433 : vector<1x256xi1>
      %cst_147 = arith.constant 0.000000e+00 : f32
      %435 = vector.shape_cast %434 : vector<1x256xi1> to vector<1x256xi1>
      %436 = vector.broadcast %435 : vector<1x256xi1> to vector<4x256xi1>
      %437 = vector.broadcast %cst_147 : f32 to vector<4x256xf32>
      %438 = arith.select %436, %423, %437 : vector<4x256xi1>, vector<4x256xf32>
      %c238_i32 = arith.constant 238 : i32
      %439 = tpu.dynamic_rotate %149 by %c238_i32 dim 1 : vector<4x256xf32>, i32 -> vector<4x256xf32>
      %c-1_i32_148 = arith.constant -1 : i32
      %440 = vector.broadcast %c-1_i32_148 : i32 to vector<1x256xi32>
      %441 = arith.cmpi sge, %4, %440 : vector<1x256xi32>
      %c15_i32_149 = arith.constant 15 : i32
      %442 = vector.broadcast %c15_i32_149 : i32 to vector<1x256xi32>
      %443 = arith.cmpi slt, %4, %442 : vector<1x256xi32>
      %444 = arith.andi %441, %443 : vector<1x256xi1>
      %c-2_i32_150 = arith.constant -2 : i32
      %445 = vector.broadcast %c-2_i32_150 : i32 to vector<1x256xi32>
      %446 = arith.cmpi sge, %5, %445 : vector<1x256xi32>
      %447 = arith.andi %444, %446 : vector<1x256xi1>
      %c14_i32_151 = arith.constant 14 : i32
      %448 = vector.broadcast %c14_i32_151 : i32 to vector<1x256xi32>
      %449 = arith.cmpi slt, %5, %448 : vector<1x256xi32>
      %450 = arith.andi %447, %449 : vector<1x256xi1>
      %cst_152 = arith.constant 0.000000e+00 : f32
      %451 = vector.shape_cast %450 : vector<1x256xi1> to vector<1x256xi1>
      %452 = vector.broadcast %451 : vector<1x256xi1> to vector<4x256xi1>
      %453 = vector.broadcast %cst_152 : f32 to vector<4x256xf32>
      %454 = arith.select %452, %439, %453 : vector<4x256xi1>, vector<4x256xf32>
      %c226_i32 = arith.constant 226 : i32
      %455 = tpu.dynamic_rotate %149 by %c226_i32 dim 1 : vector<4x256xf32>, i32 -> vector<4x256xf32>
      %c-2_i32_153 = arith.constant -2 : i32
      %456 = vector.broadcast %c-2_i32_153 : i32 to vector<1x256xi32>
      %457 = arith.cmpi sge, %4, %456 : vector<1x256xi32>
      %c14_i32_154 = arith.constant 14 : i32
      %458 = vector.broadcast %c14_i32_154 : i32 to vector<1x256xi32>
      %459 = arith.cmpi slt, %4, %458 : vector<1x256xi32>
      %460 = arith.andi %457, %459 : vector<1x256xi1>
      %c2_i32_155 = arith.constant 2 : i32
      %461 = vector.broadcast %c2_i32_155 : i32 to vector<1x256xi32>
      %462 = arith.cmpi sge, %5, %461 : vector<1x256xi32>
      %463 = arith.andi %460, %462 : vector<1x256xi1>
      %c18_i32_156 = arith.constant 18 : i32
      %464 = vector.broadcast %c18_i32_156 : i32 to vector<1x256xi32>
      %465 = arith.cmpi slt, %5, %464 : vector<1x256xi32>
      %466 = arith.andi %463, %465 : vector<1x256xi1>
      %cst_157 = arith.constant 0.000000e+00 : f32
      %467 = vector.shape_cast %466 : vector<1x256xi1> to vector<1x256xi1>
      %468 = vector.broadcast %467 : vector<1x256xi1> to vector<4x256xi1>
      %469 = vector.broadcast %cst_157 : f32 to vector<4x256xf32>
      %470 = arith.select %468, %455, %469 : vector<4x256xi1>, vector<4x256xf32>
      %c225_i32 = arith.constant 225 : i32
      %471 = tpu.dynamic_rotate %149 by %c225_i32 dim 1 : vector<4x256xf32>, i32 -> vector<4x256xf32>
      %c-2_i32_158 = arith.constant -2 : i32
      %472 = vector.broadcast %c-2_i32_158 : i32 to vector<1x256xi32>
      %473 = arith.cmpi sge, %4, %472 : vector<1x256xi32>
      %c14_i32_159 = arith.constant 14 : i32
      %474 = vector.broadcast %c14_i32_159 : i32 to vector<1x256xi32>
      %475 = arith.cmpi slt, %4, %474 : vector<1x256xi32>
      %476 = arith.andi %473, %475 : vector<1x256xi1>
      %c1_i32_160 = arith.constant 1 : i32
      %477 = vector.broadcast %c1_i32_160 : i32 to vector<1x256xi32>
      %478 = arith.cmpi sge, %5, %477 : vector<1x256xi32>
      %479 = arith.andi %476, %478 : vector<1x256xi1>
      %c17_i32_161 = arith.constant 17 : i32
      %480 = vector.broadcast %c17_i32_161 : i32 to vector<1x256xi32>
      %481 = arith.cmpi slt, %5, %480 : vector<1x256xi32>
      %482 = arith.andi %479, %481 : vector<1x256xi1>
      %cst_162 = arith.constant 0.000000e+00 : f32
      %483 = vector.shape_cast %482 : vector<1x256xi1> to vector<1x256xi1>
      %484 = vector.broadcast %483 : vector<1x256xi1> to vector<4x256xi1>
      %485 = vector.broadcast %cst_162 : f32 to vector<4x256xf32>
      %486 = arith.select %484, %471, %485 : vector<4x256xi1>, vector<4x256xf32>
      %c224_i32 = arith.constant 224 : i32
      %487 = tpu.dynamic_rotate %149 by %c224_i32 dim 1 : vector<4x256xf32>, i32 -> vector<4x256xf32>
      %c-2_i32_163 = arith.constant -2 : i32
      %488 = vector.broadcast %c-2_i32_163 : i32 to vector<1x256xi32>
      %489 = arith.cmpi sge, %4, %488 : vector<1x256xi32>
      %c14_i32_164 = arith.constant 14 : i32
      %490 = vector.broadcast %c14_i32_164 : i32 to vector<1x256xi32>
      %491 = arith.cmpi slt, %4, %490 : vector<1x256xi32>
      %492 = arith.andi %489, %491 : vector<1x256xi1>
      %c0_i32_165 = arith.constant 0 : i32
      %493 = vector.broadcast %c0_i32_165 : i32 to vector<1x256xi32>
      %494 = arith.cmpi sge, %5, %493 : vector<1x256xi32>
      %495 = arith.andi %492, %494 : vector<1x256xi1>
      %c16_i32_166 = arith.constant 16 : i32
      %496 = vector.broadcast %c16_i32_166 : i32 to vector<1x256xi32>
      %497 = arith.cmpi slt, %5, %496 : vector<1x256xi32>
      %498 = arith.andi %495, %497 : vector<1x256xi1>
      %cst_167 = arith.constant 0.000000e+00 : f32
      %499 = vector.shape_cast %498 : vector<1x256xi1> to vector<1x256xi1>
      %500 = vector.broadcast %499 : vector<1x256xi1> to vector<4x256xi1>
      %501 = vector.broadcast %cst_167 : f32 to vector<4x256xf32>
      %502 = arith.select %500, %487, %501 : vector<4x256xi1>, vector<4x256xf32>
      %c223_i32 = arith.constant 223 : i32
      %503 = tpu.dynamic_rotate %149 by %c223_i32 dim 1 : vector<4x256xf32>, i32 -> vector<4x256xf32>
      %c-2_i32_168 = arith.constant -2 : i32
      %504 = vector.broadcast %c-2_i32_168 : i32 to vector<1x256xi32>
      %505 = arith.cmpi sge, %4, %504 : vector<1x256xi32>
      %c14_i32_169 = arith.constant 14 : i32
      %506 = vector.broadcast %c14_i32_169 : i32 to vector<1x256xi32>
      %507 = arith.cmpi slt, %4, %506 : vector<1x256xi32>
      %508 = arith.andi %505, %507 : vector<1x256xi1>
      %c-1_i32_170 = arith.constant -1 : i32
      %509 = vector.broadcast %c-1_i32_170 : i32 to vector<1x256xi32>
      %510 = arith.cmpi sge, %5, %509 : vector<1x256xi32>
      %511 = arith.andi %508, %510 : vector<1x256xi1>
      %c15_i32_171 = arith.constant 15 : i32
      %512 = vector.broadcast %c15_i32_171 : i32 to vector<1x256xi32>
      %513 = arith.cmpi slt, %5, %512 : vector<1x256xi32>
      %514 = arith.andi %511, %513 : vector<1x256xi1>
      %cst_172 = arith.constant 0.000000e+00 : f32
      %515 = vector.shape_cast %514 : vector<1x256xi1> to vector<1x256xi1>
      %516 = vector.broadcast %515 : vector<1x256xi1> to vector<4x256xi1>
      %517 = vector.broadcast %cst_172 : f32 to vector<4x256xf32>
      %518 = arith.select %516, %503, %517 : vector<4x256xi1>, vector<4x256xf32>
      %c222_i32 = arith.constant 222 : i32
      %519 = tpu.dynamic_rotate %149 by %c222_i32 dim 1 : vector<4x256xf32>, i32 -> vector<4x256xf32>
      %c-2_i32_173 = arith.constant -2 : i32
      %520 = vector.broadcast %c-2_i32_173 : i32 to vector<1x256xi32>
      %521 = arith.cmpi sge, %4, %520 : vector<1x256xi32>
      %c14_i32_174 = arith.constant 14 : i32
      %522 = vector.broadcast %c14_i32_174 : i32 to vector<1x256xi32>
      %523 = arith.cmpi slt, %4, %522 : vector<1x256xi32>
      %524 = arith.andi %521, %523 : vector<1x256xi1>
      %c-2_i32_175 = arith.constant -2 : i32
      %525 = vector.broadcast %c-2_i32_175 : i32 to vector<1x256xi32>
      %526 = arith.cmpi sge, %5, %525 : vector<1x256xi32>
      %527 = arith.andi %524, %526 : vector<1x256xi1>
      %c14_i32_176 = arith.constant 14 : i32
      %528 = vector.broadcast %c14_i32_176 : i32 to vector<1x256xi32>
      %529 = arith.cmpi slt, %5, %528 : vector<1x256xi32>
      %530 = arith.andi %527, %529 : vector<1x256xi1>
      %cst_177 = arith.constant 0.000000e+00 : f32
      %531 = vector.shape_cast %530 : vector<1x256xi1> to vector<1x256xi1>
      %532 = vector.broadcast %531 : vector<1x256xi1> to vector<4x256xi1>
      %533 = vector.broadcast %cst_177 : f32 to vector<4x256xf32>
      %534 = arith.select %532, %519, %533 : vector<4x256xi1>, vector<4x256xf32>
      %535 = tpu.concatenate %166, %182, %198, %214, %230, %246, %262, %278, %294, %310, %326, %342, %149, %358, %374, %390 in 0 : vector<4x256xf32>, vector<4x256xf32>, vector<4x256xf32>, vector<4x256xf32>, vector<4x256xf32>, vector<4x256xf32>, vector<4x256xf32>, vector<4x256xf32>, vector<4x256xf32>, vector<4x256xf32>, vector<4x256xf32>, vector<4x256xf32>, vector<4x256xf32>, vector<4x256xf32>, vector<4x256xf32>, vector<4x256xf32> -> vector<64x256xf32>
      %536 = tpu.concatenate %406, %422, %438, %454, %470, %486, %502, %518, %534 in 0 : vector<4x256xf32>, vector<4x256xf32>, vector<4x256xf32>, vector<4x256xf32>, vector<4x256xf32>, vector<4x256xf32>, vector<4x256xf32>, vector<4x256xf32>, vector<4x256xf32> -> vector<36x256xf32>
      %537 = tpu.concatenate %535, %536 in 0 : vector<64x256xf32>, vector<36x256xf32> -> vector<100x256xf32>
      %cst_178 = arith.constant dense<0.000000e+00> : vector<8x256xf32>
      %538 = tpu.matmul %150, %537, %cst_178 {dimension_numbers = #tpu.dot_dimension_numbers<[1], [0], [0], [1], [0, 0, 1, 1], [], []>} : vector<8x100xf32>, vector<100x256xf32>, vector<8x256xf32> -> vector<8x256xf32>
      %539 = vector.broadcast %143 : vector<8x1xf32> to vector<8x256xf32>
      %540 = arith.addf %538, %539 : vector<8x256xf32>
      %cst_179 = arith.constant 0.000000e+00 : f32
      %541 = vector.broadcast %cst_179 : f32 to vector<8x256xf32>
      %542 = arith.maximumf %540, %541 : vector<8x256xf32>
      %c0_180 = arith.constant 0 : index
      %c0_181 = arith.constant 0 : index
      %c0_182 = arith.constant 0 : index
      %543 = vector.load %arg8[%c0_180, %c0_181, %c0_182] : memref<1x8x256xf32, #tpu.memory_space<vmem>>, vector<1x8x256xf32>
      %544 = vector.shape_cast %543 : vector<1x8x256xf32> to vector<8x256xf32>
      %545 = vector.shape_cast %542 : vector<8x256xf32> to vector<1x8x256xf32>
      tpu.vector_store %arg8[%c0_180, %c0_181, %c0_182], %545 {strides = array<i32>} : memref<1x8x256xf32, #tpu.memory_space<vmem>>, vector<1x8x256xf32>,
    } else {
    }
    return
  }
  func.func @transform_0(%arg0: i32, %arg1: memref<2xi32, #tpu.memory_space<smem>>) -> (i32, i32, i32) {
    %c0_i32 = arith.constant 0 : i32
    %c0_i32_0 = arith.constant 0 : i32
    %c0_i32_1 = arith.constant 0 : i32
    return %arg0, %c0_i32, %c0_i32_0 : i32, i32, i32
  }
  func.func @transform_1(%arg0: i32, %arg1: memref<2xi32, #tpu.memory_space<smem>>) -> (i32, i32) {
    %c0_i32 = arith.constant 0 : i32
    %c0_i32_0 = arith.constant 0 : i32
    %c0_i32_1 = arith.constant 0 : i32
    return %c0_i32, %c0_i32_0 : i32, i32
  }
  func.func @transform_2(%arg0: i32, %arg1: memref<2xi32, #tpu.memory_space<smem>>) -> (i32, i32) {
    %c0_i32 = arith.constant 0 : i32
    %c0_i32_0 = arith.constant 0 : i32
    %c0_i32_1 = arith.constant 0 : i32
    return %c0_i32, %c0_i32_0 : i32, i32
  }
  func.func @transform_3(%arg0: i32, %arg1: memref<2xi32, #tpu.memory_space<smem>>) -> (i32, i32) {
    %c0_i32 = arith.constant 0 : i32
    %c0_i32_0 = arith.constant 0 : i32
    %c0_i32_1 = arith.constant 0 : i32
    return %c0_i32, %c0_i32_0 : i32, i32
  }
  func.func @transform_4(%arg0: i32, %arg1: memref<2xi32, #tpu.memory_space<smem>>) -> (i32, i32) {
    %c0_i32 = arith.constant 0 : i32
    %c0_i32_0 = arith.constant 0 : i32
    %c0_i32_1 = arith.constant 0 : i32
    return %c0_i32, %c0_i32_0 : i32, i32
  }
  func.func @transform_5(%arg0: i32, %arg1: memref<2xi32, #tpu.memory_space<smem>>) -> (i32, i32) {
    %c0_i32 = arith.constant 0 : i32
    %c0_i32_0 = arith.constant 0 : i32
    %c0_i32_1 = arith.constant 0 : i32
    return %c0_i32, %c0_i32_0 : i32, i32
  }
  func.func @transform_6(%arg0: i32, %arg1: memref<2xi32, #tpu.memory_space<smem>>) -> (i32, i32, i32) {
    %c0_i32 = arith.constant 0 : i32
    %c0_i32_0 = arith.constant 0 : i32
    %c0_i32_1 = arith.constant 0 : i32
    return %arg0, %c0_i32, %c0_i32_0 : i32, i32, i32
  }
}

</mosaic_0001>

<bundles_post_ra>
// kernel: tile.9
= control target key start
LH: loop header
LB: loop body
LE: loop exit
PB: predicated region body
PF: predicated region fallthrough
CT: control target
= control target key end

     0   :  { %s7_s6 = smov 3  ;;  %s21_s9 = smov 3  ;;  %vm4_vm0 = vcmask 130048   ;;  %vm11_vm1 = vcmask 1048448   ;;  %vm18_vm2 = vcmask 917248   ;;  %vm25_vm3 = vcmask 786048   ;;  %s128_s0 = inlined_call_operand.vmem [shape: s32[16,16], index: 0, kind: input, shape index: {}]   ;;  %s129_s1 = inlined_call_operand.vmem [shape: s32[1,256], index: 1, kind: output, shape index: {}]  }
   0x1   :  { %v66_v0 = vld [vmem:[%s128_s0 + $0x7] ss:$8 sm:%s7_s6]   ;;  %s81_s10 = smov 112   ;;  %v68_v1 = vld [vmem:[%s128_s0 + $0x5] ss:$8 sm:%s21_s9]   ;;  %s14_s13 = smov 3 }
   0x2   :  { %9 = vrot.lane.b32.xlu0 %v66_v0, %s81_s10  ;;  %s82_s14 = smov 80   ;;  %v67_v2 = vld [vmem:[%s128_s0 + $0x6] ss:$8 sm:%s14_s13]   ;;  %s28_s17 = smov 3  ;;  %vm32_vm4 = vcmask 654848   ;;  %vm39_vm5 = vcmask 523648  }
   0x3   :  { %23 = vrot.lane.b32.xlu1 %v68_v1, %s82_s14  ;;  %v69_v3 = vld [vmem:[%s128_s0 + $0x4] ss:$8 sm:%s28_s17]   ;;  %s35_s20 = smov 3  ;;  %s42_s21 = smov 3  ;;  %vm46_vm6 = vcmask 392448   ;;  %vm53_vm7 = vcmask 261248  }
   0x4   :  { %s83_s22 = smov 96   ;;  %s84_s23 = smov 64   ;;  %v70_v4 = vld [vmem:[%s128_s0 + $0x3] ss:$8 sm:%s35_s20]   ;;  %v71_v5 = vld [vmem:[%s128_s0 + $0x2] ss:$8 sm:%s42_s21]  }
   0x5   :  { %s2_s26 = smov 3  ;;  %s49_s29 = smov 3 }
   0x6   :  { %16 = vrot.lane.b32.xlu0 %v67_v2, %s83_s22  ;;  %v3_v6 = vld [vmem:[%s128_s0] ss:$8 sm:%s2_s26]   ;;  %s85_s3 = smov 48   ;;  %s86_s4 = smov 32  }
   0x7   :  { %30 = vrot.lane.b32.xlu1 %v69_v3, %s84_s23  ;;  %5 = vst.msk [vmem:[#allocation0] ss:$8 sm:$0x3] %vm4_vm0, %v3_v6   ;;  %v72_v7 = vld [vmem:[%s128_s0 + $0x1] ss:$8 sm:%s49_s29]   ;;  %s87_s0 = smov 16  }
   0xa   :  { %37 = vrot.lane.b32.xlu0 %v70_v4, %s85_s3 }
   0xb   :  { %44 = vrot.lane.b32.xlu1 %v71_v5, %s86_s4 }
   0xe   :  { %51 = vrot.lane.b32.xlu0 %v72_v7, %s87_s0 }
  0x74   :  { %v10_v8 = vpop.permute.xlu0 %9  }
  0x75   :  { %12 = vst.msk [vmem:[#allocation0] ss:$8 sm:$0x3] %vm11_vm1, %v10_v8   ;;  %v24_v9 = vpop.permute.xlu1 %23  }
  0x78   :  { %v17_v10 = vpop.permute.xlu0 %16  }
  0x79   :  { %19 = vst.msk [vmem:[#allocation0] ss:$8 sm:$0x3] %vm18_vm2, %v17_v10   ;;  %v31_v11 = vpop.permute.xlu1 %30  }
  0x7a   :  { %26 = vst.msk [vmem:[#allocation0] ss:$8 sm:$0x3] %vm25_vm3, %v24_v9  }
  0x7b   :  { %33 = vst.msk [vmem:[#allocation0] ss:$8 sm:$0x3] %vm32_vm4, %v31_v11  }
  0x7c   :  { %v38_v12 = vpop.permute.xlu0 %37  }
  0x7d   :  { %40 = vst.msk [vmem:[#allocation0] ss:$8 sm:$0x3] %vm39_vm5, %v38_v12   ;;  %v45_v13 = vpop.permute.xlu1 %44  }
  0x7e   :  { %47 = vst.msk [vmem:[#allocation0] ss:$8 sm:$0x3] %vm46_vm6, %v45_v13  }
  0x80   :  { %v52_v14 = vpop.permute.xlu0 %51  }
  0x81   :  { %54 = vst.msk [vmem:[#allocation0] ss:$8 sm:$0x3] %vm53_vm7, %v52_v14  }
  0x88   :  { %v58_v15 = vld [vmem:[#allocation0] sm:$0x1]  ;;  %v62_v16 = vld [vmem:[#allocation0 + $0x8] sm:$0x1] }
  0x89   :  { %60 = vst [vmem:[%s129_s1] sm:$0x1] %v58_v15  ;;  %73 = vst [vmem:[%s129_s1 + $0x1] sm:$0x1] %v62_v16 }

// kernel: conv_block_lk_sobel_moe.1
= control target key start
LH: loop header
LB: loop body
LE: loop exit
PB: predicated region body
PF: predicated region fallthrough
CT: control target
= control target key end

     0   :  { %s6760_s0 = inlined_call_operand.vmem [shape: s32[2], index: 0, kind: input, shape index: {}]   ;;  %s6761_s1 = inlined_call_operand.vmem [shape: f32[2,4,256], index: 1, kind: input, shape index: {}]   ;;  %s6762_s2 = inlined_call_operand.vmem [shape: s32[2,256], index: 2, kind: input, shape index: {}]   ;;  %s6763_s3 = inlined_call_operand.vmem [shape: f32[8,36], index: 3, kind: input, shape index: {}]   ;;  %s6764_s4 = inlined_call_operand.vmem [shape: f32[8,200], index: 4, kind: input, shape index: {}]   ;;  %s6765_s5 = inlined_call_operand.vmem [shape: f32[24,100], index: 5, kind: input, shape index: {}]   ;;  %s6766_s6 = inlined_call_operand.vmem [shape: f32[40,1], index: 6, kind: input, shape index: {}]   ;;  %s6767_s7 = inlined_call_operand.vmem [shape: f32[2,8,256], index: 7, kind: output, shape index: {}]  }
   0x1   :  { %s12_s26 = sshll.u32 %s6760_s0, 4  ;;  %s13_s26 = int_to_ptr.vmem [resolvable:$true] %s12_s26 }
   0x2   :  { %s3613_s27 = scalar_lea.vmem %s13_s26, 16  ;;  %p3618_p1 = scmp.lt.s32.totalorder %s13_s26, %s13_s26 }
   0x3   :  { %p3614_p0 = scmp.ne.s32.totalorder %s13_s26, %s3613_s27  ;;  %p3619_p2 = scmp.lt.s32.totalorder %s3613_s27, %s3613_s27 }
   0x5   :  { %p3620_p3 = por %p3619_p2, %p3618_p1 }
   0x7   :  { %p3621_p4 = pnand %p3620_p3, %p3614_p0 }
   0x9   :  { %3624 = shalt.err (!%p3621_p4)  }
   0xa   :  { %s3635_s28 = smov [#allocation3]  }
   0xb   :  { %15 = dma.vmem_to_smem %s13_s26, 16, %s3635_s28, [#allocation2] }
   0xc   :  { %3629 = dma.done.wait [#allocation2], 16 }
   0xd   :  { %3630 = vsyncadd [#allocation2], 4294967280 }
   0xe   :  { %17 = sfence }
   0xf   :  { %s3767_s29 = smov 0  }
  0x10 LB: > { %s2820_s0 = sadd.s32 4294967295, %s3633_s29   ;;  %p2824_p5 = scmp.ge.s32.totalorder %s3633_s29, 1  ;;  %s3633_s29 = sphi %s3767_s29, %s23_s29  }
  0x11   : > { %p219_p6 = scmp.lt.s32.totalorder %s3633_s29, 3 }
  0x13   : > { %p220_p7 = pnand %p2824_p5, %p219_p6 }
  0x15   : > { %223 = sbr.rel (%p220_p7) target bundleno = 1730 (0x6c2), region = 44 }
  0x1c   : > { %p249_p8 = scmp.lt.s32.totalorder %s2820_s0, 1  ;;  %s3636_s16 = smov 16   ;;  %v3810_v2 = vld [vmem:[%s6762_s2] ss:$2 sm:$0x3]  ;;  %v6886_v4 = vmov 0  ;;  %v271_v5 = vlaneseq }
  0x1d   : > { %s3637_s17 = smov 17   ;;  %s3638_s18 = smov 15   ;;  %6884 = vst [vmem:[#allocation6_spill] sm:$0xff] %v3810_v2  ;;  %v3815_v3 = vld [vmem:[%s6762_s2 + $0x1] ss:$2 sm:$0x3] }
  0x1e   : > { %s250_s30 = scalar_select %p249_p8, %s2820_s0, 1  ;;  %6885 = vst [vmem:[#allocation7_spill] sm:$0xff] %v3815_v3  ;;  %vm276_vm0 = vcmp.ge.s32.totalorder %v3810_v2, 1  ;;  %vm277_vm1 = vcmp.lt.s32.totalorder %v3810_v2, 17  ;;  %vm6772_vm3 = vcmp.ge.s32.totalorder %v3815_v3, 0  ;;  %vm6769_vm5 = vcmp.lt.s32.totalorder %v3815_v3, 16 }
  0x1f   : > { %s3639_s19 = smov 1   ;;  %s3640_s20 = smov 127   ;;  %vm3819_vm2 = vmand %vm276_vm0, %vm277_vm1  ;;  %vm6768_vm6 = vcmp.ge.s32.totalorder %v3815_v3, 4294967295  ;;  %v285_v6 = vshrl.u32 %v271_v5, 7  ;;  %vm6773_vm7 = vcmp.ge.s32.totalorder %v3815_v3, 1  ;;  %vm351_vm9 = vcmp.ge.s32.totalorder %v3810_v2, 0 }
  0x20   : > { %s2896_s8 = sshll.u32 %s250_s30, 3  ;;  %s2897_s9 = sshll.u32 %s250_s30, 4  ;;  %v6887_v4 = vsel %vm3819_vm2, 4294967295, %v6886_v4  ;;  %vm304_vm4 = vmand %vm3819_vm2, %vm6772_vm3  ;;  %vm352_vm10 = vcmp.lt.s32.totalorder %v3810_v2, 16  ;;  %vm6771_vm12 = vcmp.lt.s32.totalorder %v3815_v3, 15  ;;  %vm6776_vm14 = vcmp.lt.s32.totalorder %v3815_v3, 17 }
  0x21   : > { %s253_s12 = scalar_lea.vmem %s6761_s1, %s2896_s8  ;;  %s3781_s15 = scalar_lea.vmem %s6767_s7, %s2897_s9  ;;  %6888 = vst [vmem:[#allocation8_spill] sm:$0xff] %v6887_v4  ;;  %vm306_vm8 = vmand %vm304_vm4, %vm6769_vm5  ;;  %v3845_v7 = vsub.s32 0, %v285_v6  ;;  %v3847_v8 = vsub.s32 1, %v285_v6  ;;  %v6889_v9 = vmov 0  ;;  %v3644_v10 = vmov 0  }
  0x22   : > { %v3783_v0 = vld [vmem:[%s253_s12] sm:$0xff]  ;;  %s3799_s21 = sld [smem:[#allocation3 + %s2820_s0]]  ;;  %s3641_s22 = smov 113   ;;  %vm328_vm11 = vmand %vm3819_vm2, %vm6768_vm6  ;;  %v307_v11 = vsel %vm306_vm8, 1, %v3644_v10  ;;  %v3858_v12 = vand.u32 127, %v271_v5  ;;  %vm398_vm8 = vcmp.ge.s32.totalorder %v3810_v2, 4294967295 }
  0x23   : > { %6883 = vst [vmem:[#allocation5_spill] sm:$0xff] %v3783_v0  ;;  %296 = vrot.lane.b32.xlu1 %v3783_v0, %s3636_s16  ;;  %267 = vrot.lane.b32.xlu0 %v3783_v0, %s3637_s17  ;;  %v3789_v1 = vcombine.high %v3783_v0, %v3783_v0  ;;  %s3642_s23 = smov 112   ;;  %s3643_s24 = smov 111   ;;  %vm280_vm13 = vmand %vm3819_vm2, %vm6773_vm7  ;;  %v311_v13 = vrot.slane %v307_v11, %v3845_v7  ;;  %v6892_v21 = vmov 0  ;;  %v6894_v22 = vmov 0 }
  0x24   : > { %vm3849_vm15 = vmand %vm351_vm9, %vm352_vm10  ;;  %v315_v14 = vrot.slane %v307_v11, %v3847_v8  ;;  %vm399_vm9 = vcmp.lt.s32.totalorder %v3810_v2, 15  ;;  %v6896_v25 = vmov 0  ;;  %vm6775_vm5 = vcmp.lt.s32.totalorder %v3858_v12, 17 }
  0x25   : > { %v6890_v9 = vsel %vm3849_vm15, 4294967295, %v6889_v9  ;;  %vm330_vm0 = vmand %vm328_vm11, %vm6771_vm12  ;;  %vm6770_vm11 = vcmp.lt.s32.totalorder %v3858_v12, 16  ;;  %v6901_v33 = vmov 0  ;;  %v6903_v34 = vmov 0 }
  0x26   : > { %6891 = vst [vmem:[#allocation9_spill] sm:$0xff] %v6890_v9  ;;  %vm282_vm1 = vmand %vm280_vm13, %vm6776_vm14  ;;  %v331_v15 = vsel %vm330_vm0, 1, %v3644_v10  ;;  %vm3879_vm0 = vcmp.eq.s32.totalorder %v311_v13, 1  ;;  %v6905_v35 = vmov 0  ;;  %v6907_v36 = vmov 0 }
  0x27   : > { %320 = vrot.lane.b32.xlu0 %v3783_v0, %s3638_s18  ;;  %298 = vrot.lane.b32.xlu1 %v3789_v1, %s3636_s16  ;;  %vm354_vm4 = vmand %vm3849_vm15, %vm6773_vm7  ;;  %v283_v18 = vsel %vm282_vm1, 1, %v3644_v10  ;;  %v335_v19 = vrot.slane %v331_v15, %v3845_v7  ;;  %v339_v20 = vrot.slane %v331_v15, %v3847_v8  ;;  %v6893_v21 = vsel %vm3879_vm0, 4294967295, %v6892_v21 }
  0x28   : > { %vm355_vm10 = vmand %vm354_vm4, %vm6776_vm14  ;;  %vm3883_vm1 = vcmp.eq.s32.totalorder %v315_v14, 1  ;;  %v287_v23 = vrot.slane %v283_v18, %v3845_v7  ;;  %v291_v24 = vrot.slane %v283_v18, %v3847_v8  ;;  %vm6786_vm3 = vcmp.lt.s32.totalorder %v3858_v12, 1  ;;  %p2830_p9 = scmp.ne.s32.totalorder %s3799_s21, 0 }
  0x29   : > { %vm376_vm13 = vmand %vm3849_vm15, %vm6768_vm6  ;;  %v6895_v22 = vsel %vm3883_vm1, 4294967295, %v6894_v22  ;;  %v356_v28 = vsel %vm355_vm10, 1, %v3644_v10  ;;  %vm6774_vm6 = vcmp.lt.s32.totalorder %v3858_v12, 15  ;;  %vm3914_vm10 = vcmp.eq.s32.totalorder %v339_v20, 1  ;;  %s3647_s10 = smov (!%p2830_p9), 33   ;;  %s3648_s11 = smov (!%p2830_p9), 34  }
  0x2a   : > { %vm3889_vm4 = vmand %vm398_vm8, %vm399_vm9  ;;  %vm3910_vm9 = vcmp.eq.s32.totalorder %v335_v19, 1  ;;  %v6904_v34 = vsel %vm3914_vm10, 4294967295, %v6903_v34  ;;  %v360_v37 = vrot.slane %v356_v28, %v3845_v7  ;;  %v364_v38 = vrot.slane %v356_v28, %v3847_v8  ;;  %s3649_s12 = smov (!%p2830_p9), 32   ;;  %s3650_s13 = smov (!%p2830_p9), 31  }
  0x2b   : > { %322 = vrot.lane.b32.xlu1 %v3789_v1, %s3638_s18  ;;  %269 = vrot.lane.b32.xlu0 %v3789_v1, %s3637_s17  ;;  %v6897_v25 = vsel %vm3889_vm4, 4294967295, %v6896_v25  ;;  %vm377_vm8 = vmand %vm376_vm13, %vm6771_vm12  ;;  %v6902_v33 = vsel %vm3910_vm9, 4294967295, %v6901_v33  ;;  %vm3926_vm12 = vcmp.eq.s32.totalorder %v291_v24, 1  ;;  %v6910_v50 = vmov 0  ;;  %s3651_s14 = smov (!%p2830_p9), 30   ;;  %s3652_s16 = smov (!%p2830_p9), 18  }
  0x2c   : > { %6898 = vst [vmem:[#allocation10_spill] sm:$0xff] %v6897_v25  ;;  %vm401_vm13 = vmand %vm3889_vm4, %vm6773_vm7  ;;  %v6908_v36 = vsel %vm3926_vm12, 4294967295, %v6907_v36  ;;  %v378_v41 = vsel %vm377_vm8, 1, %v3644_v10  ;;  %vm6909_vm8 = vcmp.ge.s32.totalorder %v3815_v3, 0  ;;  %v6912_v51 = vmov 0  ;;  %s3653_s17 = smov (!%p2830_p9), 17  }
  0x2d   : > { %vm402_vm7 = vmand %vm401_vm13, %vm6776_vm14  ;;  %v382_v52 = vrot.slane %v378_v41, %v3845_v7  ;;  %v386_v53 = vrot.slane %v378_v41, %v3847_v8  ;;  %v6918_v61 = vmov 0  ;;  %v6920_v62 = vmov 0  ;;  %s3654_s18 = smov (!%p2830_p9), 16   ;;  %s3660_s25 = smov (!%p2830_p9), 126  }
  0x2e   : > { %vm423_vm13 = vmand %vm3889_vm4, %vm6909_vm8  ;;  %v403_v56 = vsel %vm402_vm7, 1, %v3644_v10  ;;  %vm6914_vm8 = vcmp.lt.s32.totalorder %v3815_v3, 16  ;;  %vm6917_vm7 = vcmp.ge.s32.totalorder %v3815_v3, 4294967295  ;;  %v6925_v18 = vmov 0  ;;  %s3661_s26 = smov (!%p2830_p9), 114   ;;  %s3662_s27 = smov (!%p2830_p9), 113  }
  0x2f   : > { %346 = vrot.lane.b32.xlu1 %v3789_v1, %s3639_s19  ;;  %344 = vrot.lane.b32.xlu0 %v3783_v0, %s3639_s19  ;;  %vm424_vm14 = vmand %vm423_vm13, %vm6914_vm8  ;;  %vm3998_vm13 = vcmp.eq.s32.totalorder %v386_v53, 1  ;;  %v407_v63 = vrot.slane %v403_v56, %v3845_v7  ;;  %v411_v5 = vrot.slane %v403_v56, %v3847_v8  ;;  %vm6922_vm8 = vcmp.lt.s32.totalorder %v3815_v3, 15  ;;  %s3655_s19 = smov (!%p2830_p9), 15   ;;  %s3663_s28 = smov (!%p2830_p9), 112  }
  0x30   : > { %v6921_v62 = vsel %vm3998_vm13, 4294967295, %v6920_v62  ;;  %v425_v13 = vsel %vm424_vm14, 1, %v3644_v10  ;;  %v6928_v19 = vmov 0  ;;  %v6937_v53 = vmov 0  ;;  %s3664_s0 = smov (!%p2830_p9), 111   ;;  %s3665_s30 = smov (!%p2830_p9), 110  }
  0x31   : > { %vm4020_vm14 = vcmp.eq.s32.totalorder %v407_v63, 1  ;;  %v429_v20 = vrot.slane %v425_v13, %v3845_v7  ;;  %s3666_s8 = smov (!%p2830_p9), 98   ;;  %s3667_s9 = smov (!%p2830_p9), 97  }
  0x32   : > { %v6926_v18 = vsel %vm4020_vm14, 4294967295, %v6925_v18 }
  0x33   : > { %371 = vrot.lane.b32.xlu1 %v3789_v1, %s3640_s20  ;;  %369 = vrot.lane.b32.xlu0 %v3783_v0, %s3640_s20  ;;  %6927 = vst [vmem:[#allocation17_spill] sm:$0xff] %v6926_v18  ;;  %s3656_s20 = smov (!%p2830_p9), 14  }
  0x37   : > { %393 = vrot.lane.b32.xlu1 %v3789_v1, %s3641_s22  ;;  %391 = vrot.lane.b32.xlu0 %v3783_v0, %s3641_s22  ;;  %s3657_s22 = smov (!%p2830_p9), 2  }
  0x3b   : > { %418 = vrot.lane.b32.xlu1 %v3789_v1, %s3642_s23  ;;  %416 = vrot.lane.b32.xlu0 %v3783_v0, %s3642_s23  ;;  %s3658_s23 = smov (!%p2830_p9), 1  }
  0x3f   : > { %440 = vrot.lane.b32.xlu1 %v3789_v1, %s3643_s24  ;;  %438 = vrot.lane.b32.xlu0 %v3783_v0, %s3643_s24  ;;  %s3659_s24 = smov (!%p2830_p9), 127  }
  0x95   : > { %v297_v16 = vpop.permute.xlu1 %296  ;;  %v268_v17 = vpop.permute.xlu0 %267 }
  0x99   : > { %v321_v26 = vpop.permute.xlu0 %320  ;;  %v299_v27 = vpop.permute.xlu1 %298 }
  0x9a   : > { %v301_v29 = vsel %vm6770_vm11, %v297_v16, %v299_v27  ;;  %v302_v30 = vsel %vm6770_vm11, %v299_v27, %v297_v16  ;;  %vm3922_vm11 = vcmp.eq.s32.totalorder %v287_v23, 1  ;;  %v433_v23 = vrot.slane %v425_v13, %v3847_v8 }
  0x9b   : > { %v3904_v31 = vsel %vm3879_vm0, %v302_v30, 0.0  ;;  %v3908_v32 = vsel %vm3883_vm1, %v301_v29, 0.0  ;;  %v6906_v35 = vsel %vm3922_vm11, 4294967295, %v6905_v35  ;;  %vm3994_vm0 = vcmp.eq.s32.totalorder %v382_v52, 1 }
  0x9c   : > { %6899 = vst [vmem:[#allocation11_spill] sm:$0xff] %v3904_v31  ;;  %6900 = vst [vmem:[#allocation12_spill] sm:$0xff] %v3908_v32  ;;  %v6919_v61 = vsel %vm3994_vm0, 4294967295, %v6918_v61  ;;  %v468_v13 = vrot.slane (!%p2830_p9), %v3904_v31, 4  ;;  %vm6838_vm1 = vcmp.ge.s32.totalorder (!%p2830_p9), %v3815_v3, 4294967294 }
  0x9d   : > { %v323_v39 = vpop.permute.xlu1 %322  ;;  %v270_v40 = vpop.permute.xlu0 %269 }
  0x9e   : > { %v325_v42 = vsel %vm6774_vm6, %v321_v26, %v323_v39  ;;  %v326_v43 = vsel %vm6774_vm6, %v323_v39, %v321_v26  ;;  %v274_v44 = vsel %vm6775_vm5, %v268_v17, %v270_v40  ;;  %v275_v45 = vsel %vm6775_vm5, %v270_v40, %v268_v17 }
  0x9f   : > { %v3946_v46 = vsel %vm3910_vm9, %v326_v43, 0.0  ;;  %v3950_v47 = vsel %vm3914_vm10, %v325_v42, 0.0  ;;  %v3954_v48 = vsel %vm3922_vm11, %v275_v45, 0.0  ;;  %v3958_v49 = vsel %vm3926_vm12, %v274_v44, 0.0  ;;  %vm445_vm10 = vmand %vm3889_vm4, %vm6917_vm7 }
  0xa0   : > { %vm3964_vm6 = vcmp.eq.s32.totalorder %v360_v37, 1  ;;  %vm3968_vm5 = vcmp.eq.s32.totalorder %v364_v38, 1  ;;  %vm6791_vm9 = vcmp.lt.s32.totalorder %v3858_v12, 127  ;;  %vm446_vm7 = vmand %vm445_vm10, %vm6922_vm8  ;;  %vm6795_vm10 = vcmp.lt.s32.totalorder %v3858_v12, 112 }
  0xa1   : > { %v6911_v50 = vsel %vm3964_vm6, 4294967295, %v6910_v50  ;;  %v6913_v51 = vsel %vm3968_vm5, 4294967295, %v6912_v51  ;;  %v347_v54 = vpop.permute.xlu1 %346  ;;  %v345_v55 = vpop.permute.xlu0 %344  ;;  %v447_v27 = vsel %vm446_vm7, 1, %v3644_v10  ;;  %vm4044_vm8 = vcmp.eq.s32.totalorder %v429_v20, 1 }
  0xa2   : > { %v349_v57 = vsel %vm6786_vm3, %v345_v55, %v347_v54  ;;  %v350_v58 = vsel %vm6786_vm3, %v347_v54, %v345_v55  ;;  %vm6790_vm3 = vcmp.lt.s32.totalorder %v3858_v12, 113  ;;  %v6931_v38 = vmov 0 }
  0xa3   : > { %v3983_v59 = vsel %vm3964_vm6, %v350_v58, 0.0  ;;  %v3987_v60 = vsel %vm3968_vm5, %v349_v57, 0.0  ;;  %vm4024_vm6 = vcmp.eq.s32.totalorder %v411_v5, 1  ;;  %v6932_v38 = vsel %vm4044_vm8, 4294967295, %v6931_v38 }
  0xa4   : > { %6915 = vst [vmem:[#allocation13_spill] sm:$0xff] %v3983_v59  ;;  %6916 = vst [vmem:[#allocation14_spill] sm:$0xff] %v3987_v60  ;;  %v6929_v19 = vsel %vm4024_vm6, 4294967295, %v6928_v19  ;;  %vm4048_vm7 = vcmp.eq.s32.totalorder %v433_v23, 1  ;;  %v6933_v10 = vmov 0  ;;  %v451_v39 = vrot.slane %v447_v27, %v3845_v7 }
  0xa5   : > { %v372_v6 = vpop.permute.xlu1 %371  ;;  %v370_v11 = vpop.permute.xlu0 %369  ;;  %6930 = vst [vmem:[#allocation18_spill] sm:$0xff] %v6929_v19  ;;  %v6934_v10 = vsel %vm4048_vm7, 4294967295, %v6933_v10  ;;  %v455_v40 = vrot.slane %v447_v27, %v3847_v8  ;;  %v6939_v54 = vmov 0  ;;  %vm6947_vm5 = vcmp.ge.s32.totalorder (!%p2830_p9), %v3815_v3, 4294967295 }
  0xa6   : > { %v374_v14 = vsel %vm6791_vm9, %v370_v11, %v372_v6  ;;  %v375_v15 = vsel %vm6791_vm9, %v372_v6, %v370_v11  ;;  %vm4067_vm9 = vcmp.eq.s32.totalorder %v451_v39, 1  ;;  %v469_v6 = vrot.slane (!%p2830_p9), %v3908_v32, 4 }
  0xa7   : > { %v4013_v16 = vsel %vm3994_vm0, %v374_v14, 0.0  ;;  %v4017_v17 = vsel %vm3998_vm13, %v375_v15, 0.0  ;;  %v6938_v53 = vsel %vm4067_vm9, 4294967295, %v6937_v53  ;;  %v475_v11 = vrot.slane (!%p2830_p9), %v3987_v60, 4 }
  0xa8   : > { %6923 = vst [vmem:[#allocation15_spill] sm:$0xff] %v4013_v16  ;;  %6924 = vst [vmem:[#allocation16_spill] sm:$0xff] %v4017_v17  ;;  %v474_v14 = vrot.slane (!%p2830_p9), %v3983_v59, 4  ;;  %v481_v15 = vrot.slane (!%p2830_p9), %v4017_v17, 4  ;;  %v480_v23 = vrot.slane (!%p2830_p9), %v4013_v16, 4  ;;  %vm6945_vm0 = vcmp.ge.s32.totalorder (!%p2830_p9), %v3815_v3, 1 }
  0xa9   : > { %v394_v24 = vpop.permute.xlu1 %393  ;;  %v392_v26 = vpop.permute.xlu0 %391  ;;  %vm6948_vm4 = vcmp.lt.s32.totalorder (!%p2830_p9), %v3815_v3, 17 }
  0xaa   : > { %v396_v28 = vsel %vm6790_vm3, %v392_v26, %v394_v24  ;;  %v397_v29 = vsel %vm6790_vm3, %v394_v24, %v392_v26  ;;  %vm6796_vm3 = vcmp.lt.s32.totalorder %v3858_v12, 111 }
  0xab   : > { %v4037_v30 = vsel %vm4020_vm14, %v396_v28, 0.0  ;;  %v4041_v37 = vsel %vm4024_vm6, %v397_v29, 0.0  ;;  %vm4071_vm14 = vcmp.eq.s32.totalorder %v455_v40, 1 }
  0xac   : > { %v6940_v54 = vsel %vm4071_vm14, 4294967295, %v6939_v54 }
  0xad   : > { %v419_v41 = vpop.permute.xlu1 %418  ;;  %v417_v42 = vpop.permute.xlu0 %416 }
  0xae   : > { %v421_v43 = vsel %vm6795_vm10, %v417_v42, %v419_v41  ;;  %v422_v44 = vsel %vm6795_vm10, %v419_v41, %v417_v42  ;;  %463 = sbr.rel (%p2830_p9) target bundleno = 814 (0x32e), region = 48  ;;  %vm490_vm10 = vcmask (!%p2830_p9), 1043456  }
  0xaf   : > { %v4060_v45 = vsel %vm4044_vm8, %v421_v43, 0.0  ;;  %v4064_v52 = vsel %vm4048_vm7, %v422_v44, 0.0  ;;  %v492_v24 = vsel (!%p2830_p9), %vm490_vm10, %v3958_v49, %v469_v6  ;;  %v494_v26 = vsel (!%p2830_p9), %vm490_vm10, %v3950_v47, %v475_v11  ;;  %v499_v6 = vld [vmem:[%s6763_s3] sm:$0xff] (!%p2830_p9) }
  0xb0   : > { %6935 = vst [vmem:[#allocation19_spill] sm:$0xff] %v4060_v45  ;;  %6936 = vst [vmem:[#allocation20_spill] sm:$0xff] %v4064_v52  ;;  %v487_v20 = vrot.slane (!%p2830_p9), %v4064_v52, 4  ;;  %v491_v27 = vsel (!%p2830_p9), %vm490_vm10, %v3954_v48, %v468_v13  ;;  %v486_v28 = vrot.slane (!%p2830_p9), %v4060_v45, 4  ;;  %v2898_v29 = vpack.c.bf16 (!%p2830_p9), %v494_v26, %v492_v24 }
  0xb1   : > { %v441_v55 = vpop.permute.xlu1 %440  ;;  %v439_v56 = vpop.permute.xlu0 %438  ;;  %v493_v39 = vsel (!%p2830_p9), %vm490_vm10, %v3946_v46, %v474_v14  ;;  %v496_v40 = vsel (!%p2830_p9), %vm490_vm10, %v3789_v1, %v481_v15  ;;  %v495_v44 = vsel (!%p2830_p9), %vm490_vm10, %v3783_v0, %v480_v23  ;;  %v6840_v1 = vmov (!%p2830_p9), 0  }
  0xb2   : > { %v443_v57 = vsel %vm6796_vm3, %v439_v56, %v441_v55  ;;  %v444_v58 = vsel %vm6796_vm3, %v441_v55, %v439_v56  ;;  %v498_v41 = vsel (!%p2830_p9), %vm490_vm10, %v4041_v37, %v487_v20  ;;  %v2900_v42 = vpack.c.bf16 (!%p2830_p9), %v493_v39, %v491_v27  ;;  %2899 = vmatprep.subr.bf16.mxu0 (!%p2830_p9), %v2898_v29  ;;  %v464_v56 = vld [vmem:[%s6766_s6] sm:$0xff] (!%p2830_p9)  ;;  %v589_v27 = vld [vmem:[%s6764_s4 + $0x8] sm:$0xff] (!%p2830_p9) }
  0xb3   : > { %v4081_v63 = vsel %vm4067_vm9, %v443_v57, 0.0  ;;  %v4085_v5 = vsel %vm4071_vm14, %v444_v58, 0.0  ;;  %v2902_v43 = vpack.c.bf16 (!%p2830_p9), %v498_v41, %v496_v40  ;;  %v497_v55 = vsel (!%p2830_p9), %vm490_vm10, %v4037_v30, %v486_v28  ;;  %3148 = vset.pattern.permute.xlu0 (!%p2830_p9), %v6840_v1  ;;  %v465_v28 = vld [vmem:[%s6766_s6 + $0x8] sm:$0xff] (!%p2830_p9) }
  0xb4   : > { %6941 = vst [vmem:[#allocation21_spill] sm:$0xff] %v4081_v63  ;;  %6942 = vst [vmem:[#allocation22_spill] sm:$0xff] %v4085_v5  ;;  %2901 = vmatpush1.bf16.msra.mxu0 (!%p2830_p9), %v2900_v42  ;;  %v2904_v57 = vpack.c.bf16 (!%p2830_p9), %v497_v55, %v495_v44  ;;  %v3645_v58 = vmov (!%p2830_p9), 0.0   ;;  %502 = vperm.xlu0 (!%p2830_p9), %3148, %v464_v56   ;;  %vm505_vm3 = vcmask (!%p2830_p9), 293888   ;;  %vm598_vm9 = vcmp.lt.s32.totalorder (!%p2830_p9), %v3810_v2, 18 }
  0xb5   : > { %579 = vmatprep.mubr.f32.mxu0 %v3645_v58  ;;  %2903 = vmatprep.subr.bf16.mxu0 %v2902_v43  ;;  %vm6827_vm7 = vcmp.lt.s32.totalorder %v3815_v3, 18  ;;  %v6973_v0 = vmov 0  }
  0xb8   : > { %2905 = vmatpush1.bf16.msra.mxu0 %v2904_v57 }
  0xb9   : > { %2831 = vmatprep.subr.msk.mxu0 %vm490_vm10, %v4085_v5 }
  0xbc   : > { %2832 = vmatpush1.msk.msra.mxu0 %vm490_vm10, %v4081_v63  ;;  %vm597_vm10 = vcmp.ge.s32.totalorder %v3810_v2, 2 }
  0xbd   : > { %2833 = vmatmul.mubr.msk.f32.vlgmr.msra.gmra.mrb[0].mxu0 %vm505_vm3, %v499_v6  ;;  %vm1021_vm3 = vcmask 588800   ;;  %vm4139_vm14 = vmand %vm597_vm10, %vm598_vm9  ;;  %vm6946_vm10 = vcmp.ge.s32.totalorder %v3815_v3, 0 }
  0xbe   : > { %2882 = vmatprep.mubr.msk.f32.mxu1 %vm1021_vm3, %v589_v27  ;;  %vm6819_vm3 = vcmp.ge.s32.totalorder %v3815_v3, 2  ;;  %vm624_vm9 = vmand %vm4139_vm14, %vm6945_vm0  ;;  %vm6950_vm0 = vcmp.lt.s32.totalorder %v3815_v3, 15 }
  0xbf   : > { %vm601_vm8 = vmand %vm4139_vm14, %vm6819_vm3 }
  0xc0   : > { %vm603_vm6 = vmand %vm601_vm8, %vm6827_vm7  ;;  %vm6949_vm8 = vcmp.lt.s32.totalorder %v3815_v3, 16 }
  0xc1   : > { %vm646_vm13 = vmand %vm4139_vm14, %vm6946_vm10  ;;  %v604_v39 = vsel %vm603_vm6, 1, %v6840_v1  ;;  %vm6951_vm10 = vcmp.ge.s32.totalorder %v3815_v3, 2  ;;  %vm6952_vm6 = vcmp.lt.s32.totalorder %v3815_v3, 18 }
  0xc2   : > { %vm668_vm3 = vmand %vm4139_vm14, %vm6947_vm5  ;;  %v612_v43 = vrot.slane %v604_v39, %v3847_v8  ;;  %v608_v44 = vrot.slane %v604_v39, %v3845_v7 }
  0xc3   : > { %vm625_vm11 = vmand %vm624_vm9, %vm6948_vm4  ;;  %vm6839_vm4 = vcmp.lt.s32.totalorder %v3815_v3, 14  ;;  %vm621_vm9 = vcmp.lt.s32.totalorder %v3858_v12, 33 }
  0xc4   : > { %vm647_vm7 = vmand %vm646_vm13, %vm6949_vm8  ;;  %v626_v40 = vsel %vm625_vm11, 1, %v6840_v1  ;;  %vm4207_vm8 = vcmp.eq.s32.totalorder %v608_v44, 1 }
  0xc5   : > { %vm669_vm12 = vmand %vm668_vm3, %vm6950_vm0  ;;  %v648_v41 = vsel %vm647_vm7, 1, %v6840_v1  ;;  %v634_v55 = vrot.slane %v626_v40, %v3847_v8  ;;  %v630_v56 = vrot.slane %v626_v40, %v3845_v7  ;;  %vm594_vm7 = vcmp.lt.s32.totalorder %v3858_v12, 34 }
  0xc6   : > { %vm714_vm15 = vmand %vm3819_vm2, %vm6951_vm10  ;;  %v670_v42 = vsel %vm669_vm12, 1, %v6840_v1  ;;  %v656_v57 = vrot.slane %v648_v41, %v3847_v8  ;;  %v652_v6 = vrot.slane %v648_v41, %v3845_v7  ;;  %vm4202_vm3 = vcmp.eq.s32.totalorder %v612_v43, 1 }
  0xc7   : > { %vm691_vm5 = vmand %vm4139_vm14, %vm6838_vm1  ;;  %v678_v58 = vrot.slane %v670_v42, %v3847_v8  ;;  %vm4212_vm0 = vcmp.eq.s32.totalorder %v634_v55, 1  ;;  %vm4216_vm10 = vcmp.eq.s32.totalorder %v630_v56, 1 }
  0xc8   : > { %vm715_vm13 = vmand %vm714_vm15, %vm6952_vm6  ;;  %vm4236_vm14 = vcmp.eq.s32.totalorder %v652_v6, 1 }
  0xc9   : > { %vm693_vm11 = vmand %vm691_vm5, %vm6839_vm4  ;;  %vm4220_vm5 = vcmp.eq.s32.totalorder %v656_v57, 1 }
  0xca   : > { %vm760_vm12 = vmand %vm3819_vm2, %vm6838_vm1  ;;  %vm4232_vm1 = vcmp.eq.s32.totalorder %v678_v58, 1 }
  0xcb   : > { %vm4227_vm6 = vmand %vm760_vm12, %vm6839_vm4  ;;  %vm6970_vm12 = vnez %v6890_v9 }
  0xcc   : > { %v762_v4 = vsel %vm4227_vm6, 1, %v6973_v0 }
 0x133   : > { %v503_v11 = vpop.permute.xlu0 %502 }
 0x190   : > { %v581_v13 = vpop.f32.mrb[0].mxu0 }
 0x191   : > { %v582_v14 = vadd.f32 %v581_v13, %v503_v11  ;;  %v583_v15 = vpop.f32.mrb[1].mxu0 }
 0x192   : > { %v584_v20 = vadd.f32 %v583_v15, %v503_v11  ;;  %v716_v11 = vsel %vm715_vm13, 1, %v6840_v1  ;;  %v674_v15 = vrot.slane %v670_v42, %v3845_v7 }
 0x193   : > { %v4123_v23 = vmax.f32 %v582_v14, 0.0  ;;  %v724_v43 = vrot.slane %v716_v11, %v3847_v8  ;;  %v720_v44 = vrot.slane %v716_v11, %v3845_v7 }
 0x194   : > { %v4125_v24 = vmax.f32 %v584_v20, 0.0  ;;  %vm4250_vm15 = vcmp.eq.s32.totalorder %v674_v15, 1 }
 0x195   : > { %vm4277_vm2 = vcmp.eq.s32.totalorder %v724_v43, 1 }
 0x196   : > { %v3154_v26 = vpack.i.bf16 %v4125_v24, %v4123_v23 }
 0x198   : > { %3155 = vrot.lane.b32.xlu1 %v3154_v26, %s3647_s10  ;;  %3150 = vrot.lane.b32.xlu0 %v3154_v26, %s3648_s11  ;;  %s3668_s10 = smov 96  }
 0x19c   : > { %3160 = vrot.lane.b32.xlu1 %v3154_v26, %s3649_s12  ;;  %3165 = vrot.lane.b32.xlu0 %v3154_v26, %s3650_s13  ;;  %s3669_s13 = smov 95  }
 0x1a0   : > { %3170 = vrot.lane.b32.xlu1 %v3154_v26, %s3651_s14  ;;  %3175 = vrot.lane.b32.xlu0 %v3154_v26, %s3652_s16  ;;  %s3670_s14 = smov 94  }
 0x1a4   : > { %3180 = vrot.lane.b32.xlu1 %v3154_v26, %s3653_s17  ;;  %3185 = vrot.lane.b32.xlu0 %v3154_v26, %s3654_s18 }
 0x1a8   : > { %3190 = vrot.lane.b32.xlu1 %v3154_v26, %s3655_s19  ;;  %3195 = vrot.lane.b32.xlu0 %v3154_v26, %s3656_s20 }
 0x1ac   : > { %3200 = vrot.lane.b32.xlu1 %v3154_v26, %s3657_s22  ;;  %3205 = vrot.lane.b32.xlu0 %v3154_v26, %s3658_s23 }
 0x1b0   : > { %3210 = vrot.lane.b32.xlu1 %v3154_v26, %s3659_s24  ;;  %3215 = vrot.lane.b32.xlu0 %v3154_v26, %s3660_s25 }
 0x1b4   : > { %3220 = vrot.lane.b32.xlu1 %v3154_v26, %s3661_s26  ;;  %3225 = vrot.lane.b32.xlu0 %v3154_v26, %s3662_s27 }
 0x1b8   : > { %3230 = vrot.lane.b32.xlu1 %v3154_v26, %s3663_s28  ;;  %3235 = vrot.lane.b32.xlu0 %v3154_v26, %s3664_s0 }
 0x1bc   : > { %3240 = vrot.lane.b32.xlu1 %v3154_v26, %s3665_s30  ;;  %3245 = vrot.lane.b32.xlu0 %v3154_v26, %s3666_s8 }
 0x1c0   : > { %3250 = vrot.lane.b32.xlu1 %v3154_v26, %s3667_s9  ;;  %3255 = vrot.lane.b32.xlu0 %v3154_v26, %s3668_s10 }
 0x1c4   : > { %3260 = vrot.lane.b32.xlu1 %v3154_v26, %s3669_s13  ;;  %994 = vrot.lane.b32.xlu0 %v4123_v23, %s3670_s14 }
 0x1c8   : > { %996 = vrot.lane.b32.xlu1 %v4125_v24, %s3670_s14  ;;  %1018 = vperm.xlu0 %3148, %v465_v28   ;;  %v694_v28 = vsel %vm693_vm11, 1, %v6840_v1  ;;  %vm6969_vm11 = vcmp.ge.s32.totalorder %v3815_v3, 2 }
 0x1c9   : > { %vm782_vm4 = vmand %vm6970_vm12, %vm6969_vm11  ;;  %v702_v11 = vrot.slane %v694_v28, %v3847_v8  ;;  %v698_v1 = vrot.slane %v694_v28, %v3845_v7  ;;  %vm6974_vm11 = vcmp.lt.s32.totalorder %v3815_v3, 18 }
 0x1ca   : > { %vm4269_vm13 = vmand %vm782_vm4, %vm6974_vm11 }
 0x1cb   : > { %vm6981_vm4 = vmpackc.low %vm4212_vm0, %vm4202_vm3  ;;  %vm4294_vm11 = vcmp.eq.s32.totalorder %v702_v11, 1  ;;  %vm4298_vm6 = vcmp.eq.s32.totalorder %v698_v1, 1  ;;  %v784_v13 = vsel %vm4269_vm13, 1, %v6973_v0  ;;  %vm6986_vm3 = vcmp.lt.s32.totalorder %v3858_v12, 32 }
 0x1cc   : > { %vm6987_vm0 = vmmov %vm6986_vm3  ;;  %v792_v28 = vrot.slane %v784_v13, %v3847_v8  ;;  %vm7004_vm13 = vcmp.ge.s32.totalorder %v3815_v3, 4294967294 }
 0x1cd   : > { %vm6990_vm12 = vmpackc.low %vm4216_vm10, %vm4207_vm8  ;;  %vm7005_vm8 = vnez %v6890_v9 }
 0x20a   : > { %v3156_v39 = vpop.permute.xlu1 %3155  ;;  %v3151_v40 = vpop.permute.xlu0 %3150 }
 0x20b   : > { %v3158_v55 = vunpack.i.h.bf16 %v3156_v39  ;;  %v3157_v56 = vunpack.i.l.bf16 %v3156_v39  ;;  %v3153_v57 = vunpack.i.h.bf16 %v3151_v40  ;;  %v3152_v58 = vunpack.i.l.bf16 %v3151_v40 }
 0x20d   : > { %v595_v39 = vsel %vm594_vm7, %v3152_v58, %v3153_v57  ;;  %v622_v40 = vsel %vm621_vm9, %v3157_v56, %v3158_v55  ;;  %v596_v15 = vsel %vm594_vm7, %v3153_v57, %v3152_v58  ;;  %v623_v5 = vsel %vm621_vm9, %v3158_v55, %v3157_v56 }
 0x20e   : > { %v3161_v29 = vpop.permute.xlu1 %3160  ;;  %v3166_v63 = vpop.permute.xlu0 %3165  ;;  %v2906_v17 = vpack.c.bf16 %v622_v40, %v595_v39  ;;  %v2909_v16 = vpack.c.bf16 %v623_v5, %v596_v15  ;;  %vm4281_vm7 = vcmp.eq.s32.totalorder %v720_v44, 1  ;;  %v6979_v55 = vmov 0 }
 0x20f   : > { %v6980_v55 = vsel %vm4281_vm7, 4294967295, %v6979_v55  ;;  %v3163_v56 = vunpack.i.h.bf16 %v3161_v29  ;;  %v3162_v58 = vunpack.i.l.bf16 %v3161_v29  ;;  %v3168_v60 = vunpack.i.h.bf16 %v3166_v63  ;;  %vm6995_vm7 = vmpackc.low %vm4232_vm1, %vm4220_vm5 }
 0x210   : > { %v3167_v59 = vunpack.i.l.bf16 %v3166_v63  ;;  %2908 = vmatprep.subr.msk.bf16.mxu1 %vm6981_vm4, %v2906_v17  ;;  %v770_v63 = vrot.slane %v762_v4, %v3847_v8  ;;  %vm6988_vm4 = vcmp.lt.s32.totalorder %v3858_v12, 31  ;;  %vm6996_vm10 = vnez %v6980_v55 }
 0x211   : > { %v644_v17 = vsel %vm6986_vm3, %v3162_v58, %v3163_v56  ;;  %v645_v20 = vsel %vm6987_vm0, %v3163_v56, %v3162_v58  ;;  %vm6989_vm9 = vmmov %vm6988_vm4  ;;  %2911 = vmatpush1.bf16.msk.msra.mxu1 %vm6990_vm12, %v2909_v16  ;;  %vm6992_vm0 = vnez %v6895_v22  ;;  %v788_v29 = vrot.slane %v784_v13, %v3845_v7 }
 0x212   : > { %v666_v44 = vsel %vm6988_vm4, %v3167_v59, %v3168_v60  ;;  %v667_v1 = vsel %vm6989_vm9, %v3168_v60, %v3167_v59  ;;  %v3171_v40 = vpop.permute.xlu1 %3170  ;;  %v3176_v59 = vpop.permute.xlu0 %3175  ;;  %v766_v60 = vrot.slane %v762_v4, %v3845_v7  ;;  %vm4346_vm9 = vcmp.eq.s32.totalorder %v770_v63, 1 }
 0x213   : > { %v2912_v11 = vpack.c.bf16 %v666_v44, %v644_v17  ;;  %v2915_v39 = vpack.c.bf16 %v667_v1, %v645_v20  ;;  %v3173_v16 = vunpack.i.h.bf16 %v3171_v40  ;;  %v3172_v14 = vunpack.i.l.bf16 %v3171_v40 }
 0x214   : > { %v3178_v26 = vunpack.i.h.bf16 %v3176_v59  ;;  %v3177_v15 = vunpack.i.l.bf16 %v3176_v59  ;;  %vm6999_vm12 = vcmp.lt.s32.totalorder %v3858_v12, 30  ;;  %vm7001_vm1 = vcmp.lt.s32.totalorder %v3858_v12, 18 }
 0x215   : > { %2914 = vmatprep.subr.msk.bf16.mxu1 %vm6995_vm7, %v2912_v11  ;;  %v688_v41 = vsel %vm6999_vm12, %v3172_v14, %v3173_v16  ;;  %vm7000_vm4 = vmmov %vm6999_vm12  ;;  %vm7020_vm3 = vcmp.lt.s32.totalorder %v3815_v3, 14 }
 0x216   : > { %v689_v27 = vsel %vm7000_vm4, %v3173_v16, %v3172_v14  ;;  %v712_v56 = vsel %vm7001_vm1, %v3177_v15, %v3178_v26  ;;  %vm7002_vm5 = vmmov %vm7001_vm1  ;;  %v3181_v20 = vpop.permute.xlu1 %3180  ;;  %v3186_v44 = vpop.permute.xlu0 %3185  ;;  %vm4373_vm4 = vcmp.eq.s32.totalorder %v766_v60, 1  ;;  %vm7010_vm1 = vcmp.ge.s32.totalorder %v3815_v3, 2 }
 0x217   : > { %v713_v58 = vsel %vm7002_vm5, %v3178_v26, %v3177_v15  ;;  %vm7003_vm7 = vmpackc.low %vm4250_vm15, %vm4236_vm14  ;;  %v2918_v13 = vpack.c.bf16 %v712_v56, %v688_v41  ;;  %vm7011_vm15 = vnez %v6897_v25  ;;  %v3183_v6 = vunpack.i.h.bf16 %v3181_v20 }
 0x218   : > { %2917 = vmatpush1.bf16.msk.msra.mxu1 %vm7003_vm7, %v2915_v39  ;;  %vm4369_vm12 = vmand %vm7005_vm8, %vm7004_vm13  ;;  %v2921_v17 = vpack.c.bf16 %v713_v58, %v689_v27  ;;  %v3182_v11 = vunpack.i.l.bf16 %v3181_v20  ;;  %v3188_v39 = vunpack.i.h.bf16 %v3186_v44  ;;  %v3187_v40 = vunpack.i.l.bf16 %v3186_v44 }
 0x219   : > { %vm4381_vm14 = vmand %vm7011_vm15, %vm7010_vm1  ;;  %vm4395_vm1 = vcmp.eq.s32.totalorder %v792_v28, 1  ;;  %vm4399_vm15 = vcmp.eq.s32.totalorder %v788_v29, 1  ;;  %vm911_vm13 = vcmp.lt.s32.totalorder %v3810_v2, 14 }
 0x21a   : > { %vm7015_vm5 = vmpackc.low %vm4277_vm2, %vm4294_vm11  ;;  %vm7023_vm2 = vcmp.lt.s32.totalorder %v3858_v12, 17  ;;  %v3191_v29 = vpop.permute.xlu1 %3190  ;;  %v3196_v41 = vpop.permute.xlu0 %3195 }
 0x21b   : > { %2920 = vmatprep.subr.msk.bf16.mxu1 %vm7015_vm5, %v2918_v13  ;;  %vm4407_vm8 = vmand %vm4369_vm12, %vm7020_vm3  ;;  %v733_v5 = vsel %vm7023_vm2, %v3182_v11, %v3183_v6  ;;  %vm7025_vm5 = vcmp.lt.s32.totalorder %v3858_v12, 16  ;;  %vm7028_vm12 = vcmp.lt.s32.totalorder %v3815_v3, 18  ;;  %v3193_v55 = vunpack.i.h.bf16 %v3191_v29 }
 0x21c   : > { %vm7024_vm11 = vmmov %vm7023_vm2  ;;  %v741_v14 = vsel %vm7025_vm5, %v3187_v40, %v3188_v39  ;;  %v3192_v43 = vunpack.i.l.bf16 %v3191_v29  ;;  %v3198_v27 = vunpack.i.h.bf16 %v3196_v41  ;;  %v3197_v56 = vunpack.i.l.bf16 %v3196_v41 }
 0x21d   : > { %v734_v16 = vsel %vm7024_vm11, %v3183_v6, %v3182_v11  ;;  %vm7026_vm7 = vmmov %vm7025_vm5  ;;  %v2924_v15 = vpack.c.bf16 %v741_v14, %v733_v5  ;;  %vm7029_vm11 = vnez %v6902_v33  ;;  %v822_v58 = vsel %vm4407_vm8, 1, %v6973_v0 }
 0x21e   : > { %v742_v26 = vsel %vm7026_vm7, %v3188_v39, %v3187_v40  ;;  %vm7027_vm3 = vmpackc.low %vm6996_vm10, %vm4298_vm6  ;;  %vm7030_vm6 = vnez %v6913_v51  ;;  %vm7034_vm7 = vnez %v6897_v25  ;;  %vm7037_vm10 = vcmp.lt.s32.totalorder %v3858_v12, 15  ;;  %v3201_v40 = vpop.permute.xlu1 %3200  ;;  %v3206_v57 = vpop.permute.xlu0 %3205 }
 0x21f   : > { %2923 = vmatpush1.bf16.msk.msra.mxu1 %vm7027_vm3, %v2921_v17  ;;  %vm843_vm2 = vmand %vm4381_vm14, %vm7028_vm12  ;;  %v2927_v28 = vpack.c.bf16 %v742_v26, %v734_v16  ;;  %vm7031_vm14 = vnez %v6908_v36  ;;  %vm7033_vm12 = vcmp.ge.s32.totalorder %v3815_v3, 4294967294  ;;  %v749_v17 = vsel %vm7037_vm10, %v3192_v43, %v3193_v55 }
 0x220   : > { %vm7032_vm3 = vmpackc.low %vm6992_vm0, %vm7031_vm14  ;;  %v844_v63 = vsel %vm843_vm2, 1, %v6973_v0  ;;  %vm7039_vm14 = vcmp.lt.s32.totalorder %v3858_v12, 14  ;;  %vm7041_vm2 = vnez %v6893_v21  ;;  %v3203_v5 = vunpack.i.h.bf16 %v3201_v40 }
 0x221   : > { %2926 = vmatprep.subr.msk.bf16.mxu1 %vm7032_vm3, %v2924_v15  ;;  %vm4451_vm5 = vmand %vm7034_vm7, %vm7033_vm12  ;;  %v758_v44 = vsel %vm7039_vm14, %v3197_v56, %v3198_v27  ;;  %vm7042_vm3 = vnez %v6906_v35  ;;  %vm7044_vm12 = vcmp.ge.s32.totalorder %v3810_v2, 4294967294  ;;  %v3202_v16 = vunpack.i.l.bf16 %v3201_v40 }
 0x222   : > { %vm7038_vm0 = vmmov %vm7037_vm10  ;;  %v2930_v11 = vpack.c.bf16 %v758_v44, %v749_v17  ;;  %v3208_v14 = vunpack.i.h.bf16 %v3206_v57  ;;  %v3207_v26 = vunpack.i.l.bf16 %v3206_v57  ;;  %v852_v29 = vrot.slane %v844_v63, %v3847_v8  ;;  %v3216_v44 = vpop.permute.xlu0 %3215 }
 0x223   : > { %v750_v20 = vsel %vm7038_vm0, %v3193_v55, %v3192_v43  ;;  %vm7040_vm8 = vmmov %vm7039_vm14  ;;  %vm779_vm0 = vcmp.lt.s32.totalorder %v3858_v12, 2  ;;  %vm7047_vm14 = vnez %v6911_v50  ;;  %v826_v41 = vrot.slane %v822_v58, %v3845_v7 }
 0x224   : > { %v759_v42 = vsel %vm7040_vm8, %v3198_v27, %v3197_v56  ;;  %vm7043_vm7 = vmpackc.low %vm7041_vm2, %vm7042_vm3  ;;  %vm7051_vm3 = vnez %v6904_v34  ;;  %v780_v43 = vsel %vm779_vm0, %v3202_v16, %v3203_v5  ;;  %v781_v4 = vsel %vm779_vm0, %v3203_v5, %v3202_v16 }
 0x225   : > { %2929 = vmatpush1.bf16.msk.msra.mxu1 %vm7043_vm7, %v2927_v28  ;;  %vm4472_vm10 = vmand %vm7044_vm12, %vm911_vm13  ;;  %v2933_v39 = vpack.c.bf16 %v759_v42, %v750_v20  ;;  %vm7048_vm13 = vcmp.lt.s32.totalorder %v3815_v3, 14  ;;  %v830_v28 = vrot.slane %v822_v58, %v3847_v8  ;;  %vm7053_vm12 = vcmp.ge.s32.totalorder %v3815_v3, 2  ;;  %v3211_v20 = vpop.permute.xlu1 %3210 }
 0x226   : > { %vm2940_vm8 = vmpackc.low %vm7047_vm14, %vm4399_vm15  ;;  %vm3671_vm0 = vmmov 1   ;;  %v848_v42 = vrot.slane %v844_v63, %v3845_v7  ;;  %v3218_v15 = vunpack.i.h.bf16 %v3216_v44 }
 0x227   : > { %vm4485_vm2 = vmand %vm4451_vm5, %vm7048_vm13  ;;  %vm7056_vm13 = vcmp.lt.s32.totalorder %v3858_v12, 1 }
 0x228   : > { %vm7052_vm7 = vmpackc.low %vm4346_vm9, %vm7051_vm3  ;;  %v801_v27 = vsel %vm7056_vm13, %v3207_v26, %v3208_v14  ;;  %v890_v40 = vsel %vm4485_vm2, 1, %v6973_v0  ;;  %vm4552_vm2 = vcmp.eq.s32.totalorder %v852_v29, 1  ;;  %vm4594_vm15 = vcmp.eq.s32.totalorder %v848_v42, 1 }
 0x229   : > { %2932 = vmatprep.subr.msk.bf16.mxu1 %vm7052_vm7, %v2930_v11  ;;  %vm4501_vm5 = vmand %vm4472_vm10, %vm7053_vm12  ;;  %vm7059_vm7 = vcmp.ge.s32.totalorder %v3815_v3, 1  ;;  %v2936_v13 = vpack.c.bf16 %v801_v27, %v780_v43  ;;  %v3213_v11 = vunpack.i.h.bf16 %v3211_v20  ;;  %v3221_v43 = vpop.permute.xlu1 %3220 }
 0x22a   : > { %vm7057_vm9 = vmmov %vm7056_vm13  ;;  %vm7062_vm13 = vnez %v6921_v62  ;;  %v3223_v58 = vunpack.i.h.bf16 %v3221_v43 }
 0x22b   : > { %v802_v56 = vsel %vm7057_vm9, %v3208_v14, %v3207_v26  ;;  %vm7058_vm3 = vmpackc.low %vm4373_vm4, %vm7029_vm11  ;;  %vm7065_vm11 = vcmp.lt.s32.totalorder %v3815_v3, 18  ;;  %vm4548_vm4 = vcmp.eq.s32.totalorder %v830_v28, 1  ;;  %v3217_v28 = vunpack.i.l.bf16 %v3216_v44 }
 0x22c   : > { %2935 = vmatpush1.bf16.msk.msra.mxu1 %vm7058_vm3, %v2933_v39  ;;  %vm4518_vm12 = vmand %vm4472_vm10, %vm7059_vm7  ;;  %v2939_v17 = vpack.c.bf16 %v802_v56, %v781_v4  ;;  %v3212_v39 = vunpack.i.l.bf16 %v3211_v20  ;;  %v3226_v4 = vpop.permute.xlu0 %3225  ;;  %v898_v56 = vrot.slane %v890_v40, %v3847_v8 }
 0x22d   : > { %vm4525_vm9 = vmpackc.low %vm7062_vm13, %vm3671_vm0  ;;  %vm7080_vm13 = vcmp.ge.s32.totalorder %v3815_v3, 0  ;;  %v3227_v20 = vunpack.i.l.bf16 %v3226_v4 }
 0x22e   : > { %vm4538_vm3 = vmand %vm4501_vm5, %vm7065_vm11  ;;  %vm4556_vm5 = vcmp.eq.s32.totalorder %v826_v41, 1  ;;  %vm7075_vm11 = vcmp.lt.s32.totalorder %v3815_v3, 17 }
 0x22f   : > { %vm7068_vm7 = vmpackc.low %vm7030_vm6, %vm4395_vm1  ;;  %vm7078_vm6 = vcmp.lt.s32.totalorder %v3858_v12, 127 }
 0x230   : > { %2938 = vmatprep.subr.msk.bf16.mxu1 %vm7068_vm7, %v2936_v13  ;;  %vm4564_vm1 = vmand %vm4518_vm12, %vm7075_vm11  ;;  %v809_v14 = vsel %vm7078_vm6, %v3212_v39, %v3213_v11  ;;  %vm7083_vm11 = vnez %v6919_v61  ;;  %v3222_v13 = vunpack.i.l.bf16 %v3221_v43 }
 0x231   : > { %vm7079_vm7 = vmmov %vm7078_vm6  ;;  %2941 = vmatpush1.bf16.msk.msra.mxu1 %vm2940_vm8, %v2939_v17  ;;  %v2945_v55 = vpack.c.bf16 %v809_v14, %v4123_v23  ;;  %v894_v23 = vrot.slane %v890_v40, %v3845_v7  ;;  %v3228_v17 = vunpack.i.h.bf16 %v3226_v4  ;;  %v4613_v44 = vsel %vm4564_vm1, 1, %v6973_v0 }
 0x232   : > { %v810_v26 = vsel %vm7079_vm7, %v3213_v11, %v3212_v39  ;;  %vm4581_vm12 = vmand %vm4472_vm10, %vm7080_vm13  ;;  %vm7093_vm7 = vcmp.lt.s32.totalorder %v3858_v12, 114 }
 0x233   : > { %v2942_v41 = vpack.c.bf16 %v810_v26, %v4125_v24  ;;  %vm4590_vm6 = vmpackc.low %vm7083_vm11, %vm3671_vm0  ;;  %v915_v24 = vsel %vm4538_vm3, 1, %v6973_v0  ;;  %vm7088_vm0 = vcmp.lt.s32.totalorder %v3815_v3, 16  ;;  %vm7091_vm3 = vcmp.lt.s32.totalorder %v3858_v12, 126  ;;  %v3231_v26 = vpop.permute.xlu1 %3230 }
 0x234   : > { %vm2949_vm14 = vmpackc.low %vm4552_vm2, %vm4548_vm4  ;;  %v818_v11 = vsel %vm7091_vm3, %v3217_v28, %v3218_v15  ;;  %v840_v39 = vsel %vm7093_vm7, %v3222_v13, %v3223_v58  ;;  %vm7095_vm11 = vcmp.ge.s32.totalorder %v3815_v3, 4294967295  ;;  %v919_v29 = vrot.slane %v915_v24, %v3845_v7 }
 0x235   : > { %2944 = vmatprep.subr.msk.bf16.mxu1 %vm4525_vm9, %v2942_v41  ;;  %vm4619_vm13 = vmand %vm4581_vm12, %vm7088_vm0  ;;  %v2951_v14 = vpack.c.bf16 %v840_v39, %v818_v11  ;;  %v3233_v41 = vunpack.i.h.bf16 %v3231_v26  ;;  %vm4657_vm12 = vcmp.eq.s32.totalorder %v894_v23, 1  ;;  %vm7111_vm2 = vnez %v6926_v18 }
 0x236   : > { %vm7092_vm9 = vmmov %vm7091_vm3  ;;  %2947 = vmatpush1.bf16.msk.msra.mxu1 %vm4590_vm6, %v2945_v55  ;;  %v3232_v55 = vunpack.i.l.bf16 %v3231_v26  ;;  %vm7104_vm6 = vcmp.lt.s32.totalorder %v3858_v12, 113 }
 0x237   : > { %v819_v1 = vsel %vm7092_vm9, %v3218_v15, %v3217_v28  ;;  %vm7094_vm1 = vmmov %vm7093_vm7  ;;  %v3236_v15 = vpop.permute.xlu0 %3235  ;;  %v923_v28 = vrot.slane %v915_v24, %v3847_v8  ;;  %vm7098_vm9 = vnez %v6929_v19  ;;  %vm7099_vm7 = vnez %v6934_v10  ;;  %v3241_v11 = vpop.permute.xlu1 %3240 }
 0x238   : > { %v841_v40 = vsel %vm7094_vm1, %v3223_v58, %v3222_v13  ;;  %vm4638_vm0 = vmand %vm4472_vm10, %vm7095_vm11  ;;  %vm4653_vm11 = vcmp.eq.s32.totalorder %v898_v56, 1  ;;  %v861_v60 = vsel %vm7104_vm6, %v3227_v20, %v3228_v17  ;;  %v945_v56 = vrot.slane %v4613_v44, %v3847_v8 }
 0x239   : > { %v2948_v59 = vpack.c.bf16 %v841_v40, %v819_v1  ;;  %vm2952_vm3 = vmpackc.low %vm4594_vm15, %vm4556_vm5  ;;  %v959_v13 = vsel %vm4619_vm13, 1, %v6973_v0  ;;  %vm7106_vm1 = vcmp.lt.s32.totalorder %v3815_v3, 15  ;;  %v3238_v24 = vunpack.i.h.bf16 %v3236_v15 }
 0x23a   : > { %vm7105_vm8 = vmmov %vm7104_vm6  ;;  %vm7117_vm5 = vcmp.ge.s32.totalorder %v3815_v3, 4294967294  ;;  %v3243_v40 = vunpack.i.h.bf16 %v3241_v11  ;;  %v3242_v57 = vunpack.i.l.bf16 %v3241_v11 }
 0x23b   : > { %v862_v58 = vsel %vm7105_vm8, %v3228_v17, %v3227_v20  ;;  %2950 = vmatprep.subr.msk.bf16.mxu1 %vm2949_vm14, %v2948_v59  ;;  %vm4679_vm6 = vmand %vm4638_vm0, %vm7106_vm1  ;;  %vm7109_vm8 = vcmp.lt.s32.totalorder %v3858_v12, 112  ;;  %v3237_v17 = vunpack.i.l.bf16 %v3236_v15  ;;  %vm7112_vm14 = vnez %v6932_v38  ;;  %v3246_v1 = vpop.permute.xlu0 %3245  ;;  %v3251_v23 = vpop.permute.xlu1 %3250 }
 0x23c   : > { %v869_v63 = vsel %vm7109_vm8, %v3232_v55, %v3233_v41  ;;  %vm7110_vm4 = vmmov %vm7109_vm8  ;;  %2953 = vmatpush1.bf16.msk.msra.mxu1 %vm2952_vm3, %v2951_v14  ;;  %vm4698_vm8 = vcmp.eq.s32.totalorder %v923_v28, 1  ;;  %v941_v59 = vrot.slane %v4613_v44, %v3845_v7  ;;  %v981_v14 = vsel %vm4679_vm6, 1, %v6973_v0 }
 0x23d   : > { %v870_v5 = vsel %vm7110_vm4, %v3233_v41, %v3232_v55  ;;  %vm2958_vm13 = vmpackc.low %vm7112_vm14, %vm7111_vm2  ;;  %v2957_v42 = vpack.c.bf16 %v869_v63, %v861_v60  ;;  %vm4702_vm4 = vcmp.eq.s32.totalorder %v919_v29, 1  ;;  %v3248_v26 = vunpack.i.h.bf16 %v3246_v1 }
 0x23e   : > { %v2954_v20 = vpack.c.bf16 %v870_v5, %v862_v58  ;;  %vm4710_vm15 = vmand %vm4472_vm10, %vm7117_vm5  ;;  %v3247_v15 = vunpack.i.l.bf16 %v3246_v1  ;;  %vm7121_vm10 = vnez %v6940_v54  ;;  %vm4728_vm1 = vcmp.eq.s32.totalorder %v945_v56, 1 }
 0x23f   : > { %vm7120_vm3 = vmpackc.low %vm7099_vm7, %vm7098_vm9  ;;  %v967_v44 = vrot.slane %v959_v13, %v3847_v8  ;;  %vm7124_vm6 = vcmp.lt.s32.totalorder %v3858_v12, 111  ;;  %vm7126_vm9 = vcmp.lt.s32.totalorder %v3858_v12, 110  ;;  %v3256_v63 = vpop.permute.xlu0 %3255  ;;  %v989_v5 = vrot.slane %v981_v14, %v3847_v8 }
 0x240   : > { %2956 = vmatprep.subr.msk.bf16.mxu1 %vm7120_vm3, %v2954_v20  ;;  %vm2961_vm5 = vmpackc.low %vm4653_vm11, %vm7121_vm10  ;;  %v877_v28 = vsel %vm7124_vm6, %v3237_v17, %v3238_v24  ;;  %v886_v41 = vsel %vm7126_vm9, %v3242_v57, %v3243_v40  ;;  %vm7128_vm3 = vcmp.lt.s32.totalorder %v3815_v3, 14  ;;  %v3252_v20 = vunpack.i.l.bf16 %v3251_v23 }
 0x241   : > { %vm7125_vm0 = vmmov %vm7124_vm6  ;;  %2959 = vmatpush1.bf16.msk.msra.mxu1 %vm2958_vm13, %v2957_v42  ;;  %v2963_v56 = vpack.c.bf16 %v886_v41, %v877_v28  ;;  %vm4760_vm2 = vcmp.eq.s32.totalorder %v941_v59, 1  ;;  %v985_v11 = vrot.slane %v981_v14, %v3845_v7  ;;  %vm7134_vm14 = vcmp.lt.s32.totalorder %v3858_v12, 98 }
 0x242   : > { %v878_v29 = vsel %vm7125_vm0, %v3238_v24, %v3237_v17  ;;  %vm7127_vm7 = vmmov %vm7126_vm9  ;;  %vm7131_vm0 = vnez %v6938_v53  ;;  %v963_v24 = vrot.slane %v959_v13, %v3845_v7  ;;  %v3253_v17 = vunpack.i.h.bf16 %v3251_v23 }
 0x243   : > { %v887_v55 = vsel %vm7127_vm7, %v3243_v40, %v3242_v57  ;;  %vm4750_vm6 = vmand %vm4710_vm15, %vm7128_vm3  ;;  %v908_v1 = vsel %vm7134_vm14, %v3247_v15, %v3248_v26  ;;  %vm4774_vm15 = vcmp.eq.s32.totalorder %v967_v44, 1  ;;  %vm7138_vm7 = vcmp.lt.s32.totalorder %v3858_v12, 97 }
 0x244   : > { %v2960_v58 = vpack.c.bf16 %v887_v55, %v878_v29  ;;  %vm2964_vm9 = vmpackc.low %vm4657_vm12, %vm7131_vm0  ;;  %v1003_v40 = vsel %vm4750_vm6, 1, %v6973_v0  ;;  %v933_v57 = vsel %vm7138_vm7, %v3252_v20, %v3253_v17  ;;  %v3258_v14 = vunpack.i.h.bf16 %v3256_v63 }
 0x245   : > { %vm7135_vm13 = vmmov %vm7134_vm14  ;;  %v3257_v43 = vunpack.i.l.bf16 %v3256_v63  ;;  %vm4802_vm6 = vcmp.eq.s32.totalorder %v963_v24, 1  ;;  %vm4806_vm12 = vcmp.eq.s32.totalorder %v985_v11, 1  ;;  %v1011_v29 = vrot.slane %v1003_v40, %v3847_v8 }
 0x246   : > { %v909_v27 = vsel %vm7135_vm13, %v3248_v26, %v3247_v15  ;;  %2962 = vmatprep.subr.msk.bf16.mxu1 %vm2961_vm5, %v2960_v58  ;;  %vm7139_vm3 = vmmov %vm7138_vm7  ;;  %v2969_v26 = vpack.c.bf16 %v933_v57, %v908_v1  ;;  %v3261_v15 = vpop.permute.xlu1 %3260  ;;  %vm4798_vm5 = vcmp.eq.s32.totalorder %v989_v5, 1  ;;  %v1007_v63 = vrot.slane %v1003_v40, %v3845_v7  ;;  %v995_v5 = vpop.permute.xlu0 %994 }
 0x247   : > { %v934_v59 = vsel %vm7139_vm3, %v3253_v17, %v3252_v20  ;;  %2965 = vmatpush1.bf16.msk.msra.mxu1 %vm2964_vm9, %v2963_v56  ;;  %vm2967_vm11 = vmpackc.low %vm4728_vm1, %vm4698_vm8  ;;  %v3263_v39 = vunpack.i.h.bf16 %v3261_v15  ;;  %v3262_v28 = vunpack.i.l.bf16 %v3261_v15  ;;  %vm7146_vm1 = vcmp.lt.s32.totalorder %v3858_v12, 96  ;;  %v588_v17 = vld [vmem:[%s6764_s4] sm:$0xff] }
 0x248   : > { %v2966_v0 = vpack.c.bf16 %v934_v59, %v909_v27  ;;  %vm2970_vm10 = vmpackc.low %vm4760_vm2, %vm4702_vm4  ;;  %v955_v16 = vsel %vm7146_vm1, %v3257_v43, %v3258_v14  ;;  %vm7148_vm4 = vcmp.lt.s32.totalorder %v3858_v12, 95  ;;  %vm998_vm2 = vcmp.lt.s32.totalorder %v3858_v12, 94 }
 0x249   : > { %vm7147_vm8 = vmmov %vm7146_vm1  ;;  %v977_v55 = vsel %vm7148_vm4, %v3262_v28, %v3263_v39  ;;  %vm1013_vm13 = vcmp.eq.s32.totalorder %v1011_v29, 1 }
 0x24a   : > { %2968 = vmatprep.subr.msk.bf16.mxu1 %vm2967_vm11, %v2966_v0  ;;  %v956_v41 = vsel %vm7147_vm8, %v3258_v14, %v3257_v43  ;;  %vm7149_vm0 = vmmov %vm7148_vm4  ;;  %v2975_v56 = vpack.c.bf16 %v977_v55, %v955_v16  ;;  %v997_v23 = vpop.permute.xlu1 %996  ;;  %v1019_v42 = vpop.permute.xlu0 %1018 }
 0x24b   : > { %v978_v60 = vsel %vm7149_vm0, %v3263_v39, %v3262_v28  ;;  %2971 = vmatpush1.bf16.msk.msra.mxu1 %vm2970_vm10, %v2969_v26  ;;  %vm2973_vm9 = vmpackc.low %vm4798_vm5, %vm4774_vm15  ;;  %v1000_v24 = vsel %vm998_vm2, %v997_v23, %v995_v5  ;;  %vm1012_vm15 = vcmp.eq.s32.totalorder %v1007_v63, 1  ;;  %v999_v20 = vsel %vm998_vm2, %v995_v5, %v997_v23 }
 0x24c   : > { %v2972_v58 = vpack.c.bf16 %v978_v60, %v956_v41  ;;  %vm2976_vm14 = vmpackc.low %vm4806_vm12, %vm4802_vm6 }
 0x24e   : > { %2974 = vmatprep.subr.msk.bf16.mxu1 %vm2973_vm9, %v2972_v58 }
 0x24f   : > { %2977 = vmatpush1.bf16.msk.msra.mxu1 %vm2976_vm14, %v2975_v56 }
 0x250   : > { %2880 = vmatprep.subr.msk.mxu1 %vm1013_vm13, %v1000_v24 }
 0x253   : > { %2881 = vmatpush1.msk.msra.mxu1 %vm1012_vm15, %v999_v20 }
 0x254   : > { %1090 = vmatmul.mubr.f32.vlgmr.msra.gmra.mrb[0].mxu1 %v588_v17 }
 0x327   : > { %v1091_v11 = vpop.f32.mrb[0].mxu1 }
 0x328   : > { %v1092_v1 = vadd.f32 %v1091_v11, %v1019_v42  ;;  %v1093_v27 = vpop.f32.mrb[1].mxu1 }
 0x329   : > { %v1094_v13 = vadd.f32 %v1093_v27, %v1019_v42 }
 0x32a   : > { %v1096_v40 = vmax.f32 %v1092_v1, 0.0 }
 0x32b   : > { %v1097_v57 = vmax.f32 %v1094_v13, 0.0 }
 0x32c   : > { %1098 = vst [vmem:[%s3781_s15] sm:$0xff] %v1096_v40 }
 0x32d   : > { %1099 = vst [vmem:[%s3781_s15 + $0x8] sm:$0xff] %v1097_v57 }
 0x32e PF: > { %p2883_p10 = scmp.ne.s32.totalorder %s3799_s21, 1 }
 0x330   : > { %1103 = sbr.rel (%p2883_p10) target bundleno = 1304 (0x518), region = 52 }
 0x337   : > { %v1124_v59 = vmul.f32 2.0, %v3904_v31  ;;  %v1125_v14 = vmul.f32 2.0, %v3908_v32  ;;  %v1130_v43 = vmul.f32 -1.0, %v4037_v30  ;;  %v1131_v0 = vmul.f32 -1.0, %v4041_v37  ;;  %v7150_v6 = vld [vmem:[#allocation13_spill] sm:$0xff]  ;;  %v7151_v16 = vld [vmem:[#allocation14_spill] sm:$0xff] }
 0x338   : > { %v1134_v26 = vmul.f32 -2.0, %v4060_v45  ;;  %v1135_v15 = vmul.f32 -2.0, %v4064_v52  ;;  %v1106_v39 = vmul.f32 -1.0, %v3946_v46  ;;  %v1107_v28 = vmul.f32 -1.0, %v3950_v47  ;;  %v7152_v55 = vld [vmem:[#allocation15_spill] sm:$0xff]  ;;  %v7153_v58 = vld [vmem:[#allocation16_spill] sm:$0xff] }
 0x339   : > { %v1126_v44 = vadd.f32 %v1124_v59, %v3954_v48  ;;  %v1127_v4 = vadd.f32 %v1125_v14, %v3958_v49  ;;  %v1110_v29 = vmul.f32 2.0, %v7150_v6  ;;  %v1111_v41 = vmul.f32 2.0, %v7151_v16  ;;  %v7154_v17 = vld [vmem:[#allocation21_spill] sm:$0xff]  ;;  %v7155_v42 = vld [vmem:[#allocation22_spill] sm:$0xff]  ;;  %s3673_s20 = smov 33   ;;  %s3674_s22 = smov 31  }
 0x33a   : > { %v1114_v60 = vmul.f32 -2.0, %v7152_v55  ;;  %v1115_v56 = vmul.f32 -2.0, %v7153_v58  ;;  %v1108_v5 = vadd.f32 %v1106_v39, %v3954_v48  ;;  %v1109_v24 = vadd.f32 %v1107_v28, %v3958_v49  ;;  %s3675_s23 = smov 32   ;;  %s3676_s24 = smov 34  }
 0x33b   : > { %v1128_v23 = vadd.f32 %v1126_v44, %v3946_v46  ;;  %v1129_v63 = vadd.f32 %v1127_v4, %v3950_v47  ;;  %v1120_v20 = vmul.f32 -1.0, %v7154_v17  ;;  %v1121_v11 = vmul.f32 -1.0, %v7155_v42  ;;  %s3677_s25 = smov 16   ;;  %s3678_s26 = smov 18  }
 0x33c   : > { %v1112_v13 = vadd.f32 %v1110_v29, %v1108_v5  ;;  %v1113_v40 = vadd.f32 %v1111_v41, %v1109_v24  ;;  %v3672_v57 = vmov 0   ;;  %s3679_s27 = smov 17   ;;  %s3680_s28 = smov 30   ;;  %vm1148_vm7 = vcmp.ge.s32.totalorder %v3810_v2, 2 }
 0x33d   : > { %v1132_v1 = vadd.f32 %v1130_v43, %v1128_v23  ;;  %v1133_v27 = vadd.f32 %v1131_v0, %v1129_v63  ;;  %3495 = vset.pattern.permute.xlu1 %v3672_v57  ;;  %3494 = vset.pattern.permute.xlu0 %v3672_v57  ;;  %s3681_s0 = smov 1   ;;  %s3682_s30 = smov 14   ;;  %vm1149_vm3 = vcmp.lt.s32.totalorder %v3810_v2, 18  ;;  %vm6858_vm10 = vcmp.ge.s32.totalorder %v3815_v3, 2  ;;  %v1104_v23 = vld [vmem:[%s6766_s6 + $0x10] sm:$0xff] }
 0x33e   : > { %v1116_v47 = vadd.f32 %v1114_v60, %v1112_v13  ;;  %v1117_v14 = vadd.f32 %v1115_v56, %v1113_v40  ;;  %s3683_s8 = smov 2   ;;  %s3684_s9 = smov 15   ;;  %vm4921_vm11 = vmand %vm1148_vm7, %vm1149_vm3  ;;  %vm7158_vm5 = vcmp.ge.s32.totalorder %v3815_v3, 1  ;;  %vm6856_vm1 = vcmp.lt.s32.totalorder %v3815_v3, 18  ;;  %v1105_v56 = vld [vmem:[%s6766_s6 + $0x18] sm:$0xff] }
 0x33f   : > { %v1136_v46 = vadd.f32 %v1134_v26, %v1132_v1  ;;  %v1137_v59 = vadd.f32 %v1135_v15, %v1133_v27  ;;  %s3685_s10 = smov 114   ;;  %s3686_s11 = smov 127   ;;  %vm1175_vm6 = vmand %vm4921_vm11, %vm7158_vm5  ;;  %vm6857_vm0 = vcmp.ge.s32.totalorder %v3815_v3, 4294967294  ;;  %vm7161_vm9 = vcmp.lt.s32.totalorder %v3815_v3, 17 }
 0x340   : > { %v1118_v44 = vadd.f32 %v1116_v47, %v4037_v30  ;;  %v1119_v43 = vadd.f32 %v1117_v14, %v4041_v37  ;;  %s3687_s12 = smov 126   ;;  %s3688_s13 = smov 110   ;;  %vm1152_vm12 = vmand %vm4921_vm11, %vm6858_vm10  ;;  %v7159_v37 = vld [vmem:[#allocation8_spill] sm:$0xff]  ;;  %vm7164_vm14 = vcmp.ge.s32.totalorder %v3815_v3, 0  ;;  %vm7165_vm15 = vcmp.ge.s32.totalorder %v3815_v3, 4294967295 }
 0x341   : > { %v4857_v48 = vadd.f32 %v1136_v46, %v1120_v20  ;;  %v4859_v49 = vadd.f32 %v1137_v59, %v1121_v11  ;;  %s3689_s14 = smov 112   ;;  %s3690_s16 = smov 111   ;;  %vm7160_vm8 = vnez %v7159_v37  ;;  %vm4945_vm2 = vmand %vm1175_vm6, %vm7161_vm9  ;;  %v3697_v29 = vmov 0.0  }
 0x342   : > { %v4867_v4 = vadd.f32 %v1120_v20, %v1118_v44  ;;  %v4869_v39 = vadd.f32 %v1121_v11, %v1119_v43  ;;  %s3691_s17 = smov 113   ;;  %s3692_s18 = smov 95   ;;  %vm1265_vm4 = vmand %vm7160_vm8, %vm6858_vm10  ;;  %1743 = vmatprep.mubr.f32.mxu0 %v3697_v29  ;;  %2119 = vmatprep.mubr.f32.mxu1 %v3697_v29  ;;  %v7171_v16 = vmov 0  ;;  %v7175_v41 = vmov 0 }
 0x343   : > { %v4865_v0 = vpack.i.bf16 %v4859_v49, %v4857_v48  ;;  %s3693_s19 = smov 97   ;;  %vm1197_vm13 = vmand %vm4921_vm11, %vm7164_vm14  ;;  %v7181_v60 = vmov 0  ;;  %v7185_v58 = vmov 0  ;;  %v1177_v24 = vsel %vm4945_vm2, 1, %v3672_v57 }
 0x344   : > { %v4874_v26 = vpack.i.bf16 %v4869_v39, %v4867_v4  ;;  %vm1219_vm7 = vmand %vm4921_vm11, %vm7165_vm15  ;;  %vm7197_vm2 = vcmp.ge.s32.totalorder %v3815_v3, 4294967295  ;;  %v1185_v11 = vrot.slane %v1177_v24, %v3847_v8  ;;  %v1181_v13 = vrot.slane %v1177_v24, %v3845_v7 }
 0x345   : > { %3275 = vrot.lane.b32.xlu1 %v4865_v0, %s3673_s20  ;;  %vm4960_vm3 = vmand %vm1265_vm4, %vm6856_vm1 }
 0x346   : > { %3265 = vrot.lane.b32.xlu0 %v4874_v26, %s3673_s20  ;;  %s3694_s20 = smov 96   ;;  %vm4966_vm5 = vmand %vm1152_vm12, %vm6856_vm1  ;;  %vm7170_vm12 = vcmp.lt.s32.totalorder %v3815_v3, 16  ;;  %vm7174_vm1 = vcmp.lt.s32.totalorder %v3815_v3, 15  ;;  %v5057_v20 = vsel %vm4960_vm3, 1, %v3672_v57 }
 0x347   : > { %vm1242_vm6 = vmand %vm4921_vm11, %vm6857_vm0  ;;  %vm7173_vm11 = vnez %v6897_v25  ;;  %v5062_v42 = vsel %vm4966_vm5, 1, %v3672_v57 }
 0x348   : > { %vm1311_vm4 = vmand %vm7160_vm8, %vm6857_vm0  ;;  %vm7177_vm8 = vcmp.lt.s32.totalorder %v3815_v3, 14  ;;  %v1163_v47 = vrot.slane %v5062_v42, %v3847_v8  ;;  %v1159_v28 = vrot.slane %v5062_v42, %v3845_v7 }
 0x349   : > { %3280 = vrot.lane.b32.xlu1 %v4865_v0, %s3674_s22  ;;  %vm4982_vm14 = vmand %vm1197_vm13, %vm7170_vm12 }
 0x34a   : > { %3270 = vrot.lane.b32.xlu0 %v4874_v26, %s3674_s22  ;;  %s3695_s22 = smov 98   ;;  %v7172_v16 = vsel %vm4982_vm14, 4294967295, %v7171_v16  ;;  %vm1393_vm15 = vmand %vm7173_vm11, %vm6858_vm10  ;;  %vm7184_vm14 = vcmp.lt.s32.totalorder %v3815_v3, 18 }
 0x34b   : > { %vm4992_vm9 = vmand %vm1219_vm7, %vm7174_vm1  ;;  %vm7183_vm1 = vnez %v6890_v9  ;;  %vm7200_vm5 = vnez %v7172_v16 }
 0x34c   : > { %v7176_v41 = vsel %vm4992_vm9, 4294967295, %v7175_v41  ;;  %vm4999_vm0 = vmand %vm1311_vm4, %vm7177_vm8  ;;  %vm1461_vm4 = vcmp.ge.s32.totalorder %v3810_v2, 4294967294  ;;  %v1199_v27 = vsel %vm7200_vm5, 1, %v3672_v57  ;;  %vm1216_vm5 = vcmp.lt.s32.totalorder %v3858_v12, 31 }
 0x34d   : > { %3290 = vrot.lane.b32.xlu1 %v4874_v26, %s3675_s23  ;;  %vm7180_vm13 = vmmov %vm7177_vm8  ;;  %vm1462_vm8 = vcmp.lt.s32.totalorder %v3810_v2, 14  ;;  %v1207_v15 = vrot.slane %v1199_v27, %v3847_v8 }
 0x34e   : > { %3285 = vrot.lane.b32.xlu0 %v4874_v26, %s3676_s24  ;;  %vm5005_vm12 = vmand %vm1242_vm6, %vm7180_vm13  ;;  %vm7187_vm6 = vcmp.ge.s32.totalorder %v3815_v3, 4294967294 }
 0x34f   : > { %v7182_v60 = vsel %vm5005_vm12, 4294967295, %v7181_v60  ;;  %vm1333_vm7 = vmand %vm7183_vm1, %vm6858_vm10 }
 0x350   : > { %vm5015_vm9 = vmand %vm1393_vm15, %vm7184_vm14  ;;  %vm7188_vm15 = vcmp.lt.s32.totalorder %v3815_v3, 18 }
 0x351   : > { %3300 = vrot.lane.b32.xlu1 %v4865_v0, %s3675_s23  ;;  %s3696_s23 = smov 94   ;;  %v7186_v58 = vsel %vm5015_vm9, 4294967295, %v7185_v58  ;;  %vm1439_vm14 = vmand %vm7173_vm11, %vm7187_vm6  ;;  %vm7193_vm9 = vcmp.lt.s32.totalorder %v3815_v3, 14 }
 0x352   : > { %3295 = vrot.lane.b32.xlu0 %v4865_v0, %s3676_s24  ;;  %vm5033_vm13 = vmand %vm1333_vm7, %vm7188_vm15  ;;  %vm7204_vm15 = vcmp.lt.s32.totalorder %v3815_v3, 15 }
 0x353   : > { %vm5037_vm10 = vmand %vm1461_vm4, %vm1462_vm8  ;;  %vm7199_vm4 = vcmp.ge.s32.totalorder %v3815_v3, 1  ;;  %vm7201_vm8 = vcmp.lt.s32.totalorder %v3815_v3, 14  ;;  %v5146_v55 = vsel %vm5033_vm13, 1, %v3672_v57 }
 0x354   : > { %vm5046_vm12 = vmand %vm1439_vm14, %vm7193_vm9  ;;  %vm1172_vm14 = vcmp.lt.s32.totalorder %v3858_v12, 33 }
 0x355   : > { %3310 = vrot.lane.b32.xlu1 %v4874_v26, %s3677_s25  ;;  %vm7196_vm11 = vmmov %vm7187_vm6 }
 0x356   : > { %3305 = vrot.lane.b32.xlu0 %v4874_v26, %s3678_s26  ;;  %vm1371_vm7 = vmand %vm7183_vm1, %vm7196_vm11  ;;  %vm7198_vm1 = vnez %v7176_v41  ;;  %v1203_v41 = vrot.slane %v1199_v27, %v3845_v7 }
 0x357   : > { %vm1530_vm9 = vmand %vm5037_vm10, %vm7197_vm2  ;;  %v1221_v1 = vsel %vm7198_vm1, 1, %v3672_v57  ;;  %vm7208_vm2 = vcmp.lt.s32.totalorder %v3815_v3, 17  ;;  %vm5117_vm1 = vcmp.eq.s32.totalorder %v1185_v11, 1 }
 0x358   : > { %vm1486_vm3 = vmand %vm5037_vm10, %vm7199_vm4  ;;  %v1229_v44 = vrot.slane %v1221_v1, %v3847_v8  ;;  %v1225_v43 = vrot.slane %v1221_v1, %v3845_v7  ;;  %vm7214_vm4 = vcmp.ge.s32.totalorder %v3815_v3, 2 }
 0x359   : > { %3320 = vrot.lane.b32.xlu1 %v4865_v0, %s3677_s25  ;;  %vm5082_vm6 = vmand %vm1371_vm7, %vm7201_vm8  ;;  %vm7207_vm7 = vnez %v7182_v60  ;;  %vm5138_vm8 = vcmp.eq.s32.totalorder %v1181_v13, 1  ;;  %v5151_v60 = vsel %vm5046_vm12, 1, %v3672_v57  ;;  %vm7222_vm12 = vcmp.ge.s32.totalorder %v3815_v3, 4294967294 }
 0x35a   : > { %3315 = vrot.lane.b32.xlu0 %v4865_v0, %s3678_s26  ;;  %vm5095_vm11 = vmand %vm1530_vm9, %vm7204_vm15  ;;  %vm7219_vm15 = vcmp.ge.s32.totalorder %v3815_v3, 0  ;;  %v5170_v24 = vsel %vm5082_vm6, 1, %v3672_v57 }
 0x35b   : > { %vm5113_vm9 = vmand %vm1486_vm3, %vm7208_vm2  ;;  %vm5180_vm2 = vcmp.eq.s32.totalorder %v1229_v44, 1  ;;  %v5195_v5 = vsel %vm5095_vm11, 1, %v3672_v57  ;;  %vm7232_vm11 = vcmp.lt.s32.totalorder %v3815_v3, 16 }
 0x35c   : > { %vm5133_vm3 = vmand %vm5037_vm10, %vm7214_vm4  ;;  %v5200_v13 = vsel %vm5113_vm9, 1, %v3672_v57  ;;  %vm1194_vm4 = vcmp.lt.s32.totalorder %v3858_v12, 32 }
 0x35d   : > { %3330 = vrot.lane.b32.xlu1 %v4874_v26, %s3679_s27  ;;  %vm5176_vm13 = vmand %vm5037_vm10, %vm7222_vm12  ;;  %vm1145_vm12 = vcmp.lt.s32.totalorder %v3858_v12, 34 }
 0x35e   : > { %3325 = vrot.lane.b32.xlu0 %v4874_v26, %s3680_s28 }
 0x361   : > { %3340 = vrot.lane.b32.xlu1 %v4865_v0, %s3679_s27 }
 0x362   : > { %3335 = vrot.lane.b32.xlu0 %v4865_v0, %s3680_s28 }
 0x365   : > { %3350 = vrot.lane.b32.xlu1 %v4874_v26, %s3681_s0 }
 0x366   : > { %3345 = vrot.lane.b32.xlu0 %v4874_v26, %s3682_s30 }
 0x369   : > { %3360 = vrot.lane.b32.xlu1 %v4865_v0, %s3681_s0 }
 0x36a   : > { %3355 = vrot.lane.b32.xlu0 %v4865_v0, %s3682_s30 }
 0x36d   : > { %3370 = vrot.lane.b32.xlu1 %v4874_v26, %s3683_s8 }
 0x36e   : > { %3365 = vrot.lane.b32.xlu0 %v4874_v26, %s3684_s9 }
 0x371   : > { %3380 = vrot.lane.b32.xlu1 %v4865_v0, %s3683_s8 }
 0x372   : > { %3375 = vrot.lane.b32.xlu0 %v4865_v0, %s3684_s9 }
 0x375   : > { %3390 = vrot.lane.b32.xlu1 %v4874_v26, %s3685_s10 }
 0x376   : > { %3385 = vrot.lane.b32.xlu0 %v4874_v26, %s3686_s11 }
 0x379   : > { %3400 = vrot.lane.b32.xlu1 %v4865_v0, %s3685_s10 }
 0x37a   : > { %3395 = vrot.lane.b32.xlu0 %v4865_v0, %s3686_s11 }
 0x37d   : > { %3410 = vrot.lane.b32.xlu1 %v4865_v0, %s3687_s12 }
 0x37e   : > { %3405 = vrot.lane.b32.xlu0 %v4874_v26, %s3687_s12 }
 0x381   : > { %3420 = vrot.lane.b32.xlu1 %v4874_v26, %s3688_s13 }
 0x382   : > { %3415 = vrot.lane.b32.xlu0 %v4874_v26, %s3689_s14 }
 0x385   : > { %3430 = vrot.lane.b32.xlu1 %v4865_v0, %s3688_s13 }
 0x386   : > { %3425 = vrot.lane.b32.xlu0 %v4865_v0, %s3689_s14 }
 0x389   : > { %3440 = vrot.lane.b32.xlu1 %v4874_v26, %s3690_s16 }
 0x38a   : > { %3435 = vrot.lane.b32.xlu0 %v4874_v26, %s3691_s17 }
 0x38d   : > { %3450 = vrot.lane.b32.xlu1 %v4865_v0, %s3690_s16 }
 0x38e   : > { %3445 = vrot.lane.b32.xlu0 %v4865_v0, %s3691_s17 }
 0x391   : > { %3460 = vrot.lane.b32.xlu1 %v4874_v26, %s3692_s18 }
 0x392   : > { %3455 = vrot.lane.b32.xlu0 %v4874_v26, %s3693_s19 }
 0x395   : > { %3470 = vrot.lane.b32.xlu1 %v4865_v0, %s3692_s18 }
 0x396   : > { %3465 = vrot.lane.b32.xlu0 %v4865_v0, %s3693_s19 }
 0x399   : > { %3480 = vrot.lane.b32.xlu1 %v4874_v26, %s3694_s20 }
 0x39a   : > { %3475 = vrot.lane.b32.xlu0 %v4874_v26, %s3695_s22  ;;  %v5109_v26 = vsel %vm7207_vm7, 1, %v3672_v57  ;;  %vm5157_vm7 = vmand %vm5037_vm10, %vm7219_vm15  ;;  %vm7229_vm10 = vcmp.lt.s32.totalorder %v3815_v3, 18  ;;  %vm7237_vm15 = vcmp.lt.s32.totalorder %v3815_v3, 14 }
 0x39b   : > { %vm5206_vm6 = vmand %vm5133_vm3, %vm7229_vm10  ;;  %vm5227_vm3 = vcmp.eq.s32.totalorder %v1207_v15, 1  ;;  %vm1615_vm10 = vcmask 1043456  }
 0x39c   : > { %vm5223_vm9 = vmand %vm5157_vm7, %vm7232_vm11  ;;  %vm5256_vm11 = vcmp.eq.s32.totalorder %v1203_v41, 1 }
 0x39d   : > { %3490 = vrot.lane.b32.xlu1 %v4865_v0, %s3694_s20  ;;  %vm5239_vm7 = vmand %vm5176_vm13, %vm7237_vm15  ;;  %vm5252_vm13 = vcmp.eq.s32.totalorder %v1163_v47, 1  ;;  %v5268_v27 = vsel %vm5223_vm9, 1, %v3672_v57  ;;  %vm5278_vm15 = vcmp.eq.s32.totalorder %v1159_v28, 1  ;;  %vm7256_vm9 = vnez %v6893_v21 }
 0x39e   : > { %3485 = vrot.lane.b32.xlu0 %v4865_v0, %s3695_s22  ;;  %v5104_v0 = vsel %vm4999_vm0, 1, %v3672_v57  ;;  %vm7213_vm0 = vnez %v7186_v58  ;;  %7245 = vst [vmem:[#allocation24_spill] sm:$0xff] %v5268_v27  ;;  %v5287_v29 = vsel %vm5239_vm7, 1, %v3672_v57 }
 0x39f   : > { %v5127_v6 = vsel %vm7213_vm0, 1, %v3672_v57  ;;  %vm5184_vm0 = vcmp.eq.s32.totalorder %v1225_v43, 1  ;;  %v1562_v14 = vrot.slane %v5287_v29, %v3847_v8 }
 0x3a1   : > { %1547 = vrot.lane.b32.xlu1 %v4869_v39, %s3696_s23 }
 0x3a2   : > { %1545 = vrot.lane.b32.xlu0 %v4867_v4, %s3696_s23 }
 0x3a5   : > { %1939 = vrot.lane.b32.xlu1 %v4859_v49, %s3696_s23 }
 0x3a6   : > { %1937 = vrot.lane.b32.xlu0 %v4857_v48, %s3696_s23 }
 0x3a9   : > { %2043 = vperm.xlu1 %3495, %v1105_v56  }
 0x3aa   : > { %1666 = vperm.xlu0 %3494, %v1104_v23  }
 0x3b7   : > { %v3276_v44 = vpop.permute.xlu1 %3275 }
 0x3b8   : > { %v3278_v1 = vunpack.i.h.bf16 %v3276_v44  ;;  %v3277_v56 = vunpack.i.l.bf16 %v3276_v44  ;;  %v3266_v43 = vpop.permute.xlu0 %3265  ;;  %v5263_v44 = vsel %vm5206_vm6, 1, %v3672_v57  ;;  %vm1238_vm6 = vcmp.lt.s32.totalorder %v3858_v12, 30 }
 0x3b9   : > { %v3268_v30 = vunpack.i.h.bf16 %v3266_v43  ;;  %v3267_v63 = vunpack.i.l.bf16 %v3266_v43  ;;  %7244 = vst [vmem:[#allocation23_spill] sm:$0xff] %v5263_v44 }
 0x3ba   : > { %v5272_v47 = vsel %vm1172_vm14, %v3277_v56, %v3278_v1  ;;  %v5276_v41 = vsel %vm1172_vm14, %v3278_v1, %v3277_v56 }
 0x3bb   : > { %v3281_v43 = vpop.permute.xlu1 %3280  ;;  %v1173_v15 = vsel %vm1172_vm14, %v3267_v63, %v3268_v30  ;;  %v1174_v56 = vsel %vm1172_vm14, %v3268_v30, %v3267_v63  ;;  %v1768_v58 = vsel %vm5117_vm1, %v5272_v47, 0.0  ;;  %vm1262_vm14 = vcmp.lt.s32.totalorder %v3858_v12, 18 }
 0x3bc   : > { %v3283_v1 = vunpack.i.h.bf16 %v3281_v43  ;;  %v3282_v46 = vunpack.i.l.bf16 %v3281_v43  ;;  %v3271_v28 = vpop.permute.xlu0 %3270  ;;  %v1189_v63 = vsel %vm5117_vm1, %v1173_v15, 0.0  ;;  %v1188_v40 = vsel %vm5138_vm8, %v1174_v56, 0.0 }
 0x3bd   : > { %v3273_v9 = vunpack.i.h.bf16 %v3271_v28  ;;  %v3272_v3 = vunpack.i.l.bf16 %v3271_v28  ;;  %v1767_v28 = vsel %vm5138_vm8, %v5276_v41, 0.0  ;;  %v1570_v16 = vrot.slane %v1189_v63, 4 }
 0x3be   : > { %v1781_v43 = vsel %vm1216_vm5, %v3282_v46, %v3283_v1  ;;  %v5321_v52 = vsel %vm1216_vm5, %v3283_v1, %v3282_v46  ;;  %v7248_v46 = vrot.slane %v5057_v20, %v3845_v7  ;;  %vm7254_vm8 = vcmp.lt.s32.totalorder %v3858_v12, 16 }
 0x3bf   : > { %v3291_v25 = vpop.permute.xlu1 %3290  ;;  %v1217_v15 = vsel %vm1216_vm5, %v3272_v3, %v3273_v9  ;;  %v1218_v30 = vsel %vm1216_vm5, %v3273_v9, %v3272_v3  ;;  %v1947_v23 = vrot.slane %v1767_v28, 4  ;;  %v7269_v1 = vrot.slane %v5104_v0, %v3847_v8 }
 0x3c0   : > { %v3293_v57 = vunpack.i.h.bf16 %v3291_v25  ;;  %v3292_v2 = vunpack.i.l.bf16 %v3291_v25  ;;  %v3286_v56 = vpop.permute.xlu0 %3285  ;;  %v1233_v37 = vsel %vm5180_vm2, %v1217_v15, 0.0  ;;  %v1232_v47 = vsel %vm5184_vm0, %v1218_v30, 0.0 }
 0x3c1   : > { %v3288_v41 = vunpack.i.h.bf16 %v3286_v56  ;;  %v3287_v45 = vunpack.i.l.bf16 %v3286_v56  ;;  %v1576_v9 = vrot.slane %v1233_v37, 4  ;;  %vm5333_vm1 = vcmp.eq.s32.totalorder %v7248_v46, 1 }
 0x3c2   : > { %v1195_v3 = vsel %vm1194_vm4, %v3292_v2, %v3293_v57  ;;  %v1196_v30 = vsel %vm1194_vm4, %v3293_v57, %v3292_v2  ;;  %v1569_v15 = vrot.slane %v1188_v40, 4  ;;  %v1784_v56 = vsel %vm5180_vm2, %v1781_v43, 0.0  ;;  %vm7255_vm2 = vmmov %vm7254_vm8 }
 0x3c3   : > { %v3301_v25 = vpop.permute.xlu1 %3300  ;;  %v1211_v63 = vsel %vm5227_vm3, %v1195_v3, 0.0  ;;  %v1146_v31 = vsel %vm1145_vm12, %v3287_v45, %v3288_v41  ;;  %v1147_v3 = vsel %vm1145_vm12, %v3288_v41, %v3287_v45  ;;  %v1210_v2 = vsel %vm5256_vm11, %v1196_v30, 0.0  ;;  %vm7262_vm7 = vmmov %vm7255_vm2 }
 0x3c4   : > { %v3303_v32 = vunpack.i.h.bf16 %v3301_v25  ;;  %v3302_v37 = vunpack.i.l.bf16 %v3301_v25  ;;  %v1619_v46 = vsel %vm1615_vm10, %v1211_v63, %v1576_v9  ;;  %v3296_v27 = vpop.permute.xlu0 %3295  ;;  %v1167_v44 = vsel %vm5252_vm13, %v1146_v31, 0.0 }
 0x3c5   : > { %v1575_v40 = vrot.slane %v1232_v47, 4  ;;  %v3298_v42 = vunpack.i.h.bf16 %v3296_v27  ;;  %v3297_v57 = vunpack.i.l.bf16 %v3296_v27  ;;  %v7251_v43 = vrot.slane %v5057_v20, %v3847_v8 }
 0x3c6   : > { %v1617_v9 = vsel %vm1615_vm10, %v1167_v44, %v1570_v16  ;;  %v1166_v31 = vsel %vm5278_vm15, %v1147_v3, 0.0  ;;  %v1773_v27 = vsel %vm1194_vm4, %v3302_v37, %v3303_v32 }
 0x3c7   : > { %vm5355_vm5 = vcmp.eq.s32.totalorder %v7251_v43, 1  ;;  %v3311_v63 = vpop.permute.xlu1 %3310  ;;  %v2978_v45 = vpack.c.bf16 %v1619_v46, %v1617_v9  ;;  %v1616_v41 = vsel %vm1615_vm10, %v1166_v31, %v1569_v15  ;;  %v1618_v47 = vsel %vm1615_vm10, %v1210_v2, %v1575_v40 }
 0x3c8   : > { %v3313_v30 = vunpack.i.h.bf16 %v3311_v63  ;;  %v3312_v20 = vunpack.i.l.bf16 %v3311_v63  ;;  %v2980_v43 = vpack.c.bf16 %v1618_v47, %v1616_v41  ;;  %v1757_v19 = vsel %vm1145_vm12, %v3297_v57, %v3298_v42  ;;  %v3306_v18 = vpop.permute.xlu0 %3305 }
 0x3c9   : > { %2979 = vmatprep.subr.bf16.mxu0 %v2978_v45  ;;  %v1760_v44 = vsel %vm5252_vm13, %v1757_v19, 0.0  ;;  %v1776_v16 = vsel %vm5227_vm3, %v1773_v27, 0.0  ;;  %v1948_v15 = vrot.slane %v1768_v58, 4  ;;  %v1954_v46 = vrot.slane %v1784_v56, 4  ;;  %vm7261_vm3 = vmmov %vm7255_vm2 }
 0x3ca   : > { %v1292_v3 = vsel %vm7254_vm8, %v3312_v20, %v3313_v30  ;;  %v1293_v2 = vsel %vm7255_vm2, %v3313_v30, %v3312_v20  ;;  %v3308_v40 = vunpack.i.h.bf16 %v3306_v18  ;;  %v3307_v9 = vunpack.i.l.bf16 %v3306_v18  ;;  %2981 = vmatpush1.bf16.msra.mxu0 %v2980_v43 }
 0x3cb   : > { %v3321_v31 = vpop.permute.xlu1 %3320  ;;  %v1758_v63 = vsel %vm1145_vm12, %v3298_v42, %v3297_v57  ;;  %v1783_v19 = vsel %vm5184_vm0, %v5321_v52, 0.0  ;;  %v1994_v18 = vsel %vm1615_vm10, %v1760_v44, %v1948_v15  ;;  %v1996_v56 = vsel %vm1615_vm10, %v1776_v16, %v1954_v46 }
 0x3cc   : > { %v1264_v58 = vsel %vm1262_vm14, %v3308_v40, %v3307_v9  ;;  %v1774_v42 = vsel %vm1194_vm4, %v3303_v32, %v3302_v37  ;;  %v1294_v11 = vsel %vm7256_vm9, %v1293_v2, 0.0  ;;  %vm7257_vm0 = vnez %v6895_v22  ;;  %v3316_v45 = vpop.permute.xlu0 %3315 }
 0x3cd   : > { %v1295_v52 = vsel %vm7257_vm0, %v1292_v3, 0.0  ;;  %v3323_v28 = vunpack.i.h.bf16 %v3321_v31  ;;  %v3322_v57 = vunpack.i.l.bf16 %v3321_v31  ;;  %v1263_v41 = vsel %vm1262_vm14, %v3307_v9, %v3308_v40 }
 0x3ce   : > { %v1278_v47 = vsel %vm5333_vm1, %v1264_v58, 0.0  ;;  %v3318_v27 = vunpack.i.h.bf16 %v3316_v45  ;;  %v3317_v30 = vunpack.i.l.bf16 %v3316_v45  ;;  %v7258_v32 = vrot.slane %v5109_v26, %v3847_v8 }
 0x3cf   : > { %v1813_v20 = vsel %vm7261_vm3, %v3322_v57, %v3323_v28  ;;  %v1814_v43 = vsel %vm7262_vm7, %v3323_v28, %v3322_v57  ;;  %v3002_v44 = vpack.c.bf16 %v1996_v56, %v1994_v18  ;;  %v1759_v16 = vsel %vm5278_vm15, %v1758_v63, 0.0  ;;  %v3331_v15 = vpop.permute.xlu1 %3330 }
 0x3d0   : > { %vm5401_vm4 = vcmp.eq.s32.totalorder %v7258_v32, 1  ;;  %v5411_v46 = vrot.slane %v1294_v11, 4  ;;  %v1588_v3 = vrot.slane %v1295_v52, 4  ;;  %v1798_v2 = vsel %vm1262_vm14, %v3318_v27, %v3317_v30  ;;  %v3326_v56 = vpop.permute.xlu0 %3325 }
 0x3d1   : > { %v1953_v40 = vrot.slane %v1783_v19, 4  ;;  %v7263_v9 = vrot.slane %v5109_v26, %v3845_v7  ;;  %v1279_v58 = vsel %vm5355_vm5, %v1263_v41, 0.0  ;;  %v1581_v17 = vrot.slane %v1278_v47, 4  ;;  %3003 = vmatprep.subr.bf16.mxu1 %v3002_v44 }
 0x3d2   : > { %v1815_v63 = vsel %vm7256_vm9, %v1814_v43, 0.0  ;;  %v1816_v18 = vsel %vm7257_vm0, %v1813_v20, 0.0  ;;  %vm1308_vm13 = vcmp.lt.s32.totalorder %v3858_v12, 14  ;;  %v1797_v26 = vsel %vm1262_vm14, %v3317_v30, %v3318_v27 }
 0x3d3   : > { %vm5418_vm12 = vcmp.eq.s32.totalorder %v7263_v9, 1  ;;  %v1799_v19 = vsel %vm5333_vm1, %v1798_v2, 0.0  ;;  %v1775_v11 = vsel %vm5256_vm11, %v1774_v42, 0.0  ;;  %v1993_v52 = vsel %vm1615_vm10, %v1759_v16, %v1947_v23  ;;  %v3341_v47 = vpop.permute.xlu1 %3340 }
 0x3d4   : > { %v1995_v28 = vsel %vm1615_vm10, %v1775_v11, %v1953_v40  ;;  %v3333_v57 = vunpack.i.h.bf16 %v3331_v15  ;;  %v3332_v45 = vunpack.i.l.bf16 %v3331_v15  ;;  %v3328_v41 = vunpack.i.h.bf16 %v3326_v56  ;;  %v3336_v2 = vpop.permute.xlu0 %3335 }
 0x3d5   : > { %v7266_v32 = vrot.slane %v5104_v0, %v3845_v7  ;;  %vm5447_vm14 = vcmp.eq.s32.totalorder %v7269_v1, 1  ;;  %v3004_v23 = vpack.c.bf16 %v1995_v28, %v1993_v52  ;;  %v3327_v42 = vunpack.i.l.bf16 %v3326_v56 }
 0x3d6   : > { %v3343_v27 = vunpack.i.h.bf16 %v3341_v47  ;;  %v3342_v30 = vunpack.i.l.bf16 %v3341_v47  ;;  %v1582_v43 = vrot.slane %v1279_v58, 4  ;;  %v5451_v44 = vrot.slane %v1815_v63, 4 }
 0x3d7   : > { %vm5440_vm15 = vcmp.eq.s32.totalorder %v7266_v32, 1  ;;  %v5453_v16 = vrot.slane %v1816_v18, 4  ;;  %vm7272_vm11 = vcmp.lt.s32.totalorder %v3858_v12, 17  ;;  %v1800_v0 = vsel %vm5355_vm5, %v1797_v26, 0.0  ;;  %3005 = vmatpush1.bf16.msra.mxu1 %v3004_v23  ;;  %v3351_v26 = vpop.permute.xlu1 %3350 }
 0x3d8   : > { %v1284_v15 = vsel %vm7272_vm11, %v3332_v45, %v3333_v57  ;;  %vm7273_vm1 = vmmov %vm7272_vm11  ;;  %vm7274_vm8 = vnez %v6908_v36  ;;  %v1239_v58 = vsel %vm1238_vm6, %v3327_v42, %v3328_v41  ;;  %v5465_v63 = vrot.slane %v1799_v19, 4  ;;  %v3346_v19 = vpop.permute.xlu0 %3345 }
 0x3d9   : > { %v1285_v40 = vsel %vm7273_vm1, %v3333_v57, %v3332_v45  ;;  %v1287_v9 = vsel %vm7274_vm8, %v1284_v15, 0.0  ;;  %v1240_v18 = vsel %vm1238_vm6, %v3328_v41, %v3327_v42  ;;  %vm7275_vm2 = vmmov %vm7273_vm1  ;;  %v3338_v11 = vunpack.i.h.bf16 %v3336_v2 }
 0x3da   : > { %v1805_v56 = vsel %vm7275_vm2, %v3342_v30, %v3343_v27  ;;  %vm7276_vm5 = vmmov %vm7273_vm1  ;;  %v3337_v52 = vunpack.i.l.bf16 %v3336_v2  ;;  %v3353_v28 = vunpack.i.h.bf16 %v3351_v26  ;;  %v3352_v57 = vunpack.i.l.bf16 %v3351_v26 }
 0x3db   : > { %v1806_v25 = vsel %vm7276_vm5, %v3343_v27, %v3342_v30  ;;  %v1960_v45 = vrot.slane %v1800_v0, 4  ;;  %vm7277_vm9 = vnez %v6906_v35  ;;  %v1257_v32 = vsel %vm5401_vm4, %v1239_v58, 0.0 }
 0x3dc   : > { %v1286_v47 = vsel %vm7277_vm9, %v1285_v40, 0.0  ;;  %v1623_v41 = vsel %vm1615_vm10, %v1287_v9, %v1588_v3  ;;  %vm7278_vm0 = vcmp.lt.s32.totalorder %v3858_v12, 1  ;;  %v3348_v42 = vunpack.i.h.bf16 %v3346_v19  ;;  %v3361_v3 = vpop.permute.xlu1 %3360 }
 0x3dd   : > { %v1352_v1 = vsel %vm7278_vm0, %v3352_v57, %v3353_v28  ;;  %vm7279_vm3 = vmmov %vm7278_vm0  ;;  %v3347_v27 = vunpack.i.l.bf16 %v3346_v19  ;;  %v1807_v30 = vsel %vm7277_vm9, %v1806_v25, 0.0  ;;  %v1808_v15 = vsel %vm7274_vm8, %v1805_v56, 0.0 }
 0x3de   : > { %v1353_v23 = vsel %vm7279_vm3, %v3353_v28, %v3352_v57  ;;  %v1621_v2 = vsel %vm1615_vm10, %v1257_v32, %v1582_v43  ;;  %v1256_v0 = vsel %vm5418_vm12, %v1240_v18, 0.0  ;;  %v1789_v40 = vsel %vm1238_vm6, %v3337_v52, %v3338_v11  ;;  %v3356_v28 = vpop.permute.xlu0 %3355  ;;  %vm7285_vm2 = vmmov %vm7278_vm0 }
 0x3df   : > { %v1790_v9 = vsel %vm1238_vm6, %v3338_v11, %v3337_v52  ;;  %v1309_v58 = vsel %vm1308_vm13, %v3347_v27, %v3348_v42  ;;  %v1310_v25 = vsel %vm1308_vm13, %v3348_v42, %v3347_v27  ;;  %vm7280_vm7 = vnez %v6911_v50  ;;  %vm7286_vm5 = vmmov %vm7278_vm0 }
 0x3e0   : > { %v1354_v56 = vsel %vm7280_vm7, %v1353_v23, 0.0  ;;  %vm7281_vm11 = vnez %v6913_v51  ;;  %v2982_v18 = vpack.c.bf16 %v1623_v41, %v1621_v2  ;;  %v1620_v26 = vsel %vm1615_vm10, %v1256_v0, %v1581_v17  ;;  %v3371_v42 = vpop.permute.xlu1 %3370 }
 0x3e1   : > { %v1355_v43 = vsel %vm7281_vm11, %v1352_v1, 0.0  ;;  %vm1330_vm1 = vcmp.lt.s32.totalorder %v3858_v12, 2  ;;  %v1324_v11 = vsel %vm5440_vm15, %v1310_v25, 0.0  ;;  %v1325_v52 = vsel %vm5447_vm14, %v1309_v58, 0.0 }
 0x3e2   : > { %v1622_v57 = vsel %vm1615_vm10, %v1286_v47, %v5411_v46  ;;  %v3363_v19 = vunpack.i.h.bf16 %v3361_v3  ;;  %2983 = vmatprep.subr.bf16.mxu0 %v2982_v18  ;;  %v3362_v23 = vunpack.i.l.bf16 %v3361_v3  ;;  %v3358_v1 = vunpack.i.h.bf16 %v3356_v28 }
 0x3e3   : > { %v2984_v32 = vpack.c.bf16 %v1622_v57, %v1620_v26  ;;  %v3357_v41 = vunpack.i.l.bf16 %v3356_v28  ;;  %v5509_v17 = vrot.slane %v1354_v56, 4  ;;  %v5511_v27 = vrot.slane %v1355_v43, 4 }
 0x3e4   : > { %v1792_v2 = vsel %vm5401_vm4, %v1789_v40, 0.0  ;;  %v1791_v0 = vsel %vm5418_vm12, %v1790_v9, 0.0  ;;  %vm1390_vm6 = vcmp.lt.s32.totalorder %v3858_v12, 114  ;;  %v7282_v46 = vrot.slane %v5146_v55, %v3847_v8  ;;  %v3366_v9 = vpop.permute.xlu0 %3365 }
 0x3e5   : > { %2985 = vmatpush1.bf16.msra.mxu0 %v2984_v32  ;;  %v1845_v3 = vsel %vm7285_vm2, %v3362_v23, %v3363_v19  ;;  %v1846_v37 = vsel %vm7286_vm5, %v3363_v19, %v3362_v23  ;;  %v1829_v31 = vsel %vm1308_vm13, %v3357_v41, %v3358_v1  ;;  %v1830_v40 = vsel %vm1308_vm13, %v3358_v1, %v3357_v41  ;;  %v3381_v23 = vpop.permute.xlu1 %3380 }
 0x3e6   : > { %vm5521_vm8 = vcmp.eq.s32.totalorder %v7282_v46, 1  ;;  %v7287_v58 = vrot.slane %v5127_v6, %v3845_v7  ;;  %v7290_v56 = vrot.slane %v5127_v6, %v3847_v8  ;;  %v5547_v18 = vrot.slane %v1324_v11, 4 }
 0x3e7   : > { %v1594_v26 = vrot.slane %v1325_v52, 4  ;;  %v2000_v28 = vsel %vm1615_vm10, %v1808_v15, %v5453_v16  ;;  %v1999_v57 = vsel %vm1615_vm10, %v1807_v30, %v5451_v44  ;;  %v1847_v19 = vsel %vm7280_vm7, %v1846_v37, 0.0 }
 0x3e8   : > { %vm5536_vm4 = vcmp.eq.s32.totalorder %v7287_v58, 1  ;;  %vm5543_vm12 = vcmp.eq.s32.totalorder %v7290_v56, 1  ;;  %v1848_v32 = vsel %vm7281_vm11, %v1845_v3, 0.0  ;;  %v1831_v6 = vsel %vm5440_vm15, %v1830_v40, 0.0  ;;  %v3376_v3 = vpop.permute.xlu0 %3375 }
 0x3e9   : > { %v1832_v11 = vsel %vm5447_vm14, %v1829_v31, 0.0  ;;  %v7293_v52 = vrot.slane %v5146_v55, %v3845_v7  ;;  %v1998_v44 = vsel %vm1615_vm10, %v1792_v2, %v1960_v45  ;;  %v1997_v30 = vsel %vm1615_vm10, %v1791_v0, %v5465_v63  ;;  %v3391_v0 = vpop.permute.xlu1 %3390 }
 0x3ea   : > { %v3373_v15 = vunpack.i.h.bf16 %v3371_v42  ;;  %v3372_v1 = vunpack.i.l.bf16 %v3371_v42  ;;  %v3006_v20 = vpack.c.bf16 %v2000_v28, %v1998_v44  ;;  %v3008_v41 = vpack.c.bf16 %v1999_v57, %v1997_v30 }
 0x3eb   : > { %vm5564_vm13 = vcmp.eq.s32.totalorder %v7293_v52, 1  ;;  %v3368_v46 = vunpack.i.h.bf16 %v3366_v9  ;;  %v3367_v59 = vunpack.i.l.bf16 %v3366_v9  ;;  %v5571_v37 = vrot.slane %v1847_v19, 4 }
 0x3ec   : > { %v5573_v31 = vrot.slane %v1848_v32, 4  ;;  %v3383_v55 = vunpack.i.h.bf16 %v3381_v23  ;;  %v3382_v40 = vunpack.i.l.bf16 %v3381_v23  ;;  %3007 = vmatprep.subr.bf16.mxu1 %v3006_v20  ;;  %vm7296_vm15 = vcmp.lt.s32.totalorder %v3858_v12, 15  ;;  %v3386_v52 = vpop.permute.xlu0 %3385 }
 0x3ed   : > { %v1300_v45 = vsel %vm7296_vm15, %v3367_v59, %v3368_v46  ;;  %vm7297_vm14 = vmmov %vm7296_vm15  ;;  %v3378_v2 = vunpack.i.h.bf16 %v3376_v3  ;;  %v3377_v42 = vunpack.i.l.bf16 %v3376_v3  ;;  %v1971_v58 = vrot.slane %v1831_v6, 4  ;;  %3009 = vmatpush1.bf16.msra.mxu1 %v3008_v41 }
 0x3ee   : > { %v1301_v63 = vsel %vm7297_vm14, %v3368_v46, %v3367_v59  ;;  %v1972_v56 = vrot.slane %v1832_v11, 4  ;;  %v1331_v9 = vsel %vm1330_vm1, %v3372_v1, %v3373_v15  ;;  %v1332_v28 = vsel %vm1330_vm1, %v3373_v15, %v3372_v1  ;;  %vm7300_vm3 = vmmov %vm7297_vm14  ;;  %v3401_v46 = vpop.permute.xlu1 %3400 }
 0x3ef   : > { %vm7298_vm9 = vnez %v6902_v33  ;;  %vm7299_vm0 = vnez %v6904_v34  ;;  %v3393_v32 = vunpack.i.h.bf16 %v3391_v0  ;;  %v3392_v23 = vunpack.i.l.bf16 %v3391_v0  ;;  %vm7301_vm7 = vmmov %vm7300_vm3 }
 0x3f0   : > { %v1302_v57 = vsel %vm7298_vm9, %v1301_v63, 0.0  ;;  %v1303_v19 = vsel %vm7299_vm0, %v1300_v45, 0.0  ;;  %v1821_v6 = vsel %vm7300_vm3, %v3377_v42, %v3378_v2  ;;  %v1822_v11 = vsel %vm7301_vm7, %v3378_v2, %v3377_v42 }
 0x3f1   : > { %v3388_v44 = vunpack.i.h.bf16 %v3386_v52  ;;  %v3387_v30 = vunpack.i.l.bf16 %v3386_v52  ;;  %v1837_v15 = vsel %vm1330_vm1, %v3382_v40, %v3383_v55  ;;  %v1391_v1 = vsel %vm1390_vm6, %v3392_v23, %v3393_v32 }
 0x3f2   : > { %v1392_v20 = vsel %vm1390_vm6, %v3393_v32, %v3392_v23  ;;  %v1347_v41 = vsel %vm5521_vm8, %v1331_v9, 0.0  ;;  %v1838_v59 = vsel %vm1330_vm1, %v3383_v55, %v3382_v40  ;;  %v1406_v3 = vsel %vm5536_vm4, %v1391_v1, 0.0  ;;  %v3396_v40 = vpop.permute.xlu0 %3395 }
 0x3f3   : > { %v1407_v45 = vsel %vm5543_vm12, %v1392_v20, 0.0  ;;  %v1625_v63 = vsel %vm1615_vm10, %v1303_v19, %v1594_v26  ;;  %v1823_v2 = vsel %vm7298_vm9, %v1822_v11, 0.0  ;;  %v1824_v42 = vsel %vm7299_vm0, %v1821_v6, 0.0 }
 0x3f4   : > { %vm7302_vm11 = vcmp.lt.s32.totalorder %v3858_v12, 127  ;;  %v5614_v9 = vrot.slane %v1406_v3, 4  ;;  %v5616_v32 = vrot.slane %v1407_v45, 4  ;;  %v1627_v26 = vsel %vm1615_vm10, %v1347_v41, %v5511_v27 }
 0x3f5   : > { %v1360_v0 = vsel %vm7302_vm11, %v3387_v30, %v3388_v44  ;;  %vm7303_vm2 = vmmov %vm7302_vm11  ;;  %v1346_v19 = vsel %vm5564_vm13, %v1332_v28, 0.0  ;;  %vm1436_vm1 = vcmp.lt.s32.totalorder %v3858_v12, 110  ;;  %v2986_v23 = vpack.c.bf16 %v1627_v26, %v1625_v63 }
 0x3f6   : > { %v1361_v55 = vsel %vm7303_vm2, %v3388_v44, %v3387_v30  ;;  %v1624_v52 = vsel %vm1615_vm10, %v1302_v57, %v5547_v18  ;;  %v1626_v6 = vsel %vm1615_vm10, %v1346_v19, %v5509_v17  ;;  %v3403_v11 = vunpack.i.h.bf16 %v3401_v46  ;;  %v5627_v44 = vpop.permute.xlu1 %3410  ;;  %v3406_v63 = vpop.permute.xlu0 %3405  ;;  %vm7312_vm3 = vmmov %vm7303_vm2 }
 0x3f7   : > { %v7304_v30 = vrot.slane %v5151_v60, %v3845_v7  ;;  %v7307_v28 = vrot.slane %v5151_v60, %v3847_v8  ;;  %v2988_v18 = vpack.c.bf16 %v1626_v6, %v1624_v52  ;;  %v3402_v57 = vunpack.i.l.bf16 %v3401_v46  ;;  %2987 = vmatprep.subr.bf16.mxu0 %v2986_v23  ;;  %vm7313_vm7 = vmmov %vm7303_vm2 }
 0x3f8   : > { %v3398_v17 = vunpack.i.h.bf16 %v3396_v40  ;;  %v3397_v20 = vunpack.i.l.bf16 %v3396_v40  ;;  %vm1368_vm14 = vcmp.lt.s32.totalorder %v3858_v12, 126  ;;  %vm7310_vm9 = vnez %v6919_v61 }
 0x3f9   : > { %vm5632_vm5 = vcmp.eq.s32.totalorder %v7304_v30, 1  ;;  %vm5639_vm15 = vcmp.eq.s32.totalorder %v7307_v28, 1  ;;  %v1362_v41 = vsel %vm7310_vm9, %v1360_v0, 0.0  ;;  %vm7311_vm0 = vnez %v6921_v62  ;;  %2989 = vmatpush1.bf16.msra.mxu0 %v2988_v18 }
 0x3fa   : > { %v1363_v3 = vsel %vm7311_vm0, %v1361_v55, 0.0  ;;  %v1840_v60 = vsel %vm5521_vm8, %v1837_v15, 0.0  ;;  %v1839_v45 = vsel %vm5564_vm13, %v1838_v59, 0.0  ;;  %v1869_v46 = vsel %vm1390_vm6, %v3402_v57, %v3403_v11  ;;  %v3421_v26 = vpop.permute.xlu1 %3420 }
 0x3fb   : > { %v1870_v40 = vsel %vm1390_vm6, %v3403_v11, %v3402_v57  ;;  %v1853_v0 = vsel %vm7312_vm3, %v3397_v20, %v3398_v17  ;;  %v1854_v55 = vsel %vm7313_vm7, %v3398_v17, %v3397_v20  ;;  %v1871_v47 = vsel %vm5536_vm4, %v1869_v46, 0.0  ;;  %v3416_v11 = vpop.permute.xlu0 %3415 }
 0x3fc   : > { %v1872_v16 = vsel %vm5543_vm12, %v1870_v40, 0.0  ;;  %v2002_v15 = vsel %vm1615_vm10, %v1824_v42, %v1972_v56  ;;  %v2001_v59 = vsel %vm1615_vm10, %v1823_v2, %v1971_v58  ;;  %v7314_v19 = vrot.slane %v5170_v24, %v3847_v8 }
 0x3fd   : > { %v5673_v52 = vrot.slane %v1362_v41, 4  ;;  %v1606_v6 = vrot.slane %v1363_v3, 4  ;;  %v1855_v25 = vsel %vm7310_vm9, %v1853_v0, 0.0  ;;  %v1856_v43 = vsel %vm7311_vm0, %v1854_v55, 0.0 }
 0x3fe   : > { %vm5669_vm6 = vcmp.eq.s32.totalorder %v7314_v19, 1  ;;  %v5679_v56 = vrot.slane %v1871_v47, 4  ;;  %v1990_v58 = vrot.slane %v1872_v16, 4  ;;  %v2004_v2 = vsel %vm1615_vm10, %v1840_v60, %v5573_v31  ;;  %v3431_v46 = vpop.permute.xlu1 %3430 }
 0x3ff   : > { %v2003_v42 = vsel %vm1615_vm10, %v1839_v45, %v5571_v37  ;;  %v3010_v30 = vpack.c.bf16 %v2004_v2, %v2002_v15  ;;  %v3413_v18 = vunpack.i.h.bf16 %v5627_v44  ;;  %v3412_v57 = vunpack.i.l.bf16 %v5627_v44  ;;  %v3426_v16 = vpop.permute.xlu0 %3425 }
 0x400   : > { %v3012_v28 = vpack.c.bf16 %v2003_v42, %v2001_v59  ;;  %v7317_v17 = vrot.slane %v5170_v24, %v3845_v7  ;;  %v3408_v41 = vunpack.i.h.bf16 %v3406_v63  ;;  %v3407_v3 = vunpack.i.l.bf16 %v3406_v63 }
 0x401   : > { %v3423_v31 = vunpack.i.h.bf16 %v3421_v26  ;;  %v3422_v60 = vunpack.i.l.bf16 %v3421_v26  ;;  %v1983_v37 = vrot.slane %v1855_v25, 4  ;;  %v1984_v45 = vrot.slane %v1856_v43, 4  ;;  %3011 = vmatprep.subr.bf16.mxu1 %v3010_v30 }
 0x402   : > { %vm5690_vm8 = vcmp.eq.s32.totalorder %v7317_v17, 1  ;;  %v3418_v40 = vunpack.i.h.bf16 %v3416_v11  ;;  %v3417_v0 = vunpack.i.l.bf16 %v3416_v11  ;;  %3013 = vmatpush1.bf16.msra.mxu1 %v3012_v28  ;;  %v3433_v55 = vunpack.i.h.bf16 %v3431_v46  ;;  %v3441_v42 = vpop.permute.xlu1 %3440 }
 0x403   : > { %v1437_v44 = vsel %vm1436_vm1, %v3422_v60, %v3423_v31  ;;  %v1438_v24 = vsel %vm1436_vm1, %v3423_v31, %v3422_v60  ;;  %v3432_v47 = vunpack.i.l.bf16 %v3431_v46  ;;  %vm7320_vm4 = vcmp.lt.s32.totalorder %v3858_v12, 112 }
 0x404   : > { %v1452_v63 = vsel %vm5632_vm5, %v1437_v44, 0.0  ;;  %v1453_v15 = vsel %vm5639_vm15, %v1438_v24, 0.0  ;;  %v1420_v59 = vsel %vm7320_vm4, %v3417_v0, %v3418_v40  ;;  %vm7321_vm12 = vmmov %vm7320_vm4  ;;  %v1861_v19 = vsel %vm1368_vm14, %v3412_v57, %v3413_v18 }
 0x405   : > { %v1421_v26 = vsel %vm7321_vm12, %v3418_v40, %v3417_v0  ;;  %v1370_v25 = vsel %vm1368_vm14, %v3408_v41, %v3407_v3  ;;  %vm7322_vm13 = vnez %v6932_v38  ;;  %vm7323_vm11 = vnez %v6934_v10  ;;  %v3436_v0 = vpop.permute.xlu0 %3435  ;;  %vm7324_vm2 = vmmov %vm7320_vm4 }
 0x406   : > { %v1422_v43 = vsel %vm7322_vm13, %v1420_v59, 0.0  ;;  %v1423_v2 = vsel %vm7323_vm11, %v1421_v26, 0.0  ;;  %v1862_v11 = vsel %vm1368_vm14, %v3413_v18, %v3412_v57  ;;  %v1369_v30 = vsel %vm1368_vm14, %v3407_v3, %v3408_v41  ;;  %vm7325_vm14 = vmmov %vm7324_vm2 }
 0x407   : > { %v5718_v28 = vrot.slane %v1452_v63, 4  ;;  %v5720_v17 = vrot.slane %v1453_v15, 4  ;;  %v1901_v31 = vsel %vm1436_vm1, %v3432_v47, %v3433_v55  ;;  %v1902_v60 = vsel %vm1436_vm1, %v3433_v55, %v3432_v47 }
 0x408   : > { %v3428_v46 = vunpack.i.h.bf16 %v3426_v16  ;;  %v3427_v40 = vunpack.i.l.bf16 %v3426_v16  ;;  %v5726_v44 = vrot.slane %v1422_v43, 4  ;;  %v5728_v24 = vrot.slane %v1423_v2, 4  ;;  %v3451_v16 = vpop.permute.xlu1 %3450 }
 0x409   : > { %v1385_v18 = vsel %vm5669_vm6, %v1370_v25, 0.0  ;;  %v1629_v57 = vsel %vm1615_vm10, %v4869_v39, %v1606_v6  ;;  %v1864_v47 = vsel %vm5669_vm6, %v1862_v11, 0.0  ;;  %v1903_v63 = vsel %vm5632_vm5, %v1901_v31, 0.0  ;;  %v3446_v27 = vpop.permute.xlu0 %3445 }
 0x40a   : > { %v1885_v41 = vsel %vm7324_vm2, %v3427_v40, %v3428_v46  ;;  %v1886_v3 = vsel %vm7325_vm14, %v3428_v46, %v3427_v40  ;;  %v1631_v55 = vsel %vm1615_vm10, %v1385_v18, %v5616_v32  ;;  %v1904_v15 = vsel %vm5639_vm15, %v1902_v60, 0.0 }
 0x40b   : > { %v1887_v39 = vsel %vm7322_vm13, %v1885_v41, 0.0  ;;  %v2990_v6 = vpack.c.bf16 %v1631_v55, %v1629_v57  ;;  %v1888_v59 = vsel %vm7323_vm11, %v1886_v3, 0.0  ;;  %v2006_v32 = vsel %vm1615_vm10, %v4859_v49, %v1984_v45 }
 0x40c   : > { %v2008_v23 = vsel %vm1615_vm10, %v1864_v47, %v1990_v58  ;;  %v1384_v26 = vsel %vm5690_vm8, %v1369_v30, 0.0  ;;  %vm1527_vm1 = vcmp.lt.s32.totalorder %v3858_v12, 95  ;;  %vm1483_vm5 = vcmp.lt.s32.totalorder %v3858_v12, 97 }
 0x40d   : > { %2991 = vmatprep.subr.bf16.mxu0 %v2990_v6  ;;  %v3014_v1 = vpack.c.bf16 %v2008_v23, %v2006_v32  ;;  %v1628_v25 = vsel %vm1615_vm10, %v4867_v4, %v5673_v52  ;;  %v1630_v43 = vsel %vm1615_vm10, %v1384_v26, %v5614_v9  ;;  %v1863_v49 = vsel %vm5690_vm8, %v1861_v19, 0.0  ;;  %v3461_v52 = vpop.permute.xlu1 %3460  ;;  %v3456_v3 = vpop.permute.xlu0 %3455 }
 0x40e   : > { %v2992_v58 = vpack.c.bf16 %v1630_v43, %v1628_v25  ;;  %v2005_v45 = vsel %vm1615_vm10, %v4857_v48, %v1983_v37  ;;  %v2007_v2 = vsel %vm1615_vm10, %v1863_v49, %v5679_v56  ;;  %v3443_v11 = vunpack.i.h.bf16 %v3441_v42  ;;  %v7346_v43 = vld [vmem:[#allocation18_spill] sm:$0xff] }
 0x40f   : > { %v7326_v30 = vrot.slane %v5195_v5, %v3845_v7  ;;  %v7329_v4 = vrot.slane %v5195_v5, %v3847_v8  ;;  %v7332_v48 = vrot.slane %v5200_v13, %v3845_v7  ;;  %v7335_v20 = vrot.slane %v5200_v13, %v3847_v8  ;;  %3015 = vmatprep.subr.bf16.mxu1 %v3014_v1  ;;  %v7344_v1 = vld [vmem:[#allocation17_spill] sm:$0xff] }
 0x410   : > { %v3016_v5 = vpack.c.bf16 %v2007_v2, %v2005_v45  ;;  %v3442_v19 = vunpack.i.l.bf16 %v3441_v42  ;;  %v3438_v60 = vunpack.i.h.bf16 %v3436_v0  ;;  %v3437_v46 = vunpack.i.l.bf16 %v3436_v0  ;;  %2993 = vmatpush1.bf16.msra.mxu0 %v2992_v58 }
 0x411   : > { %vm5771_vm15 = vcmp.eq.s32.totalorder %v7326_v30, 1  ;;  %vm5778_vm9 = vcmp.eq.s32.totalorder %v7329_v4, 1  ;;  %vm5785_vm0 = vcmp.eq.s32.totalorder %v7332_v48, 1  ;;  %vm5792_vm3 = vcmp.eq.s32.totalorder %v7335_v20, 1  ;;  %v3471_v23 = vpop.permute.xlu1 %3470  ;;  %v3466_v58 = vpop.permute.xlu0 %3465 }
 0x412   : > { %v3453_v40 = vunpack.i.h.bf16 %v3451_v16  ;;  %v3452_v18 = vunpack.i.l.bf16 %v3451_v16  ;;  %v3448_v57 = vunpack.i.h.bf16 %v3446_v27  ;;  %v3447_v41 = vunpack.i.l.bf16 %v3446_v27  ;;  %3017 = vmatpush1.bf16.msra.mxu1 %v3016_v5 }
 0x413   : > { %vm7338_vm7 = vcmp.lt.s32.totalorder %v3858_v12, 111  ;;  %vm7340_vm8 = vcmp.lt.s32.totalorder %v3858_v12, 113  ;;  %v5804_v0 = vrot.slane %v1903_v63, 4  ;;  %v2018_v6 = vrot.slane %v1904_v15, 4 }
 0x414   : > { %v1428_v55 = vsel %vm7338_vm7, %v3442_v19, %v3443_v11  ;;  %vm7339_vm6 = vmmov %vm7338_vm7  ;;  %v1412_v47 = vsel %vm7340_vm8, %v3437_v46, %v3438_v60  ;;  %v2011_v16 = vrot.slane %v1887_v39, 4  ;;  %v2012_v32 = vrot.slane %v1888_v59, 4 }
 0x415   : > { %v1429_v13 = vsel %vm7339_vm6, %v3443_v11, %v3442_v19  ;;  %vm7341_vm4 = vmmov %vm7340_vm8  ;;  %vm7342_vm12 = vnez %v6938_v53  ;;  %vm7343_vm13 = vnez %v6940_v54  ;;  %vm7345_vm11 = vnez %v7344_v1  ;;  %v5832_v19 = vpop.permute.xlu1 %3480 }
 0x416   : > { %v1413_v42 = vsel %vm7341_vm4, %v3438_v60, %v3437_v46  ;;  %v1430_v26 = vsel %vm7342_vm12, %v1428_v55, 0.0  ;;  %v1431_v27 = vsel %vm7343_vm13, %v1429_v13, 0.0  ;;  %v1414_v25 = vsel %vm7345_vm11, %v1412_v47, 0.0  ;;  %vm7348_vm14 = vmmov %vm7339_vm6  ;;  %v7352_v13 = vld [vmem:[#allocation23_spill] sm:$0xff] }
 0x417   : > { %vm7347_vm2 = vnez %v7346_v43  ;;  %v5816_v63 = vsel %vm7348_vm14, %v3452_v18, %v3453_v40  ;;  %vm7349_vm7 = vmmov %vm7339_vm6  ;;  %v3463_v45 = vunpack.i.h.bf16 %v3461_v52  ;;  %v3462_v2 = vunpack.i.l.bf16 %v3461_v52 }
 0x418   : > { %v1415_v49 = vsel %vm7347_vm2, %v1413_v42, 0.0  ;;  %v1894_v15 = vsel %vm7349_vm7, %v3453_v40, %v3452_v18  ;;  %vm7350_vm6 = vmmov %vm7341_vm4  ;;  %v3458_v11 = vunpack.i.h.bf16 %v3456_v3  ;;  %v3457_v30 = vunpack.i.l.bf16 %v3456_v3  ;;  %v3476_v18 = vpop.permute.xlu0 %3475 }
 0x419   : > { %v1877_v39 = vsel %vm7350_vm6, %v3447_v41, %v3448_v57  ;;  %vm7351_vm8 = vmmov %vm7341_vm4  ;;  %v1657_v4 = vsel %vm1615_vm10, %v1415_v49, %v5728_v24  ;;  %v1659_v48 = vsel %vm1615_vm10, %v1431_v27, %v5720_v17  ;;  %v1656_v20 = vsel %vm1615_vm10, %v1414_v25, %v5726_v44 }
 0x41a   : > { %v1878_v59 = vsel %vm7351_vm8, %v3448_v57, %v3447_v41  ;;  %v1658_v5 = vsel %vm1615_vm10, %v1430_v26, %v5718_v28  ;;  %v1528_v60 = vsel %vm1527_vm1, %v3462_v2, %v3463_v45  ;;  %v1529_v52 = vsel %vm1527_vm1, %v3463_v45, %v3462_v2  ;;  %v7356_v26 = vld [vmem:[#allocation24_spill] sm:$0xff] }
 0x41b   : > { %v1484_v24 = vsel %vm1483_vm5, %v3457_v30, %v3458_v11  ;;  %v1485_v17 = vsel %vm1483_vm5, %v3458_v11, %v3457_v30  ;;  %vm1505_vm4 = vcmp.lt.s32.totalorder %v3858_v12, 96  ;;  %vm1458_vm14 = vcmp.lt.s32.totalorder %v3858_v12, 98 }
 0x41c   : > { %v1895_v28 = vsel %vm7342_vm12, %v5816_v63, 0.0  ;;  %v1896_v44 = vsel %vm7343_vm13, %v1894_v15, 0.0  ;;  %v1879_v46 = vsel %vm7345_vm11, %v1877_v39, 0.0  ;;  %v1880_v40 = vsel %vm7347_vm2, %v1878_v59, 0.0  ;;  %v3491_v15 = vpop.permute.xlu1 %3490 }
 0x41d   : > { %v1543_v57 = vsel %vm5771_vm15, %v1528_v60, 0.0  ;;  %v1544_v41 = vsel %vm5778_vm9, %v1529_v52, 0.0  ;;  %v1499_v3 = vsel %vm5785_vm0, %v1484_v24, 0.0  ;;  %v1500_v55 = vsel %vm5792_vm3, %v1485_v17, 0.0  ;;  %v1752_v17 = vld [vmem:[%s6765_s5 + $0x8] sm:$0xff] }
 0x41e   : > { %v7353_v47 = vrot.slane %v7352_v13, %v3847_v8  ;;  %v7357_v27 = vrot.slane %v7356_v26, %v3847_v8  ;;  %v2994_v25 = vpack.c.bf16 %v1659_v48, %v1657_v4  ;;  %v2996_v43 = vpack.c.bf16 %v1658_v5, %v1656_v20  ;;  %v3486_v20 = vpop.permute.xlu0 %3485 }
 0x41f   : > { %v3473_v49 = vunpack.i.h.bf16 %v3471_v23  ;;  %v3472_v63 = vunpack.i.l.bf16 %v3471_v23  ;;  %vm1549_vm11 = vcmp.lt.s32.totalorder %v3858_v12, 94  ;;  %v3468_v39 = vunpack.i.h.bf16 %v3466_v58  ;;  %v1140_v23 = vld [vmem:[%s6765_s5] sm:$0xff] }
 0x420   : > { %vm5864_vm12 = vcmp.eq.s32.totalorder %v7353_v47, 1  ;;  %vm5871_vm13 = vcmp.eq.s32.totalorder %v7357_v27, 1  ;;  %v3467_v59 = vunpack.i.l.bf16 %v3466_v58  ;;  %v2034_v45 = vsel %vm1615_vm10, %v1880_v40, %v2012_v32  ;;  %2995 = vmatprep.subr.bf16.mxu0 %v2994_v25 }
 0x421   : > { %v2036_v2 = vsel %vm1615_vm10, %v1896_v44, %v2018_v6  ;;  %v7360_v11 = vrot.slane %v7352_v13, %v3845_v7  ;;  %v7363_v4 = vrot.slane %v7356_v26, %v3845_v7  ;;  %v1652_v48 = vrot.slane %v1543_v57, 4  ;;  %2997 = vmatpush1.bf16.msra.mxu0 %v2996_v43  ;;  %v1548_v26 = vpop.permute.xlu1 %1547 }
 0x422   : > { %v5894_v32 = vsel %vm1527_vm1, %v3472_v63, %v3473_v49  ;;  %v1934_v6 = vsel %vm1527_vm1, %v3473_v49, %v3472_v63  ;;  %v3018_v58 = vpack.c.bf16 %v2036_v2, %v2034_v45  ;;  %v1653_v5 = vrot.slane %v1544_v41, 4  ;;  %v1546_v37 = vpop.permute.xlu0 %1545 }
 0x423   : > { %vm5881_vm2 = vcmp.eq.s32.totalorder %v7360_v11, 1  ;;  %vm5888_vm7 = vcmp.eq.s32.totalorder %v7363_v4, 1  ;;  %v1917_v60 = vsel %vm1483_vm5, %v3467_v59, %v3468_v39  ;;  %v1918_v52 = vsel %vm1483_vm5, %v3468_v39, %v3467_v59 }
 0x424   : > { %v2033_v24 = vsel %vm1615_vm10, %v1879_v46, %v2011_v16  ;;  %vm5906_vm6 = vcmp.eq.s32.totalorder %v1562_v14, 1  ;;  %v1646_v44 = vrot.slane %v1499_v3, 4  ;;  %v1647_v40 = vrot.slane %v1500_v55, 4  ;;  %3019 = vmatprep.subr.bf16.mxu1 %v3018_v58 }
 0x425   : > { %v1935_v57 = vsel %vm5771_vm15, %v5894_v32, 0.0  ;;  %v1936_v41 = vsel %vm5778_vm9, %v1934_v6, 0.0  ;;  %v1919_v16 = vsel %vm5785_vm0, %v1917_v60, 0.0  ;;  %v1920_v46 = vsel %vm5792_vm3, %v1918_v52, 0.0 }
 0x426   : > { %v2035_v14 = vsel %vm1615_vm10, %v1895_v28, %v5804_v0  ;;  %v3483_v3 = vunpack.i.h.bf16 %v5832_v19  ;;  %v3482_v13 = vunpack.i.l.bf16 %v5832_v19  ;;  %v3478_v31 = vunpack.i.h.bf16 %v3476_v18 }
 0x427   : > { %v3020_v55 = vpack.c.bf16 %v2035_v14, %v2033_v24  ;;  %v3477_v47 = vunpack.i.l.bf16 %v3476_v18  ;;  %v7368_v9 = vrot.slane %v5287_v29, %v3845_v7  ;;  %v3493_v27 = vunpack.i.h.bf16 %v3491_v15 }
 0x428   : > { %v3492_v25 = vunpack.i.l.bf16 %v3491_v15  ;;  %v3488_v43 = vunpack.i.h.bf16 %v3486_v20  ;;  %v3487_v0 = vunpack.i.l.bf16 %v3486_v20  ;;  %v2030_v28 = vrot.slane %v1936_v41, 4  ;;  %v1940_v41 = vpop.permute.xlu1 %1939 }
 0x429   : > { %vm5926_vm1 = vcmp.eq.s32.totalorder %v7368_v9, 1  ;;  %v2023_v49 = vrot.slane %v1919_v16, 4  ;;  %3021 = vmatpush1.bf16.msra.mxu1 %v3020_v55  ;;  %v1507_v19 = vsel %vm1505_vm4, %v3483_v3, %v3482_v13  ;;  %v1460_v18 = vsel %vm1458_vm14, %v3478_v31, %v3477_v47  ;;  %v1938_v16 = vpop.permute.xlu0 %1937 }
 0x42a   : > { %v2024_v63 = vrot.slane %v1920_v46, 4  ;;  %v1506_v29 = vsel %vm1505_vm4, %v3482_v13, %v3483_v3  ;;  %v1459_v39 = vsel %vm1458_vm14, %v3477_v47, %v3478_v31  ;;  %v1910_v15 = vsel %vm1458_vm14, %v3488_v43, %v3487_v0 }
 0x42b   : > { %v1925_v59 = vsel %vm1505_vm4, %v3492_v25, %v3493_v27  ;;  %v1926_v45 = vsel %vm1505_vm4, %v3493_v27, %v3492_v25  ;;  %v1478_v2 = vsel %vm5864_vm12, %v1460_v18, 0.0  ;;  %v1522_v11 = vsel %vm5871_vm13, %v1507_v19, 0.0 }
 0x42c   : > { %v1909_v4 = vsel %vm1458_vm14, %v3487_v0, %v3488_v43  ;;  %v1661_v32 = vsel %vm1615_vm10, %v1478_v2, %v1647_v40  ;;  %v1663_v6 = vsel %vm1615_vm10, %v1522_v11, %v1653_v5  ;;  %v1551_v58 = vsel %vm1549_vm11, %v1548_v26, %v1546_v37  ;;  %v2044_v19 = vpop.permute.xlu1 %2043 }
 0x42d   : > { %v2998_v20 = vpack.c.bf16 %v1663_v6, %v1661_v32  ;;  %v1477_v60 = vsel %vm5881_vm2, %v1459_v39, 0.0  ;;  %v1521_v52 = vsel %vm5888_vm7, %v1506_v29, 0.0  ;;  %v1912_v24 = vsel %vm5864_vm12, %v1910_v15, 0.0  ;;  %v1667_v43 = vpop.permute.xlu0 %1666 }
 0x42e   : > { %v1660_v46 = vsel %vm1615_vm10, %v1477_v60, %v1646_v44  ;;  %v1662_v40 = vsel %vm1615_vm10, %v1521_v52, %v1652_v48  ;;  %v1928_v5 = vsel %vm5871_vm13, %v1926_v45, 0.0  ;;  %v2038_v14 = vsel %vm1615_vm10, %v1912_v24, %v2024_v63 }
 0x42f   : > { %2999 = vmatprep.subr.bf16.mxu0 %v2998_v20  ;;  %v1550_v3 = vsel %vm1549_vm11, %v1546_v37, %v1548_v26  ;;  %v1566_v55 = vsel %vm5906_vm6, %v1551_v58, 0.0  ;;  %v3000_v42 = vpack.c.bf16 %v1662_v40, %v1660_v46  ;;  %v2040_v13 = vsel %vm1615_vm10, %v1928_v5, %v2030_v28 }
 0x430   : > { %v2029_v31 = vrot.slane %v1935_v57, 4  ;;  %v3022_v47 = vpack.c.bf16 %v2040_v13, %v2038_v14  ;;  %v1942_v48 = vsel %vm1549_vm11, %v1940_v41, %v1938_v16  ;;  %v1911_v1 = vsel %vm5881_vm2, %v1909_v4, 0.0 }
 0x431   : > { %3001 = vmatpush1.bf16.msra.mxu0 %v3000_v42  ;;  %v1927_v44 = vsel %vm5888_vm7, %v1925_v59, 0.0  ;;  %v2037_v26 = vsel %vm1615_vm10, %v1911_v1, %v2023_v49  ;;  %v1565_v9 = vsel %vm5926_vm1, %v1550_v3, 0.0  ;;  %v1941_v37 = vsel %vm1549_vm11, %v1938_v16, %v1940_v41 }
 0x432   : > { %2884 = vmatprep.subr.msk.mxu0 %vm1615_vm10, %v1566_v55  ;;  %3023 = vmatprep.subr.bf16.mxu1 %v3022_v47  ;;  %v2039_v57 = vsel %vm1615_vm10, %v1927_v44, %v2029_v31  ;;  %v1944_v30 = vsel %vm5906_vm6, %v1942_v48, 0.0  ;;  %vm1669_vm5 = vcmask 818176   ;;  %v1943_v25 = vsel %vm5926_vm1, %v1941_v37, 0.0 }
 0x433   : > { %v3024_v27 = vpack.c.bf16 %v2039_v57, %v2037_v26 }
 0x435   : > { %2885 = vmatpush1.msk.msra.mxu0 %vm1615_vm10, %v1565_v9  ;;  %3025 = vmatpush1.bf16.msra.mxu1 %v3024_v27 }
 0x436   : > { %2887 = vmatprep.subr.msk.mxu1 %vm1615_vm10, %v1944_v30  ;;  %2886 = vmatmul.mubr.msk.f32.vlgmr.msra.gmra.mrb[0].mxu0 %vm1669_vm5, %v1140_v23 }
 0x439   : > { %2888 = vmatpush1.msk.msra.mxu1 %vm1615_vm10, %v1943_v25 }
 0x43a   : > { %2889 = vmatmul.mubr.msk.f32.vlgmr.msra.gmra.mrb[0].mxu1 %vm1669_vm5, %v1752_v17 }
 0x509   : > { %v1745_v0 = vpop.f32.mrb[0].mxu0 }
 0x50a   : > { %v1747_v28 = vpop.f32.mrb[1].mxu0  ;;  %v1746_v49 = vadd.f32 %v1745_v0, %v1667_v43 }
 0x50b   : > { %v1748_v18 = vadd.f32 %v1747_v28, %v1667_v43 }
 0x50c   : > { %v1750_v29 = vmax.f32 %v1746_v49, 0.0 }
 0x50d   : > { %v2121_v56 = vpop.f32.mrb[0].mxu1  ;;  %v1751_v15 = vmax.f32 %v1748_v18, 0.0 }
 0x50e   : > { %v2122_v63 = vadd.f32 %v2121_v56, %v2044_v19  ;;  %v2123_v39 = vpop.f32.mrb[1].mxu1 }
 0x50f   : > { %v2124_v59 = vadd.f32 %v2123_v39, %v2044_v19 }
 0x510   : > { %v2126_v45 = vmax.f32 %v2122_v63, 0.0 }
 0x511   : > { %v2127_v2 = vmax.f32 %v2124_v59, 0.0 }
 0x512   : > { %v2128_v11 = vadd.f32 %v2126_v45, %v1750_v29 }
 0x513   : > { %v2129_v4 = vadd.f32 %v2127_v2, %v1751_v15 }
 0x514   : > { %v2130_v32 = vmul.f32 0.5, %v2128_v11 }
 0x515   : > { %v2131_v6 = vmul.f32 0.5, %v2129_v4 }
 0x516   : > { %2132 = vst [vmem:[%s3781_s15] sm:$0xff] %v2130_v32 }
 0x517   : > { %2133 = vst [vmem:[%s3781_s15 + $0x8] sm:$0xff] %v2131_v6 }
 0x518 PF: > { %p2890_p11 = scmp.ne.s32.totalorder %s3799_s21, 2 }
 0x519   : > { %v7371_v58 = vld [vmem:[#allocation11_spill] sm:$0xff] (!%p2890_p11)  ;;  %v7372_v20 = vld [vmem:[#allocation13_spill] sm:$0xff] (!%p2890_p11)  ;;  %v7373_v52 = vld [vmem:[#allocation12_spill] sm:$0xff] (!%p2890_p11)  ;;  %v3698_v14 = vmov (!%p2890_p11), 0   ;;  %s3699_s21 = smov (!%p2890_p11), 34   ;;  %s3700_s9 = smov (!%p2890_p11), 33  }
 0x51a   : > { %2137 = sbr.rel (%p2890_p11) target bundleno = 1730 (0x6c2), region = 56  ;;  %v2139_v60 = vadd.f32 (!%p2890_p11), %v7372_v20, %v7371_v58  ;;  %v7374_v24 = vld [vmem:[#allocation14_spill] sm:$0xff] (!%p2890_p11)  ;;  %v7375_v16 = vld [vmem:[#allocation5_spill] sm:$0xff] (!%p2890_p11)  ;;  %3611 = vset.pattern.permute.xlu1 (!%p2890_p11), %v3698_v14  ;;  %3612 = vset.pattern.permute.xlu0 (!%p2890_p11), %v3698_v14  ;;  %v7376_v55 = vld [vmem:[#allocation15_spill] sm:$0xff] (!%p2890_p11)  ;;  %s3701_s10 = smov (!%p2890_p11), 32   ;;  %v3723_v9 = vmov (!%p2890_p11), 0.0  }
 0x51b   : > { %v2140_v41 = vadd.f32 (!%p2890_p11), %v7374_v24, %v7373_v52  ;;  %v2141_v46 = vmul.f32 (!%p2890_p11), -4.0, %v7375_v16  ;;  %v7377_v13 = vld [vmem:[#allocation16_spill] sm:$0xff] (!%p2890_p11)  ;;  %v7378_v47 = vld [vmem:[#allocation19_spill] sm:$0xff] (!%p2890_p11)  ;;  %s3702_s11 = smov (!%p2890_p11), 31   ;;  %s3703_s12 = smov (!%p2890_p11), 16   ;;  %2754 = vmatprep.mubr.f32.mxu0 (!%p2890_p11), %v3723_v9  ;;  %v2138_v57 = vld [vmem:[%s6766_s6 + $0x20] sm:$0xff] (!%p2890_p11) }
 0x51c   : > { %v7379_v1 = vld [vmem:[#allocation20_spill] sm:$0xff] (!%p2890_p11)  ;;  %s3704_s13 = smov (!%p2890_p11), 18   ;;  %s3705_s14 = smov (!%p2890_p11), 17   ;;  %v7380_v37 = vld [vmem:[#allocation6_spill] sm:$0xff] (!%p2890_p11)  ;;  %v7381_v30 = vld [vmem:[#allocation7_spill] sm:$0xff] (!%p2890_p11)  ;;  %v7393_v17 = vmov (!%p2890_p11), 0 }
 0x51d   : > { %v2143_v40 = vcombine.high (!%p2890_p11), %v2141_v46, %v2141_v46  ;;  %v2145_v5 = vadd.f32 (!%p2890_p11), %v2141_v46, %v2139_v60  ;;  %s3706_s16 = smov (!%p2890_p11), 30   ;;  %s3707_s17 = smov (!%p2890_p11), 1   ;;  %vm2159_vm10 = vcmp.ge.s32.totalorder (!%p2890_p11), %v7380_v37, 2  ;;  %vm2160_vm15 = vcmp.lt.s32.totalorder (!%p2890_p11), %v7380_v37, 18  ;;  %v7384_v27 = vld [vmem:[#allocation8_spill] sm:$0xff] (!%p2890_p11)  ;;  %v7400_v28 = vld [vmem:[#allocation9_spill] sm:$0xff] (!%p2890_p11) }
 0x51e   : > { %s3708_s18 = smov (!%p2890_p11), 14   ;;  %s3709_s19 = smov (!%p2890_p11), 2   ;;  %vm6880_vm9 = vcmp.ge.s32.totalorder (!%p2890_p11), %v7381_v30, 2  ;;  %vm2161_vm0 = vmand (!%p2890_p11), %vm2159_vm10, %vm2160_vm15  ;;  %vm6879_vm8 = vcmp.lt.s32.totalorder (!%p2890_p11), %v7381_v30, 18  ;;  %vm7382_vm4 = vcmp.ge.s32.totalorder (!%p2890_p11), %v7381_v30, 1  ;;  %vm7383_vm12 = vcmp.ge.s32.totalorder (!%p2890_p11), %v7381_v30, 4294967295 }
 0x51f   : > { %v2146_v3 = vadd.f32 (!%p2890_p11), %v2143_v40, %v2140_v41  ;;  %v2147_v42 = vadd.f32 (!%p2890_p11), %v2145_v5, %v7376_v55  ;;  %s3710_s20 = smov (!%p2890_p11), 15   ;;  %s3711_s22 = smov (!%p2890_p11), 127   ;;  %vm2163_vm3 = vmand (!%p2890_p11), %vm2161_vm0, %vm6880_vm9  ;;  %vm7385_vm11 = vnez (!%p2890_p11), %v7384_v27  ;;  %vm6881_vm7 = vcmp.ge.s32.totalorder (!%p2890_p11), %v7381_v30, 4294967294  ;;  %v7402_v49 = vld [vmem:[#allocation10_spill] sm:$0xff] (!%p2890_p11) }
 0x520   : > { %s3712_s23 = smov (!%p2890_p11), 114   ;;  %s3713_s24 = smov (!%p2890_p11), 126   ;;  %vm2186_vm14 = vmand (!%p2890_p11), %vm2161_vm0, %vm7382_vm4  ;;  %vm7388_vm1 = vcmp.lt.s32.totalorder (!%p2890_p11), %v7381_v30, 17  ;;  %vm7391_vm10 = vcmp.ge.s32.totalorder (!%p2890_p11), %v7381_v30, 0  ;;  %vm7392_vm4 = vcmp.lt.s32.totalorder (!%p2890_p11), %v7381_v30, 15  ;;  %v7395_v43 = vmov (!%p2890_p11), 0 }
 0x521   : > { %v2148_v31 = vadd.f32 %v2146_v3, %v7377_v13  ;;  %v6009_v48 = vadd.f32 %v2147_v42, %v7378_v47  ;;  %s3714_s25 = smov 112   ;;  %s3715_s26 = smov 110   ;;  %vm2230_vm13 = vmand %vm2161_vm0, %vm7383_vm12  ;;  %v7404_v19 = vmov 0  ;;  %v7409_v56 = vmov 0 }
 0x522   : > { %s3716_s27 = smov 113   ;;  %s3717_s28 = smov 111   ;;  %vm2276_vm2 = vmand %vm7385_vm11, %vm6880_vm9 }
 0x523   : > { %v6012_v44 = vadd.f32 %v2148_v31, %v7379_v1  ;;  %s3718_s0 = smov 97   ;;  %s3719_s30 = smov 95   ;;  %vm6038_vm6 = vmand %vm2163_vm3, %vm6879_vm8 }
 0x524   : > { %s3720_s8 = smov 98   ;;  %vm6044_vm5 = vmand %vm2186_vm14, %vm7388_vm1  ;;  %vm6882_vm1 = vcmp.lt.s32.totalorder %v7381_v30, 14  ;;  %v2166_v39 = vsel %vm6038_vm6, 1, %v3698_v14 }
 0x525   : > { %v3506_v26 = vpack.i.bf16 %v6012_v44, %v6009_v48  ;;  %vm2208_vm15 = vmand %vm2161_vm0, %vm7391_vm10  ;;  %v2188_v15 = vsel %vm6044_vm5, 1, %v3698_v14  ;;  %vm7426_vm5 = vcmp.ge.s32.totalorder %v7381_v30, 1  ;;  %v2174_v32 = vrot.slane %v2166_v39, %v3847_v8 }
 0x526   : > { %vm6052_vm12 = vmand %vm2230_vm13, %vm7392_vm4  ;;  %vm7397_vm13 = vcmp.lt.s32.totalorder %v7381_v30, 16  ;;  %v2196_v6 = vrot.slane %v2188_v15, %v3847_v8  ;;  %v2192_v20 = vrot.slane %v2188_v15, %v3845_v7  ;;  %v2170_v24 = vrot.slane %v2166_v39, %v3845_v7 }
 0x527   : > { %3507 = vrot.lane.b32.xlu1 %v3506_v26, %s3699_s21  ;;  %3497 = vrot.lane.b32.xlu0 %v3506_v26, %s3700_s9  ;;  %s3721_s21 = smov 96   ;;  %s3722_s9 = smov 94   ;;  %v7394_v17 = vsel %vm6052_vm12, 4294967295, %v7393_v17  ;;  %vm2322_vm3 = vmand %vm7385_vm11, %vm6881_vm7  ;;  %vm7401_vm11 = vnez %v7400_v28 }
 0x528   : > { %vm6062_vm14 = vmand %vm2276_vm2, %vm6879_vm8  ;;  %vm7403_vm2 = vnez %v7402_v49 }
 0x529   : > { %v7396_v43 = vsel %vm6062_vm14, 4294967295, %v7395_v43  ;;  %vm2253_vm10 = vmand %vm2161_vm0, %vm6881_vm7 }
 0x52a   : > { %vm6071_vm4 = vmand %vm2208_vm15, %vm7397_vm13  ;;  %vm7408_vm15 = vcmp.lt.s32.totalorder %v7381_v30, 18  ;;  %vm7425_vm6 = vnez %v7396_v43 }
 0x52b   : > { %3512 = vrot.lane.b32.xlu1 %v3506_v26, %s3701_s10  ;;  %3502 = vrot.lane.b32.xlu0 %v3506_v26, %s3702_s11  ;;  %vm2344_vm12 = vmand %vm7401_vm11, %vm6880_vm9  ;;  %v2278_v11 = vsel %vm7425_vm6, 1, %v3698_v14  ;;  %v2210_v58 = vsel %vm6071_vm4, 1, %v3698_v14  ;;  %vm7432_vm4 = vcmp.ge.s32.totalorder %v7381_v30, 2 }
 0x52c   : > { %vm2404_vm8 = vmand %vm7403_vm2, %vm6880_vm9  ;;  %v2282_v16 = vrot.slane %v2278_v11, %v3845_v7  ;;  %v2286_v46 = vrot.slane %v2278_v11, %v3847_v8  ;;  %v2218_v55 = vrot.slane %v2210_v58, %v3847_v8  ;;  %v2214_v42 = vrot.slane %v2210_v58, %v3845_v7 }
 0x52d   : > { %vm6085_vm14 = vmand %vm2322_vm3, %vm6882_vm1  ;;  %vm2472_vm3 = vcmp.ge.s32.totalorder %v7380_v37, 4294967294 }
 0x52e   : > { %v7405_v19 = vsel %vm6085_vm14, 4294967295, %v7404_v19  ;;  %vm6091_vm0 = vmand %vm2253_vm10, %vm6882_vm1  ;;  %vm2473_vm14 = vcmp.lt.s32.totalorder %v7380_v37, 14  ;;  %vm7414_vm10 = vcmp.ge.s32.totalorder %v7381_v30, 4294967294 }
 0x52f   : > { %3522 = vrot.lane.b32.xlu1 %v3506_v26, %s3703_s12  ;;  %3517 = vrot.lane.b32.xlu0 %v3506_v26, %s3704_s13  ;;  %vm6097_vm13 = vmand %vm2344_vm12, %vm7408_vm15  ;;  %v6189_v5 = vsel %vm6091_vm0, 1, %v3698_v14 }
 0x530   : > { %v7410_v56 = vsel %vm6097_vm13, 4294967295, %v7409_v56  ;;  %vm7411_vm9 = vmmov %vm7408_vm15  ;;  %v2264_v0 = vrot.slane %v6189_v5, %v3847_v8 }
 0x531   : > { %vm6103_vm7 = vmand %vm2404_vm8, %vm7411_vm9  ;;  %vm7418_vm9 = vcmp.lt.s32.totalorder %v7381_v30, 14  ;;  %vm7439_vm0 = vnez %v7410_v56 }
 0x532   : > { %vm2382_vm1 = vmand %vm7401_vm11, %vm7414_vm10  ;;  %v6204_v13 = vsel %vm6103_vm7, 1, %v3698_v14  ;;  %v6209_v31 = vsel %vm7439_vm0, 1, %v3698_v14  ;;  %vm6224_vm7 = vcmp.eq.s32.totalorder %v2196_v6, 1 }
 0x533   : > { %3532 = vrot.lane.b32.xlu1 %v3506_v26, %s3705_s14  ;;  %3527 = vrot.lane.b32.xlu0 %v3506_v26, %s3706_s16  ;;  %vm7415_vm12 = vmmov %vm7414_vm10  ;;  %v2354_v56 = vrot.slane %v6209_v31, %v3847_v8  ;;  %v2350_v63 = vrot.slane %v6209_v31, %v3845_v7  ;;  %v2414_v15 = vrot.slane %v6204_v13, %v3847_v8 }
 0x534   : > { %vm2450_vm15 = vmand %vm7403_vm2, %vm7415_vm12  ;;  %vm2183_vm12 = vcmp.lt.s32.totalorder %v3858_v12, 33 }
 0x535   : > { %vm6117_vm13 = vmand %vm2472_vm3, %vm2473_vm14  ;;  %vm7421_vm14 = vnez %v7394_v17  ;;  %vm7429_vm3 = vcmp.ge.s32.totalorder %v7381_v30, 4294967295 }
 0x536   : > { %vm6129_vm8 = vmand %vm2382_vm1, %vm7418_vm9  ;;  %v2232_v45 = vsel %vm7421_vm14, 1, %v3698_v14  ;;  %vm7435_vm14 = vnez %v7405_v19  ;;  %v2260_v19 = vrot.slane %v6189_v5, %v3845_v7 }
 0x537   : > { %3542 = vrot.lane.b32.xlu1 %v3506_v26, %s3707_s17  ;;  %3537 = vrot.lane.b32.xlu0 %v3506_v26, %s3708_s18  ;;  %vm7422_vm11 = vmmov %vm7418_vm9  ;;  %v2240_v52 = vrot.slane %v2232_v45, %v3847_v8  ;;  %v6184_v40 = vsel %vm7435_vm14, 1, %v3698_v14  ;;  %v6237_v37 = vsel %vm6129_vm8, 1, %v3698_v14  ;;  %vm6251_vm14 = vcmp.eq.s32.totalorder %v2170_v24, 1 }
 0x538   : > { %vm6138_vm2 = vmand %vm2450_vm15, %vm7422_vm11  ;;  %vm2156_vm15 = vcmp.lt.s32.totalorder %v3858_v12, 34  ;;  %vm7436_vm11 = vcmp.lt.s32.totalorder %v7381_v30, 17  ;;  %v2328_v17 = vrot.slane %v6184_v40, %v3845_v7  ;;  %v2332_v43 = vrot.slane %v6184_v40, %v3847_v8 }
 0x539   : > { %vm6149_vm1 = vmand %vm6117_vm13, %vm7426_vm5  ;;  %vm7440_vm5 = vcmp.lt.s32.totalorder %v7381_v30, 15  ;;  %v6264_v28 = vsel %vm6138_vm2, 1, %v3698_v14  ;;  %vm7456_vm8 = vcmp.ge.s32.totalorder %v7381_v30, 0  ;;  %vm6282_vm2 = vcmp.eq.s32.totalorder %v2218_v55, 1 }
 0x53a   : > { %vm6163_vm10 = vmand %vm6117_vm13, %vm7429_vm3  ;;  %vm6340_vm3 = vcmp.eq.s32.totalorder %v2214_v42, 1 }
 0x53b   : > { %3552 = vrot.lane.b32.xlu1 %v3506_v26, %s3709_s19  ;;  %3547 = vrot.lane.b32.xlu0 %v3506_v26, %s3710_s20  ;;  %vm6175_vm9 = vmand %vm6117_vm13, %vm7432_vm4  ;;  %vm6220_vm4 = vcmp.eq.s32.totalorder %v2174_v32, 1 }
 0x53c   : > { %vm6195_vm6 = vmand %vm6149_vm1, %vm7436_vm11  ;;  %vm6229_vm11 = vcmp.eq.s32.totalorder %v2192_v20, 1 }
 0x53d   : > { %vm6215_vm1 = vmand %vm6163_vm10, %vm7440_vm5  ;;  %vm7449_vm10 = vcmp.lt.s32.totalorder %v7381_v30, 18  ;;  %vm6247_vm5 = vcmp.eq.s32.totalorder %v2240_v52, 1 }
 0x53e   : > { %vm6243_vm0 = vmand %vm6175_vm9, %vm7449_vm10  ;;  %v6298_v2 = vsel %vm6215_vm1, 1, %v3698_v14 }
 0x53f   : > { %3557 = vrot.lane.b32.xlu0 %v3506_v26, %s3711_s22  ;;  %3562 = vrot.lane.b32.xlu1 %v3506_v26, %s3712_s23  ;;  %vm6270_vm9 = vmand %vm6117_vm13, %vm7456_vm8  ;;  %v6310_v20 = vsel %vm6243_vm0, 1, %v3698_v14  ;;  %vm6320_vm8 = vcmp.eq.s32.totalorder %v2282_v16, 1  ;;  %vm7468_vm0 = vcmp.ge.s32.totalorder %v7381_v30, 4294967294 }
 0x543   : > { %3567 = vrot.lane.b32.xlu0 %v3506_v26, %s3713_s24  ;;  %3572 = vrot.lane.b32.xlu1 %v3506_v26, %s3714_s25 }
 0x547   : > { %3577 = vrot.lane.b32.xlu0 %v3506_v26, %s3715_s26  ;;  %3582 = vrot.lane.b32.xlu1 %v3506_v26, %s3716_s27 }
 0x54b   : > { %3587 = vrot.lane.b32.xlu0 %v3506_v26, %s3717_s28  ;;  %3592 = vrot.lane.b32.xlu1 %v3506_v26, %s3718_s0 }
 0x54f   : > { %3597 = vrot.lane.b32.xlu0 %v3506_v26, %s3719_s30  ;;  %3602 = vrot.lane.b32.xlu1 %v3506_v26, %s3720_s8 }
 0x553   : > { %3607 = vrot.lane.b32.xlu0 %v3506_v26, %s3721_s21  ;;  %2556 = vrot.lane.b32.xlu1 %v6009_v48, %s3722_s9 }
 0x557   : > { %2558 = vrot.lane.b32.xlu0 %v6012_v44, %s3722_s9  ;;  %2677 = vperm.xlu1 %3611, %v2138_v57   ;;  %v2236_v57 = vrot.slane %v2232_v45, %v3845_v7  ;;  %v6293_v45 = vsel %vm6195_vm6, 1, %v3698_v14  ;;  %vm7461_vm6 = vcmp.lt.s32.totalorder %v7381_v30, 16 }
 0x558   : > { %vm6316_vm1 = vmand %vm6270_vm9, %vm7461_vm6  ;;  %vm6336_vm6 = vcmp.eq.s32.totalorder %v2286_v46, 1 }
 0x559   : > { %vm6324_vm10 = vcmp.eq.s32.totalorder %v2236_v57, 1  ;;  %vm6332_vm9 = vmand %vm6117_vm13, %vm7468_vm0  ;;  %v6361_v57 = vsel %vm6316_vm1, 1, %v3698_v14  ;;  %vm7475_vm13 = vcmp.lt.s32.totalorder %v7381_v30, 14  ;;  %vm2249_vm1 = vcmp.lt.s32.totalorder %v3858_v12, 30 }
 0x55a   : > { %v2529_v26 = vrot.slane %v6361_v57, %v3847_v8  ;;  %vm6404_vm0 = vcmp.eq.s32.totalorder %v2260_v19, 1 }
 0x599   : > { %v3508_v11 = vpop.permute.xlu1 %3507  ;;  %v3498_v4 = vpop.permute.xlu0 %3497 }
 0x59a   : > { %v3510_v52 = vunpack.i.h.bf16 %v3508_v11  ;;  %v3509_v24 = vunpack.i.l.bf16 %v3508_v11  ;;  %v3500_v41 = vunpack.i.h.bf16 %v3498_v4  ;;  %v3499_v3 = vunpack.i.l.bf16 %v3498_v4 }
 0x59c   : > { %v2184_v46 = vsel %vm2183_vm12, %v3499_v3, %v3500_v41  ;;  %v2185_v42 = vsel %vm2183_vm12, %v3500_v41, %v3499_v3  ;;  %v2157_v29 = vsel %vm2156_vm15, %v3509_v24, %v3510_v52  ;;  %v2158_v59 = vsel %vm2156_vm15, %v3510_v52, %v3509_v24  ;;  %vm2564_vm12 = vmand %vm6332_vm9, %vm7475_vm13 }
 0x59d   : > { %v3513_v11 = vpop.permute.xlu1 %3512  ;;  %v3503_v6 = vpop.permute.xlu0 %3502  ;;  %v2200_v4 = vsel %vm6224_vm7, %v2184_v46, 0.0  ;;  %v2199_v41 = vsel %vm6229_vm11, %v2185_v42, 0.0  ;;  %vm7476_vm15 = vcmp.lt.s32.totalorder %v3858_v12, 31  ;;  %v2178_v24 = vsel %vm6220_vm4, %v2157_v29, 0.0 }
 0x59e   : > { %v3515_v60 = vunpack.i.h.bf16 %v3513_v11  ;;  %v3514_v3 = vunpack.i.l.bf16 %v3513_v11  ;;  %v3505_v58 = vunpack.i.h.bf16 %v3503_v6  ;;  %v3504_v32 = vunpack.i.l.bf16 %v3503_v6  ;;  %vm7478_vm11 = vmmov %vm7476_vm15 }
 0x59f   : > { %v2581_v18 = vrot.slane %v2200_v4, 4  ;;  %vm7477_vm7 = vcmp.lt.s32.totalorder %v3858_v12, 32  ;;  %v6389_v27 = vsel %vm2564_vm12, 1, %v3698_v14  ;;  %v2177_v9 = vsel %vm6251_vm14, %v2158_v59, 0.0 }
 0x5a0   : > { %v2228_v30 = vsel %vm7476_vm15, %v3504_v32, %v3505_v58  ;;  %v2206_v6 = vsel %vm7477_vm7, %v3514_v3, %v3515_v60  ;;  %v2229_v11 = vsel %vm7478_vm11, %v3505_v58, %v3504_v32  ;;  %v2580_v52 = vrot.slane %v2199_v41, 4 }
 0x5a1   : > { %v3523_v4 = vpop.permute.xlu1 %3522  ;;  %v3518_v46 = vpop.permute.xlu0 %3517  ;;  %v2244_v42 = vsel %vm6247_vm5, %v2228_v30, 0.0  ;;  %vm6400_vm4 = vcmp.eq.s32.totalorder %v2264_v0, 1  ;;  %v2222_v25 = vsel %vm6282_vm2, %v2206_v6, 0.0  ;;  %vm7483_vm14 = vcmask 1043456   ;;  %vm7484_vm5 = vmmov %vm7477_vm7 }
 0x5a2   : > { %v3525_v32 = vunpack.i.h.bf16 %v3523_v4  ;;  %v3524_v58 = vunpack.i.l.bf16 %v3523_v4  ;;  %v3520_v29 = vunpack.i.h.bf16 %v3518_v46  ;;  %v3519_v23 = vunpack.i.l.bf16 %v3518_v46 }
 0x5a3   : > { %v2587_v59 = vrot.slane %v2244_v42, 4  ;;  %v2628_v41 = vsel %vm7483_vm14, %v2178_v24, %v2581_v18  ;;  %v2207_v5 = vsel %vm7484_vm5, %v3515_v60, %v3514_v3  ;;  %vm2319_vm9 = vcmp.lt.s32.totalorder %v3858_v12, 14 }
 0x5a4   : > { %vm7485_vm13 = vcmp.lt.s32.totalorder %v3858_v12, 16  ;;  %vm7487_vm15 = vcmp.lt.s32.totalorder %v3858_v12, 18  ;;  %vm6425_vm2 = vcmp.eq.s32.totalorder %v2332_v43, 1  ;;  %vm7491_vm11 = vnez %v6893_v21 }
 0x5a5   : > { %v2303_v0 = vsel %vm7485_vm13, %v3524_v58, %v3525_v32  ;;  %vm7486_vm12 = vmmov %vm7485_vm13  ;;  %v2274_v30 = vsel %vm7487_vm15, %v3519_v23, %v3520_v29  ;;  %vm7492_vm14 = vnez %v6895_v22  ;;  %v3533_v6 = vpop.permute.xlu1 %3532  ;;  %v3528_v4 = vpop.permute.xlu0 %3527  ;;  %v2243_v46 = vsel %vm6324_vm10, %v2229_v11, 0.0 }
 0x5a6   : > { %v2304_v19 = vsel %vm7486_vm12, %v3525_v32, %v3524_v58  ;;  %vm7488_vm7 = vmmov %vm7487_vm15  ;;  %v2306_v3 = vsel %vm7492_vm14, %v2303_v0, 0.0  ;;  %vm6440_vm5 = vcmp.eq.s32.totalorder %v2328_v17, 1  ;;  %v2290_v22 = vsel %vm6336_vm6, %v2274_v30, 0.0 }
 0x5a7   : > { %v2275_v39 = vsel %vm7488_vm7, %v3520_v29, %v3519_v23  ;;  %v2305_v60 = vsel %vm7491_vm11, %v2304_v19, 0.0  ;;  %v2221_v55 = vsel %vm6340_vm3, %v2207_v5, 0.0  ;;  %v3535_v32 = vunpack.i.h.bf16 %v3533_v6 }
 0x5a8   : > { %v2289_v24 = vsel %vm6320_vm8, %v2275_v39, 0.0  ;;  %v2598_v21 = vrot.slane %v2305_v60, 4  ;;  %vm7495_vm8 = vcmask 1043456   ;;  %v3534_v58 = vunpack.i.l.bf16 %v3533_v6 }
 0x5a9   : > { %v2627_v42 = vsel %vm7495_vm8, %v2177_v9, %v2580_v52  ;;  %v3530_v47 = vunpack.i.h.bf16 %v3528_v4  ;;  %v3529_v11 = vunpack.i.l.bf16 %v3528_v4  ;;  %vm2341_vm10 = vcmp.lt.s32.totalorder %v3858_v12, 2  ;;  %vm7496_vm13 = vmmov %vm7495_vm8  ;;  %v3543_v5 = vpop.permute.xlu1 %3542  ;;  %v3538_v0 = vpop.permute.xlu0 %3537 }
 0x5aa   : > { %v2599_v40 = vrot.slane %v2306_v3, 4  ;;  %v2592_v17 = vrot.slane %v2289_v24, 4  ;;  %v2630_v29 = vsel %vm7496_vm13, %v2222_v25, %v2587_v59  ;;  %v2586_v23 = vrot.slane %v2243_v46, 4  ;;  %vm7502_vm7 = vmmov %vm7495_vm8 }
 0x5ab   : > { %vm7497_vm12 = vcmp.lt.s32.totalorder %v3858_v12, 17  ;;  %v2250_v52 = vsel %vm2249_vm1, %v3529_v11, %v3530_v47  ;;  %v2251_v9 = vsel %vm2249_vm1, %v3530_v47, %v3529_v11  ;;  %vm6462_vm3 = vcmp.eq.s32.totalorder %v2354_v56, 1 }
 0x5ac   : > { %v2295_v49 = vsel %vm7497_vm12, %v3534_v58, %v3535_v32  ;;  %vm7498_vm6 = vmmov %vm7497_vm12  ;;  %v2593_v59 = vrot.slane %v2290_v22, 4  ;;  %vm7501_vm15 = vnez %v6908_v36  ;;  %v3026_v30 = vpack.c.bf16 %v2630_v29, %v2628_v41 }
 0x5ad   : > { %v2296_v16 = vsel %vm7498_vm6, %v3535_v32, %v3534_v58  ;;  %v2298_v19 = vsel %vm7501_vm15, %v2295_v49, 0.0  ;;  %v2629_v39 = vsel %vm7502_vm7, %v2221_v55, %v2586_v23  ;;  %v3545_v3 = vunpack.i.h.bf16 %v3543_v5  ;;  %v3553_v55 = vpop.permute.xlu1 %3552  ;;  %v3548_v1 = vpop.permute.xlu0 %3547 }
 0x5ae   : > { %v3028_v60 = vpack.c.bf16 %v2629_v39, %v2627_v42  ;;  %v3544_v24 = vunpack.i.l.bf16 %v3543_v5  ;;  %v3540_v6 = vunpack.i.h.bf16 %v3538_v0  ;;  %vm2401_vm1 = vcmp.lt.s32.totalorder %v3858_v12, 114  ;;  %3027 = vmatprep.subr.bf16.mxu0 %v3026_v30 }
 0x5af   : > { %vm7503_vm11 = vnez %v6906_v35  ;;  %v3539_v56 = vunpack.i.l.bf16 %v3538_v0  ;;  %v2268_v46 = vsel %vm6400_vm4, %v2250_v52, 0.0  ;;  %v2267_v36 = vsel %vm6404_vm0, %v2251_v9, 0.0  ;;  %vm7508_vm4 = vmmov %vm7502_vm7 }
 0x5b0   : > { %v2297_v4 = vsel %vm7503_vm11, %v2296_v16, 0.0  ;;  %vm6479_vm14 = vcmp.eq.s32.totalorder %v2414_v15, 1  ;;  %3029 = vmatpush1.bf16.msra.mxu0 %v3028_v60  ;;  %vm7506_vm8 = vcmp.lt.s32.totalorder %v3858_v12, 1  ;;  %v2632_v42 = vsel %vm7508_vm4, %v2268_v46, %v2593_v59  ;;  %vm7509_vm12 = vmmov %vm7508_vm4 }
 0x5b1   : > { %v2363_v35 = vsel %vm7506_vm8, %v3544_v24, %v3545_v3  ;;  %vm7507_vm13 = vmmov %vm7506_vm8  ;;  %v2634_v14 = vsel %vm7509_vm12, %v2298_v19, %v2599_v40  ;;  %vm7510_vm0 = vnez %v6911_v50  ;;  %vm7511_vm6 = vnez %v6913_v51  ;;  %v3558_v5 = vpop.permute.xlu0 %3557  ;;  %v3563_v0 = vpop.permute.xlu1 %3562 }
 0x5b2   : > { %v2364_v22 = vsel %vm7507_vm13, %v3545_v3, %v3544_v24  ;;  %v2366_v15 = vsel %vm7511_vm6, %v2363_v35, 0.0  ;;  %v2320_v58 = vsel %vm2319_vm9, %v3539_v56, %v3540_v6  ;;  %v2321_v47 = vsel %vm2319_vm9, %v3540_v6, %v3539_v56  ;;  %vm7514_vm7 = vmmov %vm7508_vm4 }
 0x5b3   : > { %v2365_v32 = vsel %vm7510_vm0, %v2364_v22, 0.0  ;;  %vm6500_vm15 = vcmp.eq.s32.totalorder %v2350_v63, 1  ;;  %v2336_v50 = vsel %vm6425_vm2, %v2320_v58, 0.0  ;;  %v2631_v51 = vsel %vm7514_vm7, %v2267_v36, %v2592_v17  ;;  %vm7518_vm2 = vmmov %vm7508_vm4 }
 0x5b4   : > { %v2610_v40 = vrot.slane %v2365_v32, 4  ;;  %v7515_v29 = vrot.slane %v6204_v13, %v3845_v7  ;;  %v2569_v31 = vrot.slane %v6389_v27, %v3845_v7  ;;  %v2611_v63 = vrot.slane %v2366_v15, 4 }
 0x5b5   : > { %v2335_v49 = vsel %vm6440_vm5, %v2321_v47, 0.0  ;;  %v3555_v16 = vunpack.i.h.bf16 %v3553_v55  ;;  %v3554_v52 = vunpack.i.l.bf16 %v3553_v55  ;;  %vm2379_vm9 = vcmp.lt.s32.totalorder %v3858_v12, 126  ;;  %v3568_v32 = vpop.permute.xlu0 %3567  ;;  %v3573_v15 = vpop.permute.xlu1 %3572 }
 0x5b6   : > { %vm6510_vm11 = vcmp.eq.s32.totalorder %v7515_v29, 1  ;;  %v3550_v18 = vunpack.i.h.bf16 %v3548_v1  ;;  %v3549_v17 = vunpack.i.l.bf16 %v3548_v1  ;;  %v3030_v9 = vpack.c.bf16 %v2634_v14, %v2632_v42 }
 0x5b7   : > { %v2633_v13 = vsel %vm7518_vm2, %v2297_v4, %v2598_v21  ;;  %v2605_v59 = vrot.slane %v2336_v50, 4  ;;  %v2342_v19 = vsel %vm2341_vm10, %v3554_v52, %v3555_v16  ;;  %v3560_v39 = vunpack.i.h.bf16 %v3558_v5 }
 0x5b8   : > { %v3032_v30 = vpack.c.bf16 %v2633_v13, %v2631_v51  ;;  %vm2447_vm8 = vcmp.lt.s32.totalorder %v3858_v12, 110  ;;  %vm7519_vm5 = vcmp.lt.s32.totalorder %v3858_v12, 15  ;;  %3031 = vmatprep.subr.bf16.mxu0 %v3030_v9  ;;  %v3559_v3 = vunpack.i.l.bf16 %v3558_v5 }
 0x5b9   : > { %v2311_v43 = vsel %vm7519_vm5, %v3549_v17, %v3550_v18  ;;  %vm7520_vm13 = vmmov %vm7519_vm5  ;;  %v3565_v24 = vunpack.i.h.bf16 %v3563_v0  ;;  %v7521_v21 = vrot.slane %v6264_v28, %v3845_v7  ;;  %v7524_v4 = vrot.slane %v6237_v37, %v3847_v8  ;;  %v3578_v5 = vpop.permute.xlu0 %3577 }
 0x5ba   : > { %v2312_v60 = vsel %vm7520_vm13, %v3550_v18, %v3549_v17  ;;  %v2343_v46 = vsel %vm2341_vm10, %v3555_v16, %v3554_v52  ;;  %vm7527_vm0 = vnez %v6904_v34  ;;  %3033 = vmatpush1.bf16.msra.mxu0 %v3032_v30  ;;  %v3564_v35 = vunpack.i.l.bf16 %v3563_v0  ;;  %v3583_v0 = vpop.permute.xlu1 %3582 }
 0x5bb   : > { %vm6530_vm4 = vcmp.eq.s32.totalorder %v7521_v21, 1  ;;  %vm6537_vm12 = vcmp.eq.s32.totalorder %v7524_v4, 1  ;;  %v2314_v36 = vsel %vm7527_vm0, %v2311_v43, 0.0  ;;  %v2358_v22 = vsel %vm6462_vm3, %v2342_v19, 0.0 }
 0x5bc   : > { %v7528_v55 = vrot.slane %v6264_v28, %v3847_v8  ;;  %vm7531_vm7 = vnez %v6902_v33  ;;  %vm7532_vm10 = vcmp.lt.s32.totalorder %v3858_v12, 127  ;;  %vm7534_vm5 = vcmask 1043456  }
 0x5bd   : > { %v2313_v42 = vsel %vm7531_vm7, %v2312_v60, 0.0  ;;  %v2371_v14 = vsel %vm7532_vm10, %v3559_v3, %v3560_v39  ;;  %vm7533_vm2 = vmmov %vm7532_vm10  ;;  %v2636_v25 = vsel %vm7534_vm5, %v2314_v36, %v2605_v59  ;;  %vm7535_vm3 = vnez %v6919_v61 }
 0x5be   : > { %vm6550_vm6 = vcmp.eq.s32.totalorder %v7528_v55, 1  ;;  %v2372_v34 = vsel %vm7533_vm2, %v3560_v39, %v3559_v3  ;;  %v2373_v28 = vsel %vm7535_vm3, %v2371_v14, 0.0  ;;  %vm7536_vm13 = vnez %v6921_v62  ;;  %vm7537_vm0 = vmmov %vm7534_vm5  ;;  %v3588_v14 = vpop.permute.xlu0 %3587 }
 0x5bf   : > { %v2374_v58 = vsel %vm7536_vm13, %v2372_v34, 0.0  ;;  %v2403_v33 = vsel %vm2401_vm1, %v3565_v24, %v3564_v35  ;;  %v2638_v47 = vsel %vm7537_vm0, %v2358_v22, %v2611_v63  ;;  %v7538_v50 = vrot.slane %v6237_v37, %v3845_v7  ;;  %vm7541_vm10 = vmmov %vm7537_vm0  ;;  %v3593_v34 = vpop.permute.xlu1 %3592 }
 0x5c0   : > { %v2604_v29 = vrot.slane %v2335_v49, 4  ;;  %v2402_v61 = vsel %vm2401_vm1, %v3564_v35, %v3565_v24  ;;  %v2418_v62 = vsel %vm6479_vm14, %v2403_v33, 0.0  ;;  %v2573_v16 = vrot.slane %v6389_v27, %v3847_v8  ;;  %vm7542_vm1 = vmmov %vm7537_vm0 }
 0x5c1   : > { %vm6571_vm7 = vcmp.eq.s32.totalorder %v7538_v50, 1  ;;  %v2616_v52 = vrot.slane %v2373_v28, 4  ;;  %v2617_v18 = vrot.slane %v2374_v58, 4  ;;  %v3570_v63 = vunpack.i.h.bf16 %v3568_v32 }
 0x5c2   : > { %v3569_v17 = vunpack.i.l.bf16 %v3568_v32  ;;  %v3034_v9 = vpack.c.bf16 %v2638_v47, %v2636_v25  ;;  %v2357_v37 = vsel %vm6500_vm15, %v2343_v46, 0.0  ;;  %v2635_v13 = vsel %vm7541_vm10, %v2313_v42, %v2604_v29 }
 0x5c3   : > { %v3575_v49 = vunpack.i.h.bf16 %v3573_v15  ;;  %v2417_v41 = vsel %vm6510_vm11, %v2402_v61, 0.0  ;;  %v2623_v59 = vrot.slane %v2418_v62, 4  ;;  %v2637_v19 = vsel %vm7542_vm1, %v2357_v37, %v2610_v40 }
 0x5c4   : > { %v3574_v30 = vunpack.i.l.bf16 %v3573_v15  ;;  %v2381_v39 = vsel %vm2379_vm9, %v3570_v63, %v3569_v17  ;;  %3035 = vmatprep.subr.bf16.mxu0 %v3034_v9  ;;  %v3036_v43 = vpack.c.bf16 %v2637_v19, %v2635_v13  ;;  %v3580_v60 = vunpack.i.h.bf16 %v3578_v5  ;;  %v3598_v13 = vpop.permute.xlu0 %3597 }
 0x5c5   : > { %v3579_v11 = vunpack.i.l.bf16 %v3578_v5  ;;  %vm2494_vm14 = vcmp.lt.s32.totalorder %v3858_v12, 97  ;;  %vm2538_vm15 = vcmp.lt.s32.totalorder %v3858_v12, 95  ;;  %vm7543_vm2 = vcmp.lt.s32.totalorder %v3858_v12, 112  ;;  %v3603_v5 = vpop.permute.xlu1 %3602 }
 0x5c6   : > { %v2431_v3 = vsel %vm7543_vm2, %v3574_v30, %v3575_v49  ;;  %vm7544_vm11 = vmmov %vm7543_vm2  ;;  %v3585_v24 = vunpack.i.h.bf16 %v3583_v0  ;;  %v3584_v40 = vunpack.i.l.bf16 %v3583_v0  ;;  %v7545_v21 = vrot.slane %v6293_v45, %v3845_v7  ;;  %3037 = vmatpush1.bf16.msra.mxu0 %v3036_v43 }
 0x5c7   : > { %v2432_v23 = vsel %vm7544_vm11, %v3575_v49, %v3574_v30  ;;  %v7548_v46 = vrot.slane %v6293_v45, %v3847_v8  ;;  %vm7551_vm13 = vnez %v6932_v38  ;;  %vm7552_vm0 = vnez %v6934_v10 }
 0x5c8   : > { %vm6598_vm5 = vcmp.eq.s32.totalorder %v7545_v21, 1  ;;  %v2433_v35 = vsel %vm7551_vm13, %v2431_v3, 0.0  ;;  %v2434_v22 = vsel %vm7552_vm0, %v2432_v23, 0.0  ;;  %v2448_v55 = vsel %vm2447_vm8, %v3579_v11, %v3580_v60  ;;  %v7582_v23 = vld [vmem:[#allocation17_spill] sm:$0xff] }
 0x5c9   : > { %vm6605_vm3 = vcmp.eq.s32.totalorder %v7548_v46, 1  ;;  %v2449_v42 = vsel %vm2447_vm8, %v3580_v60, %v3579_v11  ;;  %v7553_v45 = vrot.slane %v6298_v2, %v3845_v7  ;;  %v7556_v38 = vrot.slane %v6298_v2, %v3847_v8  ;;  %v3608_v46 = vpop.permute.xlu0 %3607 }
 0x5ca   : > { %v2622_v25 = vrot.slane %v2417_v41, 4  ;;  %v2380_v15 = vsel %vm2379_vm9, %v3569_v17, %v3570_v63  ;;  %v2463_v28 = vsel %vm6530_vm4, %v2448_v55, 0.0  ;;  %v2396_v58 = vsel %vm6537_vm12, %v2381_v39, 0.0 }
 0x5cb   : > { %vm6620_vm10 = vcmp.eq.s32.totalorder %v7553_v45, 1  ;;  %vm6627_vm1 = vcmp.eq.s32.totalorder %v7556_v38, 1  ;;  %vm2469_vm8 = vcmp.lt.s32.totalorder %v3858_v12, 98  ;;  %v2645_v33 = vrot.slane %v2433_v35, 4 }
 0x5cc   : > { %v2646_v47 = vrot.slane %v2434_v22, 4  ;;  %v2464_v2 = vsel %vm6550_vm6, %v2449_v42, 0.0  ;;  %v2651_v50 = vrot.slane %v2463_v28, 4  ;;  %v7559_v29 = vrot.slane %v6310_v20, %v3847_v8 }
 0x5cd   : > { %vm7562_vm9 = vcmp.lt.s32.totalorder %v3858_v12, 113  ;;  %v3590_v62 = vunpack.i.h.bf16 %v3588_v14  ;;  %v3589_v63 = vunpack.i.l.bf16 %v3588_v14  ;;  %vm2516_vm12 = vcmp.lt.s32.totalorder %v3858_v12, 96 }
 0x5ce   : > { %vm6643_vm2 = vcmp.eq.s32.totalorder %v7559_v29, 1  ;;  %v2423_v6 = vsel %vm7562_vm9, %v3584_v40, %v3585_v24  ;;  %vm7563_vm4 = vmmov %vm7562_vm9  ;;  %vm7564_vm6 = vcmask 1043456   ;;  %v2395_v9 = vsel %vm6571_vm7, %v2380_v15, 0.0 }
 0x5cf   : > { %v2424_v56 = vsel %vm7563_vm4, %v3585_v24, %v3584_v40  ;;  %v2640_v1 = vsel %vm7564_vm6, %v6012_v44, %v2617_v18  ;;  %vm7565_vm11 = vmmov %vm7564_vm6  ;;  %vm6662_vm0 = vcmp.eq.s32.totalorder %v2529_v26, 1  ;;  %v7569_v44 = vrot.slane %v6310_v20, %v3845_v7 }
 0x5d0   : > { %v2642_v17 = vsel %vm7565_vm11, %v2396_v58, %v2623_v59  ;;  %vm7566_vm13 = vmmov %vm7564_vm6  ;;  %vm7572_vm7 = vcmp.lt.s32.totalorder %v3858_v12, 111  ;;  %v2641_v26 = vsel %vm7565_vm11, %v2395_v9, %v2622_v25  ;;  %v7574_v0 = vrot.slane %v6361_v57, %v3845_v7  ;;  %v7577_v59 = vld [vmem:[#allocation18_spill] sm:$0xff]  ;;  %v2557_v58 = vpop.permute.xlu1 %2556 }
 0x5d1   : > { %v2639_v37 = vsel %vm7566_vm13, %v6009_v48, %v2616_v52  ;;  %vm6670_vm4 = vcmp.eq.s32.totalorder %v7569_v44, 1  ;;  %v2439_v48 = vsel %vm7572_vm7, %v3589_v63, %v3590_v62  ;;  %vm7573_vm6 = vmmov %vm7572_vm7  ;;  %v3038_v52 = vpack.c.bf16 %v2642_v17, %v2640_v1 }
 0x5d2   : > { %v2440_v51 = vsel %vm7573_vm6, %v3590_v62, %v3589_v63  ;;  %vm6682_vm13 = vcmp.eq.s32.totalorder %v7574_v0, 1  ;;  %v2652_v20 = vrot.slane %v2464_v2, 4  ;;  %vm7578_vm9 = vnez %v7577_v59 }
 0x5d3   : > { %v2426_v19 = vsel %vm7578_vm9, %v2424_v56, 0.0  ;;  %v3040_v30 = vpack.c.bf16 %v2641_v26, %v2639_v37  ;;  %v3595_v39 = vunpack.i.h.bf16 %v3593_v34  ;;  %vm7579_vm7 = vnez %v6940_v54  ;;  %3039 = vmatprep.subr.bf16.mxu0 %v3038_v52  ;;  %v2151_v26 = vld [vmem:[%s6765_s5 + $0x10] sm:$0xff] }
 0x5d4   : > { %v2442_v43 = vsel %vm7579_vm7, %v2440_v51, 0.0  ;;  %v3594_v60 = vunpack.i.l.bf16 %v3593_v34  ;;  %v3600_v11 = vunpack.i.h.bf16 %v3598_v13  ;;  %v3599_v3 = vunpack.i.l.bf16 %v3598_v13 }
 0x5d5   : > { %vm6693_vm6 = vcmp.eq.s32.totalorder %v2573_v16, 1  ;;  %vm7583_vm11 = vnez %v7582_v23  ;;  %vm7584_vm9 = vnez %v6938_v53  ;;  %3041 = vmatpush1.bf16.msra.mxu0 %v3040_v30  ;;  %v3605_v54 = vunpack.i.h.bf16 %v3603_v5 }
 0x5d6   : > { %v2425_v24 = vsel %vm7583_vm11, %v2423_v6, 0.0  ;;  %v2441_v40 = vsel %vm7584_vm9, %v2439_v48, 0.0  ;;  %v3604_v21 = vunpack.i.l.bf16 %v3603_v5  ;;  %v2495_v35 = vsel %vm2494_vm14, %v3594_v60, %v3595_v39  ;;  %v2678_v7 = vpop.permute.xlu1 %2677 }
 0x5d7   : > { %v2496_v8 = vsel %vm2494_vm14, %v3595_v39, %v3594_v60  ;;  %v2539_v16 = vsel %vm2538_vm15, %v3599_v3, %v3600_v11  ;;  %v2540_v22 = vsel %vm2538_vm15, %v3600_v11, %v3599_v3  ;;  %v2510_v53 = vsel %vm6598_vm5, %v2495_v35, 0.0 }
 0x5d8   : > { %v2511_v55 = vsel %vm6605_vm3, %v2496_v8, 0.0  ;;  %vm7585_vm7 = vcmask 1043456   ;;  %v2554_v45 = vsel %vm6620_vm10, %v2539_v16, 0.0  ;;  %v2555_v38 = vsel %vm6627_vm1, %v2540_v22, 0.0 }
 0x5d9   : > { %v2668_v42 = vsel %vm7585_vm7, %v2426_v19, %v2646_v47  ;;  %vm7586_vm11 = vmmov %vm7585_vm7  ;;  %v2658_v34 = vrot.slane %v2511_v55, 4  ;;  %v2470_v4 = vsel %vm2469_vm8, %v3604_v21, %v3605_v54  ;;  %v2471_v36 = vsel %vm2469_vm8, %v3605_v54, %v3604_v21  ;;  %v2559_v47 = vpop.permute.xlu0 %2558 }
 0x5da   : > { %v2670_v14 = vsel %vm7586_vm11, %v2442_v43, %v2652_v20  ;;  %vm7587_vm14 = vmmov %vm7585_vm7  ;;  %v3610_v15 = vunpack.i.h.bf16 %v3608_v46  ;;  %v3609_v28 = vunpack.i.l.bf16 %v3608_v46  ;;  %v2657_v2 = vrot.slane %v2510_v53, 4 }
 0x5db   : > { %v2667_v25 = vsel %vm7587_vm14, %v2425_v24, %v2645_v33  ;;  %v3042_v29 = vpack.c.bf16 %v2670_v14, %v2668_v42  ;;  %vm7588_vm15 = vmmov %vm7585_vm7  ;;  %v2489_v10 = vsel %vm6643_vm2, %v2471_v36, 0.0  ;;  %v2664_v6 = vrot.slane %v2555_v38, 4 }
 0x5dc   : > { %v2669_v32 = vsel %vm7588_vm15, %v2441_v40, %v2651_v50  ;;  %v2517_v33 = vsel %vm2516_vm12, %v3609_v28, %v3610_v15  ;;  %v2518_v56 = vsel %vm2516_vm12, %v3610_v15, %v3609_v28  ;;  %v2663_v63 = vrot.slane %v2554_v45, 4  ;;  %vm7590_vm3 = vmmov %vm7585_vm7 }
 0x5dd   : > { %v3044_v62 = vpack.c.bf16 %v2669_v32, %v2667_v25  ;;  %3043 = vmatprep.subr.bf16.mxu0 %v3042_v29  ;;  %v2533_v1 = vsel %vm6662_vm0, %v2518_v56, 0.0  ;;  %vm7589_vm5 = vcmp.lt.s32.totalorder %v3858_v12, 94  ;;  %v2488_v50 = vsel %vm6670_vm4, %v2470_v4, 0.0  ;;  %vm7591_vm10 = vmmov %vm7590_vm3 }
 0x5de   : > { %v2562_v17 = vsel %vm7589_vm5, %v2559_v47, %v2557_v58  ;;  %v2672_v61 = vsel %vm7590_vm3, %v2489_v10, %v2658_v34  ;;  %v2674_v9 = vsel %vm7591_vm10, %v2533_v1, %v2664_v6  ;;  %v2532_v37 = vsel %vm6682_vm13, %v2517_v33, 0.0  ;;  %vm7592_vm1 = vmmov %vm7590_vm3 }
 0x5df   : > { %3045 = vmatpush1.bf16.msra.mxu0 %v3044_v62  ;;  %v3046_v13 = vpack.c.bf16 %v2674_v9, %v2672_v61  ;;  %v2671_v44 = vsel %vm7592_vm1, %v2488_v50, %v2657_v2  ;;  %vm7593_vm8 = vmmov %vm7592_vm1  ;;  %vm2574_vm2 = vcmp.eq.s32.totalorder %v2569_v31, 1  ;;  %v2577_v48 = vsel %vm6693_vm6, %v2562_v17, 0.0 }
 0x5e0   : > { %v2673_v49 = vsel %vm7593_vm8, %v2532_v37, %v2663_v63  ;;  %vm7594_vm12 = vmmov %vm7589_vm5  ;;  %vm2680_vm4 = vcmask 818176  }
 0x5e1   : > { %v2561_v18 = vsel %vm7594_vm12, %v2557_v58, %v2559_v47  ;;  %v3048_v51 = vpack.c.bf16 %v2673_v49, %v2671_v44  ;;  %3047 = vmatprep.subr.bf16.mxu0 %v3046_v13  ;;  %vm7595_vm0 = vmmov %vm7592_vm1 }
 0x5e2   : > { %v2576_v52 = vsel %vm2574_vm2, %v2561_v18, 0.0  ;;  %vm7596_vm13 = vmmov %vm7595_vm0 }
 0x5e3   : > { %3049 = vmatpush1.bf16.msra.mxu0 %v3048_v51 }
 0x5e4   : > { %2891 = vmatprep.subr.msk.mxu0 %vm7595_vm0, %v2577_v48 }
 0x5e7   : > { %2892 = vmatpush1.msk.msra.mxu0 %vm7596_vm13, %v2576_v52 }
 0x5e8   : > { %2893 = vmatmul.mubr.msk.f32.vlgmr.msra.gmra.mrb[0].mxu0 %vm2680_vm4, %v2151_v26 }
 0x6bb   : > { %v2756_v12 = vpop.f32.mrb[0].mxu0 }
 0x6bc   : > { %v2757_v27 = vadd.f32 %v2756_v12, %v2678_v7  ;;  %v2758_v31 = vpop.f32.mrb[1].mxu0 }
 0x6bd   : > { %v2759_v5 = vadd.f32 %v2758_v31, %v2678_v7 }
 0x6be   : > { %v2761_v0 = vmax.f32 %v2757_v27, 0.0 }
 0x6bf   : > { %v2762_v41 = vmax.f32 %v2759_v5, 0.0 }
 0x6c0   : > { %2763 = vst [vmem:[%s3781_s15] sm:$0xff] %v2761_v0 }
 0x6c1   : > { %2764 = vst [vmem:[%s3781_s15 + $0x8] sm:$0xff] %v2762_v41 }
 0x6c2 PF: > { %s23_s29 = sadd.s32 1, %s3633_s29  }
 0x6c3   : > { %p20_p12 = scmp.ge.s32.totalorder %s23_s29, 4  }
 0x6c5   :  { %22 = sbr.rel (!%p20_p12) target bundleno = 16 (0x10), region = 87 }

</bundles_post_ra>
